<compile_context>
chip_gen: v6e
topology: v6e:2x2x1
jax: 0.10.0
libtpu: 0.0.40
codegen_flags: <defaults>
</compile_context>

<pallas_src>
import math

import jax
import jax.numpy as jnp
from jax.experimental import pallas as pl
from jax.experimental.pallas import tpu as pltpu

KK = 7            # unified tap grid (largest kernel)
PAD = KK // 2     # 'same' halo of the 7x7 kernel
NEG_SLOPE = 0.2   # LeakyReLU slope
CLAMP = 0.8       # InvBlock clamp
APRON = 128       # zero halo width (lanes) on each side of an image


def _round_up(x, m):
    return ((x + m - 1) // m) * m


# --------------------------------------------------------------------------- weights
def _build_subnet_mats(p, cin, cout):
    """Fuse one subnet's three convs (7/5/3) into a single matmul-ready weight.

    Returns (3*cout, K) with K = round_up(49*cin + 1, 8); column order is
    (ky*7 + kx)*cin + ci, followed by the bias column (matched by the ones-row of
    the im2col patch) and zero padding columns.  The 5x5/3x3 kernels are
    zero-embedded into the 7x7 tap grid so one tap loop serves all three branches.
    """
    kcols = KK * KK * cin
    krows = _round_up(kcols + 1, 8)
    wrows, brows = [], []
    for k in (7, 5, 3):
        w = p[f"w{k}"]                                       # (k, k, cin, cout)
        off = (KK - k) // 2
        wemb = jnp.zeros((KK, KK, cin, cout), jnp.float32)
        wemb = wemb.at[off:off + k, off:off + k].set(w)
        wrows.append(jnp.transpose(wemb, (3, 0, 1, 2)).reshape(cout, kcols))
        brows.append(p[f"b{k}"].reshape(cout, 1))
    wmat = jnp.concatenate(wrows, axis=0)                    # (3*cout, 49*cin)
    bias = jnp.concatenate(brows, axis=0)                    # (3*cout, 1)
    parts = [wmat, bias]
    if krows > kcols + 1:
        parts.append(jnp.zeros((3 * cout, krows - kcols - 1), jnp.float32))
    return jnp.concatenate(parts, axis=1)                    # (3*cout, krows)


# --------------------------------------------------------------------------- kernel
def _make_kernel(c1, c2, H, W, bstep):
    HW = H * W
    L = bstep * HW

    def kernel(x_ref, masks_ref, wf_ref, whg_ref, out_ref, patch_ref):
        masks = masks_ref[...]                               # (KK, HW) f32

        def build_patch(images, cin):
            """im2col into the VMEM patch scratch: 49 shifted/masked (cin, HW) tap
            blocks per image + a ones row (bias) + zero pad rows, so the whole conv
            pass is a single MXU matmul with contraction K = round8(49*cin + 1)."""
            kcols = KK * KK * cin
            krows = _round_up(kcols + 1, 8)
            zl = jnp.zeros((cin, APRON), jnp.float32)
            for b, u in enumerate(images):                   # u: (cin, HW)
                flat = jnp.concatenate([zl, u, zl], axis=1)  # zero halo apron
                lo = b * HW
                for ky in range(KK):
                    for kx in range(KK):
                        off = APRON + (ky - PAD) * W + (kx - PAD)
                        blk = flat[:, off:off + HW]
                        if kx != PAD:                        # center column needs no mask
                            blk = blk * masks[kx:kx + 1, :]
                        t = (ky * KK + kx) * cin
                        patch_ref[t:t + cin, lo:lo + HW] = blk
            patch_ref[kcols:kcols + 1, :] = jnp.ones((1, L), jnp.float32)      # bias row
            if krows > kcols + 1:
                patch_ref[kcols + 1:krows, :] = jnp.zeros((krows - kcols - 1, L),
                                                          jnp.float32)
            return krows

        def fuse_subnet(conv, cout):
            # conv rows = [7x7 branch | 5x5 branch | 3x3 branch], bias already folded in.
            # Exact PyTorch op order f12 + f12*f11 + f12*f13, staged folding.
            def branch(i):
                z = conv[i * cout:(i + 1) * cout, :]
                return jnp.maximum(z, NEG_SLOPE * z)         # LeakyReLU(0.2)
            f11 = branch(0)
            f12 = branch(1)
            out = f12 + f12 * f11
            f13 = branch(2)
            return out + f12 * f13

        # ---- y1 = x2 + F(x1): one im2col pass + one MXU matmul ----
        x1_imgs = [x_ref[b, 0:c1, :] for b in range(bstep)]
        krows = build_patch(x1_imgs, c1)
        convF = jnp.dot(wf_ref[...], patch_ref[0:krows, :],
                        preferred_element_type=jnp.float32)  # (3*c2, L)
        fF = fuse_subnet(convF, c2)                          # (c2, L)
        y1_imgs = [x_ref[b, c1:c1 + c2, :] + fF[:, b * HW:(b + 1) * HW]
                   for b in range(bstep)]

        # ---- H(y1) and G(y1) share one conv pass (concatenated fused weights) ----
        krows = build_patch(y1_imgs, c2)
        convHG = jnp.dot(whg_ref[...], patch_ref[0:krows, :],
                         preferred_element_type=jnp.float32)  # (6*c1, L)
        outH = fuse_subnet(convHG[0:3 * c1, :], c1)
        outG = fuse_subnet(convHG[3 * c1:6 * c1, :], c1)

        # clamp*(2*sigmoid(h)-1) == clamp*tanh(h/2): single EUP op
        es = jnp.exp(CLAMP * jnp.tanh(0.5 * outH))            # (c1, L)

        # ---- merged output: channels [0:c2]=y1, [c2:C]=y2, one slab store per image ----
        for b in range(bstep):
            y2_b = (x1_imgs[b] * es[:, b * HW:(b + 1) * HW]
                    + outG[:, b * HW:(b + 1) * HW])
            out_ref[b] = jnp.concatenate([y1_imgs[b], y2_b],
                                         axis=0).astype(out_ref.dtype)

    return kernel


# --------------------------------------------------------------------------- wrapper
def _pick_images_per_step(batch, hw):
    """v7x has two TensorCores -> keep a 'parallel' grid across them; single-TC
    chips (v5e/v6e) fold the whole batch into the lane axis (grid collapses)."""
    try:
        kind = jax.devices()[0].device_kind.lower()
    except Exception:
        kind = ""
    if ("v7" in kind or "7x" in kind) and batch % 2 == 0:
        per_step = batch // 2
    else:
        per_step = batch
    while per_step > 1 and (batch % per_step != 0 or per_step * hw > 4096):
        per_step -= 1
    return max(per_step, 1)


def invblock_forward(x_nchw, params, split1, split2, images_per_step=None):
    N, C, H, W = x_nchw.shape
    c1, c2 = split1, split2
    assert C == c1 + c2
    HW = H * W
    assert HW % 128 == 0, "H*W must be a multiple of 128 (lane alignment)"
    assert PAD * (W + 1) <= APRON, "conv halo must fit in the 128-lane zero apron"

    bstep = images_per_step or _pick_images_per_step(N, HW)
    assert N % bstep == 0
    L = bstep * HW

    x_flat = x_nchw.reshape(N, C, HW)                # free reshape; H*W is the lane axis

    wF = _build_subnet_mats(params["F"], c1, c2)     # F : c1 -> c2   (3*c2, K1)
    wH = _build_subnet_mats(params["H"], c2, c1)     # H : c2 -> c1   (3*c1, K2)
    wG = _build_subnet_mats(params["G"], c2, c1)     # G : c2 -> c1   (3*c1, K2)
    wHG = jnp.concatenate([wH, wG], axis=0)          # (6*c1, K2)

    # W-periodic column-validity masks for the 7 horizontal tap offsets (hoisted here).
    col = jnp.arange(HW, dtype=jnp.int32) % W
    masks = jnp.stack([((col >= PAD - kx) & (col < W + PAD - kx)).astype(jnp.float32)
                       for kx in range(KK)], axis=0)  # (KK, HW)

    krows_max = max(_round_up(KK * KK * c1 + 1, 8), _round_up(KK * KK * c2 + 1, 8))

    cost = pl.CostEstimate(
        flops=2 * N * HW * KK * KK * (c1 * 3 * c2 + c2 * 6 * c1),
        transcendentals=2 * N * c1 * HW,                         # tanh + exp
        bytes_accessed=4 * (2 * N * C * HW + wF.size + wHG.size + masks.size),
    )

    grid_spec = pltpu.PrefetchScalarGridSpec(
        num_scalar_prefetch=0,
        grid=(N // bstep,),
        in_specs=[
            pl.BlockSpec((bstep, C, HW), lambda g: (g, 0, 0)),
            pl.BlockSpec(masks.shape, lambda g: (0, 0)),
            pl.BlockSpec(wF.shape, lambda g: (0, 0)),
            pl.BlockSpec(wHG.shape, lambda g: (0, 0)),
        ],
        out_specs=pl.BlockSpec((bstep, C, HW), lambda g: (g, 0, 0)),
        scratch_shapes=[pltpu.VMEM((krows_max, L), jnp.float32)],   # im2col patch matrix
    )

    out_flat = pl.pallas_call(
        _make_kernel(c1, c2, H, W, bstep),
        out_shape=jax.ShapeDtypeStruct((N, C, HW), x_nchw.dtype),
        grid_spec=grid_spec,
        compiler_params=pltpu.CompilerParams(dimension_semantics=("parallel",)),
        cost_estimate=cost,
    )(x_flat, masks, wF, wHG)

    return out_flat.reshape(N, C, H, W)


# --------------------------------------------------------------------------- params
def init_params(key, c1, c2):
    """Deterministic xavier-normal * 0.1 weights, small random biases."""
    def subnet(key, cin, cout):
        p = {}
        for k in (7, 5, 3):
            key, kw, kb = jax.random.split(key, 3)
            fan_in, fan_out = cin * k * k, cout * k * k
            std = math.sqrt(2.0 / (fan_in + fan_out))
            p[f"w{k}"] = jax.random.normal(kw, (k, k, cin, cout), jnp.float32) * std * 0.1
            p[f"b{k}"] = jax.random.normal(kb, (cout,), jnp.float32) * 0.01
        return key, p

    key, pF = subnet(key, c1, c2)
    key, pH = subnet(key, c2, c1)
    key, pG = subnet(key, c2, c1)
    return {"F": pF, "H": pH, "G": pG}


# --------------------------------------------------------------------------- reference
def _subnet_ref(x, p):
    def conv(w, b):
        w_oihw = jnp.transpose(w, (3, 2, 0, 1))
        y = jax.lax.conv_general_dilated(
            x, w_oihw, window_strides=(1, 1), padding="SAME",
            dimension_numbers=("NCHW", "OIHW", "NCHW"),
            precision=jax.lax.Precision.HIGHEST)
        return y + b.reshape(1, -1, 1, 1)

    def lrelu(v):
        return jnp.where(v > 0, v, NEG_SLOPE * v)

    f11 = lrelu(conv(p["w7"], p["b7"]))
    f12 = lrelu(conv(p["w5"], p["b5"]))
    f13 = lrelu(conv(p["w3"], p["b3"]))
    return f12 + f12 * f11 + f12 * f13


def ref_forward(x, params, split1, split2):
    x1 = x[:, :split1]
    x2 = x[:, split1:split1 + split2]
    y1 = x2 + _subnet_ref(x1, params["F"])
    s = CLAMP * (jax.nn.sigmoid(_subnet_ref(y1, params["H"])) * 2.0 - 1.0)
    y2 = x1 * jnp.exp(s) + _subnet_ref(y1, params["G"])
    return jnp.concatenate([y1, y2], axis=1)


# --------------------------------------------------------------------------- main
if __name__ == "__main__":
    N, C1, C2, H, W = 2, 4, 4, 16, 16

    key = jax.random.PRNGKey(0)
    kx_, kp = jax.random.split(key)
    x = jax.random.normal(kx_, (N, C1 + C2, H, W), jnp.float32)
    params = init_params(kp, C1, C2)

    out = jax.block_until_ready(invblock_forward(x, params, C1, C2))
    ref = jax.block_until_ready(ref_forward(x, params, C1, C2))

    assert out.shape == (N, C1 + C2, H, W)
    err = float(jnp.max(jnp.abs(out - ref)))
    # MXU accumulation order differs from XLA's conv; allow a small f32 margin.
    assert err < 2e-3, f"mismatch vs reference: max abs err {err}"
    print("KERNEL_OK")
</pallas_src>

<mosaic_0001>
module attributes {stable_mosaic.version = 11 : i64} {
  func.func @kernel(%arg0: i32, %arg1: memref<2x8x256xf32, #tpu.memory_space<vmem>>, %arg2: memref<7x256xf32, #tpu.memory_space<vmem>>, %arg3: memref<12x200xf32, #tpu.memory_space<vmem>>, %arg4: memref<24x200xf32, #tpu.memory_space<vmem>>, %arg5: memref<2x8x256xf32, #tpu.memory_space<vmem>>, %arg6: memref<200x512xf32, #tpu.memory_space<vmem>>) attributes {dimension_semantics = [#tpu.dimension_semantics<parallel>], iteration_bounds = array<i64: 1>, scalar_prefetch = 0 : i64, scratch_operands = 1 : i64, tpu.core_type = #tpu.core_type<tc>, window_params = [{transform_indices = @transform_0, window_bounds = array<i64: 2, 8, 256>}, {pipeline_mode = #tpu.pipeline_mode<synchronous>, transform_indices = @transform_1, window_bounds = array<i64: 7, 256>}, {pipeline_mode = #tpu.pipeline_mode<synchronous>, transform_indices = @transform_2, window_bounds = array<i64: 12, 200>}, {pipeline_mode = #tpu.pipeline_mode<synchronous>, transform_indices = @transform_3, window_bounds = array<i64: 24, 200>}, {transform_indices = @transform_4, window_bounds = array<i64: 2, 8, 256>}]} {
    %c0 = arith.constant 0 : index
    %c0_0 = arith.constant 0 : index
    %0 = vector.load %arg2[%c0, %c0_0] : memref<7x256xf32, #tpu.memory_space<vmem>>, vector<7x256xf32>
    %c0_1 = arith.constant 0 : index
    %c0_2 = arith.constant 0 : index
    %c0_3 = arith.constant 0 : index
    %1 = vector.load %arg1[%c0_1, %c0_2, %c0_3] : memref<2x8x256xf32, #tpu.memory_space<vmem>>, vector<1x4x256xf32>
    %2 = vector.shape_cast %1 : vector<1x4x256xf32> to vector<4x256xf32>
    %c1 = arith.constant 1 : index
    %c0_4 = arith.constant 0 : index
    %c0_5 = arith.constant 0 : index
    %3 = vector.load %arg1[%c1, %c0_4, %c0_5] : memref<2x8x256xf32, #tpu.memory_space<vmem>>, vector<1x4x256xf32>
    %4 = vector.shape_cast %3 : vector<1x4x256xf32> to vector<4x256xf32>
    %cst = arith.constant 0.000000e+00 : f32
    %5 = vector.broadcast %cst : f32 to vector<4x128xf32>
    %6 = tpu.concatenate %5, %2, %5 in 1 : vector<4x128xf32>, vector<4x256xf32>, vector<4x128xf32> -> vector<4x512xf32>
    %7 = vector.extract_strided_slice %6 {offsets = [0, 77], sizes = [4, 256], strides = [1, 1]} : vector<4x512xf32> to vector<4x256xf32>
    %8 = vector.extract_strided_slice %0 {offsets = [0, 0], sizes = [1, 256], strides = [1, 1]} : vector<7x256xf32> to vector<1x256xf32>
    %9 = vector.broadcast %8 : vector<1x256xf32> to vector<4x256xf32>
    %10 = arith.mulf %7, %9 : vector<4x256xf32>
    %c0_6 = arith.constant 0 : index
    %c0_7 = arith.constant 0 : index
    %11 = vector.load %arg6[%c0_6, %c0_7] : memref<200x512xf32, #tpu.memory_space<vmem>>, vector<4x256xf32>
    tpu.vector_store %arg6[%c0_6, %c0_7], %10 {strides = array<i32>} : memref<200x512xf32, #tpu.memory_space<vmem>>, vector<4x256xf32>,
    %12 = vector.extract_strided_slice %6 {offsets = [0, 78], sizes = [4, 256], strides = [1, 1]} : vector<4x512xf32> to vector<4x256xf32>
    %13 = vector.extract_strided_slice %0 {offsets = [1, 0], sizes = [1, 256], strides = [1, 1]} : vector<7x256xf32> to vector<1x256xf32>
    %14 = vector.broadcast %13 : vector<1x256xf32> to vector<4x256xf32>
    %15 = arith.mulf %12, %14 : vector<4x256xf32>
    %c4 = arith.constant 4 : index
    %c0_8 = arith.constant 0 : index
    %16 = vector.load %arg6[%c4, %c0_8] : memref<200x512xf32, #tpu.memory_space<vmem>>, vector<4x256xf32>
    tpu.vector_store %arg6[%c4, %c0_8], %15 {strides = array<i32>} : memref<200x512xf32, #tpu.memory_space<vmem>>, vector<4x256xf32>,
    %17 = vector.extract_strided_slice %6 {offsets = [0, 79], sizes = [4, 256], strides = [1, 1]} : vector<4x512xf32> to vector<4x256xf32>
    %18 = vector.extract_strided_slice %0 {offsets = [2, 0], sizes = [1, 256], strides = [1, 1]} : vector<7x256xf32> to vector<1x256xf32>
    %19 = vector.broadcast %18 : vector<1x256xf32> to vector<4x256xf32>
    %20 = arith.mulf %17, %19 : vector<4x256xf32>
    %c8 = arith.constant 8 : index
    %c0_9 = arith.constant 0 : index
    %21 = vector.load %arg6[%c8, %c0_9] : memref<200x512xf32, #tpu.memory_space<vmem>>, vector<4x256xf32>
    tpu.vector_store %arg6[%c8, %c0_9], %20 {strides = array<i32>} : memref<200x512xf32, #tpu.memory_space<vmem>>, vector<4x256xf32>,
    %22 = vector.extract_strided_slice %6 {offsets = [0, 80], sizes = [4, 256], strides = [1, 1]} : vector<4x512xf32> to vector<4x256xf32>
    %c12 = arith.constant 12 : index
    %c0_10 = arith.constant 0 : index
    %23 = vector.load %arg6[%c12, %c0_10] : memref<200x512xf32, #tpu.memory_space<vmem>>, vector<4x256xf32>
    tpu.vector_store %arg6[%c12, %c0_10], %22 {strides = array<i32>} : memref<200x512xf32, #tpu.memory_space<vmem>>, vector<4x256xf32>,
    %24 = vector.extract_strided_slice %6 {offsets = [0, 81], sizes = [4, 256], strides = [1, 1]} : vector<4x512xf32> to vector<4x256xf32>
    %25 = vector.extract_strided_slice %0 {offsets = [4, 0], sizes = [1, 256], strides = [1, 1]} : vector<7x256xf32> to vector<1x256xf32>
    %26 = vector.broadcast %25 : vector<1x256xf32> to vector<4x256xf32>
    %27 = arith.mulf %24, %26 : vector<4x256xf32>
    %c16 = arith.constant 16 : index
    %c0_11 = arith.constant 0 : index
    %28 = vector.load %arg6[%c16, %c0_11] : memref<200x512xf32, #tpu.memory_space<vmem>>, vector<4x256xf32>
    tpu.vector_store %arg6[%c16, %c0_11], %27 {strides = array<i32>} : memref<200x512xf32, #tpu.memory_space<vmem>>, vector<4x256xf32>,
    %29 = vector.extract_strided_slice %6 {offsets = [0, 82], sizes = [4, 256], strides = [1, 1]} : vector<4x512xf32> to vector<4x256xf32>
    %30 = vector.extract_strided_slice %0 {offsets = [5, 0], sizes = [1, 256], strides = [1, 1]} : vector<7x256xf32> to vector<1x256xf32>
    %31 = vector.broadcast %30 : vector<1x256xf32> to vector<4x256xf32>
    %32 = arith.mulf %29, %31 : vector<4x256xf32>
    %c20 = arith.constant 20 : index
    %c0_12 = arith.constant 0 : index
    %33 = vector.load %arg6[%c20, %c0_12] : memref<200x512xf32, #tpu.memory_space<vmem>>, vector<4x256xf32>
    tpu.vector_store %arg6[%c20, %c0_12], %32 {strides = array<i32>} : memref<200x512xf32, #tpu.memory_space<vmem>>, vector<4x256xf32>,
    %34 = vector.extract_strided_slice %6 {offsets = [0, 83], sizes = [4, 256], strides = [1, 1]} : vector<4x512xf32> to vector<4x256xf32>
    %35 = vector.extract_strided_slice %0 {offsets = [6, 0], sizes = [1, 256], strides = [1, 1]} : vector<7x256xf32> to vector<1x256xf32>
    %36 = vector.broadcast %35 : vector<1x256xf32> to vector<4x256xf32>
    %37 = arith.mulf %34, %36 : vector<4x256xf32>
    %c24 = arith.constant 24 : index
    %c0_13 = arith.constant 0 : index
    %38 = vector.load %arg6[%c24, %c0_13] : memref<200x512xf32, #tpu.memory_space<vmem>>, vector<4x256xf32>
    tpu.vector_store %arg6[%c24, %c0_13], %37 {strides = array<i32>} : memref<200x512xf32, #tpu.memory_space<vmem>>, vector<4x256xf32>,
    %39 = vector.extract_strided_slice %6 {offsets = [0, 93], sizes = [4, 256], strides = [1, 1]} : vector<4x512xf32> to vector<4x256xf32>
    %40 = vector.extract_strided_slice %0 {offsets = [0, 0], sizes = [1, 256], strides = [1, 1]} : vector<7x256xf32> to vector<1x256xf32>
    %41 = vector.broadcast %40 : vector<1x256xf32> to vector<4x256xf32>
    %42 = arith.mulf %39, %41 : vector<4x256xf32>
    %c28 = arith.constant 28 : index
    %c0_14 = arith.constant 0 : index
    %43 = vector.load %arg6[%c28, %c0_14] : memref<200x512xf32, #tpu.memory_space<vmem>>, vector<4x256xf32>
    tpu.vector_store %arg6[%c28, %c0_14], %42 {strides = array<i32>} : memref<200x512xf32, #tpu.memory_space<vmem>>, vector<4x256xf32>,
    %44 = vector.extract_strided_slice %6 {offsets = [0, 94], sizes = [4, 256], strides = [1, 1]} : vector<4x512xf32> to vector<4x256xf32>
    %45 = vector.extract_strided_slice %0 {offsets = [1, 0], sizes = [1, 256], strides = [1, 1]} : vector<7x256xf32> to vector<1x256xf32>
    %46 = vector.broadcast %45 : vector<1x256xf32> to vector<4x256xf32>
    %47 = arith.mulf %44, %46 : vector<4x256xf32>
    %c32 = arith.constant 32 : index
    %c0_15 = arith.constant 0 : index
    %48 = vector.load %arg6[%c32, %c0_15] : memref<200x512xf32, #tpu.memory_space<vmem>>, vector<4x256xf32>
    tpu.vector_store %arg6[%c32, %c0_15], %47 {strides = array<i32>} : memref<200x512xf32, #tpu.memory_space<vmem>>, vector<4x256xf32>,
    %49 = vector.extract_strided_slice %6 {offsets = [0, 95], sizes = [4, 256], strides = [1, 1]} : vector<4x512xf32> to vector<4x256xf32>
    %50 = vector.extract_strided_slice %0 {offsets = [2, 0], sizes = [1, 256], strides = [1, 1]} : vector<7x256xf32> to vector<1x256xf32>
    %51 = vector.broadcast %50 : vector<1x256xf32> to vector<4x256xf32>
    %52 = arith.mulf %49, %51 : vector<4x256xf32>
    %c36 = arith.constant 36 : index
    %c0_16 = arith.constant 0 : index
    %53 = vector.load %arg6[%c36, %c0_16] : memref<200x512xf32, #tpu.memory_space<vmem>>, vector<4x256xf32>
    tpu.vector_store %arg6[%c36, %c0_16], %52 {strides = array<i32>} : memref<200x512xf32, #tpu.memory_space<vmem>>, vector<4x256xf32>,
    %54 = vector.extract_strided_slice %6 {offsets = [0, 96], sizes = [4, 256], strides = [1, 1]} : vector<4x512xf32> to vector<4x256xf32>
    %c40 = arith.constant 40 : index
    %c0_17 = arith.constant 0 : index
    %55 = vector.load %arg6[%c40, %c0_17] : memref<200x512xf32, #tpu.memory_space<vmem>>, vector<4x256xf32>
    tpu.vector_store %arg6[%c40, %c0_17], %54 {strides = array<i32>} : memref<200x512xf32, #tpu.memory_space<vmem>>, vector<4x256xf32>,
    %56 = vector.extract_strided_slice %6 {offsets = [0, 97], sizes = [4, 256], strides = [1, 1]} : vector<4x512xf32> to vector<4x256xf32>
    %57 = vector.extract_strided_slice %0 {offsets = [4, 0], sizes = [1, 256], strides = [1, 1]} : vector<7x256xf32> to vector<1x256xf32>
    %58 = vector.broadcast %57 : vector<1x256xf32> to vector<4x256xf32>
    %59 = arith.mulf %56, %58 : vector<4x256xf32>
    %c44 = arith.constant 44 : index
    %c0_18 = arith.constant 0 : index
    %60 = vector.load %arg6[%c44, %c0_18] : memref<200x512xf32, #tpu.memory_space<vmem>>, vector<4x256xf32>
    tpu.vector_store %arg6[%c44, %c0_18], %59 {strides = array<i32>} : memref<200x512xf32, #tpu.memory_space<vmem>>, vector<4x256xf32>,
    %61 = vector.extract_strided_slice %6 {offsets = [0, 98], sizes = [4, 256], strides = [1, 1]} : vector<4x512xf32> to vector<4x256xf32>
    %62 = vector.extract_strided_slice %0 {offsets = [5, 0], sizes = [1, 256], strides = [1, 1]} : vector<7x256xf32> to vector<1x256xf32>
    %63 = vector.broadcast %62 : vector<1x256xf32> to vector<4x256xf32>
    %64 = arith.mulf %61, %63 : vector<4x256xf32>
    %c48 = arith.constant 48 : index
    %c0_19 = arith.constant 0 : index
    %65 = vector.load %arg6[%c48, %c0_19] : memref<200x512xf32, #tpu.memory_space<vmem>>, vector<4x256xf32>
    tpu.vector_store %arg6[%c48, %c0_19], %64 {strides = array<i32>} : memref<200x512xf32, #tpu.memory_space<vmem>>, vector<4x256xf32>,
    %66 = vector.extract_strided_slice %6 {offsets = [0, 99], sizes = [4, 256], strides = [1, 1]} : vector<4x512xf32> to vector<4x256xf32>
    %67 = vector.extract_strided_slice %0 {offsets = [6, 0], sizes = [1, 256], strides = [1, 1]} : vector<7x256xf32> to vector<1x256xf32>
    %68 = vector.broadcast %67 : vector<1x256xf32> to vector<4x256xf32>
    %69 = arith.mulf %66, %68 : vector<4x256xf32>
    %c52 = arith.constant 52 : index
    %c0_20 = arith.constant 0 : index
    %70 = vector.load %arg6[%c52, %c0_20] : memref<200x512xf32, #tpu.memory_space<vmem>>, vector<4x256xf32>
    tpu.vector_store %arg6[%c52, %c0_20], %69 {strides = array<i32>} : memref<200x512xf32, #tpu.memory_space<vmem>>, vector<4x256xf32>,
    %71 = vector.extract_strided_slice %6 {offsets = [0, 109], sizes = [4, 256], strides = [1, 1]} : vector<4x512xf32> to vector<4x256xf32>
    %72 = vector.extract_strided_slice %0 {offsets = [0, 0], sizes = [1, 256], strides = [1, 1]} : vector<7x256xf32> to vector<1x256xf32>
    %73 = vector.broadcast %72 : vector<1x256xf32> to vector<4x256xf32>
    %74 = arith.mulf %71, %73 : vector<4x256xf32>
    %c56 = arith.constant 56 : index
    %c0_21 = arith.constant 0 : index
    %75 = vector.load %arg6[%c56, %c0_21] : memref<200x512xf32, #tpu.memory_space<vmem>>, vector<4x256xf32>
    tpu.vector_store %arg6[%c56, %c0_21], %74 {strides = array<i32>} : memref<200x512xf32, #tpu.memory_space<vmem>>, vector<4x256xf32>,
    %76 = vector.extract_strided_slice %6 {offsets = [0, 110], sizes = [4, 256], strides = [1, 1]} : vector<4x512xf32> to vector<4x256xf32>
    %77 = vector.extract_strided_slice %0 {offsets = [1, 0], sizes = [1, 256], strides = [1, 1]} : vector<7x256xf32> to vector<1x256xf32>
    %78 = vector.broadcast %77 : vector<1x256xf32> to vector<4x256xf32>
    %79 = arith.mulf %76, %78 : vector<4x256xf32>
    %c60 = arith.constant 60 : index
    %c0_22 = arith.constant 0 : index
    %80 = vector.load %arg6[%c60, %c0_22] : memref<200x512xf32, #tpu.memory_space<vmem>>, vector<4x256xf32>
    tpu.vector_store %arg6[%c60, %c0_22], %79 {strides = array<i32>} : memref<200x512xf32, #tpu.memory_space<vmem>>, vector<4x256xf32>,
    %81 = vector.extract_strided_slice %6 {offsets = [0, 111], sizes = [4, 256], strides = [1, 1]} : vector<4x512xf32> to vector<4x256xf32>
    %82 = vector.extract_strided_slice %0 {offsets = [2, 0], sizes = [1, 256], strides = [1, 1]} : vector<7x256xf32> to vector<1x256xf32>
    %83 = vector.broadcast %82 : vector<1x256xf32> to vector<4x256xf32>
    %84 = arith.mulf %81, %83 : vector<4x256xf32>
    %c64 = arith.constant 64 : index
    %c0_23 = arith.constant 0 : index
    %85 = vector.load %arg6[%c64, %c0_23] : memref<200x512xf32, #tpu.memory_space<vmem>>, vector<4x256xf32>
    tpu.vector_store %arg6[%c64, %c0_23], %84 {strides = array<i32>} : memref<200x512xf32, #tpu.memory_space<vmem>>, vector<4x256xf32>,
    %86 = vector.extract_strided_slice %6 {offsets = [0, 112], sizes = [4, 256], strides = [1, 1]} : vector<4x512xf32> to vector<4x256xf32>
    %c68 = arith.constant 68 : index
    %c0_24 = arith.constant 0 : index
    %87 = vector.load %arg6[%c68, %c0_24] : memref<200x512xf32, #tpu.memory_space<vmem>>, vector<4x256xf32>
    tpu.vector_store %arg6[%c68, %c0_24], %86 {strides = array<i32>} : memref<200x512xf32, #tpu.memory_space<vmem>>, vector<4x256xf32>,
    %88 = vector.extract_strided_slice %6 {offsets = [0, 113], sizes = [4, 256], strides = [1, 1]} : vector<4x512xf32> to vector<4x256xf32>
    %89 = vector.extract_strided_slice %0 {offsets = [4, 0], sizes = [1, 256], strides = [1, 1]} : vector<7x256xf32> to vector<1x256xf32>
    %90 = vector.broadcast %89 : vector<1x256xf32> to vector<4x256xf32>
    %91 = arith.mulf %88, %90 : vector<4x256xf32>
    %c72 = arith.constant 72 : index
    %c0_25 = arith.constant 0 : index
    %92 = vector.load %arg6[%c72, %c0_25] : memref<200x512xf32, #tpu.memory_space<vmem>>, vector<4x256xf32>
    tpu.vector_store %arg6[%c72, %c0_25], %91 {strides = array<i32>} : memref<200x512xf32, #tpu.memory_space<vmem>>, vector<4x256xf32>,
    %93 = vector.extract_strided_slice %6 {offsets = [0, 114], sizes = [4, 256], strides = [1, 1]} : vector<4x512xf32> to vector<4x256xf32>
    %94 = vector.extract_strided_slice %0 {offsets = [5, 0], sizes = [1, 256], strides = [1, 1]} : vector<7x256xf32> to vector<1x256xf32>
    %95 = vector.broadcast %94 : vector<1x256xf32> to vector<4x256xf32>
    %96 = arith.mulf %93, %95 : vector<4x256xf32>
    %c76 = arith.constant 76 : index
    %c0_26 = arith.constant 0 : index
    %97 = vector.load %arg6[%c76, %c0_26] : memref<200x512xf32, #tpu.memory_space<vmem>>, vector<4x256xf32>
    tpu.vector_store %arg6[%c76, %c0_26], %96 {strides = array<i32>} : memref<200x512xf32, #tpu.memory_space<vmem>>, vector<4x256xf32>,
    %98 = vector.extract_strided_slice %6 {offsets = [0, 115], sizes = [4, 256], strides = [1, 1]} : vector<4x512xf32> to vector<4x256xf32>
    %99 = vector.extract_strided_slice %0 {offsets = [6, 0], sizes = [1, 256], strides = [1, 1]} : vector<7x256xf32> to vector<1x256xf32>
    %100 = vector.broadcast %99 : vector<1x256xf32> to vector<4x256xf32>
    %101 = arith.mulf %98, %100 : vector<4x256xf32>
    %c80 = arith.constant 80 : index
    %c0_27 = arith.constant 0 : index
    %102 = vector.load %arg6[%c80, %c0_27] : memref<200x512xf32, #tpu.memory_space<vmem>>, vector<4x256xf32>
    tpu.vector_store %arg6[%c80, %c0_27], %101 {strides = array<i32>} : memref<200x512xf32, #tpu.memory_space<vmem>>, vector<4x256xf32>,
    %103 = vector.extract_strided_slice %6 {offsets = [0, 125], sizes = [4, 256], strides = [1, 1]} : vector<4x512xf32> to vector<4x256xf32>
    %104 = vector.extract_strided_slice %0 {offsets = [0, 0], sizes = [1, 256], strides = [1, 1]} : vector<7x256xf32> to vector<1x256xf32>
    %105 = vector.broadcast %104 : vector<1x256xf32> to vector<4x256xf32>
    %106 = arith.mulf %103, %105 : vector<4x256xf32>
    %c84 = arith.constant 84 : index
    %c0_28 = arith.constant 0 : index
    %107 = vector.load %arg6[%c84, %c0_28] : memref<200x512xf32, #tpu.memory_space<vmem>>, vector<4x256xf32>
    tpu.vector_store %arg6[%c84, %c0_28], %106 {strides = array<i32>} : memref<200x512xf32, #tpu.memory_space<vmem>>, vector<4x256xf32>,
    %108 = vector.extract_strided_slice %6 {offsets = [0, 126], sizes = [4, 256], strides = [1, 1]} : vector<4x512xf32> to vector<4x256xf32>
    %109 = vector.extract_strided_slice %0 {offsets = [1, 0], sizes = [1, 256], strides = [1, 1]} : vector<7x256xf32> to vector<1x256xf32>
    %110 = vector.broadcast %109 : vector<1x256xf32> to vector<4x256xf32>
    %111 = arith.mulf %108, %110 : vector<4x256xf32>
    %c88 = arith.constant 88 : index
    %c0_29 = arith.constant 0 : index
    %112 = vector.load %arg6[%c88, %c0_29] : memref<200x512xf32, #tpu.memory_space<vmem>>, vector<4x256xf32>
    tpu.vector_store %arg6[%c88, %c0_29], %111 {strides = array<i32>} : memref<200x512xf32, #tpu.memory_space<vmem>>, vector<4x256xf32>,
    %113 = vector.extract_strided_slice %6 {offsets = [0, 127], sizes = [4, 256], strides = [1, 1]} : vector<4x512xf32> to vector<4x256xf32>
    %114 = vector.extract_strided_slice %0 {offsets = [2, 0], sizes = [1, 256], strides = [1, 1]} : vector<7x256xf32> to vector<1x256xf32>
    %115 = vector.broadcast %114 : vector<1x256xf32> to vector<4x256xf32>
    %116 = arith.mulf %113, %115 : vector<4x256xf32>
    %c92 = arith.constant 92 : index
    %c0_30 = arith.constant 0 : index
    %117 = vector.load %arg6[%c92, %c0_30] : memref<200x512xf32, #tpu.memory_space<vmem>>, vector<4x256xf32>
    tpu.vector_store %arg6[%c92, %c0_30], %116 {strides = array<i32>} : memref<200x512xf32, #tpu.memory_space<vmem>>, vector<4x256xf32>,
    %118 = vector.extract_strided_slice %6 {offsets = [0, 128], sizes = [4, 256], strides = [1, 1]} : vector<4x512xf32> to vector<4x256xf32>
    %c96 = arith.constant 96 : index
    %c0_31 = arith.constant 0 : index
    %119 = vector.load %arg6[%c96, %c0_31] : memref<200x512xf32, #tpu.memory_space<vmem>>, vector<4x256xf32>
    tpu.vector_store %arg6[%c96, %c0_31], %118 {strides = array<i32>} : memref<200x512xf32, #tpu.memory_space<vmem>>, vector<4x256xf32>,
    %120 = vector.extract_strided_slice %6 {offsets = [0, 129], sizes = [4, 256], strides = [1, 1]} : vector<4x512xf32> to vector<4x256xf32>
    %121 = vector.extract_strided_slice %0 {offsets = [4, 0], sizes = [1, 256], strides = [1, 1]} : vector<7x256xf32> to vector<1x256xf32>
    %122 = vector.broadcast %121 : vector<1x256xf32> to vector<4x256xf32>
    %123 = arith.mulf %120, %122 : vector<4x256xf32>
    %c100 = arith.constant 100 : index
    %c0_32 = arith.constant 0 : index
    %124 = vector.load %arg6[%c100, %c0_32] : memref<200x512xf32, #tpu.memory_space<vmem>>, vector<4x256xf32>
    tpu.vector_store %arg6[%c100, %c0_32], %123 {strides = array<i32>} : memref<200x512xf32, #tpu.memory_space<vmem>>, vector<4x256xf32>,
    %125 = vector.extract_strided_slice %6 {offsets = [0, 130], sizes = [4, 256], strides = [1, 1]} : vector<4x512xf32> to vector<4x256xf32>
    %126 = vector.extract_strided_slice %0 {offsets = [5, 0], sizes = [1, 256], strides = [1, 1]} : vector<7x256xf32> to vector<1x256xf32>
    %127 = vector.broadcast %126 : vector<1x256xf32> to vector<4x256xf32>
    %128 = arith.mulf %125, %127 : vector<4x256xf32>
    %c104 = arith.constant 104 : index
    %c0_33 = arith.constant 0 : index
    %129 = vector.load %arg6[%c104, %c0_33] : memref<200x512xf32, #tpu.memory_space<vmem>>, vector<4x256xf32>
    tpu.vector_store %arg6[%c104, %c0_33], %128 {strides = array<i32>} : memref<200x512xf32, #tpu.memory_space<vmem>>, vector<4x256xf32>,
    %130 = vector.extract_strided_slice %6 {offsets = [0, 131], sizes = [4, 256], strides = [1, 1]} : vector<4x512xf32> to vector<4x256xf32>
    %131 = vector.extract_strided_slice %0 {offsets = [6, 0], sizes = [1, 256], strides = [1, 1]} : vector<7x256xf32> to vector<1x256xf32>
    %132 = vector.broadcast %131 : vector<1x256xf32> to vector<4x256xf32>
    %133 = arith.mulf %130, %132 : vector<4x256xf32>
    %c108 = arith.constant 108 : index
    %c0_34 = arith.constant 0 : index
    %134 = vector.load %arg6[%c108, %c0_34] : memref<200x512xf32, #tpu.memory_space<vmem>>, vector<4x256xf32>
    tpu.vector_store %arg6[%c108, %c0_34], %133 {strides = array<i32>} : memref<200x512xf32, #tpu.memory_space<vmem>>, vector<4x256xf32>,
    %135 = vector.extract_strided_slice %6 {offsets = [0, 141], sizes = [4, 256], strides = [1, 1]} : vector<4x512xf32> to vector<4x256xf32>
    %136 = vector.extract_strided_slice %0 {offsets = [0, 0], sizes = [1, 256], strides = [1, 1]} : vector<7x256xf32> to vector<1x256xf32>
    %137 = vector.broadcast %136 : vector<1x256xf32> to vector<4x256xf32>
    %138 = arith.mulf %135, %137 : vector<4x256xf32>
    %c112 = arith.constant 112 : index
    %c0_35 = arith.constant 0 : index
    %139 = vector.load %arg6[%c112, %c0_35] : memref<200x512xf32, #tpu.memory_space<vmem>>, vector<4x256xf32>
    tpu.vector_store %arg6[%c112, %c0_35], %138 {strides = array<i32>} : memref<200x512xf32, #tpu.memory_space<vmem>>, vector<4x256xf32>,
    %140 = vector.extract_strided_slice %6 {offsets = [0, 142], sizes = [4, 256], strides = [1, 1]} : vector<4x512xf32> to vector<4x256xf32>
    %141 = vector.extract_strided_slice %0 {offsets = [1, 0], sizes = [1, 256], strides = [1, 1]} : vector<7x256xf32> to vector<1x256xf32>
    %142 = vector.broadcast %141 : vector<1x256xf32> to vector<4x256xf32>
    %143 = arith.mulf %140, %142 : vector<4x256xf32>
    %c116 = arith.constant 116 : index
    %c0_36 = arith.constant 0 : index
    %144 = vector.load %arg6[%c116, %c0_36] : memref<200x512xf32, #tpu.memory_space<vmem>>, vector<4x256xf32>
    tpu.vector_store %arg6[%c116, %c0_36], %143 {strides = array<i32>} : memref<200x512xf32, #tpu.memory_space<vmem>>, vector<4x256xf32>,
    %145 = vector.extract_strided_slice %6 {offsets = [0, 143], sizes = [4, 256], strides = [1, 1]} : vector<4x512xf32> to vector<4x256xf32>
    %146 = vector.extract_strided_slice %0 {offsets = [2, 0], sizes = [1, 256], strides = [1, 1]} : vector<7x256xf32> to vector<1x256xf32>
    %147 = vector.broadcast %146 : vector<1x256xf32> to vector<4x256xf32>
    %148 = arith.mulf %145, %147 : vector<4x256xf32>
    %c120 = arith.constant 120 : index
    %c0_37 = arith.constant 0 : index
    %149 = vector.load %arg6[%c120, %c0_37] : memref<200x512xf32, #tpu.memory_space<vmem>>, vector<4x256xf32>
    tpu.vector_store %arg6[%c120, %c0_37], %148 {strides = array<i32>} : memref<200x512xf32, #tpu.memory_space<vmem>>, vector<4x256xf32>,
    %150 = vector.extract_strided_slice %6 {offsets = [0, 144], sizes = [4, 256], strides = [1, 1]} : vector<4x512xf32> to vector<4x256xf32>
    %c124 = arith.constant 124 : index
    %c0_38 = arith.constant 0 : index
    %151 = vector.load %arg6[%c124, %c0_38] : memref<200x512xf32, #tpu.memory_space<vmem>>, vector<4x256xf32>
    tpu.vector_store %arg6[%c124, %c0_38], %150 {strides = array<i32>} : memref<200x512xf32, #tpu.memory_space<vmem>>, vector<4x256xf32>,
    %152 = vector.extract_strided_slice %6 {offsets = [0, 145], sizes = [4, 256], strides = [1, 1]} : vector<4x512xf32> to vector<4x256xf32>
    %153 = vector.extract_strided_slice %0 {offsets = [4, 0], sizes = [1, 256], strides = [1, 1]} : vector<7x256xf32> to vector<1x256xf32>
    %154 = vector.broadcast %153 : vector<1x256xf32> to vector<4x256xf32>
    %155 = arith.mulf %152, %154 : vector<4x256xf32>
    %c128 = arith.constant 128 : index
    %c0_39 = arith.constant 0 : index
    %156 = vector.load %arg6[%c128, %c0_39] : memref<200x512xf32, #tpu.memory_space<vmem>>, vector<4x256xf32>
    tpu.vector_store %arg6[%c128, %c0_39], %155 {strides = array<i32>} : memref<200x512xf32, #tpu.memory_space<vmem>>, vector<4x256xf32>,
    %157 = vector.extract_strided_slice %6 {offsets = [0, 146], sizes = [4, 256], strides = [1, 1]} : vector<4x512xf32> to vector<4x256xf32>
    %158 = vector.extract_strided_slice %0 {offsets = [5, 0], sizes = [1, 256], strides = [1, 1]} : vector<7x256xf32> to vector<1x256xf32>
    %159 = vector.broadcast %158 : vector<1x256xf32> to vector<4x256xf32>
    %160 = arith.mulf %157, %159 : vector<4x256xf32>
    %c132 = arith.constant 132 : index
    %c0_40 = arith.constant 0 : index
    %161 = vector.load %arg6[%c132, %c0_40] : memref<200x512xf32, #tpu.memory_space<vmem>>, vector<4x256xf32>
    tpu.vector_store %arg6[%c132, %c0_40], %160 {strides = array<i32>} : memref<200x512xf32, #tpu.memory_space<vmem>>, vector<4x256xf32>,
    %162 = vector.extract_strided_slice %6 {offsets = [0, 147], sizes = [4, 256], strides = [1, 1]} : vector<4x512xf32> to vector<4x256xf32>
    %163 = vector.extract_strided_slice %0 {offsets = [6, 0], sizes = [1, 256], strides = [1, 1]} : vector<7x256xf32> to vector<1x256xf32>
    %164 = vector.broadcast %163 : vector<1x256xf32> to vector<4x256xf32>
    %165 = arith.mulf %162, %164 : vector<4x256xf32>
    %c136 = arith.constant 136 : index
    %c0_41 = arith.constant 0 : index
    %166 = vector.load %arg6[%c136, %c0_41] : memref<200x512xf32, #tpu.memory_space<vmem>>, vector<4x256xf32>
    tpu.vector_store %arg6[%c136, %c0_41], %165 {strides = array<i32>} : memref<200x512xf32, #tpu.memory_space<vmem>>, vector<4x256xf32>,
    %167 = vector.extract_strided_slice %6 {offsets = [0, 157], sizes = [4, 256], strides = [1, 1]} : vector<4x512xf32> to vector<4x256xf32>
    %168 = vector.extract_strided_slice %0 {offsets = [0, 0], sizes = [1, 256], strides = [1, 1]} : vector<7x256xf32> to vector<1x256xf32>
    %169 = vector.broadcast %168 : vector<1x256xf32> to vector<4x256xf32>
    %170 = arith.mulf %167, %169 : vector<4x256xf32>
    %c140 = arith.constant 140 : index
    %c0_42 = arith.constant 0 : index
    %171 = vector.load %arg6[%c140, %c0_42] : memref<200x512xf32, #tpu.memory_space<vmem>>, vector<4x256xf32>
    tpu.vector_store %arg6[%c140, %c0_42], %170 {strides = array<i32>} : memref<200x512xf32, #tpu.memory_space<vmem>>, vector<4x256xf32>,
    %172 = vector.extract_strided_slice %6 {offsets = [0, 158], sizes = [4, 256], strides = [1, 1]} : vector<4x512xf32> to vector<4x256xf32>
    %173 = vector.extract_strided_slice %0 {offsets = [1, 0], sizes = [1, 256], strides = [1, 1]} : vector<7x256xf32> to vector<1x256xf32>
    %174 = vector.broadcast %173 : vector<1x256xf32> to vector<4x256xf32>
    %175 = arith.mulf %172, %174 : vector<4x256xf32>
    %c144 = arith.constant 144 : index
    %c0_43 = arith.constant 0 : index
    %176 = vector.load %arg6[%c144, %c0_43] : memref<200x512xf32, #tpu.memory_space<vmem>>, vector<4x256xf32>
    tpu.vector_store %arg6[%c144, %c0_43], %175 {strides = array<i32>} : memref<200x512xf32, #tpu.memory_space<vmem>>, vector<4x256xf32>,
    %177 = vector.extract_strided_slice %6 {offsets = [0, 159], sizes = [4, 256], strides = [1, 1]} : vector<4x512xf32> to vector<4x256xf32>
    %178 = vector.extract_strided_slice %0 {offsets = [2, 0], sizes = [1, 256], strides = [1, 1]} : vector<7x256xf32> to vector<1x256xf32>
    %179 = vector.broadcast %178 : vector<1x256xf32> to vector<4x256xf32>
    %180 = arith.mulf %177, %179 : vector<4x256xf32>
    %c148 = arith.constant 148 : index
    %c0_44 = arith.constant 0 : index
    %181 = vector.load %arg6[%c148, %c0_44] : memref<200x512xf32, #tpu.memory_space<vmem>>, vector<4x256xf32>
    tpu.vector_store %arg6[%c148, %c0_44], %180 {strides = array<i32>} : memref<200x512xf32, #tpu.memory_space<vmem>>, vector<4x256xf32>,
    %182 = vector.extract_strided_slice %6 {offsets = [0, 160], sizes = [4, 256], strides = [1, 1]} : vector<4x512xf32> to vector<4x256xf32>
    %c152 = arith.constant 152 : index
    %c0_45 = arith.constant 0 : index
    %183 = vector.load %arg6[%c152, %c0_45] : memref<200x512xf32, #tpu.memory_space<vmem>>, vector<4x256xf32>
    tpu.vector_store %arg6[%c152, %c0_45], %182 {strides = array<i32>} : memref<200x512xf32, #tpu.memory_space<vmem>>, vector<4x256xf32>,
    %184 = vector.extract_strided_slice %6 {offsets = [0, 161], sizes = [4, 256], strides = [1, 1]} : vector<4x512xf32> to vector<4x256xf32>
    %185 = vector.extract_strided_slice %0 {offsets = [4, 0], sizes = [1, 256], strides = [1, 1]} : vector<7x256xf32> to vector<1x256xf32>
    %186 = vector.broadcast %185 : vector<1x256xf32> to vector<4x256xf32>
    %187 = arith.mulf %184, %186 : vector<4x256xf32>
    %c156 = arith.constant 156 : index
    %c0_46 = arith.constant 0 : index
    %188 = vector.load %arg6[%c156, %c0_46] : memref<200x512xf32, #tpu.memory_space<vmem>>, vector<4x256xf32>
    tpu.vector_store %arg6[%c156, %c0_46], %187 {strides = array<i32>} : memref<200x512xf32, #tpu.memory_space<vmem>>, vector<4x256xf32>,
    %189 = vector.extract_strided_slice %6 {offsets = [0, 162], sizes = [4, 256], strides = [1, 1]} : vector<4x512xf32> to vector<4x256xf32>
    %190 = vector.extract_strided_slice %0 {offsets = [5, 0], sizes = [1, 256], strides = [1, 1]} : vector<7x256xf32> to vector<1x256xf32>
    %191 = vector.broadcast %190 : vector<1x256xf32> to vector<4x256xf32>
    %192 = arith.mulf %189, %191 : vector<4x256xf32>
    %c160 = arith.constant 160 : index
    %c0_47 = arith.constant 0 : index
    %193 = vector.load %arg6[%c160, %c0_47] : memref<200x512xf32, #tpu.memory_space<vmem>>, vector<4x256xf32>
    tpu.vector_store %arg6[%c160, %c0_47], %192 {strides = array<i32>} : memref<200x512xf32, #tpu.memory_space<vmem>>, vector<4x256xf32>,
    %194 = vector.extract_strided_slice %6 {offsets = [0, 163], sizes = [4, 256], strides = [1, 1]} : vector<4x512xf32> to vector<4x256xf32>
    %195 = vector.extract_strided_slice %0 {offsets = [6, 0], sizes = [1, 256], strides = [1, 1]} : vector<7x256xf32> to vector<1x256xf32>
    %196 = vector.broadcast %195 : vector<1x256xf32> to vector<4x256xf32>
    %197 = arith.mulf %194, %196 : vector<4x256xf32>
    %c164 = arith.constant 164 : index
    %c0_48 = arith.constant 0 : index
    %198 = vector.load %arg6[%c164, %c0_48] : memref<200x512xf32, #tpu.memory_space<vmem>>, vector<4x256xf32>
    tpu.vector_store %arg6[%c164, %c0_48], %197 {strides = array<i32>} : memref<200x512xf32, #tpu.memory_space<vmem>>, vector<4x256xf32>,
    %199 = vector.extract_strided_slice %6 {offsets = [0, 173], sizes = [4, 256], strides = [1, 1]} : vector<4x512xf32> to vector<4x256xf32>
    %200 = vector.extract_strided_slice %0 {offsets = [0, 0], sizes = [1, 256], strides = [1, 1]} : vector<7x256xf32> to vector<1x256xf32>
    %201 = vector.broadcast %200 : vector<1x256xf32> to vector<4x256xf32>
    %202 = arith.mulf %199, %201 : vector<4x256xf32>
    %c168 = arith.constant 168 : index
    %c0_49 = arith.constant 0 : index
    %203 = vector.load %arg6[%c168, %c0_49] : memref<200x512xf32, #tpu.memory_space<vmem>>, vector<4x256xf32>
    tpu.vector_store %arg6[%c168, %c0_49], %202 {strides = array<i32>} : memref<200x512xf32, #tpu.memory_space<vmem>>, vector<4x256xf32>,
    %204 = vector.extract_strided_slice %6 {offsets = [0, 174], sizes = [4, 256], strides = [1, 1]} : vector<4x512xf32> to vector<4x256xf32>
    %205 = vector.extract_strided_slice %0 {offsets = [1, 0], sizes = [1, 256], strides = [1, 1]} : vector<7x256xf32> to vector<1x256xf32>
    %206 = vector.broadcast %205 : vector<1x256xf32> to vector<4x256xf32>
    %207 = arith.mulf %204, %206 : vector<4x256xf32>
    %c172 = arith.constant 172 : index
    %c0_50 = arith.constant 0 : index
    %208 = vector.load %arg6[%c172, %c0_50] : memref<200x512xf32, #tpu.memory_space<vmem>>, vector<4x256xf32>
    tpu.vector_store %arg6[%c172, %c0_50], %207 {strides = array<i32>} : memref<200x512xf32, #tpu.memory_space<vmem>>, vector<4x256xf32>,
    %209 = vector.extract_strided_slice %6 {offsets = [0, 175], sizes = [4, 256], strides = [1, 1]} : vector<4x512xf32> to vector<4x256xf32>
    %210 = vector.extract_strided_slice %0 {offsets = [2, 0], sizes = [1, 256], strides = [1, 1]} : vector<7x256xf32> to vector<1x256xf32>
    %211 = vector.broadcast %210 : vector<1x256xf32> to vector<4x256xf32>
    %212 = arith.mulf %209, %211 : vector<4x256xf32>
    %c176 = arith.constant 176 : index
    %c0_51 = arith.constant 0 : index
    %213 = vector.load %arg6[%c176, %c0_51] : memref<200x512xf32, #tpu.memory_space<vmem>>, vector<4x256xf32>
    tpu.vector_store %arg6[%c176, %c0_51], %212 {strides = array<i32>} : memref<200x512xf32, #tpu.memory_space<vmem>>, vector<4x256xf32>,
    %214 = vector.extract_strided_slice %6 {offsets = [0, 176], sizes = [4, 256], strides = [1, 1]} : vector<4x512xf32> to vector<4x256xf32>
    %c180 = arith.constant 180 : index
    %c0_52 = arith.constant 0 : index
    %215 = vector.load %arg6[%c180, %c0_52] : memref<200x512xf32, #tpu.memory_space<vmem>>, vector<4x256xf32>
    tpu.vector_store %arg6[%c180, %c0_52], %214 {strides = array<i32>} : memref<200x512xf32, #tpu.memory_space<vmem>>, vector<4x256xf32>,
    %216 = vector.extract_strided_slice %6 {offsets = [0, 177], sizes = [4, 256], strides = [1, 1]} : vector<4x512xf32> to vector<4x256xf32>
    %217 = vector.extract_strided_slice %0 {offsets = [4, 0], sizes = [1, 256], strides = [1, 1]} : vector<7x256xf32> to vector<1x256xf32>
    %218 = vector.broadcast %217 : vector<1x256xf32> to vector<4x256xf32>
    %219 = arith.mulf %216, %218 : vector<4x256xf32>
    %c184 = arith.constant 184 : index
    %c0_53 = arith.constant 0 : index
    %220 = vector.load %arg6[%c184, %c0_53] : memref<200x512xf32, #tpu.memory_space<vmem>>, vector<4x256xf32>
    tpu.vector_store %arg6[%c184, %c0_53], %219 {strides = array<i32>} : memref<200x512xf32, #tpu.memory_space<vmem>>, vector<4x256xf32>,
    %221 = vector.extract_strided_slice %6 {offsets = [0, 178], sizes = [4, 256], strides = [1, 1]} : vector<4x512xf32> to vector<4x256xf32>
    %222 = vector.extract_strided_slice %0 {offsets = [5, 0], sizes = [1, 256], strides = [1, 1]} : vector<7x256xf32> to vector<1x256xf32>
    %223 = vector.broadcast %222 : vector<1x256xf32> to vector<4x256xf32>
    %224 = arith.mulf %221, %223 : vector<4x256xf32>
    %c188 = arith.constant 188 : index
    %c0_54 = arith.constant 0 : index
    %225 = vector.load %arg6[%c188, %c0_54] : memref<200x512xf32, #tpu.memory_space<vmem>>, vector<4x256xf32>
    tpu.vector_store %arg6[%c188, %c0_54], %224 {strides = array<i32>} : memref<200x512xf32, #tpu.memory_space<vmem>>, vector<4x256xf32>,
    %226 = vector.extract_strided_slice %6 {offsets = [0, 179], sizes = [4, 256], strides = [1, 1]} : vector<4x512xf32> to vector<4x256xf32>
    %227 = vector.extract_strided_slice %0 {offsets = [6, 0], sizes = [1, 256], strides = [1, 1]} : vector<7x256xf32> to vector<1x256xf32>
    %228 = vector.broadcast %227 : vector<1x256xf32> to vector<4x256xf32>
    %229 = arith.mulf %226, %228 : vector<4x256xf32>
    %c192 = arith.constant 192 : index
    %c0_55 = arith.constant 0 : index
    %230 = vector.load %arg6[%c192, %c0_55] : memref<200x512xf32, #tpu.memory_space<vmem>>, vector<4x256xf32>
    tpu.vector_store %arg6[%c192, %c0_55], %229 {strides = array<i32>} : memref<200x512xf32, #tpu.memory_space<vmem>>, vector<4x256xf32>,
    %231 = tpu.concatenate %5, %4, %5 in 1 : vector<4x128xf32>, vector<4x256xf32>, vector<4x128xf32> -> vector<4x512xf32>
    %232 = vector.extract_strided_slice %231 {offsets = [0, 77], sizes = [4, 256], strides = [1, 1]} : vector<4x512xf32> to vector<4x256xf32>
    %233 = vector.extract_strided_slice %0 {offsets = [0, 0], sizes = [1, 256], strides = [1, 1]} : vector<7x256xf32> to vector<1x256xf32>
    %234 = vector.broadcast %233 : vector<1x256xf32> to vector<4x256xf32>
    %235 = arith.mulf %232, %234 : vector<4x256xf32>
    %c0_56 = arith.constant 0 : index
    %c256 = arith.constant 256 : index
    %236 = vector.load %arg6[%c0_56, %c256] : memref<200x512xf32, #tpu.memory_space<vmem>>, vector<4x256xf32>
    tpu.vector_store %arg6[%c0_56, %c256], %235 {strides = array<i32>} : memref<200x512xf32, #tpu.memory_space<vmem>>, vector<4x256xf32>,
    %237 = vector.extract_strided_slice %231 {offsets = [0, 78], sizes = [4, 256], strides = [1, 1]} : vector<4x512xf32> to vector<4x256xf32>
    %238 = vector.extract_strided_slice %0 {offsets = [1, 0], sizes = [1, 256], strides = [1, 1]} : vector<7x256xf32> to vector<1x256xf32>
    %239 = vector.broadcast %238 : vector<1x256xf32> to vector<4x256xf32>
    %240 = arith.mulf %237, %239 : vector<4x256xf32>
    %c4_57 = arith.constant 4 : index
    %c256_58 = arith.constant 256 : index
    %241 = vector.load %arg6[%c4_57, %c256_58] : memref<200x512xf32, #tpu.memory_space<vmem>>, vector<4x256xf32>
    tpu.vector_store %arg6[%c4_57, %c256_58], %240 {strides = array<i32>} : memref<200x512xf32, #tpu.memory_space<vmem>>, vector<4x256xf32>,
    %242 = vector.extract_strided_slice %231 {offsets = [0, 79], sizes = [4, 256], strides = [1, 1]} : vector<4x512xf32> to vector<4x256xf32>
    %243 = vector.extract_strided_slice %0 {offsets = [2, 0], sizes = [1, 256], strides = [1, 1]} : vector<7x256xf32> to vector<1x256xf32>
    %244 = vector.broadcast %243 : vector<1x256xf32> to vector<4x256xf32>
    %245 = arith.mulf %242, %244 : vector<4x256xf32>
    %c8_59 = arith.constant 8 : index
    %c256_60 = arith.constant 256 : index
    %246 = vector.load %arg6[%c8_59, %c256_60] : memref<200x512xf32, #tpu.memory_space<vmem>>, vector<4x256xf32>
    tpu.vector_store %arg6[%c8_59, %c256_60], %245 {strides = array<i32>} : memref<200x512xf32, #tpu.memory_space<vmem>>, vector<4x256xf32>,
    %247 = vector.extract_strided_slice %231 {offsets = [0, 80], sizes = [4, 256], strides = [1, 1]} : vector<4x512xf32> to vector<4x256xf32>
    %c12_61 = arith.constant 12 : index
    %c256_62 = arith.constant 256 : index
    %248 = vector.load %arg6[%c12_61, %c256_62] : memref<200x512xf32, #tpu.memory_space<vmem>>, vector<4x256xf32>
    tpu.vector_store %arg6[%c12_61, %c256_62], %247 {strides = array<i32>} : memref<200x512xf32, #tpu.memory_space<vmem>>, vector<4x256xf32>,
    %249 = vector.extract_strided_slice %231 {offsets = [0, 81], sizes = [4, 256], strides = [1, 1]} : vector<4x512xf32> to vector<4x256xf32>
    %250 = vector.extract_strided_slice %0 {offsets = [4, 0], sizes = [1, 256], strides = [1, 1]} : vector<7x256xf32> to vector<1x256xf32>
    %251 = vector.broadcast %250 : vector<1x256xf32> to vector<4x256xf32>
    %252 = arith.mulf %249, %251 : vector<4x256xf32>
    %c16_63 = arith.constant 16 : index
    %c256_64 = arith.constant 256 : index
    %253 = vector.load %arg6[%c16_63, %c256_64] : memref<200x512xf32, #tpu.memory_space<vmem>>, vector<4x256xf32>
    tpu.vector_store %arg6[%c16_63, %c256_64], %252 {strides = array<i32>} : memref<200x512xf32, #tpu.memory_space<vmem>>, vector<4x256xf32>,
    %254 = vector.extract_strided_slice %231 {offsets = [0, 82], sizes = [4, 256], strides = [1, 1]} : vector<4x512xf32> to vector<4x256xf32>
    %255 = vector.extract_strided_slice %0 {offsets = [5, 0], sizes = [1, 256], strides = [1, 1]} : vector<7x256xf32> to vector<1x256xf32>
    %256 = vector.broadcast %255 : vector<1x256xf32> to vector<4x256xf32>
    %257 = arith.mulf %254, %256 : vector<4x256xf32>
    %c20_65 = arith.constant 20 : index
    %c256_66 = arith.constant 256 : index
    %258 = vector.load %arg6[%c20_65, %c256_66] : memref<200x512xf32, #tpu.memory_space<vmem>>, vector<4x256xf32>
    tpu.vector_store %arg6[%c20_65, %c256_66], %257 {strides = array<i32>} : memref<200x512xf32, #tpu.memory_space<vmem>>, vector<4x256xf32>,
    %259 = vector.extract_strided_slice %231 {offsets = [0, 83], sizes = [4, 256], strides = [1, 1]} : vector<4x512xf32> to vector<4x256xf32>
    %260 = vector.extract_strided_slice %0 {offsets = [6, 0], sizes = [1, 256], strides = [1, 1]} : vector<7x256xf32> to vector<1x256xf32>
    %261 = vector.broadcast %260 : vector<1x256xf32> to vector<4x256xf32>
    %262 = arith.mulf %259, %261 : vector<4x256xf32>
    %c24_67 = arith.constant 24 : index
    %c256_68 = arith.constant 256 : index
    %263 = vector.load %arg6[%c24_67, %c256_68] : memref<200x512xf32, #tpu.memory_space<vmem>>, vector<4x256xf32>
    tpu.vector_store %arg6[%c24_67, %c256_68], %262 {strides = array<i32>} : memref<200x512xf32, #tpu.memory_space<vmem>>, vector<4x256xf32>,
    %264 = vector.extract_strided_slice %231 {offsets = [0, 93], sizes = [4, 256], strides = [1, 1]} : vector<4x512xf32> to vector<4x256xf32>
    %265 = vector.extract_strided_slice %0 {offsets = [0, 0], sizes = [1, 256], strides = [1, 1]} : vector<7x256xf32> to vector<1x256xf32>
    %266 = vector.broadcast %265 : vector<1x256xf32> to vector<4x256xf32>
    %267 = arith.mulf %264, %266 : vector<4x256xf32>
    %c28_69 = arith.constant 28 : index
    %c256_70 = arith.constant 256 : index
    %268 = vector.load %arg6[%c28_69, %c256_70] : memref<200x512xf32, #tpu.memory_space<vmem>>, vector<4x256xf32>
    tpu.vector_store %arg6[%c28_69, %c256_70], %267 {strides = array<i32>} : memref<200x512xf32, #tpu.memory_space<vmem>>, vector<4x256xf32>,
    %269 = vector.extract_strided_slice %231 {offsets = [0, 94], sizes = [4, 256], strides = [1, 1]} : vector<4x512xf32> to vector<4x256xf32>
    %270 = vector.extract_strided_slice %0 {offsets = [1, 0], sizes = [1, 256], strides = [1, 1]} : vector<7x256xf32> to vector<1x256xf32>
    %271 = vector.broadcast %270 : vector<1x256xf32> to vector<4x256xf32>
    %272 = arith.mulf %269, %271 : vector<4x256xf32>
    %c32_71 = arith.constant 32 : index
    %c256_72 = arith.constant 256 : index
    %273 = vector.load %arg6[%c32_71, %c256_72] : memref<200x512xf32, #tpu.memory_space<vmem>>, vector<4x256xf32>
    tpu.vector_store %arg6[%c32_71, %c256_72], %272 {strides = array<i32>} : memref<200x512xf32, #tpu.memory_space<vmem>>, vector<4x256xf32>,
    %274 = vector.extract_strided_slice %231 {offsets = [0, 95], sizes = [4, 256], strides = [1, 1]} : vector<4x512xf32> to vector<4x256xf32>
    %275 = vector.extract_strided_slice %0 {offsets = [2, 0], sizes = [1, 256], strides = [1, 1]} : vector<7x256xf32> to vector<1x256xf32>
    %276 = vector.broadcast %275 : vector<1x256xf32> to vector<4x256xf32>
    %277 = arith.mulf %274, %276 : vector<4x256xf32>
    %c36_73 = arith.constant 36 : index
    %c256_74 = arith.constant 256 : index
    %278 = vector.load %arg6[%c36_73, %c256_74] : memref<200x512xf32, #tpu.memory_space<vmem>>, vector<4x256xf32>
    tpu.vector_store %arg6[%c36_73, %c256_74], %277 {strides = array<i32>} : memref<200x512xf32, #tpu.memory_space<vmem>>, vector<4x256xf32>,
    %279 = vector.extract_strided_slice %231 {offsets = [0, 96], sizes = [4, 256], strides = [1, 1]} : vector<4x512xf32> to vector<4x256xf32>
    %c40_75 = arith.constant 40 : index
    %c256_76 = arith.constant 256 : index
    %280 = vector.load %arg6[%c40_75, %c256_76] : memref<200x512xf32, #tpu.memory_space<vmem>>, vector<4x256xf32>
    tpu.vector_store %arg6[%c40_75, %c256_76], %279 {strides = array<i32>} : memref<200x512xf32, #tpu.memory_space<vmem>>, vector<4x256xf32>,
    %281 = vector.extract_strided_slice %231 {offsets = [0, 97], sizes = [4, 256], strides = [1, 1]} : vector<4x512xf32> to vector<4x256xf32>
    %282 = vector.extract_strided_slice %0 {offsets = [4, 0], sizes = [1, 256], strides = [1, 1]} : vector<7x256xf32> to vector<1x256xf32>
    %283 = vector.broadcast %282 : vector<1x256xf32> to vector<4x256xf32>
    %284 = arith.mulf %281, %283 : vector<4x256xf32>
    %c44_77 = arith.constant 44 : index
    %c256_78 = arith.constant 256 : index
    %285 = vector.load %arg6[%c44_77, %c256_78] : memref<200x512xf32, #tpu.memory_space<vmem>>, vector<4x256xf32>
    tpu.vector_store %arg6[%c44_77, %c256_78], %284 {strides = array<i32>} : memref<200x512xf32, #tpu.memory_space<vmem>>, vector<4x256xf32>,
    %286 = vector.extract_strided_slice %231 {offsets = [0, 98], sizes = [4, 256], strides = [1, 1]} : vector<4x512xf32> to vector<4x256xf32>
    %287 = vector.extract_strided_slice %0 {offsets = [5, 0], sizes = [1, 256], strides = [1, 1]} : vector<7x256xf32> to vector<1x256xf32>
    %288 = vector.broadcast %287 : vector<1x256xf32> to vector<4x256xf32>
    %289 = arith.mulf %286, %288 : vector<4x256xf32>
    %c48_79 = arith.constant 48 : index
    %c256_80 = arith.constant 256 : index
    %290 = vector.load %arg6[%c48_79, %c256_80] : memref<200x512xf32, #tpu.memory_space<vmem>>, vector<4x256xf32>
    tpu.vector_store %arg6[%c48_79, %c256_80], %289 {strides = array<i32>} : memref<200x512xf32, #tpu.memory_space<vmem>>, vector<4x256xf32>,
    %291 = vector.extract_strided_slice %231 {offsets = [0, 99], sizes = [4, 256], strides = [1, 1]} : vector<4x512xf32> to vector<4x256xf32>
    %292 = vector.extract_strided_slice %0 {offsets = [6, 0], sizes = [1, 256], strides = [1, 1]} : vector<7x256xf32> to vector<1x256xf32>
    %293 = vector.broadcast %292 : vector<1x256xf32> to vector<4x256xf32>
    %294 = arith.mulf %291, %293 : vector<4x256xf32>
    %c52_81 = arith.constant 52 : index
    %c256_82 = arith.constant 256 : index
    %295 = vector.load %arg6[%c52_81, %c256_82] : memref<200x512xf32, #tpu.memory_space<vmem>>, vector<4x256xf32>
    tpu.vector_store %arg6[%c52_81, %c256_82], %294 {strides = array<i32>} : memref<200x512xf32, #tpu.memory_space<vmem>>, vector<4x256xf32>,
    %296 = vector.extract_strided_slice %231 {offsets = [0, 109], sizes = [4, 256], strides = [1, 1]} : vector<4x512xf32> to vector<4x256xf32>
    %297 = vector.extract_strided_slice %0 {offsets = [0, 0], sizes = [1, 256], strides = [1, 1]} : vector<7x256xf32> to vector<1x256xf32>
    %298 = vector.broadcast %297 : vector<1x256xf32> to vector<4x256xf32>
    %299 = arith.mulf %296, %298 : vector<4x256xf32>
    %c56_83 = arith.constant 56 : index
    %c256_84 = arith.constant 256 : index
    %300 = vector.load %arg6[%c56_83, %c256_84] : memref<200x512xf32, #tpu.memory_space<vmem>>, vector<4x256xf32>
    tpu.vector_store %arg6[%c56_83, %c256_84], %299 {strides = array<i32>} : memref<200x512xf32, #tpu.memory_space<vmem>>, vector<4x256xf32>,
    %301 = vector.extract_strided_slice %231 {offsets = [0, 110], sizes = [4, 256], strides = [1, 1]} : vector<4x512xf32> to vector<4x256xf32>
    %302 = vector.extract_strided_slice %0 {offsets = [1, 0], sizes = [1, 256], strides = [1, 1]} : vector<7x256xf32> to vector<1x256xf32>
    %303 = vector.broadcast %302 : vector<1x256xf32> to vector<4x256xf32>
    %304 = arith.mulf %301, %303 : vector<4x256xf32>
    %c60_85 = arith.constant 60 : index
    %c256_86 = arith.constant 256 : index
    %305 = vector.load %arg6[%c60_85, %c256_86] : memref<200x512xf32, #tpu.memory_space<vmem>>, vector<4x256xf32>
    tpu.vector_store %arg6[%c60_85, %c256_86], %304 {strides = array<i32>} : memref<200x512xf32, #tpu.memory_space<vmem>>, vector<4x256xf32>,
    %306 = vector.extract_strided_slice %231 {offsets = [0, 111], sizes = [4, 256], strides = [1, 1]} : vector<4x512xf32> to vector<4x256xf32>
    %307 = vector.extract_strided_slice %0 {offsets = [2, 0], sizes = [1, 256], strides = [1, 1]} : vector<7x256xf32> to vector<1x256xf32>
    %308 = vector.broadcast %307 : vector<1x256xf32> to vector<4x256xf32>
    %309 = arith.mulf %306, %308 : vector<4x256xf32>
    %c64_87 = arith.constant 64 : index
    %c256_88 = arith.constant 256 : index
    %310 = vector.load %arg6[%c64_87, %c256_88] : memref<200x512xf32, #tpu.memory_space<vmem>>, vector<4x256xf32>
    tpu.vector_store %arg6[%c64_87, %c256_88], %309 {strides = array<i32>} : memref<200x512xf32, #tpu.memory_space<vmem>>, vector<4x256xf32>,
    %311 = vector.extract_strided_slice %231 {offsets = [0, 112], sizes = [4, 256], strides = [1, 1]} : vector<4x512xf32> to vector<4x256xf32>
    %c68_89 = arith.constant 68 : index
    %c256_90 = arith.constant 256 : index
    %312 = vector.load %arg6[%c68_89, %c256_90] : memref<200x512xf32, #tpu.memory_space<vmem>>, vector<4x256xf32>
    tpu.vector_store %arg6[%c68_89, %c256_90], %311 {strides = array<i32>} : memref<200x512xf32, #tpu.memory_space<vmem>>, vector<4x256xf32>,
    %313 = vector.extract_strided_slice %231 {offsets = [0, 113], sizes = [4, 256], strides = [1, 1]} : vector<4x512xf32> to vector<4x256xf32>
    %314 = vector.extract_strided_slice %0 {offsets = [4, 0], sizes = [1, 256], strides = [1, 1]} : vector<7x256xf32> to vector<1x256xf32>
    %315 = vector.broadcast %314 : vector<1x256xf32> to vector<4x256xf32>
    %316 = arith.mulf %313, %315 : vector<4x256xf32>
    %c72_91 = arith.constant 72 : index
    %c256_92 = arith.constant 256 : index
    %317 = vector.load %arg6[%c72_91, %c256_92] : memref<200x512xf32, #tpu.memory_space<vmem>>, vector<4x256xf32>
    tpu.vector_store %arg6[%c72_91, %c256_92], %316 {strides = array<i32>} : memref<200x512xf32, #tpu.memory_space<vmem>>, vector<4x256xf32>,
    %318 = vector.extract_strided_slice %231 {offsets = [0, 114], sizes = [4, 256], strides = [1, 1]} : vector<4x512xf32> to vector<4x256xf32>
    %319 = vector.extract_strided_slice %0 {offsets = [5, 0], sizes = [1, 256], strides = [1, 1]} : vector<7x256xf32> to vector<1x256xf32>
    %320 = vector.broadcast %319 : vector<1x256xf32> to vector<4x256xf32>
    %321 = arith.mulf %318, %320 : vector<4x256xf32>
    %c76_93 = arith.constant 76 : index
    %c256_94 = arith.constant 256 : index
    %322 = vector.load %arg6[%c76_93, %c256_94] : memref<200x512xf32, #tpu.memory_space<vmem>>, vector<4x256xf32>
    tpu.vector_store %arg6[%c76_93, %c256_94], %321 {strides = array<i32>} : memref<200x512xf32, #tpu.memory_space<vmem>>, vector<4x256xf32>,
    %323 = vector.extract_strided_slice %231 {offsets = [0, 115], sizes = [4, 256], strides = [1, 1]} : vector<4x512xf32> to vector<4x256xf32>
    %324 = vector.extract_strided_slice %0 {offsets = [6, 0], sizes = [1, 256], strides = [1, 1]} : vector<7x256xf32> to vector<1x256xf32>
    %325 = vector.broadcast %324 : vector<1x256xf32> to vector<4x256xf32>
    %326 = arith.mulf %323, %325 : vector<4x256xf32>
    %c80_95 = arith.constant 80 : index
    %c256_96 = arith.constant 256 : index
    %327 = vector.load %arg6[%c80_95, %c256_96] : memref<200x512xf32, #tpu.memory_space<vmem>>, vector<4x256xf32>
    tpu.vector_store %arg6[%c80_95, %c256_96], %326 {strides = array<i32>} : memref<200x512xf32, #tpu.memory_space<vmem>>, vector<4x256xf32>,
    %328 = vector.extract_strided_slice %231 {offsets = [0, 125], sizes = [4, 256], strides = [1, 1]} : vector<4x512xf32> to vector<4x256xf32>
    %329 = vector.extract_strided_slice %0 {offsets = [0, 0], sizes = [1, 256], strides = [1, 1]} : vector<7x256xf32> to vector<1x256xf32>
    %330 = vector.broadcast %329 : vector<1x256xf32> to vector<4x256xf32>
    %331 = arith.mulf %328, %330 : vector<4x256xf32>
    %c84_97 = arith.constant 84 : index
    %c256_98 = arith.constant 256 : index
    %332 = vector.load %arg6[%c84_97, %c256_98] : memref<200x512xf32, #tpu.memory_space<vmem>>, vector<4x256xf32>
    tpu.vector_store %arg6[%c84_97, %c256_98], %331 {strides = array<i32>} : memref<200x512xf32, #tpu.memory_space<vmem>>, vector<4x256xf32>,
    %333 = vector.extract_strided_slice %231 {offsets = [0, 126], sizes = [4, 256], strides = [1, 1]} : vector<4x512xf32> to vector<4x256xf32>
    %334 = vector.extract_strided_slice %0 {offsets = [1, 0], sizes = [1, 256], strides = [1, 1]} : vector<7x256xf32> to vector<1x256xf32>
    %335 = vector.broadcast %334 : vector<1x256xf32> to vector<4x256xf32>
    %336 = arith.mulf %333, %335 : vector<4x256xf32>
    %c88_99 = arith.constant 88 : index
    %c256_100 = arith.constant 256 : index
    %337 = vector.load %arg6[%c88_99, %c256_100] : memref<200x512xf32, #tpu.memory_space<vmem>>, vector<4x256xf32>
    tpu.vector_store %arg6[%c88_99, %c256_100], %336 {strides = array<i32>} : memref<200x512xf32, #tpu.memory_space<vmem>>, vector<4x256xf32>,
    %338 = vector.extract_strided_slice %231 {offsets = [0, 127], sizes = [4, 256], strides = [1, 1]} : vector<4x512xf32> to vector<4x256xf32>
    %339 = vector.extract_strided_slice %0 {offsets = [2, 0], sizes = [1, 256], strides = [1, 1]} : vector<7x256xf32> to vector<1x256xf32>
    %340 = vector.broadcast %339 : vector<1x256xf32> to vector<4x256xf32>
    %341 = arith.mulf %338, %340 : vector<4x256xf32>
    %c92_101 = arith.constant 92 : index
    %c256_102 = arith.constant 256 : index
    %342 = vector.load %arg6[%c92_101, %c256_102] : memref<200x512xf32, #tpu.memory_space<vmem>>, vector<4x256xf32>
    tpu.vector_store %arg6[%c92_101, %c256_102], %341 {strides = array<i32>} : memref<200x512xf32, #tpu.memory_space<vmem>>, vector<4x256xf32>,
    %343 = vector.extract_strided_slice %231 {offsets = [0, 128], sizes = [4, 256], strides = [1, 1]} : vector<4x512xf32> to vector<4x256xf32>
    %c96_103 = arith.constant 96 : index
    %c256_104 = arith.constant 256 : index
    %344 = vector.load %arg6[%c96_103, %c256_104] : memref<200x512xf32, #tpu.memory_space<vmem>>, vector<4x256xf32>
    tpu.vector_store %arg6[%c96_103, %c256_104], %343 {strides = array<i32>} : memref<200x512xf32, #tpu.memory_space<vmem>>, vector<4x256xf32>,
    %345 = vector.extract_strided_slice %231 {offsets = [0, 129], sizes = [4, 256], strides = [1, 1]} : vector<4x512xf32> to vector<4x256xf32>
    %346 = vector.extract_strided_slice %0 {offsets = [4, 0], sizes = [1, 256], strides = [1, 1]} : vector<7x256xf32> to vector<1x256xf32>
    %347 = vector.broadcast %346 : vector<1x256xf32> to vector<4x256xf32>
    %348 = arith.mulf %345, %347 : vector<4x256xf32>
    %c100_105 = arith.constant 100 : index
    %c256_106 = arith.constant 256 : index
    %349 = vector.load %arg6[%c100_105, %c256_106] : memref<200x512xf32, #tpu.memory_space<vmem>>, vector<4x256xf32>
    tpu.vector_store %arg6[%c100_105, %c256_106], %348 {strides = array<i32>} : memref<200x512xf32, #tpu.memory_space<vmem>>, vector<4x256xf32>,
    %350 = vector.extract_strided_slice %231 {offsets = [0, 130], sizes = [4, 256], strides = [1, 1]} : vector<4x512xf32> to vector<4x256xf32>
    %351 = vector.extract_strided_slice %0 {offsets = [5, 0], sizes = [1, 256], strides = [1, 1]} : vector<7x256xf32> to vector<1x256xf32>
    %352 = vector.broadcast %351 : vector<1x256xf32> to vector<4x256xf32>
    %353 = arith.mulf %350, %352 : vector<4x256xf32>
    %c104_107 = arith.constant 104 : index
    %c256_108 = arith.constant 256 : index
    %354 = vector.load %arg6[%c104_107, %c256_108] : memref<200x512xf32, #tpu.memory_space<vmem>>, vector<4x256xf32>
    tpu.vector_store %arg6[%c104_107, %c256_108], %353 {strides = array<i32>} : memref<200x512xf32, #tpu.memory_space<vmem>>, vector<4x256xf32>,
    %355 = vector.extract_strided_slice %231 {offsets = [0, 131], sizes = [4, 256], strides = [1, 1]} : vector<4x512xf32> to vector<4x256xf32>
    %356 = vector.extract_strided_slice %0 {offsets = [6, 0], sizes = [1, 256], strides = [1, 1]} : vector<7x256xf32> to vector<1x256xf32>
    %357 = vector.broadcast %356 : vector<1x256xf32> to vector<4x256xf32>
    %358 = arith.mulf %355, %357 : vector<4x256xf32>
    %c108_109 = arith.constant 108 : index
    %c256_110 = arith.constant 256 : index
    %359 = vector.load %arg6[%c108_109, %c256_110] : memref<200x512xf32, #tpu.memory_space<vmem>>, vector<4x256xf32>
    tpu.vector_store %arg6[%c108_109, %c256_110], %358 {strides = array<i32>} : memref<200x512xf32, #tpu.memory_space<vmem>>, vector<4x256xf32>,
    %360 = vector.extract_strided_slice %231 {offsets = [0, 141], sizes = [4, 256], strides = [1, 1]} : vector<4x512xf32> to vector<4x256xf32>
    %361 = vector.extract_strided_slice %0 {offsets = [0, 0], sizes = [1, 256], strides = [1, 1]} : vector<7x256xf32> to vector<1x256xf32>
    %362 = vector.broadcast %361 : vector<1x256xf32> to vector<4x256xf32>
    %363 = arith.mulf %360, %362 : vector<4x256xf32>
    %c112_111 = arith.constant 112 : index
    %c256_112 = arith.constant 256 : index
    %364 = vector.load %arg6[%c112_111, %c256_112] : memref<200x512xf32, #tpu.memory_space<vmem>>, vector<4x256xf32>
    tpu.vector_store %arg6[%c112_111, %c256_112], %363 {strides = array<i32>} : memref<200x512xf32, #tpu.memory_space<vmem>>, vector<4x256xf32>,
    %365 = vector.extract_strided_slice %231 {offsets = [0, 142], sizes = [4, 256], strides = [1, 1]} : vector<4x512xf32> to vector<4x256xf32>
    %366 = vector.extract_strided_slice %0 {offsets = [1, 0], sizes = [1, 256], strides = [1, 1]} : vector<7x256xf32> to vector<1x256xf32>
    %367 = vector.broadcast %366 : vector<1x256xf32> to vector<4x256xf32>
    %368 = arith.mulf %365, %367 : vector<4x256xf32>
    %c116_113 = arith.constant 116 : index
    %c256_114 = arith.constant 256 : index
    %369 = vector.load %arg6[%c116_113, %c256_114] : memref<200x512xf32, #tpu.memory_space<vmem>>, vector<4x256xf32>
    tpu.vector_store %arg6[%c116_113, %c256_114], %368 {strides = array<i32>} : memref<200x512xf32, #tpu.memory_space<vmem>>, vector<4x256xf32>,
    %370 = vector.extract_strided_slice %231 {offsets = [0, 143], sizes = [4, 256], strides = [1, 1]} : vector<4x512xf32> to vector<4x256xf32>
    %371 = vector.extract_strided_slice %0 {offsets = [2, 0], sizes = [1, 256], strides = [1, 1]} : vector<7x256xf32> to vector<1x256xf32>
    %372 = vector.broadcast %371 : vector<1x256xf32> to vector<4x256xf32>
    %373 = arith.mulf %370, %372 : vector<4x256xf32>
    %c120_115 = arith.constant 120 : index
    %c256_116 = arith.constant 256 : index
    %374 = vector.load %arg6[%c120_115, %c256_116] : memref<200x512xf32, #tpu.memory_space<vmem>>, vector<4x256xf32>
    tpu.vector_store %arg6[%c120_115, %c256_116], %373 {strides = array<i32>} : memref<200x512xf32, #tpu.memory_space<vmem>>, vector<4x256xf32>,
    %375 = vector.extract_strided_slice %231 {offsets = [0, 144], sizes = [4, 256], strides = [1, 1]} : vector<4x512xf32> to vector<4x256xf32>
    %c124_117 = arith.constant 124 : index
    %c256_118 = arith.constant 256 : index
    %376 = vector.load %arg6[%c124_117, %c256_118] : memref<200x512xf32, #tpu.memory_space<vmem>>, vector<4x256xf32>
    tpu.vector_store %arg6[%c124_117, %c256_118], %375 {strides = array<i32>} : memref<200x512xf32, #tpu.memory_space<vmem>>, vector<4x256xf32>,
    %377 = vector.extract_strided_slice %231 {offsets = [0, 145], sizes = [4, 256], strides = [1, 1]} : vector<4x512xf32> to vector<4x256xf32>
    %378 = vector.extract_strided_slice %0 {offsets = [4, 0], sizes = [1, 256], strides = [1, 1]} : vector<7x256xf32> to vector<1x256xf32>
    %379 = vector.broadcast %378 : vector<1x256xf32> to vector<4x256xf32>
    %380 = arith.mulf %377, %379 : vector<4x256xf32>
    %c128_119 = arith.constant 128 : index
    %c256_120 = arith.constant 256 : index
    %381 = vector.load %arg6[%c128_119, %c256_120] : memref<200x512xf32, #tpu.memory_space<vmem>>, vector<4x256xf32>
    tpu.vector_store %arg6[%c128_119, %c256_120], %380 {strides = array<i32>} : memref<200x512xf32, #tpu.memory_space<vmem>>, vector<4x256xf32>,
    %382 = vector.extract_strided_slice %231 {offsets = [0, 146], sizes = [4, 256], strides = [1, 1]} : vector<4x512xf32> to vector<4x256xf32>
    %383 = vector.extract_strided_slice %0 {offsets = [5, 0], sizes = [1, 256], strides = [1, 1]} : vector<7x256xf32> to vector<1x256xf32>
    %384 = vector.broadcast %383 : vector<1x256xf32> to vector<4x256xf32>
    %385 = arith.mulf %382, %384 : vector<4x256xf32>
    %c132_121 = arith.constant 132 : index
    %c256_122 = arith.constant 256 : index
    %386 = vector.load %arg6[%c132_121, %c256_122] : memref<200x512xf32, #tpu.memory_space<vmem>>, vector<4x256xf32>
    tpu.vector_store %arg6[%c132_121, %c256_122], %385 {strides = array<i32>} : memref<200x512xf32, #tpu.memory_space<vmem>>, vector<4x256xf32>,
    %387 = vector.extract_strided_slice %231 {offsets = [0, 147], sizes = [4, 256], strides = [1, 1]} : vector<4x512xf32> to vector<4x256xf32>
    %388 = vector.extract_strided_slice %0 {offsets = [6, 0], sizes = [1, 256], strides = [1, 1]} : vector<7x256xf32> to vector<1x256xf32>
    %389 = vector.broadcast %388 : vector<1x256xf32> to vector<4x256xf32>
    %390 = arith.mulf %387, %389 : vector<4x256xf32>
    %c136_123 = arith.constant 136 : index
    %c256_124 = arith.constant 256 : index
    %391 = vector.load %arg6[%c136_123, %c256_124] : memref<200x512xf32, #tpu.memory_space<vmem>>, vector<4x256xf32>
    tpu.vector_store %arg6[%c136_123, %c256_124], %390 {strides = array<i32>} : memref<200x512xf32, #tpu.memory_space<vmem>>, vector<4x256xf32>,
    %392 = vector.extract_strided_slice %231 {offsets = [0, 157], sizes = [4, 256], strides = [1, 1]} : vector<4x512xf32> to vector<4x256xf32>
    %393 = vector.extract_strided_slice %0 {offsets = [0, 0], sizes = [1, 256], strides = [1, 1]} : vector<7x256xf32> to vector<1x256xf32>
    %394 = vector.broadcast %393 : vector<1x256xf32> to vector<4x256xf32>
    %395 = arith.mulf %392, %394 : vector<4x256xf32>
    %c140_125 = arith.constant 140 : index
    %c256_126 = arith.constant 256 : index
    %396 = vector.load %arg6[%c140_125, %c256_126] : memref<200x512xf32, #tpu.memory_space<vmem>>, vector<4x256xf32>
    tpu.vector_store %arg6[%c140_125, %c256_126], %395 {strides = array<i32>} : memref<200x512xf32, #tpu.memory_space<vmem>>, vector<4x256xf32>,
    %397 = vector.extract_strided_slice %231 {offsets = [0, 158], sizes = [4, 256], strides = [1, 1]} : vector<4x512xf32> to vector<4x256xf32>
    %398 = vector.extract_strided_slice %0 {offsets = [1, 0], sizes = [1, 256], strides = [1, 1]} : vector<7x256xf32> to vector<1x256xf32>
    %399 = vector.broadcast %398 : vector<1x256xf32> to vector<4x256xf32>
    %400 = arith.mulf %397, %399 : vector<4x256xf32>
    %c144_127 = arith.constant 144 : index
    %c256_128 = arith.constant 256 : index
    %401 = vector.load %arg6[%c144_127, %c256_128] : memref<200x512xf32, #tpu.memory_space<vmem>>, vector<4x256xf32>
    tpu.vector_store %arg6[%c144_127, %c256_128], %400 {strides = array<i32>} : memref<200x512xf32, #tpu.memory_space<vmem>>, vector<4x256xf32>,
    %402 = vector.extract_strided_slice %231 {offsets = [0, 159], sizes = [4, 256], strides = [1, 1]} : vector<4x512xf32> to vector<4x256xf32>
    %403 = vector.extract_strided_slice %0 {offsets = [2, 0], sizes = [1, 256], strides = [1, 1]} : vector<7x256xf32> to vector<1x256xf32>
    %404 = vector.broadcast %403 : vector<1x256xf32> to vector<4x256xf32>
    %405 = arith.mulf %402, %404 : vector<4x256xf32>
    %c148_129 = arith.constant 148 : index
    %c256_130 = arith.constant 256 : index
    %406 = vector.load %arg6[%c148_129, %c256_130] : memref<200x512xf32, #tpu.memory_space<vmem>>, vector<4x256xf32>
    tpu.vector_store %arg6[%c148_129, %c256_130], %405 {strides = array<i32>} : memref<200x512xf32, #tpu.memory_space<vmem>>, vector<4x256xf32>,
    %407 = vector.extract_strided_slice %231 {offsets = [0, 160], sizes = [4, 256], strides = [1, 1]} : vector<4x512xf32> to vector<4x256xf32>
    %c152_131 = arith.constant 152 : index
    %c256_132 = arith.constant 256 : index
    %408 = vector.load %arg6[%c152_131, %c256_132] : memref<200x512xf32, #tpu.memory_space<vmem>>, vector<4x256xf32>
    tpu.vector_store %arg6[%c152_131, %c256_132], %407 {strides = array<i32>} : memref<200x512xf32, #tpu.memory_space<vmem>>, vector<4x256xf32>,
    %409 = vector.extract_strided_slice %231 {offsets = [0, 161], sizes = [4, 256], strides = [1, 1]} : vector<4x512xf32> to vector<4x256xf32>
    %410 = vector.extract_strided_slice %0 {offsets = [4, 0], sizes = [1, 256], strides = [1, 1]} : vector<7x256xf32> to vector<1x256xf32>
    %411 = vector.broadcast %410 : vector<1x256xf32> to vector<4x256xf32>
    %412 = arith.mulf %409, %411 : vector<4x256xf32>
    %c156_133 = arith.constant 156 : index
    %c256_134 = arith.constant 256 : index
    %413 = vector.load %arg6[%c156_133, %c256_134] : memref<200x512xf32, #tpu.memory_space<vmem>>, vector<4x256xf32>
    tpu.vector_store %arg6[%c156_133, %c256_134], %412 {strides = array<i32>} : memref<200x512xf32, #tpu.memory_space<vmem>>, vector<4x256xf32>,
    %414 = vector.extract_strided_slice %231 {offsets = [0, 162], sizes = [4, 256], strides = [1, 1]} : vector<4x512xf32> to vector<4x256xf32>
    %415 = vector.extract_strided_slice %0 {offsets = [5, 0], sizes = [1, 256], strides = [1, 1]} : vector<7x256xf32> to vector<1x256xf32>
    %416 = vector.broadcast %415 : vector<1x256xf32> to vector<4x256xf32>
    %417 = arith.mulf %414, %416 : vector<4x256xf32>
    %c160_135 = arith.constant 160 : index
    %c256_136 = arith.constant 256 : index
    %418 = vector.load %arg6[%c160_135, %c256_136] : memref<200x512xf32, #tpu.memory_space<vmem>>, vector<4x256xf32>
    tpu.vector_store %arg6[%c160_135, %c256_136], %417 {strides = array<i32>} : memref<200x512xf32, #tpu.memory_space<vmem>>, vector<4x256xf32>,
    %419 = vector.extract_strided_slice %231 {offsets = [0, 163], sizes = [4, 256], strides = [1, 1]} : vector<4x512xf32> to vector<4x256xf32>
    %420 = vector.extract_strided_slice %0 {offsets = [6, 0], sizes = [1, 256], strides = [1, 1]} : vector<7x256xf32> to vector<1x256xf32>
    %421 = vector.broadcast %420 : vector<1x256xf32> to vector<4x256xf32>
    %422 = arith.mulf %419, %421 : vector<4x256xf32>
    %c164_137 = arith.constant 164 : index
    %c256_138 = arith.constant 256 : index
    %423 = vector.load %arg6[%c164_137, %c256_138] : memref<200x512xf32, #tpu.memory_space<vmem>>, vector<4x256xf32>
    tpu.vector_store %arg6[%c164_137, %c256_138], %422 {strides = array<i32>} : memref<200x512xf32, #tpu.memory_space<vmem>>, vector<4x256xf32>,
    %424 = vector.extract_strided_slice %231 {offsets = [0, 173], sizes = [4, 256], strides = [1, 1]} : vector<4x512xf32> to vector<4x256xf32>
    %425 = vector.extract_strided_slice %0 {offsets = [0, 0], sizes = [1, 256], strides = [1, 1]} : vector<7x256xf32> to vector<1x256xf32>
    %426 = vector.broadcast %425 : vector<1x256xf32> to vector<4x256xf32>
    %427 = arith.mulf %424, %426 : vector<4x256xf32>
    %c168_139 = arith.constant 168 : index
    %c256_140 = arith.constant 256 : index
    %428 = vector.load %arg6[%c168_139, %c256_140] : memref<200x512xf32, #tpu.memory_space<vmem>>, vector<4x256xf32>
    tpu.vector_store %arg6[%c168_139, %c256_140], %427 {strides = array<i32>} : memref<200x512xf32, #tpu.memory_space<vmem>>, vector<4x256xf32>,
    %429 = vector.extract_strided_slice %231 {offsets = [0, 174], sizes = [4, 256], strides = [1, 1]} : vector<4x512xf32> to vector<4x256xf32>
    %430 = vector.extract_strided_slice %0 {offsets = [1, 0], sizes = [1, 256], strides = [1, 1]} : vector<7x256xf32> to vector<1x256xf32>
    %431 = vector.broadcast %430 : vector<1x256xf32> to vector<4x256xf32>
    %432 = arith.mulf %429, %431 : vector<4x256xf32>
    %c172_141 = arith.constant 172 : index
    %c256_142 = arith.constant 256 : index
    %433 = vector.load %arg6[%c172_141, %c256_142] : memref<200x512xf32, #tpu.memory_space<vmem>>, vector<4x256xf32>
    tpu.vector_store %arg6[%c172_141, %c256_142], %432 {strides = array<i32>} : memref<200x512xf32, #tpu.memory_space<vmem>>, vector<4x256xf32>,
    %434 = vector.extract_strided_slice %231 {offsets = [0, 175], sizes = [4, 256], strides = [1, 1]} : vector<4x512xf32> to vector<4x256xf32>
    %435 = vector.extract_strided_slice %0 {offsets = [2, 0], sizes = [1, 256], strides = [1, 1]} : vector<7x256xf32> to vector<1x256xf32>
    %436 = vector.broadcast %435 : vector<1x256xf32> to vector<4x256xf32>
    %437 = arith.mulf %434, %436 : vector<4x256xf32>
    %c176_143 = arith.constant 176 : index
    %c256_144 = arith.constant 256 : index
    %438 = vector.load %arg6[%c176_143, %c256_144] : memref<200x512xf32, #tpu.memory_space<vmem>>, vector<4x256xf32>
    tpu.vector_store %arg6[%c176_143, %c256_144], %437 {strides = array<i32>} : memref<200x512xf32, #tpu.memory_space<vmem>>, vector<4x256xf32>,
    %439 = vector.extract_strided_slice %231 {offsets = [0, 176], sizes = [4, 256], strides = [1, 1]} : vector<4x512xf32> to vector<4x256xf32>
    %c180_145 = arith.constant 180 : index
    %c256_146 = arith.constant 256 : index
    %440 = vector.load %arg6[%c180_145, %c256_146] : memref<200x512xf32, #tpu.memory_space<vmem>>, vector<4x256xf32>
    tpu.vector_store %arg6[%c180_145, %c256_146], %439 {strides = array<i32>} : memref<200x512xf32, #tpu.memory_space<vmem>>, vector<4x256xf32>,
    %441 = vector.extract_strided_slice %231 {offsets = [0, 177], sizes = [4, 256], strides = [1, 1]} : vector<4x512xf32> to vector<4x256xf32>
    %442 = vector.extract_strided_slice %0 {offsets = [4, 0], sizes = [1, 256], strides = [1, 1]} : vector<7x256xf32> to vector<1x256xf32>
    %443 = vector.broadcast %442 : vector<1x256xf32> to vector<4x256xf32>
    %444 = arith.mulf %441, %443 : vector<4x256xf32>
    %c184_147 = arith.constant 184 : index
    %c256_148 = arith.constant 256 : index
    %445 = vector.load %arg6[%c184_147, %c256_148] : memref<200x512xf32, #tpu.memory_space<vmem>>, vector<4x256xf32>
    tpu.vector_store %arg6[%c184_147, %c256_148], %444 {strides = array<i32>} : memref<200x512xf32, #tpu.memory_space<vmem>>, vector<4x256xf32>,
    %446 = vector.extract_strided_slice %231 {offsets = [0, 178], sizes = [4, 256], strides = [1, 1]} : vector<4x512xf32> to vector<4x256xf32>
    %447 = vector.extract_strided_slice %0 {offsets = [5, 0], sizes = [1, 256], strides = [1, 1]} : vector<7x256xf32> to vector<1x256xf32>
    %448 = vector.broadcast %447 : vector<1x256xf32> to vector<4x256xf32>
    %449 = arith.mulf %446, %448 : vector<4x256xf32>
    %c188_149 = arith.constant 188 : index
    %c256_150 = arith.constant 256 : index
    %450 = vector.load %arg6[%c188_149, %c256_150] : memref<200x512xf32, #tpu.memory_space<vmem>>, vector<4x256xf32>
    tpu.vector_store %arg6[%c188_149, %c256_150], %449 {strides = array<i32>} : memref<200x512xf32, #tpu.memory_space<vmem>>, vector<4x256xf32>,
    %451 = vector.extract_strided_slice %231 {offsets = [0, 179], sizes = [4, 256], strides = [1, 1]} : vector<4x512xf32> to vector<4x256xf32>
    %452 = vector.extract_strided_slice %0 {offsets = [6, 0], sizes = [1, 256], strides = [1, 1]} : vector<7x256xf32> to vector<1x256xf32>
    %453 = vector.broadcast %452 : vector<1x256xf32> to vector<4x256xf32>
    %454 = arith.mulf %451, %453 : vector<4x256xf32>
    %c192_151 = arith.constant 192 : index
    %c256_152 = arith.constant 256 : index
    %455 = vector.load %arg6[%c192_151, %c256_152] : memref<200x512xf32, #tpu.memory_space<vmem>>, vector<4x256xf32>
    tpu.vector_store %arg6[%c192_151, %c256_152], %454 {strides = array<i32>} : memref<200x512xf32, #tpu.memory_space<vmem>>, vector<4x256xf32>,
    %cst_153 = arith.constant 1.000000e+00 : f32
    %456 = vector.broadcast %cst_153 : f32 to vector<1x512xf32>
    %c196 = arith.constant 196 : index
    %c0_154 = arith.constant 0 : index
    %457 = vector.load %arg6[%c196, %c0_154] : memref<200x512xf32, #tpu.memory_space<vmem>>, vector<1x512xf32>
    tpu.vector_store %arg6[%c196, %c0_154], %456 {strides = array<i32>} : memref<200x512xf32, #tpu.memory_space<vmem>>, vector<1x512xf32>,
    %cst_155 = arith.constant 0.000000e+00 : f32
    %458 = vector.broadcast %cst_155 : f32 to vector<3x512xf32>
    %c197 = arith.constant 197 : index
    %c0_156 = arith.constant 0 : index
    %459 = vector.load %arg6[%c197, %c0_156] : memref<200x512xf32, #tpu.memory_space<vmem>>, vector<3x512xf32>
    tpu.vector_store %arg6[%c197, %c0_156], %458 {strides = array<i32>} : memref<200x512xf32, #tpu.memory_space<vmem>>, vector<3x512xf32>,
    %c0_157 = arith.constant 0 : index
    %c0_158 = arith.constant 0 : index
    %460 = vector.load %arg3[%c0_157, %c0_158] : memref<12x200xf32, #tpu.memory_space<vmem>>, vector<12x200xf32>
    %c0_159 = arith.constant 0 : index
    %c0_160 = arith.constant 0 : index
    %461 = vector.load %arg6[%c0_159, %c0_160] : memref<200x512xf32, #tpu.memory_space<vmem>>, vector<200x512xf32>
    %cst_161 = arith.constant dense<0.000000e+00> : vector<12x512xf32>
    %462 = tpu.matmul %460, %461, %cst_161 {dimension_numbers = #tpu.dot_dimension_numbers<[1], [0], [0], [1], [0, 0, 1, 1], [], []>} : vector<12x200xf32>, vector<200x512xf32>, vector<12x512xf32> -> vector<12x512xf32>
    %463 = vector.extract_strided_slice %462 {offsets = [0, 0], sizes = [4, 512], strides = [1, 1]} : vector<12x512xf32> to vector<4x512xf32>
    %cst_162 = arith.constant 2.000000e-01 : f32
    %464 = vector.broadcast %cst_162 : f32 to vector<4x512xf32>
    %465 = arith.mulf %464, %463 : vector<4x512xf32>
    %466 = arith.maximumf %463, %465 : vector<4x512xf32>
    %467 = vector.extract_strided_slice %462 {offsets = [4, 0], sizes = [4, 512], strides = [1, 1]} : vector<12x512xf32> to vector<4x512xf32>
    %cst_163 = arith.constant 2.000000e-01 : f32
    %468 = vector.broadcast %cst_163 : f32 to vector<4x512xf32>
    %469 = arith.mulf %468, %467 : vector<4x512xf32>
    %470 = arith.maximumf %467, %469 : vector<4x512xf32>
    %471 = arith.mulf %470, %466 : vector<4x512xf32>
    %472 = arith.addf %470, %471 : vector<4x512xf32>
    %473 = vector.extract_strided_slice %462 {offsets = [8, 0], sizes = [4, 512], strides = [1, 1]} : vector<12x512xf32> to vector<4x512xf32>
    %cst_164 = arith.constant 2.000000e-01 : f32
    %474 = vector.broadcast %cst_164 : f32 to vector<4x512xf32>
    %475 = arith.mulf %474, %473 : vector<4x512xf32>
    %476 = arith.maximumf %473, %475 : vector<4x512xf32>
    %477 = arith.mulf %470, %476 : vector<4x512xf32>
    %478 = arith.addf %472, %477 : vector<4x512xf32>
    %c0_165 = arith.constant 0 : index
    %c4_166 = arith.constant 4 : index
    %c0_167 = arith.constant 0 : index
    %479 = vector.load %arg1[%c0_165, %c4_166, %c0_167] : memref<2x8x256xf32, #tpu.memory_space<vmem>>, vector<1x4x256xf32>
    %480 = vector.shape_cast %479 : vector<1x4x256xf32> to vector<4x256xf32>
    %481 = vector.extract_strided_slice %478 {offsets = [0, 0], sizes = [4, 256], strides = [1, 1]} : vector<4x512xf32> to vector<4x256xf32>
    %482 = arith.addf %480, %481 : vector<4x256xf32>
    %c1_168 = arith.constant 1 : index
    %c4_169 = arith.constant 4 : index
    %c0_170 = arith.constant 0 : index
    %483 = vector.load %arg1[%c1_168, %c4_169, %c0_170] : memref<2x8x256xf32, #tpu.memory_space<vmem>>, vector<1x4x256xf32>
    %484 = vector.shape_cast %483 : vector<1x4x256xf32> to vector<4x256xf32>
    %485 = vector.extract_strided_slice %478 {offsets = [0, 256], sizes = [4, 256], strides = [1, 1]} : vector<4x512xf32> to vector<4x256xf32>
    %486 = arith.addf %484, %485 : vector<4x256xf32>
    %cst_171 = arith.constant 0.000000e+00 : f32
    %487 = vector.broadcast %cst_171 : f32 to vector<4x128xf32>
    %488 = tpu.concatenate %487, %482, %487 in 1 : vector<4x128xf32>, vector<4x256xf32>, vector<4x128xf32> -> vector<4x512xf32>
    %489 = vector.extract_strided_slice %488 {offsets = [0, 77], sizes = [4, 256], strides = [1, 1]} : vector<4x512xf32> to vector<4x256xf32>
    %490 = vector.extract_strided_slice %0 {offsets = [0, 0], sizes = [1, 256], strides = [1, 1]} : vector<7x256xf32> to vector<1x256xf32>
    %491 = vector.broadcast %490 : vector<1x256xf32> to vector<4x256xf32>
    %492 = arith.mulf %489, %491 : vector<4x256xf32>
    %c0_172 = arith.constant 0 : index
    %c0_173 = arith.constant 0 : index
    %493 = vector.load %arg6[%c0_172, %c0_173] : memref<200x512xf32, #tpu.memory_space<vmem>>, vector<4x256xf32>
    tpu.vector_store %arg6[%c0_172, %c0_173], %492 {strides = array<i32>} : memref<200x512xf32, #tpu.memory_space<vmem>>, vector<4x256xf32>,
    %494 = vector.extract_strided_slice %488 {offsets = [0, 78], sizes = [4, 256], strides = [1, 1]} : vector<4x512xf32> to vector<4x256xf32>
    %495 = vector.extract_strided_slice %0 {offsets = [1, 0], sizes = [1, 256], strides = [1, 1]} : vector<7x256xf32> to vector<1x256xf32>
    %496 = vector.broadcast %495 : vector<1x256xf32> to vector<4x256xf32>
    %497 = arith.mulf %494, %496 : vector<4x256xf32>
    %c4_174 = arith.constant 4 : index
    %c0_175 = arith.constant 0 : index
    %498 = vector.load %arg6[%c4_174, %c0_175] : memref<200x512xf32, #tpu.memory_space<vmem>>, vector<4x256xf32>
    tpu.vector_store %arg6[%c4_174, %c0_175], %497 {strides = array<i32>} : memref<200x512xf32, #tpu.memory_space<vmem>>, vector<4x256xf32>,
    %499 = vector.extract_strided_slice %488 {offsets = [0, 79], sizes = [4, 256], strides = [1, 1]} : vector<4x512xf32> to vector<4x256xf32>
    %500 = vector.extract_strided_slice %0 {offsets = [2, 0], sizes = [1, 256], strides = [1, 1]} : vector<7x256xf32> to vector<1x256xf32>
    %501 = vector.broadcast %500 : vector<1x256xf32> to vector<4x256xf32>
    %502 = arith.mulf %499, %501 : vector<4x256xf32>
    %c8_176 = arith.constant 8 : index
    %c0_177 = arith.constant 0 : index
    %503 = vector.load %arg6[%c8_176, %c0_177] : memref<200x512xf32, #tpu.memory_space<vmem>>, vector<4x256xf32>
    tpu.vector_store %arg6[%c8_176, %c0_177], %502 {strides = array<i32>} : memref<200x512xf32, #tpu.memory_space<vmem>>, vector<4x256xf32>,
    %504 = vector.extract_strided_slice %488 {offsets = [0, 80], sizes = [4, 256], strides = [1, 1]} : vector<4x512xf32> to vector<4x256xf32>
    %c12_178 = arith.constant 12 : index
    %c0_179 = arith.constant 0 : index
    %505 = vector.load %arg6[%c12_178, %c0_179] : memref<200x512xf32, #tpu.memory_space<vmem>>, vector<4x256xf32>
    tpu.vector_store %arg6[%c12_178, %c0_179], %504 {strides = array<i32>} : memref<200x512xf32, #tpu.memory_space<vmem>>, vector<4x256xf32>,
    %506 = vector.extract_strided_slice %488 {offsets = [0, 81], sizes = [4, 256], strides = [1, 1]} : vector<4x512xf32> to vector<4x256xf32>
    %507 = vector.extract_strided_slice %0 {offsets = [4, 0], sizes = [1, 256], strides = [1, 1]} : vector<7x256xf32> to vector<1x256xf32>
    %508 = vector.broadcast %507 : vector<1x256xf32> to vector<4x256xf32>
    %509 = arith.mulf %506, %508 : vector<4x256xf32>
    %c16_180 = arith.constant 16 : index
    %c0_181 = arith.constant 0 : index
    %510 = vector.load %arg6[%c16_180, %c0_181] : memref<200x512xf32, #tpu.memory_space<vmem>>, vector<4x256xf32>
    tpu.vector_store %arg6[%c16_180, %c0_181], %509 {strides = array<i32>} : memref<200x512xf32, #tpu.memory_space<vmem>>, vector<4x256xf32>,
    %511 = vector.extract_strided_slice %488 {offsets = [0, 82], sizes = [4, 256], strides = [1, 1]} : vector<4x512xf32> to vector<4x256xf32>
    %512 = vector.extract_strided_slice %0 {offsets = [5, 0], sizes = [1, 256], strides = [1, 1]} : vector<7x256xf32> to vector<1x256xf32>
    %513 = vector.broadcast %512 : vector<1x256xf32> to vector<4x256xf32>
    %514 = arith.mulf %511, %513 : vector<4x256xf32>
    %c20_182 = arith.constant 20 : index
    %c0_183 = arith.constant 0 : index
    %515 = vector.load %arg6[%c20_182, %c0_183] : memref<200x512xf32, #tpu.memory_space<vmem>>, vector<4x256xf32>
    tpu.vector_store %arg6[%c20_182, %c0_183], %514 {strides = array<i32>} : memref<200x512xf32, #tpu.memory_space<vmem>>, vector<4x256xf32>,
    %516 = vector.extract_strided_slice %488 {offsets = [0, 83], sizes = [4, 256], strides = [1, 1]} : vector<4x512xf32> to vector<4x256xf32>
    %517 = vector.extract_strided_slice %0 {offsets = [6, 0], sizes = [1, 256], strides = [1, 1]} : vector<7x256xf32> to vector<1x256xf32>
    %518 = vector.broadcast %517 : vector<1x256xf32> to vector<4x256xf32>
    %519 = arith.mulf %516, %518 : vector<4x256xf32>
    %c24_184 = arith.constant 24 : index
    %c0_185 = arith.constant 0 : index
    %520 = vector.load %arg6[%c24_184, %c0_185] : memref<200x512xf32, #tpu.memory_space<vmem>>, vector<4x256xf32>
    tpu.vector_store %arg6[%c24_184, %c0_185], %519 {strides = array<i32>} : memref<200x512xf32, #tpu.memory_space<vmem>>, vector<4x256xf32>,
    %521 = vector.extract_strided_slice %488 {offsets = [0, 93], sizes = [4, 256], strides = [1, 1]} : vector<4x512xf32> to vector<4x256xf32>
    %522 = vector.extract_strided_slice %0 {offsets = [0, 0], sizes = [1, 256], strides = [1, 1]} : vector<7x256xf32> to vector<1x256xf32>
    %523 = vector.broadcast %522 : vector<1x256xf32> to vector<4x256xf32>
    %524 = arith.mulf %521, %523 : vector<4x256xf32>
    %c28_186 = arith.constant 28 : index
    %c0_187 = arith.constant 0 : index
    %525 = vector.load %arg6[%c28_186, %c0_187] : memref<200x512xf32, #tpu.memory_space<vmem>>, vector<4x256xf32>
    tpu.vector_store %arg6[%c28_186, %c0_187], %524 {strides = array<i32>} : memref<200x512xf32, #tpu.memory_space<vmem>>, vector<4x256xf32>,
    %526 = vector.extract_strided_slice %488 {offsets = [0, 94], sizes = [4, 256], strides = [1, 1]} : vector<4x512xf32> to vector<4x256xf32>
    %527 = vector.extract_strided_slice %0 {offsets = [1, 0], sizes = [1, 256], strides = [1, 1]} : vector<7x256xf32> to vector<1x256xf32>
    %528 = vector.broadcast %527 : vector<1x256xf32> to vector<4x256xf32>
    %529 = arith.mulf %526, %528 : vector<4x256xf32>
    %c32_188 = arith.constant 32 : index
    %c0_189 = arith.constant 0 : index
    %530 = vector.load %arg6[%c32_188, %c0_189] : memref<200x512xf32, #tpu.memory_space<vmem>>, vector<4x256xf32>
    tpu.vector_store %arg6[%c32_188, %c0_189], %529 {strides = array<i32>} : memref<200x512xf32, #tpu.memory_space<vmem>>, vector<4x256xf32>,
    %531 = vector.extract_strided_slice %488 {offsets = [0, 95], sizes = [4, 256], strides = [1, 1]} : vector<4x512xf32> to vector<4x256xf32>
    %532 = vector.extract_strided_slice %0 {offsets = [2, 0], sizes = [1, 256], strides = [1, 1]} : vector<7x256xf32> to vector<1x256xf32>
    %533 = vector.broadcast %532 : vector<1x256xf32> to vector<4x256xf32>
    %534 = arith.mulf %531, %533 : vector<4x256xf32>
    %c36_190 = arith.constant 36 : index
    %c0_191 = arith.constant 0 : index
    %535 = vector.load %arg6[%c36_190, %c0_191] : memref<200x512xf32, #tpu.memory_space<vmem>>, vector<4x256xf32>
    tpu.vector_store %arg6[%c36_190, %c0_191], %534 {strides = array<i32>} : memref<200x512xf32, #tpu.memory_space<vmem>>, vector<4x256xf32>,
    %536 = vector.extract_strided_slice %488 {offsets = [0, 96], sizes = [4, 256], strides = [1, 1]} : vector<4x512xf32> to vector<4x256xf32>
    %c40_192 = arith.constant 40 : index
    %c0_193 = arith.constant 0 : index
    %537 = vector.load %arg6[%c40_192, %c0_193] : memref<200x512xf32, #tpu.memory_space<vmem>>, vector<4x256xf32>
    tpu.vector_store %arg6[%c40_192, %c0_193], %536 {strides = array<i32>} : memref<200x512xf32, #tpu.memory_space<vmem>>, vector<4x256xf32>,
    %538 = vector.extract_strided_slice %488 {offsets = [0, 97], sizes = [4, 256], strides = [1, 1]} : vector<4x512xf32> to vector<4x256xf32>
    %539 = vector.extract_strided_slice %0 {offsets = [4, 0], sizes = [1, 256], strides = [1, 1]} : vector<7x256xf32> to vector<1x256xf32>
    %540 = vector.broadcast %539 : vector<1x256xf32> to vector<4x256xf32>
    %541 = arith.mulf %538, %540 : vector<4x256xf32>
    %c44_194 = arith.constant 44 : index
    %c0_195 = arith.constant 0 : index
    %542 = vector.load %arg6[%c44_194, %c0_195] : memref<200x512xf32, #tpu.memory_space<vmem>>, vector<4x256xf32>
    tpu.vector_store %arg6[%c44_194, %c0_195], %541 {strides = array<i32>} : memref<200x512xf32, #tpu.memory_space<vmem>>, vector<4x256xf32>,
    %543 = vector.extract_strided_slice %488 {offsets = [0, 98], sizes = [4, 256], strides = [1, 1]} : vector<4x512xf32> to vector<4x256xf32>
    %544 = vector.extract_strided_slice %0 {offsets = [5, 0], sizes = [1, 256], strides = [1, 1]} : vector<7x256xf32> to vector<1x256xf32>
    %545 = vector.broadcast %544 : vector<1x256xf32> to vector<4x256xf32>
    %546 = arith.mulf %543, %545 : vector<4x256xf32>
    %c48_196 = arith.constant 48 : index
    %c0_197 = arith.constant 0 : index
    %547 = vector.load %arg6[%c48_196, %c0_197] : memref<200x512xf32, #tpu.memory_space<vmem>>, vector<4x256xf32>
    tpu.vector_store %arg6[%c48_196, %c0_197], %546 {strides = array<i32>} : memref<200x512xf32, #tpu.memory_space<vmem>>, vector<4x256xf32>,
    %548 = vector.extract_strided_slice %488 {offsets = [0, 99], sizes = [4, 256], strides = [1, 1]} : vector<4x512xf32> to vector<4x256xf32>
    %549 = vector.extract_strided_slice %0 {offsets = [6, 0], sizes = [1, 256], strides = [1, 1]} : vector<7x256xf32> to vector<1x256xf32>
    %550 = vector.broadcast %549 : vector<1x256xf32> to vector<4x256xf32>
    %551 = arith.mulf %548, %550 : vector<4x256xf32>
    %c52_198 = arith.constant 52 : index
    %c0_199 = arith.constant 0 : index
    %552 = vector.load %arg6[%c52_198, %c0_199] : memref<200x512xf32, #tpu.memory_space<vmem>>, vector<4x256xf32>
    tpu.vector_store %arg6[%c52_198, %c0_199], %551 {strides = array<i32>} : memref<200x512xf32, #tpu.memory_space<vmem>>, vector<4x256xf32>,
    %553 = vector.extract_strided_slice %488 {offsets = [0, 109], sizes = [4, 256], strides = [1, 1]} : vector<4x512xf32> to vector<4x256xf32>
    %554 = vector.extract_strided_slice %0 {offsets = [0, 0], sizes = [1, 256], strides = [1, 1]} : vector<7x256xf32> to vector<1x256xf32>
    %555 = vector.broadcast %554 : vector<1x256xf32> to vector<4x256xf32>
    %556 = arith.mulf %553, %555 : vector<4x256xf32>
    %c56_200 = arith.constant 56 : index
    %c0_201 = arith.constant 0 : index
    %557 = vector.load %arg6[%c56_200, %c0_201] : memref<200x512xf32, #tpu.memory_space<vmem>>, vector<4x256xf32>
    tpu.vector_store %arg6[%c56_200, %c0_201], %556 {strides = array<i32>} : memref<200x512xf32, #tpu.memory_space<vmem>>, vector<4x256xf32>,
    %558 = vector.extract_strided_slice %488 {offsets = [0, 110], sizes = [4, 256], strides = [1, 1]} : vector<4x512xf32> to vector<4x256xf32>
    %559 = vector.extract_strided_slice %0 {offsets = [1, 0], sizes = [1, 256], strides = [1, 1]} : vector<7x256xf32> to vector<1x256xf32>
    %560 = vector.broadcast %559 : vector<1x256xf32> to vector<4x256xf32>
    %561 = arith.mulf %558, %560 : vector<4x256xf32>
    %c60_202 = arith.constant 60 : index
    %c0_203 = arith.constant 0 : index
    %562 = vector.load %arg6[%c60_202, %c0_203] : memref<200x512xf32, #tpu.memory_space<vmem>>, vector<4x256xf32>
    tpu.vector_store %arg6[%c60_202, %c0_203], %561 {strides = array<i32>} : memref<200x512xf32, #tpu.memory_space<vmem>>, vector<4x256xf32>,
    %563 = vector.extract_strided_slice %488 {offsets = [0, 111], sizes = [4, 256], strides = [1, 1]} : vector<4x512xf32> to vector<4x256xf32>
    %564 = vector.extract_strided_slice %0 {offsets = [2, 0], sizes = [1, 256], strides = [1, 1]} : vector<7x256xf32> to vector<1x256xf32>
    %565 = vector.broadcast %564 : vector<1x256xf32> to vector<4x256xf32>
    %566 = arith.mulf %563, %565 : vector<4x256xf32>
    %c64_204 = arith.constant 64 : index
    %c0_205 = arith.constant 0 : index
    %567 = vector.load %arg6[%c64_204, %c0_205] : memref<200x512xf32, #tpu.memory_space<vmem>>, vector<4x256xf32>
    tpu.vector_store %arg6[%c64_204, %c0_205], %566 {strides = array<i32>} : memref<200x512xf32, #tpu.memory_space<vmem>>, vector<4x256xf32>,
    %568 = vector.extract_strided_slice %488 {offsets = [0, 112], sizes = [4, 256], strides = [1, 1]} : vector<4x512xf32> to vector<4x256xf32>
    %c68_206 = arith.constant 68 : index
    %c0_207 = arith.constant 0 : index
    %569 = vector.load %arg6[%c68_206, %c0_207] : memref<200x512xf32, #tpu.memory_space<vmem>>, vector<4x256xf32>
    tpu.vector_store %arg6[%c68_206, %c0_207], %568 {strides = array<i32>} : memref<200x512xf32, #tpu.memory_space<vmem>>, vector<4x256xf32>,
    %570 = vector.extract_strided_slice %488 {offsets = [0, 113], sizes = [4, 256], strides = [1, 1]} : vector<4x512xf32> to vector<4x256xf32>
    %571 = vector.extract_strided_slice %0 {offsets = [4, 0], sizes = [1, 256], strides = [1, 1]} : vector<7x256xf32> to vector<1x256xf32>
    %572 = vector.broadcast %571 : vector<1x256xf32> to vector<4x256xf32>
    %573 = arith.mulf %570, %572 : vector<4x256xf32>
    %c72_208 = arith.constant 72 : index
    %c0_209 = arith.constant 0 : index
    %574 = vector.load %arg6[%c72_208, %c0_209] : memref<200x512xf32, #tpu.memory_space<vmem>>, vector<4x256xf32>
    tpu.vector_store %arg6[%c72_208, %c0_209], %573 {strides = array<i32>} : memref<200x512xf32, #tpu.memory_space<vmem>>, vector<4x256xf32>,
    %575 = vector.extract_strided_slice %488 {offsets = [0, 114], sizes = [4, 256], strides = [1, 1]} : vector<4x512xf32> to vector<4x256xf32>
    %576 = vector.extract_strided_slice %0 {offsets = [5, 0], sizes = [1, 256], strides = [1, 1]} : vector<7x256xf32> to vector<1x256xf32>
    %577 = vector.broadcast %576 : vector<1x256xf32> to vector<4x256xf32>
    %578 = arith.mulf %575, %577 : vector<4x256xf32>
    %c76_210 = arith.constant 76 : index
    %c0_211 = arith.constant 0 : index
    %579 = vector.load %arg6[%c76_210, %c0_211] : memref<200x512xf32, #tpu.memory_space<vmem>>, vector<4x256xf32>
    tpu.vector_store %arg6[%c76_210, %c0_211], %578 {strides = array<i32>} : memref<200x512xf32, #tpu.memory_space<vmem>>, vector<4x256xf32>,
    %580 = vector.extract_strided_slice %488 {offsets = [0, 115], sizes = [4, 256], strides = [1, 1]} : vector<4x512xf32> to vector<4x256xf32>
    %581 = vector.extract_strided_slice %0 {offsets = [6, 0], sizes = [1, 256], strides = [1, 1]} : vector<7x256xf32> to vector<1x256xf32>
    %582 = vector.broadcast %581 : vector<1x256xf32> to vector<4x256xf32>
    %583 = arith.mulf %580, %582 : vector<4x256xf32>
    %c80_212 = arith.constant 80 : index
    %c0_213 = arith.constant 0 : index
    %584 = vector.load %arg6[%c80_212, %c0_213] : memref<200x512xf32, #tpu.memory_space<vmem>>, vector<4x256xf32>
    tpu.vector_store %arg6[%c80_212, %c0_213], %583 {strides = array<i32>} : memref<200x512xf32, #tpu.memory_space<vmem>>, vector<4x256xf32>,
    %585 = vector.extract_strided_slice %488 {offsets = [0, 125], sizes = [4, 256], strides = [1, 1]} : vector<4x512xf32> to vector<4x256xf32>
    %586 = vector.extract_strided_slice %0 {offsets = [0, 0], sizes = [1, 256], strides = [1, 1]} : vector<7x256xf32> to vector<1x256xf32>
    %587 = vector.broadcast %586 : vector<1x256xf32> to vector<4x256xf32>
    %588 = arith.mulf %585, %587 : vector<4x256xf32>
    %c84_214 = arith.constant 84 : index
    %c0_215 = arith.constant 0 : index
    %589 = vector.load %arg6[%c84_214, %c0_215] : memref<200x512xf32, #tpu.memory_space<vmem>>, vector<4x256xf32>
    tpu.vector_store %arg6[%c84_214, %c0_215], %588 {strides = array<i32>} : memref<200x512xf32, #tpu.memory_space<vmem>>, vector<4x256xf32>,
    %590 = vector.extract_strided_slice %488 {offsets = [0, 126], sizes = [4, 256], strides = [1, 1]} : vector<4x512xf32> to vector<4x256xf32>
    %591 = vector.extract_strided_slice %0 {offsets = [1, 0], sizes = [1, 256], strides = [1, 1]} : vector<7x256xf32> to vector<1x256xf32>
    %592 = vector.broadcast %591 : vector<1x256xf32> to vector<4x256xf32>
    %593 = arith.mulf %590, %592 : vector<4x256xf32>
    %c88_216 = arith.constant 88 : index
    %c0_217 = arith.constant 0 : index
    %594 = vector.load %arg6[%c88_216, %c0_217] : memref<200x512xf32, #tpu.memory_space<vmem>>, vector<4x256xf32>
    tpu.vector_store %arg6[%c88_216, %c0_217], %593 {strides = array<i32>} : memref<200x512xf32, #tpu.memory_space<vmem>>, vector<4x256xf32>,
    %595 = vector.extract_strided_slice %488 {offsets = [0, 127], sizes = [4, 256], strides = [1, 1]} : vector<4x512xf32> to vector<4x256xf32>
    %596 = vector.extract_strided_slice %0 {offsets = [2, 0], sizes = [1, 256], strides = [1, 1]} : vector<7x256xf32> to vector<1x256xf32>
    %597 = vector.broadcast %596 : vector<1x256xf32> to vector<4x256xf32>
    %598 = arith.mulf %595, %597 : vector<4x256xf32>
    %c92_218 = arith.constant 92 : index
    %c0_219 = arith.constant 0 : index
    %599 = vector.load %arg6[%c92_218, %c0_219] : memref<200x512xf32, #tpu.memory_space<vmem>>, vector<4x256xf32>
    tpu.vector_store %arg6[%c92_218, %c0_219], %598 {strides = array<i32>} : memref<200x512xf32, #tpu.memory_space<vmem>>, vector<4x256xf32>,
    %600 = vector.extract_strided_slice %488 {offsets = [0, 128], sizes = [4, 256], strides = [1, 1]} : vector<4x512xf32> to vector<4x256xf32>
    %c96_220 = arith.constant 96 : index
    %c0_221 = arith.constant 0 : index
    %601 = vector.load %arg6[%c96_220, %c0_221] : memref<200x512xf32, #tpu.memory_space<vmem>>, vector<4x256xf32>
    tpu.vector_store %arg6[%c96_220, %c0_221], %600 {strides = array<i32>} : memref<200x512xf32, #tpu.memory_space<vmem>>, vector<4x256xf32>,
    %602 = vector.extract_strided_slice %488 {offsets = [0, 129], sizes = [4, 256], strides = [1, 1]} : vector<4x512xf32> to vector<4x256xf32>
    %603 = vector.extract_strided_slice %0 {offsets = [4, 0], sizes = [1, 256], strides = [1, 1]} : vector<7x256xf32> to vector<1x256xf32>
    %604 = vector.broadcast %603 : vector<1x256xf32> to vector<4x256xf32>
    %605 = arith.mulf %602, %604 : vector<4x256xf32>
    %c100_222 = arith.constant 100 : index
    %c0_223 = arith.constant 0 : index
    %606 = vector.load %arg6[%c100_222, %c0_223] : memref<200x512xf32, #tpu.memory_space<vmem>>, vector<4x256xf32>
    tpu.vector_store %arg6[%c100_222, %c0_223], %605 {strides = array<i32>} : memref<200x512xf32, #tpu.memory_space<vmem>>, vector<4x256xf32>,
    %607 = vector.extract_strided_slice %488 {offsets = [0, 130], sizes = [4, 256], strides = [1, 1]} : vector<4x512xf32> to vector<4x256xf32>
    %608 = vector.extract_strided_slice %0 {offsets = [5, 0], sizes = [1, 256], strides = [1, 1]} : vector<7x256xf32> to vector<1x256xf32>
    %609 = vector.broadcast %608 : vector<1x256xf32> to vector<4x256xf32>
    %610 = arith.mulf %607, %609 : vector<4x256xf32>
    %c104_224 = arith.constant 104 : index
    %c0_225 = arith.constant 0 : index
    %611 = vector.load %arg6[%c104_224, %c0_225] : memref<200x512xf32, #tpu.memory_space<vmem>>, vector<4x256xf32>
    tpu.vector_store %arg6[%c104_224, %c0_225], %610 {strides = array<i32>} : memref<200x512xf32, #tpu.memory_space<vmem>>, vector<4x256xf32>,
    %612 = vector.extract_strided_slice %488 {offsets = [0, 131], sizes = [4, 256], strides = [1, 1]} : vector<4x512xf32> to vector<4x256xf32>
    %613 = vector.extract_strided_slice %0 {offsets = [6, 0], sizes = [1, 256], strides = [1, 1]} : vector<7x256xf32> to vector<1x256xf32>
    %614 = vector.broadcast %613 : vector<1x256xf32> to vector<4x256xf32>
    %615 = arith.mulf %612, %614 : vector<4x256xf32>
    %c108_226 = arith.constant 108 : index
    %c0_227 = arith.constant 0 : index
    %616 = vector.load %arg6[%c108_226, %c0_227] : memref<200x512xf32, #tpu.memory_space<vmem>>, vector<4x256xf32>
    tpu.vector_store %arg6[%c108_226, %c0_227], %615 {strides = array<i32>} : memref<200x512xf32, #tpu.memory_space<vmem>>, vector<4x256xf32>,
    %617 = vector.extract_strided_slice %488 {offsets = [0, 141], sizes = [4, 256], strides = [1, 1]} : vector<4x512xf32> to vector<4x256xf32>
    %618 = vector.extract_strided_slice %0 {offsets = [0, 0], sizes = [1, 256], strides = [1, 1]} : vector<7x256xf32> to vector<1x256xf32>
    %619 = vector.broadcast %618 : vector<1x256xf32> to vector<4x256xf32>
    %620 = arith.mulf %617, %619 : vector<4x256xf32>
    %c112_228 = arith.constant 112 : index
    %c0_229 = arith.constant 0 : index
    %621 = vector.load %arg6[%c112_228, %c0_229] : memref<200x512xf32, #tpu.memory_space<vmem>>, vector<4x256xf32>
    tpu.vector_store %arg6[%c112_228, %c0_229], %620 {strides = array<i32>} : memref<200x512xf32, #tpu.memory_space<vmem>>, vector<4x256xf32>,
    %622 = vector.extract_strided_slice %488 {offsets = [0, 142], sizes = [4, 256], strides = [1, 1]} : vector<4x512xf32> to vector<4x256xf32>
    %623 = vector.extract_strided_slice %0 {offsets = [1, 0], sizes = [1, 256], strides = [1, 1]} : vector<7x256xf32> to vector<1x256xf32>
    %624 = vector.broadcast %623 : vector<1x256xf32> to vector<4x256xf32>
    %625 = arith.mulf %622, %624 : vector<4x256xf32>
    %c116_230 = arith.constant 116 : index
    %c0_231 = arith.constant 0 : index
    %626 = vector.load %arg6[%c116_230, %c0_231] : memref<200x512xf32, #tpu.memory_space<vmem>>, vector<4x256xf32>
    tpu.vector_store %arg6[%c116_230, %c0_231], %625 {strides = array<i32>} : memref<200x512xf32, #tpu.memory_space<vmem>>, vector<4x256xf32>,
    %627 = vector.extract_strided_slice %488 {offsets = [0, 143], sizes = [4, 256], strides = [1, 1]} : vector<4x512xf32> to vector<4x256xf32>
    %628 = vector.extract_strided_slice %0 {offsets = [2, 0], sizes = [1, 256], strides = [1, 1]} : vector<7x256xf32> to vector<1x256xf32>
    %629 = vector.broadcast %628 : vector<1x256xf32> to vector<4x256xf32>
    %630 = arith.mulf %627, %629 : vector<4x256xf32>
    %c120_232 = arith.constant 120 : index
    %c0_233 = arith.constant 0 : index
    %631 = vector.load %arg6[%c120_232, %c0_233] : memref<200x512xf32, #tpu.memory_space<vmem>>, vector<4x256xf32>
    tpu.vector_store %arg6[%c120_232, %c0_233], %630 {strides = array<i32>} : memref<200x512xf32, #tpu.memory_space<vmem>>, vector<4x256xf32>,
    %632 = vector.extract_strided_slice %488 {offsets = [0, 144], sizes = [4, 256], strides = [1, 1]} : vector<4x512xf32> to vector<4x256xf32>
    %c124_234 = arith.constant 124 : index
    %c0_235 = arith.constant 0 : index
    %633 = vector.load %arg6[%c124_234, %c0_235] : memref<200x512xf32, #tpu.memory_space<vmem>>, vector<4x256xf32>
    tpu.vector_store %arg6[%c124_234, %c0_235], %632 {strides = array<i32>} : memref<200x512xf32, #tpu.memory_space<vmem>>, vector<4x256xf32>,
    %634 = vector.extract_strided_slice %488 {offsets = [0, 145], sizes = [4, 256], strides = [1, 1]} : vector<4x512xf32> to vector<4x256xf32>
    %635 = vector.extract_strided_slice %0 {offsets = [4, 0], sizes = [1, 256], strides = [1, 1]} : vector<7x256xf32> to vector<1x256xf32>
    %636 = vector.broadcast %635 : vector<1x256xf32> to vector<4x256xf32>
    %637 = arith.mulf %634, %636 : vector<4x256xf32>
    %c128_236 = arith.constant 128 : index
    %c0_237 = arith.constant 0 : index
    %638 = vector.load %arg6[%c128_236, %c0_237] : memref<200x512xf32, #tpu.memory_space<vmem>>, vector<4x256xf32>
    tpu.vector_store %arg6[%c128_236, %c0_237], %637 {strides = array<i32>} : memref<200x512xf32, #tpu.memory_space<vmem>>, vector<4x256xf32>,
    %639 = vector.extract_strided_slice %488 {offsets = [0, 146], sizes = [4, 256], strides = [1, 1]} : vector<4x512xf32> to vector<4x256xf32>
    %640 = vector.extract_strided_slice %0 {offsets = [5, 0], sizes = [1, 256], strides = [1, 1]} : vector<7x256xf32> to vector<1x256xf32>
    %641 = vector.broadcast %640 : vector<1x256xf32> to vector<4x256xf32>
    %642 = arith.mulf %639, %641 : vector<4x256xf32>
    %c132_238 = arith.constant 132 : index
    %c0_239 = arith.constant 0 : index
    %643 = vector.load %arg6[%c132_238, %c0_239] : memref<200x512xf32, #tpu.memory_space<vmem>>, vector<4x256xf32>
    tpu.vector_store %arg6[%c132_238, %c0_239], %642 {strides = array<i32>} : memref<200x512xf32, #tpu.memory_space<vmem>>, vector<4x256xf32>,
    %644 = vector.extract_strided_slice %488 {offsets = [0, 147], sizes = [4, 256], strides = [1, 1]} : vector<4x512xf32> to vector<4x256xf32>
    %645 = vector.extract_strided_slice %0 {offsets = [6, 0], sizes = [1, 256], strides = [1, 1]} : vector<7x256xf32> to vector<1x256xf32>
    %646 = vector.broadcast %645 : vector<1x256xf32> to vector<4x256xf32>
    %647 = arith.mulf %644, %646 : vector<4x256xf32>
    %c136_240 = arith.constant 136 : index
    %c0_241 = arith.constant 0 : index
    %648 = vector.load %arg6[%c136_240, %c0_241] : memref<200x512xf32, #tpu.memory_space<vmem>>, vector<4x256xf32>
    tpu.vector_store %arg6[%c136_240, %c0_241], %647 {strides = array<i32>} : memref<200x512xf32, #tpu.memory_space<vmem>>, vector<4x256xf32>,
    %649 = vector.extract_strided_slice %488 {offsets = [0, 157], sizes = [4, 256], strides = [1, 1]} : vector<4x512xf32> to vector<4x256xf32>
    %650 = vector.extract_strided_slice %0 {offsets = [0, 0], sizes = [1, 256], strides = [1, 1]} : vector<7x256xf32> to vector<1x256xf32>
    %651 = vector.broadcast %650 : vector<1x256xf32> to vector<4x256xf32>
    %652 = arith.mulf %649, %651 : vector<4x256xf32>
    %c140_242 = arith.constant 140 : index
    %c0_243 = arith.constant 0 : index
    %653 = vector.load %arg6[%c140_242, %c0_243] : memref<200x512xf32, #tpu.memory_space<vmem>>, vector<4x256xf32>
    tpu.vector_store %arg6[%c140_242, %c0_243], %652 {strides = array<i32>} : memref<200x512xf32, #tpu.memory_space<vmem>>, vector<4x256xf32>,
    %654 = vector.extract_strided_slice %488 {offsets = [0, 158], sizes = [4, 256], strides = [1, 1]} : vector<4x512xf32> to vector<4x256xf32>
    %655 = vector.extract_strided_slice %0 {offsets = [1, 0], sizes = [1, 256], strides = [1, 1]} : vector<7x256xf32> to vector<1x256xf32>
    %656 = vector.broadcast %655 : vector<1x256xf32> to vector<4x256xf32>
    %657 = arith.mulf %654, %656 : vector<4x256xf32>
    %c144_244 = arith.constant 144 : index
    %c0_245 = arith.constant 0 : index
    %658 = vector.load %arg6[%c144_244, %c0_245] : memref<200x512xf32, #tpu.memory_space<vmem>>, vector<4x256xf32>
    tpu.vector_store %arg6[%c144_244, %c0_245], %657 {strides = array<i32>} : memref<200x512xf32, #tpu.memory_space<vmem>>, vector<4x256xf32>,
    %659 = vector.extract_strided_slice %488 {offsets = [0, 159], sizes = [4, 256], strides = [1, 1]} : vector<4x512xf32> to vector<4x256xf32>
    %660 = vector.extract_strided_slice %0 {offsets = [2, 0], sizes = [1, 256], strides = [1, 1]} : vector<7x256xf32> to vector<1x256xf32>
    %661 = vector.broadcast %660 : vector<1x256xf32> to vector<4x256xf32>
    %662 = arith.mulf %659, %661 : vector<4x256xf32>
    %c148_246 = arith.constant 148 : index
    %c0_247 = arith.constant 0 : index
    %663 = vector.load %arg6[%c148_246, %c0_247] : memref<200x512xf32, #tpu.memory_space<vmem>>, vector<4x256xf32>
    tpu.vector_store %arg6[%c148_246, %c0_247], %662 {strides = array<i32>} : memref<200x512xf32, #tpu.memory_space<vmem>>, vector<4x256xf32>,
    %664 = vector.extract_strided_slice %488 {offsets = [0, 160], sizes = [4, 256], strides = [1, 1]} : vector<4x512xf32> to vector<4x256xf32>
    %c152_248 = arith.constant 152 : index
    %c0_249 = arith.constant 0 : index
    %665 = vector.load %arg6[%c152_248, %c0_249] : memref<200x512xf32, #tpu.memory_space<vmem>>, vector<4x256xf32>
    tpu.vector_store %arg6[%c152_248, %c0_249], %664 {strides = array<i32>} : memref<200x512xf32, #tpu.memory_space<vmem>>, vector<4x256xf32>,
    %666 = vector.extract_strided_slice %488 {offsets = [0, 161], sizes = [4, 256], strides = [1, 1]} : vector<4x512xf32> to vector<4x256xf32>
    %667 = vector.extract_strided_slice %0 {offsets = [4, 0], sizes = [1, 256], strides = [1, 1]} : vector<7x256xf32> to vector<1x256xf32>
    %668 = vector.broadcast %667 : vector<1x256xf32> to vector<4x256xf32>
    %669 = arith.mulf %666, %668 : vector<4x256xf32>
    %c156_250 = arith.constant 156 : index
    %c0_251 = arith.constant 0 : index
    %670 = vector.load %arg6[%c156_250, %c0_251] : memref<200x512xf32, #tpu.memory_space<vmem>>, vector<4x256xf32>
    tpu.vector_store %arg6[%c156_250, %c0_251], %669 {strides = array<i32>} : memref<200x512xf32, #tpu.memory_space<vmem>>, vector<4x256xf32>,
    %671 = vector.extract_strided_slice %488 {offsets = [0, 162], sizes = [4, 256], strides = [1, 1]} : vector<4x512xf32> to vector<4x256xf32>
    %672 = vector.extract_strided_slice %0 {offsets = [5, 0], sizes = [1, 256], strides = [1, 1]} : vector<7x256xf32> to vector<1x256xf32>
    %673 = vector.broadcast %672 : vector<1x256xf32> to vector<4x256xf32>
    %674 = arith.mulf %671, %673 : vector<4x256xf32>
    %c160_252 = arith.constant 160 : index
    %c0_253 = arith.constant 0 : index
    %675 = vector.load %arg6[%c160_252, %c0_253] : memref<200x512xf32, #tpu.memory_space<vmem>>, vector<4x256xf32>
    tpu.vector_store %arg6[%c160_252, %c0_253], %674 {strides = array<i32>} : memref<200x512xf32, #tpu.memory_space<vmem>>, vector<4x256xf32>,
    %676 = vector.extract_strided_slice %488 {offsets = [0, 163], sizes = [4, 256], strides = [1, 1]} : vector<4x512xf32> to vector<4x256xf32>
    %677 = vector.extract_strided_slice %0 {offsets = [6, 0], sizes = [1, 256], strides = [1, 1]} : vector<7x256xf32> to vector<1x256xf32>
    %678 = vector.broadcast %677 : vector<1x256xf32> to vector<4x256xf32>
    %679 = arith.mulf %676, %678 : vector<4x256xf32>
    %c164_254 = arith.constant 164 : index
    %c0_255 = arith.constant 0 : index
    %680 = vector.load %arg6[%c164_254, %c0_255] : memref<200x512xf32, #tpu.memory_space<vmem>>, vector<4x256xf32>
    tpu.vector_store %arg6[%c164_254, %c0_255], %679 {strides = array<i32>} : memref<200x512xf32, #tpu.memory_space<vmem>>, vector<4x256xf32>,
    %681 = vector.extract_strided_slice %488 {offsets = [0, 173], sizes = [4, 256], strides = [1, 1]} : vector<4x512xf32> to vector<4x256xf32>
    %682 = vector.extract_strided_slice %0 {offsets = [0, 0], sizes = [1, 256], strides = [1, 1]} : vector<7x256xf32> to vector<1x256xf32>
    %683 = vector.broadcast %682 : vector<1x256xf32> to vector<4x256xf32>
    %684 = arith.mulf %681, %683 : vector<4x256xf32>
    %c168_256 = arith.constant 168 : index
    %c0_257 = arith.constant 0 : index
    %685 = vector.load %arg6[%c168_256, %c0_257] : memref<200x512xf32, #tpu.memory_space<vmem>>, vector<4x256xf32>
    tpu.vector_store %arg6[%c168_256, %c0_257], %684 {strides = array<i32>} : memref<200x512xf32, #tpu.memory_space<vmem>>, vector<4x256xf32>,
    %686 = vector.extract_strided_slice %488 {offsets = [0, 174], sizes = [4, 256], strides = [1, 1]} : vector<4x512xf32> to vector<4x256xf32>
    %687 = vector.extract_strided_slice %0 {offsets = [1, 0], sizes = [1, 256], strides = [1, 1]} : vector<7x256xf32> to vector<1x256xf32>
    %688 = vector.broadcast %687 : vector<1x256xf32> to vector<4x256xf32>
    %689 = arith.mulf %686, %688 : vector<4x256xf32>
    %c172_258 = arith.constant 172 : index
    %c0_259 = arith.constant 0 : index
    %690 = vector.load %arg6[%c172_258, %c0_259] : memref<200x512xf32, #tpu.memory_space<vmem>>, vector<4x256xf32>
    tpu.vector_store %arg6[%c172_258, %c0_259], %689 {strides = array<i32>} : memref<200x512xf32, #tpu.memory_space<vmem>>, vector<4x256xf32>,
    %691 = vector.extract_strided_slice %488 {offsets = [0, 175], sizes = [4, 256], strides = [1, 1]} : vector<4x512xf32> to vector<4x256xf32>
    %692 = vector.extract_strided_slice %0 {offsets = [2, 0], sizes = [1, 256], strides = [1, 1]} : vector<7x256xf32> to vector<1x256xf32>
    %693 = vector.broadcast %692 : vector<1x256xf32> to vector<4x256xf32>
    %694 = arith.mulf %691, %693 : vector<4x256xf32>
    %c176_260 = arith.constant 176 : index
    %c0_261 = arith.constant 0 : index
    %695 = vector.load %arg6[%c176_260, %c0_261] : memref<200x512xf32, #tpu.memory_space<vmem>>, vector<4x256xf32>
    tpu.vector_store %arg6[%c176_260, %c0_261], %694 {strides = array<i32>} : memref<200x512xf32, #tpu.memory_space<vmem>>, vector<4x256xf32>,
    %696 = vector.extract_strided_slice %488 {offsets = [0, 176], sizes = [4, 256], strides = [1, 1]} : vector<4x512xf32> to vector<4x256xf32>
    %c180_262 = arith.constant 180 : index
    %c0_263 = arith.constant 0 : index
    %697 = vector.load %arg6[%c180_262, %c0_263] : memref<200x512xf32, #tpu.memory_space<vmem>>, vector<4x256xf32>
    tpu.vector_store %arg6[%c180_262, %c0_263], %696 {strides = array<i32>} : memref<200x512xf32, #tpu.memory_space<vmem>>, vector<4x256xf32>,
    %698 = vector.extract_strided_slice %488 {offsets = [0, 177], sizes = [4, 256], strides = [1, 1]} : vector<4x512xf32> to vector<4x256xf32>
    %699 = vector.extract_strided_slice %0 {offsets = [4, 0], sizes = [1, 256], strides = [1, 1]} : vector<7x256xf32> to vector<1x256xf32>
    %700 = vector.broadcast %699 : vector<1x256xf32> to vector<4x256xf32>
    %701 = arith.mulf %698, %700 : vector<4x256xf32>
    %c184_264 = arith.constant 184 : index
    %c0_265 = arith.constant 0 : index
    %702 = vector.load %arg6[%c184_264, %c0_265] : memref<200x512xf32, #tpu.memory_space<vmem>>, vector<4x256xf32>
    tpu.vector_store %arg6[%c184_264, %c0_265], %701 {strides = array<i32>} : memref<200x512xf32, #tpu.memory_space<vmem>>, vector<4x256xf32>,
    %703 = vector.extract_strided_slice %488 {offsets = [0, 178], sizes = [4, 256], strides = [1, 1]} : vector<4x512xf32> to vector<4x256xf32>
    %704 = vector.extract_strided_slice %0 {offsets = [5, 0], sizes = [1, 256], strides = [1, 1]} : vector<7x256xf32> to vector<1x256xf32>
    %705 = vector.broadcast %704 : vector<1x256xf32> to vector<4x256xf32>
    %706 = arith.mulf %703, %705 : vector<4x256xf32>
    %c188_266 = arith.constant 188 : index
    %c0_267 = arith.constant 0 : index
    %707 = vector.load %arg6[%c188_266, %c0_267] : memref<200x512xf32, #tpu.memory_space<vmem>>, vector<4x256xf32>
    tpu.vector_store %arg6[%c188_266, %c0_267], %706 {strides = array<i32>} : memref<200x512xf32, #tpu.memory_space<vmem>>, vector<4x256xf32>,
    %708 = vector.extract_strided_slice %488 {offsets = [0, 179], sizes = [4, 256], strides = [1, 1]} : vector<4x512xf32> to vector<4x256xf32>
    %709 = vector.extract_strided_slice %0 {offsets = [6, 0], sizes = [1, 256], strides = [1, 1]} : vector<7x256xf32> to vector<1x256xf32>
    %710 = vector.broadcast %709 : vector<1x256xf32> to vector<4x256xf32>
    %711 = arith.mulf %708, %710 : vector<4x256xf32>
    %c192_268 = arith.constant 192 : index
    %c0_269 = arith.constant 0 : index
    %712 = vector.load %arg6[%c192_268, %c0_269] : memref<200x512xf32, #tpu.memory_space<vmem>>, vector<4x256xf32>
    tpu.vector_store %arg6[%c192_268, %c0_269], %711 {strides = array<i32>} : memref<200x512xf32, #tpu.memory_space<vmem>>, vector<4x256xf32>,
    %713 = tpu.concatenate %487, %486, %487 in 1 : vector<4x128xf32>, vector<4x256xf32>, vector<4x128xf32> -> vector<4x512xf32>
    %714 = vector.extract_strided_slice %713 {offsets = [0, 77], sizes = [4, 256], strides = [1, 1]} : vector<4x512xf32> to vector<4x256xf32>
    %715 = vector.extract_strided_slice %0 {offsets = [0, 0], sizes = [1, 256], strides = [1, 1]} : vector<7x256xf32> to vector<1x256xf32>
    %716 = vector.broadcast %715 : vector<1x256xf32> to vector<4x256xf32>
    %717 = arith.mulf %714, %716 : vector<4x256xf32>
    %c0_270 = arith.constant 0 : index
    %c256_271 = arith.constant 256 : index
    %718 = vector.load %arg6[%c0_270, %c256_271] : memref<200x512xf32, #tpu.memory_space<vmem>>, vector<4x256xf32>
    tpu.vector_store %arg6[%c0_270, %c256_271], %717 {strides = array<i32>} : memref<200x512xf32, #tpu.memory_space<vmem>>, vector<4x256xf32>,
    %719 = vector.extract_strided_slice %713 {offsets = [0, 78], sizes = [4, 256], strides = [1, 1]} : vector<4x512xf32> to vector<4x256xf32>
    %720 = vector.extract_strided_slice %0 {offsets = [1, 0], sizes = [1, 256], strides = [1, 1]} : vector<7x256xf32> to vector<1x256xf32>
    %721 = vector.broadcast %720 : vector<1x256xf32> to vector<4x256xf32>
    %722 = arith.mulf %719, %721 : vector<4x256xf32>
    %c4_272 = arith.constant 4 : index
    %c256_273 = arith.constant 256 : index
    %723 = vector.load %arg6[%c4_272, %c256_273] : memref<200x512xf32, #tpu.memory_space<vmem>>, vector<4x256xf32>
    tpu.vector_store %arg6[%c4_272, %c256_273], %722 {strides = array<i32>} : memref<200x512xf32, #tpu.memory_space<vmem>>, vector<4x256xf32>,
    %724 = vector.extract_strided_slice %713 {offsets = [0, 79], sizes = [4, 256], strides = [1, 1]} : vector<4x512xf32> to vector<4x256xf32>
    %725 = vector.extract_strided_slice %0 {offsets = [2, 0], sizes = [1, 256], strides = [1, 1]} : vector<7x256xf32> to vector<1x256xf32>
    %726 = vector.broadcast %725 : vector<1x256xf32> to vector<4x256xf32>
    %727 = arith.mulf %724, %726 : vector<4x256xf32>
    %c8_274 = arith.constant 8 : index
    %c256_275 = arith.constant 256 : index
    %728 = vector.load %arg6[%c8_274, %c256_275] : memref<200x512xf32, #tpu.memory_space<vmem>>, vector<4x256xf32>
    tpu.vector_store %arg6[%c8_274, %c256_275], %727 {strides = array<i32>} : memref<200x512xf32, #tpu.memory_space<vmem>>, vector<4x256xf32>,
    %729 = vector.extract_strided_slice %713 {offsets = [0, 80], sizes = [4, 256], strides = [1, 1]} : vector<4x512xf32> to vector<4x256xf32>
    %c12_276 = arith.constant 12 : index
    %c256_277 = arith.constant 256 : index
    %730 = vector.load %arg6[%c12_276, %c256_277] : memref<200x512xf32, #tpu.memory_space<vmem>>, vector<4x256xf32>
    tpu.vector_store %arg6[%c12_276, %c256_277], %729 {strides = array<i32>} : memref<200x512xf32, #tpu.memory_space<vmem>>, vector<4x256xf32>,
    %731 = vector.extract_strided_slice %713 {offsets = [0, 81], sizes = [4, 256], strides = [1, 1]} : vector<4x512xf32> to vector<4x256xf32>
    %732 = vector.extract_strided_slice %0 {offsets = [4, 0], sizes = [1, 256], strides = [1, 1]} : vector<7x256xf32> to vector<1x256xf32>
    %733 = vector.broadcast %732 : vector<1x256xf32> to vector<4x256xf32>
    %734 = arith.mulf %731, %733 : vector<4x256xf32>
    %c16_278 = arith.constant 16 : index
    %c256_279 = arith.constant 256 : index
    %735 = vector.load %arg6[%c16_278, %c256_279] : memref<200x512xf32, #tpu.memory_space<vmem>>, vector<4x256xf32>
    tpu.vector_store %arg6[%c16_278, %c256_279], %734 {strides = array<i32>} : memref<200x512xf32, #tpu.memory_space<vmem>>, vector<4x256xf32>,
    %736 = vector.extract_strided_slice %713 {offsets = [0, 82], sizes = [4, 256], strides = [1, 1]} : vector<4x512xf32> to vector<4x256xf32>
    %737 = vector.extract_strided_slice %0 {offsets = [5, 0], sizes = [1, 256], strides = [1, 1]} : vector<7x256xf32> to vector<1x256xf32>
    %738 = vector.broadcast %737 : vector<1x256xf32> to vector<4x256xf32>
    %739 = arith.mulf %736, %738 : vector<4x256xf32>
    %c20_280 = arith.constant 20 : index
    %c256_281 = arith.constant 256 : index
    %740 = vector.load %arg6[%c20_280, %c256_281] : memref<200x512xf32, #tpu.memory_space<vmem>>, vector<4x256xf32>
    tpu.vector_store %arg6[%c20_280, %c256_281], %739 {strides = array<i32>} : memref<200x512xf32, #tpu.memory_space<vmem>>, vector<4x256xf32>,
    %741 = vector.extract_strided_slice %713 {offsets = [0, 83], sizes = [4, 256], strides = [1, 1]} : vector<4x512xf32> to vector<4x256xf32>
    %742 = vector.extract_strided_slice %0 {offsets = [6, 0], sizes = [1, 256], strides = [1, 1]} : vector<7x256xf32> to vector<1x256xf32>
    %743 = vector.broadcast %742 : vector<1x256xf32> to vector<4x256xf32>
    %744 = arith.mulf %741, %743 : vector<4x256xf32>
    %c24_282 = arith.constant 24 : index
    %c256_283 = arith.constant 256 : index
    %745 = vector.load %arg6[%c24_282, %c256_283] : memref<200x512xf32, #tpu.memory_space<vmem>>, vector<4x256xf32>
    tpu.vector_store %arg6[%c24_282, %c256_283], %744 {strides = array<i32>} : memref<200x512xf32, #tpu.memory_space<vmem>>, vector<4x256xf32>,
    %746 = vector.extract_strided_slice %713 {offsets = [0, 93], sizes = [4, 256], strides = [1, 1]} : vector<4x512xf32> to vector<4x256xf32>
    %747 = vector.extract_strided_slice %0 {offsets = [0, 0], sizes = [1, 256], strides = [1, 1]} : vector<7x256xf32> to vector<1x256xf32>
    %748 = vector.broadcast %747 : vector<1x256xf32> to vector<4x256xf32>
    %749 = arith.mulf %746, %748 : vector<4x256xf32>
    %c28_284 = arith.constant 28 : index
    %c256_285 = arith.constant 256 : index
    %750 = vector.load %arg6[%c28_284, %c256_285] : memref<200x512xf32, #tpu.memory_space<vmem>>, vector<4x256xf32>
    tpu.vector_store %arg6[%c28_284, %c256_285], %749 {strides = array<i32>} : memref<200x512xf32, #tpu.memory_space<vmem>>, vector<4x256xf32>,
    %751 = vector.extract_strided_slice %713 {offsets = [0, 94], sizes = [4, 256], strides = [1, 1]} : vector<4x512xf32> to vector<4x256xf32>
    %752 = vector.extract_strided_slice %0 {offsets = [1, 0], sizes = [1, 256], strides = [1, 1]} : vector<7x256xf32> to vector<1x256xf32>
    %753 = vector.broadcast %752 : vector<1x256xf32> to vector<4x256xf32>
    %754 = arith.mulf %751, %753 : vector<4x256xf32>
    %c32_286 = arith.constant 32 : index
    %c256_287 = arith.constant 256 : index
    %755 = vector.load %arg6[%c32_286, %c256_287] : memref<200x512xf32, #tpu.memory_space<vmem>>, vector<4x256xf32>
    tpu.vector_store %arg6[%c32_286, %c256_287], %754 {strides = array<i32>} : memref<200x512xf32, #tpu.memory_space<vmem>>, vector<4x256xf32>,
    %756 = vector.extract_strided_slice %713 {offsets = [0, 95], sizes = [4, 256], strides = [1, 1]} : vector<4x512xf32> to vector<4x256xf32>
    %757 = vector.extract_strided_slice %0 {offsets = [2, 0], sizes = [1, 256], strides = [1, 1]} : vector<7x256xf32> to vector<1x256xf32>
    %758 = vector.broadcast %757 : vector<1x256xf32> to vector<4x256xf32>
    %759 = arith.mulf %756, %758 : vector<4x256xf32>
    %c36_288 = arith.constant 36 : index
    %c256_289 = arith.constant 256 : index
    %760 = vector.load %arg6[%c36_288, %c256_289] : memref<200x512xf32, #tpu.memory_space<vmem>>, vector<4x256xf32>
    tpu.vector_store %arg6[%c36_288, %c256_289], %759 {strides = array<i32>} : memref<200x512xf32, #tpu.memory_space<vmem>>, vector<4x256xf32>,
    %761 = vector.extract_strided_slice %713 {offsets = [0, 96], sizes = [4, 256], strides = [1, 1]} : vector<4x512xf32> to vector<4x256xf32>
    %c40_290 = arith.constant 40 : index
    %c256_291 = arith.constant 256 : index
    %762 = vector.load %arg6[%c40_290, %c256_291] : memref<200x512xf32, #tpu.memory_space<vmem>>, vector<4x256xf32>
    tpu.vector_store %arg6[%c40_290, %c256_291], %761 {strides = array<i32>} : memref<200x512xf32, #tpu.memory_space<vmem>>, vector<4x256xf32>,
    %763 = vector.extract_strided_slice %713 {offsets = [0, 97], sizes = [4, 256], strides = [1, 1]} : vector<4x512xf32> to vector<4x256xf32>
    %764 = vector.extract_strided_slice %0 {offsets = [4, 0], sizes = [1, 256], strides = [1, 1]} : vector<7x256xf32> to vector<1x256xf32>
    %765 = vector.broadcast %764 : vector<1x256xf32> to vector<4x256xf32>
    %766 = arith.mulf %763, %765 : vector<4x256xf32>
    %c44_292 = arith.constant 44 : index
    %c256_293 = arith.constant 256 : index
    %767 = vector.load %arg6[%c44_292, %c256_293] : memref<200x512xf32, #tpu.memory_space<vmem>>, vector<4x256xf32>
    tpu.vector_store %arg6[%c44_292, %c256_293], %766 {strides = array<i32>} : memref<200x512xf32, #tpu.memory_space<vmem>>, vector<4x256xf32>,
    %768 = vector.extract_strided_slice %713 {offsets = [0, 98], sizes = [4, 256], strides = [1, 1]} : vector<4x512xf32> to vector<4x256xf32>
    %769 = vector.extract_strided_slice %0 {offsets = [5, 0], sizes = [1, 256], strides = [1, 1]} : vector<7x256xf32> to vector<1x256xf32>
    %770 = vector.broadcast %769 : vector<1x256xf32> to vector<4x256xf32>
    %771 = arith.mulf %768, %770 : vector<4x256xf32>
    %c48_294 = arith.constant 48 : index
    %c256_295 = arith.constant 256 : index
    %772 = vector.load %arg6[%c48_294, %c256_295] : memref<200x512xf32, #tpu.memory_space<vmem>>, vector<4x256xf32>
    tpu.vector_store %arg6[%c48_294, %c256_295], %771 {strides = array<i32>} : memref<200x512xf32, #tpu.memory_space<vmem>>, vector<4x256xf32>,
    %773 = vector.extract_strided_slice %713 {offsets = [0, 99], sizes = [4, 256], strides = [1, 1]} : vector<4x512xf32> to vector<4x256xf32>
    %774 = vector.extract_strided_slice %0 {offsets = [6, 0], sizes = [1, 256], strides = [1, 1]} : vector<7x256xf32> to vector<1x256xf32>
    %775 = vector.broadcast %774 : vector<1x256xf32> to vector<4x256xf32>
    %776 = arith.mulf %773, %775 : vector<4x256xf32>
    %c52_296 = arith.constant 52 : index
    %c256_297 = arith.constant 256 : index
    %777 = vector.load %arg6[%c52_296, %c256_297] : memref<200x512xf32, #tpu.memory_space<vmem>>, vector<4x256xf32>
    tpu.vector_store %arg6[%c52_296, %c256_297], %776 {strides = array<i32>} : memref<200x512xf32, #tpu.memory_space<vmem>>, vector<4x256xf32>,
    %778 = vector.extract_strided_slice %713 {offsets = [0, 109], sizes = [4, 256], strides = [1, 1]} : vector<4x512xf32> to vector<4x256xf32>
    %779 = vector.extract_strided_slice %0 {offsets = [0, 0], sizes = [1, 256], strides = [1, 1]} : vector<7x256xf32> to vector<1x256xf32>
    %780 = vector.broadcast %779 : vector<1x256xf32> to vector<4x256xf32>
    %781 = arith.mulf %778, %780 : vector<4x256xf32>
    %c56_298 = arith.constant 56 : index
    %c256_299 = arith.constant 256 : index
    %782 = vector.load %arg6[%c56_298, %c256_299] : memref<200x512xf32, #tpu.memory_space<vmem>>, vector<4x256xf32>
    tpu.vector_store %arg6[%c56_298, %c256_299], %781 {strides = array<i32>} : memref<200x512xf32, #tpu.memory_space<vmem>>, vector<4x256xf32>,
    %783 = vector.extract_strided_slice %713 {offsets = [0, 110], sizes = [4, 256], strides = [1, 1]} : vector<4x512xf32> to vector<4x256xf32>
    %784 = vector.extract_strided_slice %0 {offsets = [1, 0], sizes = [1, 256], strides = [1, 1]} : vector<7x256xf32> to vector<1x256xf32>
    %785 = vector.broadcast %784 : vector<1x256xf32> to vector<4x256xf32>
    %786 = arith.mulf %783, %785 : vector<4x256xf32>
    %c60_300 = arith.constant 60 : index
    %c256_301 = arith.constant 256 : index
    %787 = vector.load %arg6[%c60_300, %c256_301] : memref<200x512xf32, #tpu.memory_space<vmem>>, vector<4x256xf32>
    tpu.vector_store %arg6[%c60_300, %c256_301], %786 {strides = array<i32>} : memref<200x512xf32, #tpu.memory_space<vmem>>, vector<4x256xf32>,
    %788 = vector.extract_strided_slice %713 {offsets = [0, 111], sizes = [4, 256], strides = [1, 1]} : vector<4x512xf32> to vector<4x256xf32>
    %789 = vector.extract_strided_slice %0 {offsets = [2, 0], sizes = [1, 256], strides = [1, 1]} : vector<7x256xf32> to vector<1x256xf32>
    %790 = vector.broadcast %789 : vector<1x256xf32> to vector<4x256xf32>
    %791 = arith.mulf %788, %790 : vector<4x256xf32>
    %c64_302 = arith.constant 64 : index
    %c256_303 = arith.constant 256 : index
    %792 = vector.load %arg6[%c64_302, %c256_303] : memref<200x512xf32, #tpu.memory_space<vmem>>, vector<4x256xf32>
    tpu.vector_store %arg6[%c64_302, %c256_303], %791 {strides = array<i32>} : memref<200x512xf32, #tpu.memory_space<vmem>>, vector<4x256xf32>,
    %793 = vector.extract_strided_slice %713 {offsets = [0, 112], sizes = [4, 256], strides = [1, 1]} : vector<4x512xf32> to vector<4x256xf32>
    %c68_304 = arith.constant 68 : index
    %c256_305 = arith.constant 256 : index
    %794 = vector.load %arg6[%c68_304, %c256_305] : memref<200x512xf32, #tpu.memory_space<vmem>>, vector<4x256xf32>
    tpu.vector_store %arg6[%c68_304, %c256_305], %793 {strides = array<i32>} : memref<200x512xf32, #tpu.memory_space<vmem>>, vector<4x256xf32>,
    %795 = vector.extract_strided_slice %713 {offsets = [0, 113], sizes = [4, 256], strides = [1, 1]} : vector<4x512xf32> to vector<4x256xf32>
    %796 = vector.extract_strided_slice %0 {offsets = [4, 0], sizes = [1, 256], strides = [1, 1]} : vector<7x256xf32> to vector<1x256xf32>
    %797 = vector.broadcast %796 : vector<1x256xf32> to vector<4x256xf32>
    %798 = arith.mulf %795, %797 : vector<4x256xf32>
    %c72_306 = arith.constant 72 : index
    %c256_307 = arith.constant 256 : index
    %799 = vector.load %arg6[%c72_306, %c256_307] : memref<200x512xf32, #tpu.memory_space<vmem>>, vector<4x256xf32>
    tpu.vector_store %arg6[%c72_306, %c256_307], %798 {strides = array<i32>} : memref<200x512xf32, #tpu.memory_space<vmem>>, vector<4x256xf32>,
    %800 = vector.extract_strided_slice %713 {offsets = [0, 114], sizes = [4, 256], strides = [1, 1]} : vector<4x512xf32> to vector<4x256xf32>
    %801 = vector.extract_strided_slice %0 {offsets = [5, 0], sizes = [1, 256], strides = [1, 1]} : vector<7x256xf32> to vector<1x256xf32>
    %802 = vector.broadcast %801 : vector<1x256xf32> to vector<4x256xf32>
    %803 = arith.mulf %800, %802 : vector<4x256xf32>
    %c76_308 = arith.constant 76 : index
    %c256_309 = arith.constant 256 : index
    %804 = vector.load %arg6[%c76_308, %c256_309] : memref<200x512xf32, #tpu.memory_space<vmem>>, vector<4x256xf32>
    tpu.vector_store %arg6[%c76_308, %c256_309], %803 {strides = array<i32>} : memref<200x512xf32, #tpu.memory_space<vmem>>, vector<4x256xf32>,
    %805 = vector.extract_strided_slice %713 {offsets = [0, 115], sizes = [4, 256], strides = [1, 1]} : vector<4x512xf32> to vector<4x256xf32>
    %806 = vector.extract_strided_slice %0 {offsets = [6, 0], sizes = [1, 256], strides = [1, 1]} : vector<7x256xf32> to vector<1x256xf32>
    %807 = vector.broadcast %806 : vector<1x256xf32> to vector<4x256xf32>
    %808 = arith.mulf %805, %807 : vector<4x256xf32>
    %c80_310 = arith.constant 80 : index
    %c256_311 = arith.constant 256 : index
    %809 = vector.load %arg6[%c80_310, %c256_311] : memref<200x512xf32, #tpu.memory_space<vmem>>, vector<4x256xf32>
    tpu.vector_store %arg6[%c80_310, %c256_311], %808 {strides = array<i32>} : memref<200x512xf32, #tpu.memory_space<vmem>>, vector<4x256xf32>,
    %810 = vector.extract_strided_slice %713 {offsets = [0, 125], sizes = [4, 256], strides = [1, 1]} : vector<4x512xf32> to vector<4x256xf32>
    %811 = vector.extract_strided_slice %0 {offsets = [0, 0], sizes = [1, 256], strides = [1, 1]} : vector<7x256xf32> to vector<1x256xf32>
    %812 = vector.broadcast %811 : vector<1x256xf32> to vector<4x256xf32>
    %813 = arith.mulf %810, %812 : vector<4x256xf32>
    %c84_312 = arith.constant 84 : index
    %c256_313 = arith.constant 256 : index
    %814 = vector.load %arg6[%c84_312, %c256_313] : memref<200x512xf32, #tpu.memory_space<vmem>>, vector<4x256xf32>
    tpu.vector_store %arg6[%c84_312, %c256_313], %813 {strides = array<i32>} : memref<200x512xf32, #tpu.memory_space<vmem>>, vector<4x256xf32>,
    %815 = vector.extract_strided_slice %713 {offsets = [0, 126], sizes = [4, 256], strides = [1, 1]} : vector<4x512xf32> to vector<4x256xf32>
    %816 = vector.extract_strided_slice %0 {offsets = [1, 0], sizes = [1, 256], strides = [1, 1]} : vector<7x256xf32> to vector<1x256xf32>
    %817 = vector.broadcast %816 : vector<1x256xf32> to vector<4x256xf32>
    %818 = arith.mulf %815, %817 : vector<4x256xf32>
    %c88_314 = arith.constant 88 : index
    %c256_315 = arith.constant 256 : index
    %819 = vector.load %arg6[%c88_314, %c256_315] : memref<200x512xf32, #tpu.memory_space<vmem>>, vector<4x256xf32>
    tpu.vector_store %arg6[%c88_314, %c256_315], %818 {strides = array<i32>} : memref<200x512xf32, #tpu.memory_space<vmem>>, vector<4x256xf32>,
    %820 = vector.extract_strided_slice %713 {offsets = [0, 127], sizes = [4, 256], strides = [1, 1]} : vector<4x512xf32> to vector<4x256xf32>
    %821 = vector.extract_strided_slice %0 {offsets = [2, 0], sizes = [1, 256], strides = [1, 1]} : vector<7x256xf32> to vector<1x256xf32>
    %822 = vector.broadcast %821 : vector<1x256xf32> to vector<4x256xf32>
    %823 = arith.mulf %820, %822 : vector<4x256xf32>
    %c92_316 = arith.constant 92 : index
    %c256_317 = arith.constant 256 : index
    %824 = vector.load %arg6[%c92_316, %c256_317] : memref<200x512xf32, #tpu.memory_space<vmem>>, vector<4x256xf32>
    tpu.vector_store %arg6[%c92_316, %c256_317], %823 {strides = array<i32>} : memref<200x512xf32, #tpu.memory_space<vmem>>, vector<4x256xf32>,
    %825 = vector.extract_strided_slice %713 {offsets = [0, 128], sizes = [4, 256], strides = [1, 1]} : vector<4x512xf32> to vector<4x256xf32>
    %c96_318 = arith.constant 96 : index
    %c256_319 = arith.constant 256 : index
    %826 = vector.load %arg6[%c96_318, %c256_319] : memref<200x512xf32, #tpu.memory_space<vmem>>, vector<4x256xf32>
    tpu.vector_store %arg6[%c96_318, %c256_319], %825 {strides = array<i32>} : memref<200x512xf32, #tpu.memory_space<vmem>>, vector<4x256xf32>,
    %827 = vector.extract_strided_slice %713 {offsets = [0, 129], sizes = [4, 256], strides = [1, 1]} : vector<4x512xf32> to vector<4x256xf32>
    %828 = vector.extract_strided_slice %0 {offsets = [4, 0], sizes = [1, 256], strides = [1, 1]} : vector<7x256xf32> to vector<1x256xf32>
    %829 = vector.broadcast %828 : vector<1x256xf32> to vector<4x256xf32>
    %830 = arith.mulf %827, %829 : vector<4x256xf32>
    %c100_320 = arith.constant 100 : index
    %c256_321 = arith.constant 256 : index
    %831 = vector.load %arg6[%c100_320, %c256_321] : memref<200x512xf32, #tpu.memory_space<vmem>>, vector<4x256xf32>
    tpu.vector_store %arg6[%c100_320, %c256_321], %830 {strides = array<i32>} : memref<200x512xf32, #tpu.memory_space<vmem>>, vector<4x256xf32>,
    %832 = vector.extract_strided_slice %713 {offsets = [0, 130], sizes = [4, 256], strides = [1, 1]} : vector<4x512xf32> to vector<4x256xf32>
    %833 = vector.extract_strided_slice %0 {offsets = [5, 0], sizes = [1, 256], strides = [1, 1]} : vector<7x256xf32> to vector<1x256xf32>
    %834 = vector.broadcast %833 : vector<1x256xf32> to vector<4x256xf32>
    %835 = arith.mulf %832, %834 : vector<4x256xf32>
    %c104_322 = arith.constant 104 : index
    %c256_323 = arith.constant 256 : index
    %836 = vector.load %arg6[%c104_322, %c256_323] : memref<200x512xf32, #tpu.memory_space<vmem>>, vector<4x256xf32>
    tpu.vector_store %arg6[%c104_322, %c256_323], %835 {strides = array<i32>} : memref<200x512xf32, #tpu.memory_space<vmem>>, vector<4x256xf32>,
    %837 = vector.extract_strided_slice %713 {offsets = [0, 131], sizes = [4, 256], strides = [1, 1]} : vector<4x512xf32> to vector<4x256xf32>
    %838 = vector.extract_strided_slice %0 {offsets = [6, 0], sizes = [1, 256], strides = [1, 1]} : vector<7x256xf32> to vector<1x256xf32>
    %839 = vector.broadcast %838 : vector<1x256xf32> to vector<4x256xf32>
    %840 = arith.mulf %837, %839 : vector<4x256xf32>
    %c108_324 = arith.constant 108 : index
    %c256_325 = arith.constant 256 : index
    %841 = vector.load %arg6[%c108_324, %c256_325] : memref<200x512xf32, #tpu.memory_space<vmem>>, vector<4x256xf32>
    tpu.vector_store %arg6[%c108_324, %c256_325], %840 {strides = array<i32>} : memref<200x512xf32, #tpu.memory_space<vmem>>, vector<4x256xf32>,
    %842 = vector.extract_strided_slice %713 {offsets = [0, 141], sizes = [4, 256], strides = [1, 1]} : vector<4x512xf32> to vector<4x256xf32>
    %843 = vector.extract_strided_slice %0 {offsets = [0, 0], sizes = [1, 256], strides = [1, 1]} : vector<7x256xf32> to vector<1x256xf32>
    %844 = vector.broadcast %843 : vector<1x256xf32> to vector<4x256xf32>
    %845 = arith.mulf %842, %844 : vector<4x256xf32>
    %c112_326 = arith.constant 112 : index
    %c256_327 = arith.constant 256 : index
    %846 = vector.load %arg6[%c112_326, %c256_327] : memref<200x512xf32, #tpu.memory_space<vmem>>, vector<4x256xf32>
    tpu.vector_store %arg6[%c112_326, %c256_327], %845 {strides = array<i32>} : memref<200x512xf32, #tpu.memory_space<vmem>>, vector<4x256xf32>,
    %847 = vector.extract_strided_slice %713 {offsets = [0, 142], sizes = [4, 256], strides = [1, 1]} : vector<4x512xf32> to vector<4x256xf32>
    %848 = vector.extract_strided_slice %0 {offsets = [1, 0], sizes = [1, 256], strides = [1, 1]} : vector<7x256xf32> to vector<1x256xf32>
    %849 = vector.broadcast %848 : vector<1x256xf32> to vector<4x256xf32>
    %850 = arith.mulf %847, %849 : vector<4x256xf32>
    %c116_328 = arith.constant 116 : index
    %c256_329 = arith.constant 256 : index
    %851 = vector.load %arg6[%c116_328, %c256_329] : memref<200x512xf32, #tpu.memory_space<vmem>>, vector<4x256xf32>
    tpu.vector_store %arg6[%c116_328, %c256_329], %850 {strides = array<i32>} : memref<200x512xf32, #tpu.memory_space<vmem>>, vector<4x256xf32>,
    %852 = vector.extract_strided_slice %713 {offsets = [0, 143], sizes = [4, 256], strides = [1, 1]} : vector<4x512xf32> to vector<4x256xf32>
    %853 = vector.extract_strided_slice %0 {offsets = [2, 0], sizes = [1, 256], strides = [1, 1]} : vector<7x256xf32> to vector<1x256xf32>
    %854 = vector.broadcast %853 : vector<1x256xf32> to vector<4x256xf32>
    %855 = arith.mulf %852, %854 : vector<4x256xf32>
    %c120_330 = arith.constant 120 : index
    %c256_331 = arith.constant 256 : index
    %856 = vector.load %arg6[%c120_330, %c256_331] : memref<200x512xf32, #tpu.memory_space<vmem>>, vector<4x256xf32>
    tpu.vector_store %arg6[%c120_330, %c256_331], %855 {strides = array<i32>} : memref<200x512xf32, #tpu.memory_space<vmem>>, vector<4x256xf32>,
    %857 = vector.extract_strided_slice %713 {offsets = [0, 144], sizes = [4, 256], strides = [1, 1]} : vector<4x512xf32> to vector<4x256xf32>
    %c124_332 = arith.constant 124 : index
    %c256_333 = arith.constant 256 : index
    %858 = vector.load %arg6[%c124_332, %c256_333] : memref<200x512xf32, #tpu.memory_space<vmem>>, vector<4x256xf32>
    tpu.vector_store %arg6[%c124_332, %c256_333], %857 {strides = array<i32>} : memref<200x512xf32, #tpu.memory_space<vmem>>, vector<4x256xf32>,
    %859 = vector.extract_strided_slice %713 {offsets = [0, 145], sizes = [4, 256], strides = [1, 1]} : vector<4x512xf32> to vector<4x256xf32>
    %860 = vector.extract_strided_slice %0 {offsets = [4, 0], sizes = [1, 256], strides = [1, 1]} : vector<7x256xf32> to vector<1x256xf32>
    %861 = vector.broadcast %860 : vector<1x256xf32> to vector<4x256xf32>
    %862 = arith.mulf %859, %861 : vector<4x256xf32>
    %c128_334 = arith.constant 128 : index
    %c256_335 = arith.constant 256 : index
    %863 = vector.load %arg6[%c128_334, %c256_335] : memref<200x512xf32, #tpu.memory_space<vmem>>, vector<4x256xf32>
    tpu.vector_store %arg6[%c128_334, %c256_335], %862 {strides = array<i32>} : memref<200x512xf32, #tpu.memory_space<vmem>>, vector<4x256xf32>,
    %864 = vector.extract_strided_slice %713 {offsets = [0, 146], sizes = [4, 256], strides = [1, 1]} : vector<4x512xf32> to vector<4x256xf32>
    %865 = vector.extract_strided_slice %0 {offsets = [5, 0], sizes = [1, 256], strides = [1, 1]} : vector<7x256xf32> to vector<1x256xf32>
    %866 = vector.broadcast %865 : vector<1x256xf32> to vector<4x256xf32>
    %867 = arith.mulf %864, %866 : vector<4x256xf32>
    %c132_336 = arith.constant 132 : index
    %c256_337 = arith.constant 256 : index
    %868 = vector.load %arg6[%c132_336, %c256_337] : memref<200x512xf32, #tpu.memory_space<vmem>>, vector<4x256xf32>
    tpu.vector_store %arg6[%c132_336, %c256_337], %867 {strides = array<i32>} : memref<200x512xf32, #tpu.memory_space<vmem>>, vector<4x256xf32>,
    %869 = vector.extract_strided_slice %713 {offsets = [0, 147], sizes = [4, 256], strides = [1, 1]} : vector<4x512xf32> to vector<4x256xf32>
    %870 = vector.extract_strided_slice %0 {offsets = [6, 0], sizes = [1, 256], strides = [1, 1]} : vector<7x256xf32> to vector<1x256xf32>
    %871 = vector.broadcast %870 : vector<1x256xf32> to vector<4x256xf32>
    %872 = arith.mulf %869, %871 : vector<4x256xf32>
    %c136_338 = arith.constant 136 : index
    %c256_339 = arith.constant 256 : index
    %873 = vector.load %arg6[%c136_338, %c256_339] : memref<200x512xf32, #tpu.memory_space<vmem>>, vector<4x256xf32>
    tpu.vector_store %arg6[%c136_338, %c256_339], %872 {strides = array<i32>} : memref<200x512xf32, #tpu.memory_space<vmem>>, vector<4x256xf32>,
    %874 = vector.extract_strided_slice %713 {offsets = [0, 157], sizes = [4, 256], strides = [1, 1]} : vector<4x512xf32> to vector<4x256xf32>
    %875 = vector.extract_strided_slice %0 {offsets = [0, 0], sizes = [1, 256], strides = [1, 1]} : vector<7x256xf32> to vector<1x256xf32>
    %876 = vector.broadcast %875 : vector<1x256xf32> to vector<4x256xf32>
    %877 = arith.mulf %874, %876 : vector<4x256xf32>
    %c140_340 = arith.constant 140 : index
    %c256_341 = arith.constant 256 : index
    %878 = vector.load %arg6[%c140_340, %c256_341] : memref<200x512xf32, #tpu.memory_space<vmem>>, vector<4x256xf32>
    tpu.vector_store %arg6[%c140_340, %c256_341], %877 {strides = array<i32>} : memref<200x512xf32, #tpu.memory_space<vmem>>, vector<4x256xf32>,
    %879 = vector.extract_strided_slice %713 {offsets = [0, 158], sizes = [4, 256], strides = [1, 1]} : vector<4x512xf32> to vector<4x256xf32>
    %880 = vector.extract_strided_slice %0 {offsets = [1, 0], sizes = [1, 256], strides = [1, 1]} : vector<7x256xf32> to vector<1x256xf32>
    %881 = vector.broadcast %880 : vector<1x256xf32> to vector<4x256xf32>
    %882 = arith.mulf %879, %881 : vector<4x256xf32>
    %c144_342 = arith.constant 144 : index
    %c256_343 = arith.constant 256 : index
    %883 = vector.load %arg6[%c144_342, %c256_343] : memref<200x512xf32, #tpu.memory_space<vmem>>, vector<4x256xf32>
    tpu.vector_store %arg6[%c144_342, %c256_343], %882 {strides = array<i32>} : memref<200x512xf32, #tpu.memory_space<vmem>>, vector<4x256xf32>,
    %884 = vector.extract_strided_slice %713 {offsets = [0, 159], sizes = [4, 256], strides = [1, 1]} : vector<4x512xf32> to vector<4x256xf32>
    %885 = vector.extract_strided_slice %0 {offsets = [2, 0], sizes = [1, 256], strides = [1, 1]} : vector<7x256xf32> to vector<1x256xf32>
    %886 = vector.broadcast %885 : vector<1x256xf32> to vector<4x256xf32>
    %887 = arith.mulf %884, %886 : vector<4x256xf32>
    %c148_344 = arith.constant 148 : index
    %c256_345 = arith.constant 256 : index
    %888 = vector.load %arg6[%c148_344, %c256_345] : memref<200x512xf32, #tpu.memory_space<vmem>>, vector<4x256xf32>
    tpu.vector_store %arg6[%c148_344, %c256_345], %887 {strides = array<i32>} : memref<200x512xf32, #tpu.memory_space<vmem>>, vector<4x256xf32>,
    %889 = vector.extract_strided_slice %713 {offsets = [0, 160], sizes = [4, 256], strides = [1, 1]} : vector<4x512xf32> to vector<4x256xf32>
    %c152_346 = arith.constant 152 : index
    %c256_347 = arith.constant 256 : index
    %890 = vector.load %arg6[%c152_346, %c256_347] : memref<200x512xf32, #tpu.memory_space<vmem>>, vector<4x256xf32>
    tpu.vector_store %arg6[%c152_346, %c256_347], %889 {strides = array<i32>} : memref<200x512xf32, #tpu.memory_space<vmem>>, vector<4x256xf32>,
    %891 = vector.extract_strided_slice %713 {offsets = [0, 161], sizes = [4, 256], strides = [1, 1]} : vector<4x512xf32> to vector<4x256xf32>
    %892 = vector.extract_strided_slice %0 {offsets = [4, 0], sizes = [1, 256], strides = [1, 1]} : vector<7x256xf32> to vector<1x256xf32>
    %893 = vector.broadcast %892 : vector<1x256xf32> to vector<4x256xf32>
    %894 = arith.mulf %891, %893 : vector<4x256xf32>
    %c156_348 = arith.constant 156 : index
    %c256_349 = arith.constant 256 : index
    %895 = vector.load %arg6[%c156_348, %c256_349] : memref<200x512xf32, #tpu.memory_space<vmem>>, vector<4x256xf32>
    tpu.vector_store %arg6[%c156_348, %c256_349], %894 {strides = array<i32>} : memref<200x512xf32, #tpu.memory_space<vmem>>, vector<4x256xf32>,
    %896 = vector.extract_strided_slice %713 {offsets = [0, 162], sizes = [4, 256], strides = [1, 1]} : vector<4x512xf32> to vector<4x256xf32>
    %897 = vector.extract_strided_slice %0 {offsets = [5, 0], sizes = [1, 256], strides = [1, 1]} : vector<7x256xf32> to vector<1x256xf32>
    %898 = vector.broadcast %897 : vector<1x256xf32> to vector<4x256xf32>
    %899 = arith.mulf %896, %898 : vector<4x256xf32>
    %c160_350 = arith.constant 160 : index
    %c256_351 = arith.constant 256 : index
    %900 = vector.load %arg6[%c160_350, %c256_351] : memref<200x512xf32, #tpu.memory_space<vmem>>, vector<4x256xf32>
    tpu.vector_store %arg6[%c160_350, %c256_351], %899 {strides = array<i32>} : memref<200x512xf32, #tpu.memory_space<vmem>>, vector<4x256xf32>,
    %901 = vector.extract_strided_slice %713 {offsets = [0, 163], sizes = [4, 256], strides = [1, 1]} : vector<4x512xf32> to vector<4x256xf32>
    %902 = vector.extract_strided_slice %0 {offsets = [6, 0], sizes = [1, 256], strides = [1, 1]} : vector<7x256xf32> to vector<1x256xf32>
    %903 = vector.broadcast %902 : vector<1x256xf32> to vector<4x256xf32>
    %904 = arith.mulf %901, %903 : vector<4x256xf32>
    %c164_352 = arith.constant 164 : index
    %c256_353 = arith.constant 256 : index
    %905 = vector.load %arg6[%c164_352, %c256_353] : memref<200x512xf32, #tpu.memory_space<vmem>>, vector<4x256xf32>
    tpu.vector_store %arg6[%c164_352, %c256_353], %904 {strides = array<i32>} : memref<200x512xf32, #tpu.memory_space<vmem>>, vector<4x256xf32>,
    %906 = vector.extract_strided_slice %713 {offsets = [0, 173], sizes = [4, 256], strides = [1, 1]} : vector<4x512xf32> to vector<4x256xf32>
    %907 = vector.extract_strided_slice %0 {offsets = [0, 0], sizes = [1, 256], strides = [1, 1]} : vector<7x256xf32> to vector<1x256xf32>
    %908 = vector.broadcast %907 : vector<1x256xf32> to vector<4x256xf32>
    %909 = arith.mulf %906, %908 : vector<4x256xf32>
    %c168_354 = arith.constant 168 : index
    %c256_355 = arith.constant 256 : index
    %910 = vector.load %arg6[%c168_354, %c256_355] : memref<200x512xf32, #tpu.memory_space<vmem>>, vector<4x256xf32>
    tpu.vector_store %arg6[%c168_354, %c256_355], %909 {strides = array<i32>} : memref<200x512xf32, #tpu.memory_space<vmem>>, vector<4x256xf32>,
    %911 = vector.extract_strided_slice %713 {offsets = [0, 174], sizes = [4, 256], strides = [1, 1]} : vector<4x512xf32> to vector<4x256xf32>
    %912 = vector.extract_strided_slice %0 {offsets = [1, 0], sizes = [1, 256], strides = [1, 1]} : vector<7x256xf32> to vector<1x256xf32>
    %913 = vector.broadcast %912 : vector<1x256xf32> to vector<4x256xf32>
    %914 = arith.mulf %911, %913 : vector<4x256xf32>
    %c172_356 = arith.constant 172 : index
    %c256_357 = arith.constant 256 : index
    %915 = vector.load %arg6[%c172_356, %c256_357] : memref<200x512xf32, #tpu.memory_space<vmem>>, vector<4x256xf32>
    tpu.vector_store %arg6[%c172_356, %c256_357], %914 {strides = array<i32>} : memref<200x512xf32, #tpu.memory_space<vmem>>, vector<4x256xf32>,
    %916 = vector.extract_strided_slice %713 {offsets = [0, 175], sizes = [4, 256], strides = [1, 1]} : vector<4x512xf32> to vector<4x256xf32>
    %917 = vector.extract_strided_slice %0 {offsets = [2, 0], sizes = [1, 256], strides = [1, 1]} : vector<7x256xf32> to vector<1x256xf32>
    %918 = vector.broadcast %917 : vector<1x256xf32> to vector<4x256xf32>
    %919 = arith.mulf %916, %918 : vector<4x256xf32>
    %c176_358 = arith.constant 176 : index
    %c256_359 = arith.constant 256 : index
    %920 = vector.load %arg6[%c176_358, %c256_359] : memref<200x512xf32, #tpu.memory_space<vmem>>, vector<4x256xf32>
    tpu.vector_store %arg6[%c176_358, %c256_359], %919 {strides = array<i32>} : memref<200x512xf32, #tpu.memory_space<vmem>>, vector<4x256xf32>,
    %921 = vector.extract_strided_slice %713 {offsets = [0, 176], sizes = [4, 256], strides = [1, 1]} : vector<4x512xf32> to vector<4x256xf32>
    %c180_360 = arith.constant 180 : index
    %c256_361 = arith.constant 256 : index
    %922 = vector.load %arg6[%c180_360, %c256_361] : memref<200x512xf32, #tpu.memory_space<vmem>>, vector<4x256xf32>
    tpu.vector_store %arg6[%c180_360, %c256_361], %921 {strides = array<i32>} : memref<200x512xf32, #tpu.memory_space<vmem>>, vector<4x256xf32>,
    %923 = vector.extract_strided_slice %713 {offsets = [0, 177], sizes = [4, 256], strides = [1, 1]} : vector<4x512xf32> to vector<4x256xf32>
    %924 = vector.extract_strided_slice %0 {offsets = [4, 0], sizes = [1, 256], strides = [1, 1]} : vector<7x256xf32> to vector<1x256xf32>
    %925 = vector.broadcast %924 : vector<1x256xf32> to vector<4x256xf32>
    %926 = arith.mulf %923, %925 : vector<4x256xf32>
    %c184_362 = arith.constant 184 : index
    %c256_363 = arith.constant 256 : index
    %927 = vector.load %arg6[%c184_362, %c256_363] : memref<200x512xf32, #tpu.memory_space<vmem>>, vector<4x256xf32>
    tpu.vector_store %arg6[%c184_362, %c256_363], %926 {strides = array<i32>} : memref<200x512xf32, #tpu.memory_space<vmem>>, vector<4x256xf32>,
    %928 = vector.extract_strided_slice %713 {offsets = [0, 178], sizes = [4, 256], strides = [1, 1]} : vector<4x512xf32> to vector<4x256xf32>
    %929 = vector.extract_strided_slice %0 {offsets = [5, 0], sizes = [1, 256], strides = [1, 1]} : vector<7x256xf32> to vector<1x256xf32>
    %930 = vector.broadcast %929 : vector<1x256xf32> to vector<4x256xf32>
    %931 = arith.mulf %928, %930 : vector<4x256xf32>
    %c188_364 = arith.constant 188 : index
    %c256_365 = arith.constant 256 : index
    %932 = vector.load %arg6[%c188_364, %c256_365] : memref<200x512xf32, #tpu.memory_space<vmem>>, vector<4x256xf32>
    tpu.vector_store %arg6[%c188_364, %c256_365], %931 {strides = array<i32>} : memref<200x512xf32, #tpu.memory_space<vmem>>, vector<4x256xf32>,
    %933 = vector.extract_strided_slice %713 {offsets = [0, 179], sizes = [4, 256], strides = [1, 1]} : vector<4x512xf32> to vector<4x256xf32>
    %934 = vector.extract_strided_slice %0 {offsets = [6, 0], sizes = [1, 256], strides = [1, 1]} : vector<7x256xf32> to vector<1x256xf32>
    %935 = vector.broadcast %934 : vector<1x256xf32> to vector<4x256xf32>
    %936 = arith.mulf %933, %935 : vector<4x256xf32>
    %c192_366 = arith.constant 192 : index
    %c256_367 = arith.constant 256 : index
    %937 = vector.load %arg6[%c192_366, %c256_367] : memref<200x512xf32, #tpu.memory_space<vmem>>, vector<4x256xf32>
    tpu.vector_store %arg6[%c192_366, %c256_367], %936 {strides = array<i32>} : memref<200x512xf32, #tpu.memory_space<vmem>>, vector<4x256xf32>,
    %cst_368 = arith.constant 1.000000e+00 : f32
    %938 = vector.broadcast %cst_368 : f32 to vector<1x512xf32>
    %c196_369 = arith.constant 196 : index
    %c0_370 = arith.constant 0 : index
    %939 = vector.load %arg6[%c196_369, %c0_370] : memref<200x512xf32, #tpu.memory_space<vmem>>, vector<1x512xf32>
    tpu.vector_store %arg6[%c196_369, %c0_370], %938 {strides = array<i32>} : memref<200x512xf32, #tpu.memory_space<vmem>>, vector<1x512xf32>,
    %cst_371 = arith.constant 0.000000e+00 : f32
    %940 = vector.broadcast %cst_371 : f32 to vector<3x512xf32>
    %c197_372 = arith.constant 197 : index
    %c0_373 = arith.constant 0 : index
    %941 = vector.load %arg6[%c197_372, %c0_373] : memref<200x512xf32, #tpu.memory_space<vmem>>, vector<3x512xf32>
    tpu.vector_store %arg6[%c197_372, %c0_373], %940 {strides = array<i32>} : memref<200x512xf32, #tpu.memory_space<vmem>>, vector<3x512xf32>,
    %c0_374 = arith.constant 0 : index
    %c0_375 = arith.constant 0 : index
    %942 = vector.load %arg4[%c0_374, %c0_375] : memref<24x200xf32, #tpu.memory_space<vmem>>, vector<24x200xf32>
    %c0_376 = arith.constant 0 : index
    %c0_377 = arith.constant 0 : index
    %943 = vector.load %arg6[%c0_376, %c0_377] : memref<200x512xf32, #tpu.memory_space<vmem>>, vector<200x512xf32>
    %cst_378 = arith.constant dense<0.000000e+00> : vector<24x512xf32>
    %944 = tpu.matmul %942, %943, %cst_378 {dimension_numbers = #tpu.dot_dimension_numbers<[1], [0], [0], [1], [0, 0, 1, 1], [], []>} : vector<24x200xf32>, vector<200x512xf32>, vector<24x512xf32> -> vector<24x512xf32>
    %945 = vector.extract_strided_slice %944 {offsets = [0, 0], sizes = [12, 512], strides = [1, 1]} : vector<24x512xf32> to vector<12x512xf32>
    %946 = vector.extract_strided_slice %945 {offsets = [0, 0], sizes = [4, 512], strides = [1, 1]} : vector<12x512xf32> to vector<4x512xf32>
    %cst_379 = arith.constant 2.000000e-01 : f32
    %947 = vector.broadcast %cst_379 : f32 to vector<4x512xf32>
    %948 = arith.mulf %947, %946 : vector<4x512xf32>
    %949 = arith.maximumf %946, %948 : vector<4x512xf32>
    %950 = vector.extract_strided_slice %945 {offsets = [4, 0], sizes = [4, 512], strides = [1, 1]} : vector<12x512xf32> to vector<4x512xf32>
    %cst_380 = arith.constant 2.000000e-01 : f32
    %951 = vector.broadcast %cst_380 : f32 to vector<4x512xf32>
    %952 = arith.mulf %951, %950 : vector<4x512xf32>
    %953 = arith.maximumf %950, %952 : vector<4x512xf32>
    %954 = arith.mulf %953, %949 : vector<4x512xf32>
    %955 = arith.addf %953, %954 : vector<4x512xf32>
    %956 = vector.extract_strided_slice %945 {offsets = [8, 0], sizes = [4, 512], strides = [1, 1]} : vector<12x512xf32> to vector<4x512xf32>
    %cst_381 = arith.constant 2.000000e-01 : f32
    %957 = vector.broadcast %cst_381 : f32 to vector<4x512xf32>
    %958 = arith.mulf %957, %956 : vector<4x512xf32>
    %959 = arith.maximumf %956, %958 : vector<4x512xf32>
    %960 = arith.mulf %953, %959 : vector<4x512xf32>
    %961 = arith.addf %955, %960 : vector<4x512xf32>
    %962 = vector.extract_strided_slice %944 {offsets = [12, 0], sizes = [12, 512], strides = [1, 1]} : vector<24x512xf32> to vector<12x512xf32>
    %963 = vector.extract_strided_slice %962 {offsets = [0, 0], sizes = [4, 512], strides = [1, 1]} : vector<12x512xf32> to vector<4x512xf32>
    %cst_382 = arith.constant 2.000000e-01 : f32
    %964 = vector.broadcast %cst_382 : f32 to vector<4x512xf32>
    %965 = arith.mulf %964, %963 : vector<4x512xf32>
    %966 = arith.maximumf %963, %965 : vector<4x512xf32>
    %967 = vector.extract_strided_slice %962 {offsets = [4, 0], sizes = [4, 512], strides = [1, 1]} : vector<12x512xf32> to vector<4x512xf32>
    %cst_383 = arith.constant 2.000000e-01 : f32
    %968 = vector.broadcast %cst_383 : f32 to vector<4x512xf32>
    %969 = arith.mulf %968, %967 : vector<4x512xf32>
    %970 = arith.maximumf %967, %969 : vector<4x512xf32>
    %971 = arith.mulf %970, %966 : vector<4x512xf32>
    %972 = arith.addf %970, %971 : vector<4x512xf32>
    %973 = vector.extract_strided_slice %962 {offsets = [8, 0], sizes = [4, 512], strides = [1, 1]} : vector<12x512xf32> to vector<4x512xf32>
    %cst_384 = arith.constant 2.000000e-01 : f32
    %974 = vector.broadcast %cst_384 : f32 to vector<4x512xf32>
    %975 = arith.mulf %974, %973 : vector<4x512xf32>
    %976 = arith.maximumf %973, %975 : vector<4x512xf32>
    %977 = arith.mulf %970, %976 : vector<4x512xf32>
    %978 = arith.addf %972, %977 : vector<4x512xf32>
    %cst_385 = arith.constant 5.000000e-01 : f32
    %979 = vector.broadcast %cst_385 : f32 to vector<4x512xf32>
    %980 = arith.mulf %979, %961 : vector<4x512xf32>
    %981 = math.tanh %980 : vector<4x512xf32>
    %cst_386 = arith.constant 8.000000e-01 : f32
    %982 = vector.broadcast %cst_386 : f32 to vector<4x512xf32>
    %983 = arith.mulf %982, %981 : vector<4x512xf32>
    %984 = math.exp %983 : vector<4x512xf32>
    %985 = vector.extract_strided_slice %984 {offsets = [0, 0], sizes = [4, 256], strides = [1, 1]} : vector<4x512xf32> to vector<4x256xf32>
    %986 = arith.mulf %2, %985 : vector<4x256xf32>
    %987 = vector.extract_strided_slice %978 {offsets = [0, 0], sizes = [4, 256], strides = [1, 1]} : vector<4x512xf32> to vector<4x256xf32>
    %988 = arith.addf %986, %987 : vector<4x256xf32>
    %989 = tpu.concatenate %482, %988 in 0 : vector<4x256xf32>, vector<4x256xf32> -> vector<8x256xf32>
    %c0_387 = arith.constant 0 : index
    %c0_388 = arith.constant 0 : index
    %c0_389 = arith.constant 0 : index
    %990 = vector.load %arg5[%c0_387, %c0_388, %c0_389] : memref<2x8x256xf32, #tpu.memory_space<vmem>>, vector<1x8x256xf32>
    %991 = vector.shape_cast %990 : vector<1x8x256xf32> to vector<8x256xf32>
    %992 = vector.shape_cast %989 : vector<8x256xf32> to vector<1x8x256xf32>
    tpu.vector_store %arg5[%c0_387, %c0_388, %c0_389], %992 {strides = array<i32>} : memref<2x8x256xf32, #tpu.memory_space<vmem>>, vector<1x8x256xf32>,
    %993 = vector.extract_strided_slice %984 {offsets = [0, 256], sizes = [4, 256], strides = [1, 1]} : vector<4x512xf32> to vector<4x256xf32>
    %994 = arith.mulf %4, %993 : vector<4x256xf32>
    %995 = vector.extract_strided_slice %978 {offsets = [0, 256], sizes = [4, 256], strides = [1, 1]} : vector<4x512xf32> to vector<4x256xf32>
    %996 = arith.addf %994, %995 : vector<4x256xf32>
    %997 = tpu.concatenate %486, %996 in 0 : vector<4x256xf32>, vector<4x256xf32> -> vector<8x256xf32>
    %c1_390 = arith.constant 1 : index
    %c0_391 = arith.constant 0 : index
    %c0_392 = arith.constant 0 : index
    %998 = vector.load %arg5[%c1_390, %c0_391, %c0_392] : memref<2x8x256xf32, #tpu.memory_space<vmem>>, vector<1x8x256xf32>
    %999 = vector.shape_cast %998 : vector<1x8x256xf32> to vector<8x256xf32>
    %1000 = vector.shape_cast %997 : vector<8x256xf32> to vector<1x8x256xf32>
    tpu.vector_store %arg5[%c1_390, %c0_391, %c0_392], %1000 {strides = array<i32>} : memref<2x8x256xf32, #tpu.memory_space<vmem>>, vector<1x8x256xf32>,
    return
  }
  func.func @transform_0(%arg0: i32) -> (i32, i32, i32) {
    %c0_i32 = arith.constant 0 : i32
    %c0_i32_0 = arith.constant 0 : i32
    %c0_i32_1 = arith.constant 0 : i32
    return %arg0, %c0_i32, %c0_i32_0 : i32, i32, i32
  }
  func.func @transform_1(%arg0: i32) -> (i32, i32) {
    %c0_i32 = arith.constant 0 : i32
    %c0_i32_0 = arith.constant 0 : i32
    %c0_i32_1 = arith.constant 0 : i32
    return %c0_i32, %c0_i32_0 : i32, i32
  }
  func.func @transform_2(%arg0: i32) -> (i32, i32) {
    %c0_i32 = arith.constant 0 : i32
    %c0_i32_0 = arith.constant 0 : i32
    %c0_i32_1 = arith.constant 0 : i32
    return %c0_i32, %c0_i32_0 : i32, i32
  }
  func.func @transform_3(%arg0: i32) -> (i32, i32) {
    %c0_i32 = arith.constant 0 : i32
    %c0_i32_0 = arith.constant 0 : i32
    %c0_i32_1 = arith.constant 0 : i32
    return %c0_i32, %c0_i32_0 : i32, i32
  }
  func.func @transform_4(%arg0: i32) -> (i32, i32, i32) {
    %c0_i32 = arith.constant 0 : i32
    %c0_i32_0 = arith.constant 0 : i32
    %c0_i32_1 = arith.constant 0 : i32
    return %arg0, %c0_i32, %c0_i32_0 : i32, i32, i32
  }
}

</mosaic_0001>

<bundles_post_ra>
// kernel: tpu_custom_call.1
= control target key start
LH: loop header
LB: loop body
LE: loop exit
PB: predicated region body
PF: predicated region fallthrough
CT: control target
= control target key end

     0   :  { %9 = vsyncpa [#allocation4], 0  ;;  %s7061_s0 = inlined_call_operand.hbm [shape: f32[2,8,256], index: 0, kind: input, shape index: {}]   ;;  %s7062_s1 = inlined_call_operand.hbm [shape: f32[7,256], index: 1, kind: input, shape index: {}]   ;;  %s7063_s2 = inlined_call_operand.hbm [shape: f32[12,200], index: 2, kind: input, shape index: {}]   ;;  %s7064_s3 = inlined_call_operand.hbm [shape: f32[24,200], index: 3, kind: input, shape index: {}]   ;;  %s7065_s4 = inlined_call_operand.hbm [shape: f32[2,8,256], index: 4, kind: output, shape index: {}]  }
   0x1   :  { %10 = vsyncpa [#allocation7], 0 }
   0x2   :  { %11 = vsyncpa [#allocation10], 0 }
   0x3   :  { %12 = vsyncpa [#allocation5], 0  ;;  %s4498_s15 = smov [#allocation6]   ;;  %s4499_s17 = smov [#allocation3]  }
   0x4   :  { %s31_s16 = sshll.u32 %s4498_s15, 4  ;;  %s18_s18 = sshll.u32 %s4499_s17, 4  ;;  %s32_s16 = int_to_ptr.vmem [resolvable:$true] %s31_s16  ;;  %s19_s18 = int_to_ptr.vmem [resolvable:$true] %s18_s18 }
   0x5   :  { %s4398_s19 = scalar_lea.vmem %s32_s16, 256  ;;  %p4403_p1 = scmp.lt.s32.totalorder %s32_s16, %s32_s16 }
   0x6   :  { %p4399_p0 = scmp.ne.s32.totalorder %s32_s16, %s4398_s19  ;;  %p4404_p2 = scmp.lt.s32.totalorder %s4398_s19, %s4398_s19 }
   0x8   :  { %p4405_p3 = por %p4404_p2, %p4403_p1 }
   0xa   :  { %p4406_p4 = pnand %p4405_p3, %p4399_p0 }
   0xc   :  { %4409 = shalt.err (!%p4406_p4)
}
   0xd   :  { %34 = dma.hbm_to_vmem [thread:$0]  %s7062_s1, 256, %s32_s16, [#allocation7]  }
   0xe   :  { %s4418_s22 = scalar_lea.vmem %s19_s18, 512  ;;  %p4423_p6 = scmp.lt.s32.totalorder %s19_s18, %s19_s18 }
   0xf   :  { %p4419_p5 = scmp.ne.s32.totalorder %s19_s18, %s4418_s22  ;;  %p4424_p7 = scmp.lt.s32.totalorder %s4418_s22, %s4418_s22 }
  0x11   :  { %p4425_p8 = por %p4424_p7, %p4423_p6 }
  0x13   :  { %p4426_p9 = pnand %p4425_p8, %p4419_p5 }
  0x15   :  { %4429 = shalt.err (!%p4426_p9)
}
  0x16   :  { %s7086_s23 = smov 256   ;;  %s7357_s24 = smov 16  }
  0x17   :  { %24 = dma.hbm_to_vmem [thread:$0]  %s7061_s0, 512, %s19_s18, [#allocation4], %s7086_s23, %s7086_s23, %s7357_s24  }
  0x18   :  { %s4502_s27 = smov [#allocation8]   ;;  %s4503_s29 = smov [#allocation9]  }
  0x19   :  { %s40_s28 = sshll.u32 %s4502_s27, 4  ;;  %s52_s1 = sshll.u32 %s4503_s29, 4  ;;  %s41_s28 = int_to_ptr.vmem [resolvable:$true] %s40_s28  ;;  %s53_s1 = int_to_ptr.vmem [resolvable:$true] %s52_s1 }
  0x1a   :  { %s4438_s30 = scalar_lea.vmem %s41_s28, 512  ;;  %p4443_p11 = scmp.lt.s32.totalorder %s41_s28, %s41_s28 }
  0x1b   :  { %p4439_p10 = scmp.ne.s32.totalorder %s41_s28, %s4438_s30  ;;  %p4444_p12 = scmp.lt.s32.totalorder %s4438_s30, %s4438_s30 }
  0x1d   :  { %p4445_p13 = por %p4444_p12, %p4443_p11 }
  0x1f   :  { %p4446_p0 = pnand %p4445_p13, %p4439_p10 }
  0x21   :  { %4449 = shalt.err (!%p4446_p0)
}
  0x22   :  { %46 = dma.hbm_to_vmem [thread:$0]  %s7063_s2, 512, %s41_s28, [#allocation7], %s7086_s23, %s7086_s23, %s7357_s24  }
  0x23   :  { %s4458_s0 = scalar_lea.vmem %s53_s1, 768  ;;  %p4463_p2 = scmp.lt.s32.totalorder %s53_s1, %s53_s1 }
  0x24   :  { %p4459_p1 = scmp.ne.s32.totalorder %s53_s1, %s4458_s0  ;;  %p4464_p3 = scmp.lt.s32.totalorder %s4458_s0, %s4458_s0 }
  0x26   :  { %p4465_p4 = por %p4464_p3, %p4463_p2 }
  0x28   :  { %p4466_p5 = pnand %p4465_p4, %p4459_p1 }
  0x2a   :  { %4469 = shalt.err (!%p4466_p5)
}
  0x2b   :  { %58 = dma.hbm_to_vmem [thread:$0]  %s7064_s3, 768, %s53_s1, [#allocation10], %s7086_s23, %s7086_s23, %s7357_s24  }
  0x2c   :  { %4490 = dma.done.wait [#allocation4], 512  }
  0x2d   :  { %4491 = vsyncadd [#allocation4], 4294966784 }
  0x2e   :  { %4492 = dma.done.wait [#allocation7], 768  }
  0x2f   :  { %4493 = vsyncadd [#allocation7], 4294966528 }
  0x30   :  { %4494 = dma.done.wait [#allocation10], 768  }
  0x31   :  { %4495 = vsyncadd [#allocation10], 4294966528  ;;  %v7075_v0 = vlaneseq  ;;  %v7073_v1 = vmov 0.0   ;;  %v71_v6 = vld [vmem:[#allocation6] sm:$0x7f]  ;;  %s7170_s2 = smov 77  }
  0x32   :  { %2119 = vst [vmem:[#allocation2 + $0x300] sm:$0xe0] %v7073_v1  ;;  %2120 = vst [vmem:[#allocation2 + $0x308] sm:$0xe0] %v7073_v1  ;;  %v72_v7 = vld [vmem:[#allocation6 + $0x8] sm:$0x7f] }
  0x33   :  { %2121 = vst [vmem:[#allocation2 + $0x310] sm:$0xe0] %v7073_v1  ;;  %2122 = vst [vmem:[#allocation2 + $0x318] sm:$0xe0] %v7073_v1  ;;  %v79_v2 = vshrl.u32 %v7075_v0, 7  ;;  %s7164_s3 = smov 78  }
  0x34   :  { %v4605_v8 = vld [vmem:[#allocation3 + $0x8] sm:$0xf]  ;;  %v4612_v11 = vld [vmem:[#allocation3] sm:$0xf]  ;;  %v4614_v12 = vld [vmem:[#allocation3 + $0x10] sm:$0xf] }
  0x35   :  { %v80_v3 = vsub.s32 0, %v79_v2  ;;  %v118_v4 = vsub.s32 1, %v79_v2  ;;  %v159_v5 = vsub.s32 2, %v79_v2  ;;  %7438 = vst [vmem:[#allocation16_spill] sm:$0xff] %v4605_v8  ;;  %802 = vst [vmem:[#allocation2 + $0x188] sm:$0xf] %v4605_v8 }
  0x36   :  { %7439 = vst [vmem:[#allocation17_spill] sm:$0xff] %v4612_v11  ;;  %7440 = vst [vmem:[#allocation18_spill] sm:$0xff] %v4614_v12  ;;  %v4618_v13 = vld [vmem:[#allocation3 + $0x18] sm:$0xf]  ;;  %s7168_s9 = smov 79   ;;  %v4636_v17 = vrot.slane %v7073_v1, 4 }
  0x37   :  { %v4607_v9 = vrot.slane %v71_v6, %v80_v3  ;;  %v4609_v10 = vrot.slane %v71_v6, %v118_v4  ;;  %801 = vst [vmem:[#allocation2 + $0x180] sm:$0xf] %v4612_v11  ;;  %1766 = vst [vmem:[#allocation2 + $0x190] sm:$0xf] %v4614_v12  ;;  %v4624_v14 = vrot.slane %v72_v7, %v80_v3  ;;  %s7186_s10 = smov 48   ;;  %v4645_v19 = vrot.slane %v4605_v8, 4 }
  0x38   :  { %7441 = vst [vmem:[#allocation19_spill] sm:$0xff] %v4618_v13  ;;  %v4626_v15 = vrot.slane %v72_v7, %v159_v5  ;;  %1767 = vst [vmem:[#allocation2 + $0x198] sm:$0xf] %v4618_v13  ;;  %v4633_v16 = vrot.slane %v72_v7, %v118_v4  ;;  %v4642_v18 = vrot.slane %v71_v6, %v159_v5  ;;  %v216_v20 = vsub.s32 4, %v79_v2  ;;  %s7162_s11 = smov 81   ;;  %s7144_s12 = smov 82  }
  0x39   :  { %88 = vrot.lane.b32.xlu0 %v4607_v9, %s7170_s2  ;;  %126 = vrot.lane.b32.xlu1 %v4609_v10, %s7164_s3  ;;  %7442 = vst [vmem:[#allocation20_spill] sm:$0xff] %v4636_v17  ;;  %7443 = vst [vmem:[#allocation21_spill] sm:$0xff] %v4645_v19  ;;  %v4652_v21 = vrot.slane %v4612_v11, 4  ;;  %v254_v23 = vsub.s32 5, %v79_v2  ;;  %v295_v26 = vsub.s32 6, %v79_v2  ;;  %s7146_s13 = smov 83  }
  0x3a   :  { %v4654_v22 = vrot.slane %v72_v7, %v216_v20  ;;  %v4660_v24 = vrot.slane %v71_v6, %v216_v20  ;;  %s7138_s14 = smov 93   ;;  %s7140_s15 = smov 94   ;;  %vm7087_vm0 = vcmask 629760   ;;  %vm7085_vm1 = vcmask 646144  }
  0x3b   :  { %7444 = vst [vmem:[#allocation22_spill] sm:$0xff] %v4652_v21  ;;  %v4662_v25 = vrot.slane %v71_v6, %v254_v23  ;;  %v4668_v27 = vrot.slane %v72_v7, %v254_v23  ;;  %v4670_v28 = vrot.slane %v72_v7, %v295_v26  ;;  %v4676_v29 = vrot.slane %v71_v6, %v295_v26  ;;  %s7124_s16 = smov 95   ;;  %s7219_s17 = smov 32  }
  0x3c   :  { %s7107_s18 = smov 97   ;;  %s7122_s19 = smov 98   ;;  %vm7104_vm2 = vcmask 392192   ;;  %vm7083_vm3 = vcmask 662528   ;;  %vm7076_vm4 = vcmask 678912   ;;  %vm7071_vm5 = vcmask 769024  }
  0x3d   :  { %90 = vrot.lane.b32.xlu0 %v4624_v14, %s7170_s2  ;;  %169 = vrot.lane.b32.xlu1 %v4626_v15, %s7168_s9  ;;  %s7101_s20 = smov 99   ;;  %s4519_s21 = smov 51   ;;  %vm7121_vm6 = vcmask 261120   ;;  %vm7068_vm7 = vcmask 801792   ;;  %vm7084_vm8 = vcmask 637952   ;;  %vm7072_vm9 = vcmask 670720  }
  0x3e   :  { %s4520_s22 = smov 49   ;;  %s7267_s25 = smov 47   ;;  %vm7070_vm10 = vcmask 760832   ;;  %vm7069_vm11 = vcmask 777216   ;;  %vm7067_vm12 = vcmask 793600   ;;  %vm7066_vm13 = vcmask 809984  }
  0x3f   :  { %s7314_s26 = smov 45   ;;  %s7324_s27 = smov 34   ;;  %vm109_vm14 = vcmask 416768   ;;  %vm7188_vm15 = vcmask 400384  }
  0x40   :  { %s7231_s28 = smov 30   ;;  %s4525_s29 = smov 50  }
  0x41   :  { %128 = vrot.lane.b32.xlu0 %v4633_v16, %s7164_s3  ;;  %201 = vrot.lane.b32.xlu1 %v4636_v17, %s7186_s10  ;;  %s7303_s1 = smov 46   ;;  %s7306_s30 = smov 35  }
  0x42   :  { %s7322_s5 = smov 33   ;;  %s7331_s6 = smov 31  }
  0x43   :  { %s7347_s0 = smov 29   ;;  %s7105_s7 = smov 109  }
  0x44   :  { %s7355_s8 = smov 19   ;;  %s7099_s23 = smov 110  }
  0x45   :  { %167 = vrot.lane.b32.xlu0 %v4642_v18, %s7168_s9  ;;  %205 = vrot.lane.b32.xlu1 %v4645_v19, %s7186_s10  ;;  %s4545_s3 = smov 126   ;;  %s4546_s9 = smov 2  }
  0x46   :  { %s4547_s2 = smov 127  }
  0x49   :  { %203 = vrot.lane.b32.xlu0 %v4652_v21, %s7186_s10  ;;  %226 = vrot.lane.b32.xlu1 %v4654_v22, %s7162_s11  ;;  %s4548_s10 = smov 1  }
  0x4d   :  { %224 = vrot.lane.b32.xlu0 %v4660_v24, %s7162_s11  ;;  %262 = vrot.lane.b32.xlu1 %v4662_v25, %s7144_s12  ;;  %s7381_s11 = smov 3  }
  0x51   :  { %264 = vrot.lane.b32.xlu0 %v4668_v27, %s7144_s12  ;;  %305 = vrot.lane.b32.xlu1 %v4670_v28, %s7146_s13  ;;  %s4542_s12 = smov 13  }
  0x55   :  { %303 = vrot.lane.b32.xlu0 %v4676_v29, %s7146_s13  ;;  %331 = vrot.lane.b32.xlu1 %v4607_v9, %s7138_s14  ;;  %s4543_s13 = smov 125  }
  0x59   :  { %333 = vrot.lane.b32.xlu0 %v4624_v14, %s7138_s14  ;;  %364 = vrot.lane.b32.xlu1 %v4633_v16, %s7140_s15  ;;  %s7373_s14 = smov 14  }
  0x5d   :  { %362 = vrot.lane.b32.xlu0 %v4609_v10, %s7140_s15  ;;  %390 = vrot.lane.b32.xlu1 %v4642_v18, %s7124_s16  ;;  %s4541_s15 = smov 115  }
  0x61   :  { %392 = vrot.lane.b32.xlu0 %v4626_v15, %s7124_s16  ;;  %423 = vrot.lane.b32.xlu1 %v4612_v11, %s7219_s17  ;;  %s4539_s16 = smov 114  }
  0x65   :  { %421 = vrot.lane.b32.xlu0 %v7073_v1, %s7219_s17  ;;  %434 = vrot.lane.b32.xlu1 %v4660_v24, %s7107_s18 }
  0x69   :  { %425 = vrot.lane.b32.xlu0 %v4605_v8, %s7219_s17  ;;  %467 = vrot.lane.b32.xlu1 %v4668_v27, %s7122_s19  ;;  %s4549_s17 = smov 112  }
  0x6d   :  { %436 = vrot.lane.b32.xlu0 %v4654_v22, %s7107_s18  ;;  %493 = vrot.lane.b32.xlu1 %v4676_v29, %s7101_s20  ;;  %s4537_s18 = smov 113  }
  0x71   :  { %465 = vrot.lane.b32.xlu0 %v4662_v25, %s7122_s19  ;;  %s7377_s19 = smov 15  }
  0x75   :  { %495 = vrot.lane.b32.xlu0 %v4670_v28, %s7101_s20  ;;  %s4535_s20 = smov 111  }
  0xab   :  { %v89_v30 = vpop.permute.xlu0 %88  ;;  %v4710_v31 = vpop.permute.xlu1 %126 }
  0xac   :  { %v97_v32 = vmul.f32 0.0, %v89_v30 }
  0xae   :  { %103 = vrot.lane.b32.xlu1 %v97_v32, %s4519_s21 }
  0xaf   :  { %v4713_v33 = vpop.permute.xlu0 %90  ;;  %v4715_v34 = vpop.permute.xlu1 %169 }
  0xb0   :  { %7445 = vst [vmem:[#allocation23_spill] sm:$0xff] %v4713_v33  ;;  %7446 = vst [vmem:[#allocation24_spill] sm:$0xff] %v4715_v34  ;;  %v99_v35 = vmul.f32 %v4713_v33, %v4605_v8  ;;  %v4721_v36 = vsel %vm7087_vm0, %v89_v30, %v4713_v33  ;;  %v178_v49 = vmul.f32 %v4715_v34, %v4605_v8  ;;  %vm7149_vm0 = vcmask 154624  }
  0xb1   :  { %7447 = vst [vmem:[#allocation25_spill] sm:$0xff] %v4721_v36  ;;  %v98_v37 = vmul.f32 %v4721_v36, %v4612_v11 }
  0xb2   :  { %107 = vrot.lane.b32.xlu0 %v99_v35, %s4519_s21 }
  0xb3   :  { %105 = vrot.lane.b32.xlu1 %v98_v37, %s4519_s21  ;;  %v4727_v38 = vpop.permute.xlu0 %128  ;;  %v4729_v39 = vpop.permute.xlu1 %201 }
  0xb4   :  { %7448 = vst [vmem:[#allocation26_spill] sm:$0xff] %v4727_v38  ;;  %7449 = vst [vmem:[#allocation27_spill] sm:$0xff] %v4729_v39 }
  0xb7   :  { %v168_v40 = vpop.permute.xlu0 %167  ;;  %v206_v41 = vpop.permute.xlu1 %205 }
  0xb8   :  { %v4733_v42 = vsel %vm7085_vm1, %v168_v40, %v4715_v34  ;;  %v176_v43 = vmul.f32 0.0, %v168_v40  ;;  %vm7088_vm1 = vcmask 891904  }
  0xb9   :  { %7450 = vst [vmem:[#allocation28_spill] sm:$0xff] %v4733_v42  ;;  %v177_v44 = vmul.f32 %v4733_v42, %v4612_v11 }
  0xba   :  { %182 = vrot.lane.b32.xlu0 %v176_v43, %s4520_s22 }
  0xbb   :  { %184 = vrot.lane.b32.xlu1 %v177_v44, %s4520_s22  ;;  %v204_v45 = vpop.permute.xlu0 %203  ;;  %v4739_v46 = vpop.permute.xlu1 %226 }
  0xbc   :  { %7451 = vst [vmem:[#allocation29_spill] sm:$0xff] %v4739_v46  ;;  %v208_v47 = vsel %vm7104_vm2, %v4729_v39, %v204_v45  ;;  %v209_v48 = vsel %vm7104_vm2, %v204_v45, %v206_v41  ;;  %v235_v55 = vmul.f32 %v4739_v46, %v4605_v8  ;;  %vm7269_vm2 = vcmask 908288  }
  0xbd   :  { %212 = vst [vmem:[#allocation2 + $0x20] sm:$0xf0] %v208_v47  ;;  %213 = vst [vmem:[#allocation2 + $0x28] sm:$0xf0] %v209_v48 }
  0xbe   :  { %186 = vrot.lane.b32.xlu0 %v178_v49, %s4520_s22  ;;  %v135_v49 = vmul.f32 0.0, %v4710_v31 }
  0xbf   :  { %v225_v50 = vpop.permute.xlu0 %224  ;;  %v4747_v51 = vpop.permute.xlu1 %262 }
  0xc0   :  { %v4751_v52 = vsel %vm7083_vm3, %v225_v50, %v4739_v46  ;;  %v233_v53 = vmul.f32 0.0, %v225_v50  ;;  %vm7110_vm3 = vcmask 252928  }
  0xc1   :  { %7452 = vst [vmem:[#allocation30_spill] sm:$0xff] %v4751_v52  ;;  %v234_v54 = vmul.f32 %v4751_v52, %v4612_v11 }
  0xc2   :  { %239 = vrot.lane.b32.xlu0 %v233_v53, %s7267_s25  ;;  %v4817_v53 = vsel %vm7084_vm8, %v4710_v31, %v4727_v38  ;;  %vm7142_vm8 = vcmask 236544  }
  0xc3   :  { %241 = vrot.lane.b32.xlu1 %v234_v54, %s7267_s25  ;;  %v4759_v56 = vpop.permute.xlu0 %264  ;;  %v4761_v57 = vpop.permute.xlu1 %305  ;;  %7464 = vst [vmem:[#allocation42_spill] sm:$0xff] %v4817_v53 }
  0xc4   :  { %7453 = vst [vmem:[#allocation31_spill] sm:$0xff] %v4759_v56  ;;  %7454 = vst [vmem:[#allocation32_spill] sm:$0xff] %v4761_v57  ;;  %v314_v63 = vmul.f32 %v4761_v57, %v4605_v8  ;;  %v4830_v31 = vsel %vm7072_vm9, %v4747_v51, %v4759_v56  ;;  %vm7127_vm9 = vcmask 285696  }
  0xc5   :  { %7465 = vst [vmem:[#allocation43_spill] sm:$0xff] %v4830_v31 }
  0xc6   :  { %243 = vrot.lane.b32.xlu0 %v235_v55, %s7267_s25  ;;  %v136_v55 = vmul.f32 %v4817_v53, %v4612_v11 }
  0xc7   :  { %v304_v58 = vpop.permute.xlu0 %303  ;;  %v4764_v59 = vpop.permute.xlu1 %331 }
  0xc8   :  { %v4768_v60 = vsel %vm7076_vm4, %v304_v58, %v4761_v57  ;;  %v312_v61 = vmul.f32 0.0, %v304_v58  ;;  %v141_v58 = vrot.slane %v135_v49, 4  ;;  %vm7109_vm4 = vcmask 269312  }
  0xc9   :  { %7455 = vst [vmem:[#allocation33_spill] sm:$0xff] %v4768_v60  ;;  %v313_v62 = vmul.f32 %v4768_v60, %v4612_v11 }
  0xca   :  { %318 = vrot.lane.b32.xlu0 %v312_v61, %s7314_s26  ;;  %v137_v61 = vmul.f32 %v4727_v38, %v4605_v8 }
  0xcb   :  { %320 = vrot.lane.b32.xlu1 %v313_v62, %s7314_s26  ;;  %v4776_v2 = vpop.permute.xlu0 %333  ;;  %v4778_v3 = vpop.permute.xlu1 %364  ;;  %v142_v62 = vrot.slane %v136_v55, 4 }
  0xcc   :  { %7456 = vst [vmem:[#allocation34_spill] sm:$0xff] %v4776_v2  ;;  %7457 = vst [vmem:[#allocation35_spill] sm:$0xff] %v4778_v3  ;;  %v373_v23 = vmul.f32 %v4778_v3, %v4605_v8 }
  0xce   :  { %322 = vrot.lane.b32.xlu0 %v314_v63, %s7314_s26  ;;  %v272_v63 = vmul.f32 %v4830_v31, %v4612_v11 }
  0xcf   :  { %v363_v4 = vpop.permute.xlu0 %362  ;;  %v4781_v5 = vpop.permute.xlu1 %390 }
  0xd0   :  { %v4785_v6 = vsel %vm7071_vm5, %v363_v4, %v4778_v3  ;;  %v371_v7 = vmul.f32 0.0, %v363_v4  ;;  %v271_v4 = vmul.f32 0.0, %v4747_v51  ;;  %vm7172_vm5 = vcmask 375808  }
  0xd1   :  { %7458 = vst [vmem:[#allocation36_spill] sm:$0xff] %v4785_v6  ;;  %v372_v20 = vmul.f32 %v4785_v6, %v4612_v11 }
  0xd2   :  { %377 = vrot.lane.b32.xlu0 %v371_v7, %s7324_s27  ;;  %v143_v7 = vrot.slane %v137_v61, 4 }
  0xd3   :  { %379 = vrot.lane.b32.xlu1 %v372_v20, %s7324_s27  ;;  %v4793_v26 = vpop.permute.xlu0 %392  ;;  %v424_v30 = vpop.permute.xlu1 %423  ;;  %v4840_v20 = vsel %vm7070_vm10, %v4764_v59, %v4776_v2  ;;  %vm150_vm10 = vcmask 408576  }
  0xd4   :  { %7459 = vst [vmem:[#allocation37_spill] sm:$0xff] %v4793_v26  ;;  %7466 = vst [vmem:[#allocation44_spill] sm:$0xff] %v4840_v20  ;;  %v4851_v51 = vsel %vm7069_vm11, %v4781_v5, %v4793_v26  ;;  %vm7143_vm11 = vcmask 244736  }
  0xd5   :  { %7467 = vst [vmem:[#allocation45_spill] sm:$0xff] %v4851_v51 }
  0xd6   :  { %381 = vrot.lane.b32.xlu0 %v373_v23, %s7324_s27  ;;  %v278_v23 = vrot.slane %v272_v63, 4  ;;  %v342_v63 = vmul.f32 %v4776_v2, %v4605_v8 }
  0xd7   :  { %v4796_v32 = vpop.permute.xlu0 %421  ;;  %v4800_v40 = vpop.permute.xlu1 %434 }
  0xd8   :  { %7460 = vst [vmem:[#allocation38_spill] sm:$0xff] %v4796_v32  ;;  %v428_v35 = vsel %vm7121_vm6, %v4796_v32, %v424_v30 }
  0xd9   :  { %432 = vst [vmem:[#allocation2 + $0xa0] sm:$0xf] %v428_v35  ;;  %v277_v35 = vrot.slane %v271_v4, 4 }
  0xdb   :  { %v426_v37 = vpop.permute.xlu0 %425  ;;  %v4805_v44 = vpop.permute.xlu1 %467 }
  0xdc   :  { %v429_v41 = vsel %vm7121_vm6, %v424_v30, %v426_v37  ;;  %7462 = vst [vmem:[#allocation40_spill] sm:$0xff] %v4805_v44  ;;  %v476_v54 = vmul.f32 %v4805_v44, %v4605_v8  ;;  %v341_v30 = vmul.f32 %v4840_v20, %v4612_v11  ;;  %v273_v37 = vmul.f32 %v4759_v56, %v4605_v8 }
  0xdd   :  { %433 = vst [vmem:[#allocation2 + $0xa8] sm:$0xf] %v429_v41  ;;  %vm628_vm6 = vcmask 924672  }
  0xde   :  { %v347_v41 = vrot.slane %v341_v30, 4  ;;  %v348_v30 = vrot.slane %v342_v63, 4 }
  0xdf   :  { %v4803_v43 = vpop.permute.xlu0 %436 }
  0xe0   :  { %7461 = vst [vmem:[#allocation39_spill] sm:$0xff] %v4803_v43  ;;  %v4863_v55 = vsel %vm7067_vm12, %v4800_v40, %v4803_v43  ;;  %vm7167_vm12 = vcmask 367616  }
  0xe1   :  { %7469 = vst [vmem:[#allocation47_spill] sm:$0xff] %v4863_v55 }
  0xe3   :  { %v466_v45 = vpop.permute.xlu0 %465 }
  0xe4   :  { %v4809_v47 = vsel %vm7068_vm7, %v466_v45, %v4805_v44  ;;  %v474_v48 = vmul.f32 0.0, %v466_v45  ;;  %v400_v45 = vmul.f32 %v4851_v51, %v4612_v11  ;;  %vm7126_vm7 = vcmask 277504  }
  0xe5   :  { %7463 = vst [vmem:[#allocation41_spill] sm:$0xff] %v4809_v47  ;;  %v475_v50 = vmul.f32 %v4809_v47, %v4612_v11 }
  0xe6   :  { %480 = vrot.lane.b32.xlu0 %v474_v48, %s7231_s28  ;;  %v494_v48 = vpop.permute.xlu1 %493  ;;  %v406_v61 = vrot.slane %v400_v45, 4  ;;  %v443_v45 = vmul.f32 0.0, %v4800_v40 }
  0xe7   :  { %482 = vrot.lane.b32.xlu1 %v475_v50, %s7231_s28  ;;  %v4857_v49 = vpop.permute.xlu0 %495  ;;  %v340_v50 = vmul.f32 0.0, %v4764_v59 }
  0xe8   :  { %7468 = vst [vmem:[#allocation46_spill] sm:$0xff] %v4857_v49  ;;  %v504_v40 = vmul.f32 %v4857_v49, %v4605_v8 }
  0xe9   :  { %v346_v59 = vrot.slane %v340_v50, 4 }
  0xea   :  { %484 = vrot.lane.b32.xlu0 %v476_v54, %s7231_s28  ;;  %v279_v54 = vrot.slane %v273_v37, 4  ;;  %v510_v63 = vrot.slane %v504_v40, 4 }
  0xeb   :  { %144 = vrot.lane.b32.xlu1 %v141_v58, %s4525_s29  ;;  %v4869_v58 = vsel %vm7066_vm13, %v494_v48, %v4857_v49  ;;  %vm7173_vm13 = vcmask 384000  }
  0xec   :  { %7470 = vst [vmem:[#allocation48_spill] sm:$0xff] %v4869_v58  ;;  %v503_v4 = vmul.f32 %v4869_v58, %v4612_v11 }
  0xee   :  { %146 = vrot.lane.b32.xlu0 %v142_v62, %s4525_s29  ;;  %v444_v62 = vmul.f32 %v4863_v55, %v4612_v11 }
  0xef   :  { %148 = vrot.lane.b32.xlu1 %v143_v7, %s4525_s29 }
  0xf0   :  { %v450_v7 = vrot.slane %v444_v62, 4 }
  0xf2   :  { %282 = vrot.lane.b32.xlu0 %v278_v23, %s7303_s1  ;;  %v399_v23 = vmul.f32 0.0, %v4781_v5  ;;  %v449_v5 = vrot.slane %v443_v45, 4 }
  0xf3   :  { %280 = vrot.lane.b32.xlu1 %v277_v35, %s7303_s1  ;;  %v509_v35 = vrot.slane %v503_v4, 4 }
  0xf4   :  { %v405_v37 = vrot.slane %v399_v23, 4 }
  0xf6   :  { %351 = vrot.lane.b32.xlu0 %v347_v41, %s7306_s30  ;;  %v401_v41 = vmul.f32 %v4793_v26, %v4605_v8 }
  0xf7   :  { %284 = vrot.lane.b32.xlu1 %v279_v54, %s7303_s1  ;;  %v445_v54 = vmul.f32 %v4803_v43, %v4605_v8 }
  0xf8   :  { %v407_v50 = vrot.slane %v401_v41, 4 }
  0xf9   :  { %v451_v62 = vrot.slane %v445_v54, 4 }
  0xfa   :  { %410 = vrot.lane.b32.xlu0 %v406_v61, %s7322_s5  ;;  %v502_v61 = vmul.f32 0.0, %v494_v48 }
  0xfb   :  { %349 = vrot.lane.b32.xlu1 %v346_v59, %s7306_s30 }
  0xfc   :  { %v508_v59 = vrot.slane %v502_v61, 4 }
  0xfe   :  { %454 = vrot.lane.b32.xlu0 %v450_v7, %s7331_s6 }
  0xff   :  { %353 = vrot.lane.b32.xlu1 %v348_v30, %s7306_s30 }
 0x102   :  { %513 = vrot.lane.b32.xlu0 %v509_v35, %s7347_s0 }
 0x103   :  { %408 = vrot.lane.b32.xlu1 %v405_v37, %s7322_s5 }
 0x106   :  { %524 = vrot.lane.b32.xlu0 %v4607_v9, %s7105_s7 }
 0x107   :  { %412 = vrot.lane.b32.xlu1 %v407_v50, %s7322_s5 }
 0x10b   :  { %452 = vrot.lane.b32.xlu1 %v449_v5, %s7331_s6 }
 0x10f   :  { %456 = vrot.lane.b32.xlu1 %v451_v62, %s7331_s6 }
 0x113   :  { %511 = vrot.lane.b32.xlu1 %v508_v59, %s7347_s0 }
 0x117   :  { %515 = vrot.lane.b32.xlu1 %v510_v63, %s7347_s0 }
 0x11b   :  { %526 = vrot.lane.b32.xlu1 %v4624_v14, %s7105_s7  ;;  %s7369_s7 = smov 17  }
 0x120   :  { %v4900_v4 = vpop.permute.xlu1 %103 }
 0x121   :  { %7471 = vst [vmem:[#allocation49_spill] sm:$0xff] %v4900_v4 }
 0x124   :  { %v108_v7 = vpop.permute.xlu0 %107 }
 0x125   :  { %v106_v48 = vpop.permute.xlu1 %105 }
 0x126   :  { %v110_v23 = vsel %vm109_vm14, %v4900_v4, %v106_v48  ;;  %v111_v30 = vsel %vm109_vm14, %v106_v48, %v108_v7 }
 0x127   :  { %114 = vst [vmem:[#allocation2] sm:$0xf] %v110_v23  ;;  %115 = vst [vmem:[#allocation2 + $0x8] sm:$0xf] %v111_v30 }
 0x12c   :  { %v4905_v35 = vpop.permute.xlu0 %182 }
 0x12d   :  { %7472 = vst [vmem:[#allocation50_spill] sm:$0xff] %v4905_v35  ;;  %v185_v37 = vpop.permute.xlu1 %184 }
 0x12e   :  { %v189_v41 = vsel %vm7188_vm15, %v4905_v35, %v185_v37 }
 0x12f   :  { %193 = vst [vmem:[#allocation2 + $0x20] sm:$0xf] %v189_v41 }
 0x130   :  { %v187_v45 = vpop.permute.xlu0 %186 }
 0x131   :  { %v190_v50 = vsel %vm7188_vm15, %v185_v37, %v187_v45  ;;  %vm794_vm15 = vcmask 7168  }
 0x132   :  { %194 = vst [vmem:[#allocation2 + $0x28] sm:$0xf] %v190_v50 }
 0x134   :  { %v4910_v5 = vpop.permute.xlu0 %239 }
 0x135   :  { %7473 = vst [vmem:[#allocation51_spill] sm:$0xff] %v4910_v5  ;;  %v242_v54 = vpop.permute.xlu1 %241 }
 0x136   :  { %v246_v61 = vsel %vm7173_vm13, %v4910_v5, %v242_v54 }
 0x137   :  { %250 = vst [vmem:[#allocation2 + $0x40] sm:$0xf] %v246_v61 }
 0x138   :  { %v244_v62 = vpop.permute.xlu0 %243 }
 0x139   :  { %v247_v59 = vsel %vm7173_vm13, %v242_v54, %v244_v62  ;;  %vm774_vm13 = vcmask 1039360  }
 0x13a   :  { %251 = vst [vmem:[#allocation2 + $0x48] sm:$0xf] %v247_v59 }
 0x13c   :  { %v4915_v40 = vpop.permute.xlu0 %318 }
 0x13d   :  { %7474 = vst [vmem:[#allocation52_spill] sm:$0xff] %v4915_v40  ;;  %v321_v63 = vpop.permute.xlu1 %320 }
 0x13e   :  { %v325_v7 = vsel %vm7167_vm12, %v4915_v40, %v321_v63 }
 0x13f   :  { %329 = vst [vmem:[#allocation2 + $0x60] sm:$0xf] %v325_v7 }
 0x140   :  { %v323_v48 = vpop.permute.xlu0 %322 }
 0x141   :  { %v326_v23 = vsel %vm7167_vm12, %v321_v63, %v323_v48  ;;  %vm746_vm12 = vcmask 1031168  }
 0x142   :  { %330 = vst [vmem:[#allocation2 + $0x68] sm:$0xf] %v326_v23 }
 0x144   :  { %v4920_v30 = vpop.permute.xlu0 %377 }
 0x145   :  { %7475 = vst [vmem:[#allocation53_spill] sm:$0xff] %v4920_v30  ;;  %v380_v37 = vpop.permute.xlu1 %379 }
 0x146   :  { %v384_v41 = vsel %vm7126_vm7, %v4920_v30, %v380_v37 }
 0x147   :  { %388 = vst [vmem:[#allocation2 + $0x80] sm:$0xf] %v384_v41 }
 0x148   :  { %v382_v45 = vpop.permute.xlu0 %381 }
 0x149   :  { %v385_v50 = vsel %vm7126_vm7, %v380_v37, %v382_v45  ;;  %vm7340_vm7 = vcmask 121856  }
 0x14a   :  { %389 = vst [vmem:[#allocation2 + $0x88] sm:$0xf] %v385_v50 }
 0x158   :  { %v4925_v54 = vpop.permute.xlu0 %480 }
 0x159   :  { %7476 = vst [vmem:[#allocation54_spill] sm:$0xff] %v4925_v54  ;;  %v483_v61 = vpop.permute.xlu1 %482 }
 0x15a   :  { %v487_v62 = vsel %vm7143_vm11, %v4925_v54, %v483_v61 }
 0x15b   :  { %491 = vst [vmem:[#allocation2 + $0xc0] sm:$0xf] %v487_v62 }
 0x15c   :  { %v485_v59 = vpop.permute.xlu0 %484 }
 0x15d   :  { %v488_v63 = vsel %vm7143_vm11, %v483_v61, %v485_v59  ;;  %v4930_v7 = vpop.permute.xlu1 %144  ;;  %vm687_vm11 = vcmask 941056  }
 0x15e   :  { %7477 = vst [vmem:[#allocation55_spill] sm:$0xff] %v4930_v7  ;;  %492 = vst [vmem:[#allocation2 + $0xc8] sm:$0xf] %v488_v63 }
 0x160   :  { %v147_v48 = vpop.permute.xlu0 %146 }
 0x161   :  { %v151_v23 = vsel %vm150_vm10, %v4930_v7, %v147_v48  ;;  %v149_v37 = vpop.permute.xlu1 %148 }
 0x162   :  { %155 = vst [vmem:[#allocation2] sm:$0xf0] %v151_v23  ;;  %v152_v41 = vsel %vm150_vm10, %v147_v48, %v149_v37 }
 0x163   :  { %156 = vst [vmem:[#allocation2 + $0x8] sm:$0xf0] %v152_v41 }
 0x164   :  { %v283_v45 = vpop.permute.xlu0 %282 }
 0x165   :  { %v4935_v50 = vpop.permute.xlu1 %280 }
 0x166   :  { %7478 = vst [vmem:[#allocation56_spill] sm:$0xff] %v4935_v50  ;;  %v287_v61 = vsel %vm7172_vm5, %v4935_v50, %v283_v45 }
 0x167   :  { %291 = vst [vmem:[#allocation2 + $0x40] sm:$0xf0] %v287_v61 }
 0x168   :  { %v352_v62 = vpop.permute.xlu0 %351 }
 0x169   :  { %v285_v59 = vpop.permute.xlu1 %284 }
 0x16a   :  { %v288_v63 = vsel %vm7172_vm5, %v283_v45, %v285_v59  ;;  %vm763_vm5 = vcmask 15360  }
 0x16b   :  { %292 = vst [vmem:[#allocation2 + $0x48] sm:$0xf0] %v288_v63 }
 0x16c   :  { %v411_v1 = vpop.permute.xlu0 %410 }
 0x16d   :  { %v4940_v0 = vpop.permute.xlu1 %349 }
 0x16e   :  { %7479 = vst [vmem:[#allocation57_spill] sm:$0xff] %v4940_v0  ;;  %v356_v48 = vsel %vm7127_vm9, %v4940_v0, %v352_v62 }
 0x16f   :  { %360 = vst [vmem:[#allocation2 + $0x60] sm:$0xf0] %v356_v48 }
 0x170   :  { %v455_v23 = vpop.permute.xlu0 %454 }
 0x171   :  { %v354_v37 = vpop.permute.xlu1 %353 }
 0x172   :  { %v357_v41 = vsel %vm7127_vm9, %v352_v62, %v354_v37  ;;  %vm656_vm9 = vcmask 932864  }
 0x173   :  { %361 = vst [vmem:[#allocation2 + $0x68] sm:$0xf0] %v357_v41 }
 0x174   :  { %v514_v61 = vpop.permute.xlu0 %513 }
 0x175   :  { %v4945_v7 = vpop.permute.xlu1 %408 }
 0x176   :  { %7480 = vst [vmem:[#allocation58_spill] sm:$0xff] %v4945_v7  ;;  %v415_v45 = vsel %vm7109_vm4, %v4945_v7, %v411_v1 }
 0x177   :  { %419 = vst [vmem:[#allocation2 + $0x80] sm:$0xf0] %v415_v45 }
 0x178   :  { %v525_v59 = vpop.permute.xlu0 %524 }
 0x179   :  { %v413_v63 = vpop.permute.xlu1 %412  ;;  %v533_v4 = vmul.f32 0.0, %v525_v59 }
 0x17a   :  { %v416_v39 = vsel %vm7109_vm4, %v411_v1, %v413_v63  ;;  %vm7337_vm4 = vcmask 138240  }
 0x17b   :  { %420 = vst [vmem:[#allocation2 + $0x88] sm:$0xf0] %v416_v39  ;;  %539 = vrot.lane.b32.xlu0 %v533_v4, %s7355_s8 }
 0x17d   :  { %v4951_v62 = vpop.permute.xlu1 %452 }
 0x17e   :  { %7481 = vst [vmem:[#allocation59_spill] sm:$0xff] %v4951_v62  ;;  %v459_v48 = vsel %vm7110_vm3, %v4951_v62, %v455_v23 }
 0x17f   :  { %463 = vst [vmem:[#allocation2 + $0xa0] sm:$0xf0] %v459_v48 }
 0x181   :  { %v457_v37 = vpop.permute.xlu1 %456 }
 0x182   :  { %v460_v41 = vsel %vm7110_vm3, %v455_v23, %v457_v37  ;;  %vm7166_vm3 = vcmask 130048  }
 0x183   :  { %464 = vst [vmem:[#allocation2 + $0xa8] sm:$0xf0] %v460_v41 }
 0x185   :  { %v4956_v45 = vpop.permute.xlu1 %511 }
 0x186   :  { %7482 = vst [vmem:[#allocation60_spill] sm:$0xff] %v4956_v45  ;;  %v518_v1 = vsel %vm7142_vm8, %v4956_v45, %v514_v61 }
 0x187   :  { %522 = vst [vmem:[#allocation2 + $0xc0] sm:$0xf0] %v518_v1 }
 0x189   :  { %v516_v39 = vpop.permute.xlu1 %515 }
 0x18a   :  { %v519_v4 = vsel %vm7142_vm8, %v514_v61, %v516_v39  ;;  %vm7224_vm8 = vcmask 113664  }
 0x18b   :  { %523 = vst [vmem:[#allocation2 + $0xc8] sm:$0xf0] %v519_v4 }
 0x18d   :  { %v4961_v63 = vpop.permute.xlu1 %526 }
 0x18e   :  { %7483 = vst [vmem:[#allocation61_spill] sm:$0xff] %v4961_v63  ;;  %v535_v48 = vmul.f32 %v4961_v63, %v4605_v8  ;;  %v4967_v23 = vsel %vm7088_vm1, %v525_v59, %v4961_v63  ;;  %vm7103_vm1 = vcmask 900096  }
 0x18f   :  { %7484 = vst [vmem:[#allocation62_spill] sm:$0xff] %v4967_v23  ;;  %v534_v37 = vmul.f32 %v4967_v23, %v4612_v11 }
 0x190   :  { %543 = vrot.lane.b32.xlu0 %v535_v48, %s7355_s8 }
 0x191   :  { %541 = vrot.lane.b32.xlu1 %v534_v37, %s7355_s8 }
 0x194   :  { %554 = vrot.lane.b32.xlu0 %v4633_v16, %s7099_s23 }
 0x195   :  { %552 = vrot.lane.b32.xlu1 %v4609_v10, %s7099_s23  ;;  %s7349_s23 = smov 18  }
 0x1ed   :  { %v4977_v61 = vpop.permute.xlu0 %539 }
 0x1ee   :  { %7485 = vst [vmem:[#allocation63_spill] sm:$0xff] %v4977_v61 }
 0x202   :  { %v544_v41 = vpop.permute.xlu0 %543 }
 0x203   :  { %v542_v59 = vpop.permute.xlu1 %541 }
 0x204   :  { %v546_v1 = vsel %vm7149_vm0, %v4977_v61, %v542_v59  ;;  %v547_v39 = vsel %vm7149_vm0, %v542_v59, %v544_v41  ;;  %vm715_vm0 = vcmask 1022976  }
 0x205   :  { %550 = vst [vmem:[#allocation2 + $0xe0] sm:$0xf] %v546_v1  ;;  %551 = vst [vmem:[#allocation2 + $0xe8] sm:$0xf] %v547_v39 }
 0x206   :  { %v4982_v4 = vpop.permute.xlu0 %554 }
 0x207   :  { %7486 = vst [vmem:[#allocation64_spill] sm:$0xff] %v4982_v4  ;;  %v553_v48 = vpop.permute.xlu1 %552  ;;  %v563_v50 = vmul.f32 %v4982_v4, %v4605_v8 }
 0x208   :  { %v4986_v37 = vsel %vm7103_vm1, %v553_v48, %v4982_v4  ;;  %v561_v35 = vmul.f32 0.0, %v553_v48  ;;  %vm7148_vm1 = vcmask 146432  }
 0x209   :  { %7487 = vst [vmem:[#allocation65_spill] sm:$0xff] %v4986_v37  ;;  %v562_v5 = vmul.f32 %v4986_v37, %v4612_v11  ;;  %v569_v41 = vrot.slane %v563_v50, 4 }
 0x20a   :  { %v567_v0 = vrot.slane %v561_v35, 4 }
 0x20b   :  { %v568_v40 = vrot.slane %v562_v5, 4 }
 0x20c   :  { %570 = vrot.lane.b32.xlu1 %v567_v0, %s7349_s23 }
 0x20d   :  { %572 = vrot.lane.b32.xlu0 %v568_v40, %s7349_s23 }
 0x210   :  { %574 = vrot.lane.b32.xlu1 %v569_v41, %s7349_s23 }
 0x211   :  { %583 = vrot.lane.b32.xlu0 %v4642_v18, %s4535_s20 }
 0x214   :  { %585 = vrot.lane.b32.xlu1 %v4626_v15, %s4535_s20 }
 0x27e   :  { %v4999_v59 = vpop.permute.xlu1 %570 }
 0x27f   :  { %7488 = vst [vmem:[#allocation66_spill] sm:$0xff] %v4999_v59  ;;  %v573_v35 = vpop.permute.xlu0 %572 }
 0x280   :  { %v577_v5 = vsel %vm7148_vm1, %v4999_v59, %v573_v35 }
 0x281   :  { %581 = vst [vmem:[#allocation2 + $0xe0] sm:$0xf0] %v577_v5 }
 0x282   :  { %v575_v0 = vpop.permute.xlu1 %574 }
 0x283   :  { %v578_v40 = vsel %vm7148_vm1, %v573_v35, %v575_v0  ;;  %v584_v50 = vpop.permute.xlu0 %583  ;;  %vm7385_vm1 = vcmask 105472  }
 0x284   :  { %582 = vst [vmem:[#allocation2 + $0xe8] sm:$0xf0] %v578_v40  ;;  %v592_v1 = vmul.f32 0.0, %v584_v50 }
 0x286   :  { %v5004_v39 = vpop.permute.xlu1 %585  ;;  %598 = vrot.lane.b32.xlu0 %v592_v1, %s7369_s7 }
 0x287   :  { %7489 = vst [vmem:[#allocation67_spill] sm:$0xff] %v5004_v39  ;;  %v594_v48 = vmul.f32 %v5004_v39, %v4605_v8  ;;  %v5011_v41 = vsel %vm7269_vm2, %v584_v50, %v5004_v39 }
 0x288   :  { %7490 = vst [vmem:[#allocation68_spill] sm:$0xff] %v5011_v41  ;;  %v593_v5 = vmul.f32 %v5011_v41, %v4612_v11 }
 0x28a   :  { %602 = vrot.lane.b32.xlu0 %v594_v48, %s7369_s7  ;;  %600 = vrot.lane.b32.xlu1 %v593_v5, %s7369_s7 }
 0x28e   :  { %613 = vrot.lane.b32.xlu0 %v4652_v21, %s7357_s24  ;;  %611 = vrot.lane.b32.xlu1 %v4636_v17, %s7357_s24 }
 0x292   :  { %624 = vrot.lane.b32.xlu0 %v4660_v24, %s4537_s18  ;;  %615 = vrot.lane.b32.xlu1 %v4645_v19, %s7357_s24 }
 0x296   :  { %626 = vrot.lane.b32.xlu1 %v4654_v22, %s4537_s18 }
 0x2f8   :  { %v5027_v35 = vpop.permute.xlu0 %598 }
 0x2f9   :  { %7491 = vst [vmem:[#allocation69_spill] sm:$0xff] %v5027_v35 }
 0x2fc   :  { %v603_v0 = vpop.permute.xlu0 %602  ;;  %v601_v40 = vpop.permute.xlu1 %600 }
 0x2fd   :  { %v605_v50 = vsel %vm7337_vm4, %v5027_v35, %v601_v40  ;;  %v606_v1 = vsel %vm7337_vm4, %v601_v40, %v603_v0 }
 0x2fe   :  { %609 = vst [vmem:[#allocation2 + $0x100] sm:$0xf] %v605_v50  ;;  %610 = vst [vmem:[#allocation2 + $0x108] sm:$0xf] %v606_v1 }
 0x300   :  { %v614_v48 = vpop.permute.xlu0 %613  ;;  %v5032_v5 = vpop.permute.xlu1 %611 }
 0x301   :  { %7492 = vst [vmem:[#allocation70_spill] sm:$0xff] %v5032_v5  ;;  %v618_v7 = vsel %vm7166_vm3, %v5032_v5, %v614_v48 }
 0x302   :  { %622 = vst [vmem:[#allocation2 + $0x100] sm:$0xf0] %v618_v7 }
 0x304   :  { %v625_v30 = vpop.permute.xlu0 %624  ;;  %v616_v62 = vpop.permute.xlu1 %615 }
 0x305   :  { %v633_v32 = vmul.f32 0.0, %v625_v30  ;;  %v619_v45 = vsel %vm7166_vm3, %v614_v48, %v616_v62  ;;  %vm7326_vm3 = vcmask 23552  }
 0x306   :  { %623 = vst [vmem:[#allocation2 + $0x108] sm:$0xf0] %v619_v45 }
 0x307   :  { %639 = vrot.lane.b32.xlu0 %v633_v32, %s7377_s19 }
 0x308   :  { %v5038_v0 = vpop.permute.xlu1 %626 }
 0x309   :  { %7493 = vst [vmem:[#allocation71_spill] sm:$0xff] %v5038_v0  ;;  %v635_v40 = vmul.f32 %v5038_v0, %v4605_v8  ;;  %v5044_v50 = vsel %vm628_vm6, %v625_v30, %v5038_v0 }
 0x30a   :  { %7494 = vst [vmem:[#allocation72_spill] sm:$0xff] %v5044_v50  ;;  %v634_v7 = vmul.f32 %v5044_v50, %v4612_v11 }
 0x30b   :  { %643 = vrot.lane.b32.xlu0 %v635_v40, %s7377_s19 }
 0x30c   :  { %641 = vrot.lane.b32.xlu1 %v634_v7, %s7377_s19 }
 0x30f   :  { %654 = vrot.lane.b32.xlu0 %v4668_v27, %s4539_s16 }
 0x310   :  { %652 = vrot.lane.b32.xlu1 %v4662_v25, %s4539_s16 }
 0x379   :  { %v5054_v32 = vpop.permute.xlu0 %639 }
 0x37a   :  { %7495 = vst [vmem:[#allocation73_spill] sm:$0xff] %v5054_v32 }
 0x37d   :  { %v644_v62 = vpop.permute.xlu0 %643 }
 0x37e   :  { %v642_v30 = vpop.permute.xlu1 %641 }
 0x37f   :  { %v646_v45 = vsel %vm7340_vm7, %v5054_v32, %v642_v30  ;;  %v647_v1 = vsel %vm7340_vm7, %v642_v30, %v644_v62 }
 0x380   :  { %650 = vst [vmem:[#allocation2 + $0x120] sm:$0xf] %v646_v45  ;;  %651 = vst [vmem:[#allocation2 + $0x128] sm:$0xf] %v647_v1 }
 0x381   :  { %v5059_v48 = vpop.permute.xlu0 %654 }
 0x382   :  { %7496 = vst [vmem:[#allocation74_spill] sm:$0xff] %v5059_v48  ;;  %v653_v40 = vpop.permute.xlu1 %652  ;;  %v663_v59 = vmul.f32 %v5059_v48, %v4605_v8 }
 0x383   :  { %v5063_v7 = vsel %vm656_vm9, %v653_v40, %v5059_v48  ;;  %v661_v54 = vmul.f32 0.0, %v653_v40 }
 0x384   :  { %7497 = vst [vmem:[#allocation75_spill] sm:$0xff] %v5063_v7  ;;  %v662_v61 = vmul.f32 %v5063_v7, %v4612_v11  ;;  %v669_v62 = vrot.slane %v663_v59, 4 }
 0x385   :  { %v667_v5 = vrot.slane %v661_v54, 4 }
 0x386   :  { %v668_v35 = vrot.slane %v662_v61, 4 }
 0x387   :  { %670 = vrot.lane.b32.xlu1 %v667_v5, %s7373_s14 }
 0x388   :  { %672 = vrot.lane.b32.xlu0 %v668_v35, %s7373_s14 }
 0x38b   :  { %674 = vrot.lane.b32.xlu1 %v669_v62, %s7373_s14 }
 0x38c   :  { %683 = vrot.lane.b32.xlu0 %v4676_v29, %s4541_s15 }
 0x38f   :  { %685 = vrot.lane.b32.xlu1 %v4670_v28, %s4541_s15 }
 0x3f9   :  { %v5076_v30 = vpop.permute.xlu1 %670 }
 0x3fa   :  { %7498 = vst [vmem:[#allocation76_spill] sm:$0xff] %v5076_v30  ;;  %v673_v54 = vpop.permute.xlu0 %672 }
 0x3fb   :  { %v677_v61 = vsel %vm7224_vm8, %v5076_v30, %v673_v54 }
 0x3fc   :  { %681 = vst [vmem:[#allocation2 + $0x120] sm:$0xf0] %v677_v61 }
 0x3fd   :  { %v675_v59 = vpop.permute.xlu1 %674 }
 0x3fe   :  { %v678_v35 = vsel %vm7224_vm8, %v673_v54, %v675_v59  ;;  %v684_v5 = vpop.permute.xlu0 %683 }
 0x3ff   :  { %682 = vst [vmem:[#allocation2 + $0x128] sm:$0xf0] %v678_v35  ;;  %v692_v45 = vmul.f32 0.0, %v684_v5 }
 0x401   :  { %v5081_v1 = vpop.permute.xlu1 %685  ;;  %698 = vrot.lane.b32.xlu0 %v692_v45, %s4542_s12 }
 0x402   :  { %7499 = vst [vmem:[#allocation77_spill] sm:$0xff] %v5081_v1  ;;  %v694_v40 = vmul.f32 %v5081_v1, %v4605_v8  ;;  %v5088_v62 = vsel %vm687_vm11, %v684_v5, %v5081_v1 }
 0x403   :  { %7500 = vst [vmem:[#allocation78_spill] sm:$0xff] %v5088_v62  ;;  %v693_v61 = vmul.f32 %v5088_v62, %v4612_v11 }
 0x405   :  { %702 = vrot.lane.b32.xlu0 %v694_v40, %s4542_s12  ;;  %700 = vrot.lane.b32.xlu1 %v693_v61, %s4542_s12 }
 0x409   :  { %713 = vrot.lane.b32.xlu0 %v4624_v14, %s4543_s13  ;;  %711 = vrot.lane.b32.xlu1 %v4607_v9, %s4543_s13 }
 0x473   :  { %v5098_v54 = vpop.permute.xlu0 %698 }
 0x474   :  { %7501 = vst [vmem:[#allocation79_spill] sm:$0xff] %v5098_v54 }
 0x477   :  { %v703_v59 = vpop.permute.xlu0 %702  ;;  %v701_v35 = vpop.permute.xlu1 %700 }
 0x478   :  { %v705_v5 = vsel %vm7385_vm1, %v5098_v54, %v701_v35  ;;  %v706_v45 = vsel %vm7385_vm1, %v701_v35, %v703_v59 }
 0x479   :  { %709 = vst [vmem:[#allocation2 + $0x140] sm:$0xf] %v705_v5  ;;  %710 = vst [vmem:[#allocation2 + $0x148] sm:$0xf] %v706_v45 }
 0x47b   :  { %v5103_v40 = vpop.permute.xlu0 %713  ;;  %v712_v61 = vpop.permute.xlu1 %711 }
 0x47c   :  { %7502 = vst [vmem:[#allocation80_spill] sm:$0xff] %v5103_v40  ;;  %v5107_v30 = vsel %vm715_vm0, %v712_v61, %v5103_v40  ;;  %v720_v32 = vmul.f32 0.0, %v712_v61  ;;  %v722_v38 = vmul.f32 %v5103_v40, %v4605_v8 }
 0x47d   :  { %7503 = vst [vmem:[#allocation81_spill] sm:$0xff] %v5107_v30  ;;  %v721_v33 = vmul.f32 %v5107_v30, %v4612_v11 }
 0x47e   :  { %v726_v54 = vrot.slane %v720_v32, 4  ;;  %v728_v59 = vrot.slane %v722_v38, 4 }
 0x47f   :  { %v727_v53 = vrot.slane %v721_v33, 4 }
 0x480   :  { %729 = vrot.lane.b32.xlu1 %v726_v54, %s7381_s11 }
 0x481   :  { %731 = vrot.lane.b32.xlu0 %v727_v53, %s7381_s11 }
 0x484   :  { %733 = vrot.lane.b32.xlu1 %v728_v59, %s7381_s11 }
 0x485   :  { %742 = vrot.lane.b32.xlu0 %v4609_v10, %s4545_s3 }
 0x488   :  { %744 = vrot.lane.b32.xlu1 %v4633_v16, %s4545_s3 }
 0x4f2   :  { %v5120_v35 = vpop.permute.xlu1 %729 }
 0x4f3   :  { %7504 = vst [vmem:[#allocation82_spill] sm:$0xff] %v5120_v35  ;;  %v732_v32 = vpop.permute.xlu0 %731 }
 0x4f4   :  { %v736_v33 = vsel %vm7326_vm3, %v5120_v35, %v732_v32 }
 0x4f5   :  { %740 = vst [vmem:[#allocation2 + $0x140] sm:$0xf0] %v736_v33 }
 0x4f6   :  { %v734_v38 = vpop.permute.xlu1 %733 }
 0x4f7   :  { %v737_v53 = vsel %vm7326_vm3, %v732_v32, %v734_v38  ;;  %v743_v54 = vpop.permute.xlu0 %742 }
 0x4f8   :  { %741 = vst [vmem:[#allocation2 + $0x148] sm:$0xf0] %v737_v53  ;;  %v751_v5 = vmul.f32 0.0, %v743_v54 }
 0x4fa   :  { %v5125_v45 = vpop.permute.xlu1 %744  ;;  %757 = vrot.lane.b32.xlu0 %v751_v5, %s4546_s9 }
 0x4fb   :  { %7505 = vst [vmem:[#allocation83_spill] sm:$0xff] %v5125_v45  ;;  %v753_v61 = vmul.f32 %v5125_v45, %v4605_v8  ;;  %v5132_v59 = vsel %vm746_vm12, %v743_v54, %v5125_v45 }
 0x4fc   :  { %7506 = vst [vmem:[#allocation84_spill] sm:$0xff] %v5132_v59  ;;  %v752_v33 = vmul.f32 %v5132_v59, %v4612_v11 }
 0x4fe   :  { %761 = vrot.lane.b32.xlu0 %v753_v61, %s4546_s9  ;;  %759 = vrot.lane.b32.xlu1 %v752_v33, %s4546_s9 }
 0x502   :  { %772 = vrot.lane.b32.xlu0 %v4626_v15, %s4547_s2  ;;  %770 = vrot.lane.b32.xlu1 %v4642_v18, %s4547_s2 }
 0x56c   :  { %v5142_v32 = vpop.permute.xlu0 %757 }
 0x56d   :  { %7507 = vst [vmem:[#allocation85_spill] sm:$0xff] %v5142_v32 }
 0x570   :  { %v762_v38 = vpop.permute.xlu0 %761  ;;  %v760_v53 = vpop.permute.xlu1 %759 }
 0x571   :  { %v764_v54 = vsel %vm763_vm5, %v5142_v32, %v760_v53  ;;  %v765_v5 = vsel %vm763_vm5, %v760_v53, %v762_v38 }
 0x572   :  { %768 = vst [vmem:[#allocation2 + $0x160] sm:$0xf] %v764_v54  ;;  %769 = vst [vmem:[#allocation2 + $0x168] sm:$0xf] %v765_v5 }
 0x574   :  { %v5147_v61 = vpop.permute.xlu0 %772  ;;  %v771_v33 = vpop.permute.xlu1 %770 }
 0x575   :  { %7508 = vst [vmem:[#allocation86_spill] sm:$0xff] %v5147_v61  ;;  %v5151_v35 = vsel %vm774_vm13, %v771_v33, %v5147_v61  ;;  %v779_v36 = vmul.f32 0.0, %v771_v33  ;;  %v781_v34 = vmul.f32 %v5147_v61, %v4605_v8 }
 0x576   :  { %7509 = vst [vmem:[#allocation87_spill] sm:$0xff] %v5151_v35  ;;  %v780_v42 = vmul.f32 %v5151_v35, %v4612_v11 }
 0x577   :  { %v785_v32 = vrot.slane %v779_v36, 4  ;;  %v787_v38 = vrot.slane %v781_v34, 4 }
 0x578   :  { %v786_v56 = vrot.slane %v780_v42, 4 }
 0x579   :  { %788 = vrot.lane.b32.xlu1 %v785_v32, %s4548_s10 }
 0x57a   :  { %790 = vrot.lane.b32.xlu0 %v786_v56, %s4548_s10 }
 0x57d   :  { %792 = vrot.lane.b32.xlu1 %v787_v38, %s4548_s10 }
 0x57e   :  { %803 = vrot.lane.b32.xlu0 %v4660_v24, %s4548_s10 }
 0x581   :  { %805 = vrot.lane.b32.xlu1 %v4654_v22, %s4548_s10 }
 0x5eb   :  { %v5164_v53 = vpop.permute.xlu1 %788 }
 0x5ec   :  { %7510 = vst [vmem:[#allocation88_spill] sm:$0xff] %v5164_v53  ;;  %v791_v54 = vpop.permute.xlu0 %790 }
 0x5ed   :  { %v795_v36 = vsel %vm794_vm15, %v5164_v53, %v791_v54 }
 0x5ee   :  { %799 = vst [vmem:[#allocation2 + $0x160] sm:$0xf0] %v795_v36 }
 0x5ef   :  { %v793_v42 = vpop.permute.xlu1 %792 }
 0x5f0   :  { %v796_v34 = vsel %vm794_vm15, %v791_v54, %v793_v42  ;;  %v5169_v56 = vpop.permute.xlu0 %803 }
 0x5f1   :  { %7511 = vst [vmem:[#allocation89_spill] sm:$0xff] %v5169_v56  ;;  %800 = vst [vmem:[#allocation2 + $0x168] sm:$0xf0] %v796_v34  ;;  %v811_v32 = vmul.f32 %v5169_v56, %v4612_v11 }
 0x5f3   :  { %v806_v5 = vpop.permute.xlu1 %805  ;;  %v817_v33 = vrot.slane %v811_v32, 4 }
 0x5f4   :  { %v5175_v38 = vsel %vm794_vm15, %v5169_v56, %v806_v5  ;;  %v813_v46 = vmul.f32 0.0, %v806_v5 }
 0x5f5   :  { %7512 = vst [vmem:[#allocation90_spill] sm:$0xff] %v5175_v38  ;;  %v812_v53 = vmul.f32 %v5175_v38, %v4605_v8  ;;  %820 = vrot.lane.b32.xlu0 %v817_v33, %s4547_s2 }
 0x5f6   :  { %v819_v36 = vrot.slane %v813_v46, 4 }
 0x5f7   :  { %v818_v54 = vrot.slane %v812_v53, 4 }
 0x5f9   :  { %824 = vrot.lane.b32.xlu0 %v819_v36, %s4547_s2  ;;  %822 = vrot.lane.b32.xlu1 %v818_v54, %s4547_s2 }
 0x5fd   :  { %834 = vrot.lane.b32.xlu0 %v4668_v27, %s4546_s9  ;;  %832 = vrot.lane.b32.xlu1 %v4662_v25, %s4546_s9 }
 0x667   :  { %v821_v42 = vpop.permute.xlu0 %820 }
 0x66b   :  { %v5186_v34 = vpop.permute.xlu0 %824  ;;  %v823_v32 = vpop.permute.xlu1 %822 }
 0x66c   :  { %7513 = vst [vmem:[#allocation91_spill] sm:$0xff] %v5186_v34  ;;  %v826_v5 = vsel %vm774_vm13, %v821_v42, %v823_v32  ;;  %v827_v46 = vsel %vm774_vm13, %v823_v32, %v5186_v34 }
 0x66d   :  { %830 = vst [vmem:[#allocation2 + $0x180] sm:$0xf0] %v826_v5  ;;  %831 = vst [vmem:[#allocation2 + $0x188] sm:$0xf0] %v827_v46 }
 0x66f   :  { %v835_v53 = vpop.permute.xlu0 %834  ;;  %v5191_v33 = vpop.permute.xlu1 %832 }
 0x670   :  { %7514 = vst [vmem:[#allocation92_spill] sm:$0xff] %v5191_v33  ;;  %v840_v36 = vmul.f32 %v5191_v33, %v4612_v11  ;;  %v5197_v54 = vsel %vm763_vm5, %v5191_v33, %v835_v53  ;;  %v842_v52 = vmul.f32 0.0, %v835_v53 }
 0x671   :  { %7515 = vst [vmem:[#allocation93_spill] sm:$0xff] %v5197_v54  ;;  %v841_v31 = vmul.f32 %v5197_v54, %v4605_v8 }
 0x672   :  { %846 = vrot.lane.b32.xlu1 %v840_v36, %s4545_s3 }
 0x673   :  { %848 = vrot.lane.b32.xlu0 %v841_v31, %s4545_s3 }
 0x676   :  { %850 = vrot.lane.b32.xlu1 %v842_v52, %s4545_s3 }
 0x677   :  { %858 = vrot.lane.b32.xlu0 %v4676_v29, %s7381_s11 }
 0x67a   :  { %860 = vrot.lane.b32.xlu1 %v4670_v28, %s7381_s11 }
 0x6e4   :  { %v847_v42 = vpop.permute.xlu1 %846 }
 0x6e5   :  { %v849_v32 = vpop.permute.xlu0 %848 }
 0x6e6   :  { %v852_v5 = vsel %vm746_vm12, %v847_v42, %v849_v32 }
 0x6e7   :  { %856 = vst [vmem:[#allocation2 + $0x1a0] sm:$0xf] %v852_v5 }
 0x6e8   :  { %v5209_v46 = vpop.permute.xlu1 %850 }
 0x6e9   :  { %7516 = vst [vmem:[#allocation94_spill] sm:$0xff] %v5209_v46  ;;  %v853_v53 = vsel %vm746_vm12, %v849_v32, %v5209_v46  ;;  %v5213_v36 = vpop.permute.xlu0 %858 }
 0x6ea   :  { %7517 = vst [vmem:[#allocation95_spill] sm:$0xff] %v5213_v36  ;;  %857 = vst [vmem:[#allocation2 + $0x1a8] sm:$0xf] %v853_v53  ;;  %v866_v52 = vmul.f32 %v5213_v36, %v4612_v11 }
 0x6ec   :  { %v861_v31 = vpop.permute.xlu1 %860  ;;  %v872_v34 = vrot.slane %v866_v52, 4 }
 0x6ed   :  { %v5219_v2 = vsel %vm7326_vm3, %v5213_v36, %v861_v31  ;;  %v868_v57 = vmul.f32 0.0, %v861_v31 }
 0x6ee   :  { %7518 = vst [vmem:[#allocation96_spill] sm:$0xff] %v5219_v2  ;;  %v867_v42 = vmul.f32 %v5219_v2, %v4605_v8  ;;  %875 = vrot.lane.b32.xlu0 %v872_v34, %s4543_s13 }
 0x6ef   :  { %v874_v5 = vrot.slane %v868_v57, 4 }
 0x6f0   :  { %v873_v32 = vrot.slane %v867_v42, 4 }
 0x6f2   :  { %879 = vrot.lane.b32.xlu0 %v874_v5, %s4543_s13  ;;  %877 = vrot.lane.b32.xlu1 %v873_v32, %s4543_s13 }
 0x6f6   :  { %889 = vrot.lane.b32.xlu0 %v4624_v14, %s4542_s12  ;;  %887 = vrot.lane.b32.xlu1 %v4607_v9, %s4542_s12 }
 0x760   :  { %v876_v53 = vpop.permute.xlu0 %875 }
 0x764   :  { %v5230_v52 = vpop.permute.xlu0 %879  ;;  %v878_v31 = vpop.permute.xlu1 %877 }
 0x765   :  { %7519 = vst [vmem:[#allocation97_spill] sm:$0xff] %v5230_v52  ;;  %v881_v46 = vsel %vm715_vm0, %v876_v53, %v878_v31  ;;  %v882_v57 = vsel %vm715_vm0, %v878_v31, %v5230_v52 }
 0x766   :  { %885 = vst [vmem:[#allocation2 + $0x1a0] sm:$0xf0] %v881_v46  ;;  %886 = vst [vmem:[#allocation2 + $0x1a8] sm:$0xf0] %v882_v57 }
 0x768   :  { %v890_v34 = vpop.permute.xlu0 %889  ;;  %v5235_v42 = vpop.permute.xlu1 %887 }
 0x769   :  { %7520 = vst [vmem:[#allocation98_spill] sm:$0xff] %v5235_v42  ;;  %v895_v5 = vmul.f32 %v5235_v42, %v4612_v11  ;;  %v5241_v32 = vsel %vm7385_vm1, %v5235_v42, %v890_v34  ;;  %v897_v60 = vmul.f32 0.0, %v890_v34 }
 0x76a   :  { %v896_v20 = vmul.f32 %v5241_v32, %v4605_v8 }
 0x76b   :  { %901 = vrot.lane.b32.xlu1 %v895_v5, %s4541_s15 }
 0x76c   :  { %903 = vrot.lane.b32.xlu0 %v896_v20, %s4541_s15 }
 0x76f   :  { %905 = vrot.lane.b32.xlu1 %v897_v60, %s4541_s15 }
 0x770   :  { %913 = vrot.lane.b32.xlu0 %v4609_v10, %s7373_s14 }
 0x773   :  { %915 = vrot.lane.b32.xlu1 %v4633_v16, %s7373_s14 }
 0x774   :  { %942 = vrot.lane.b32.xlu0 %v4642_v18, %s7377_s19 }
 0x777   :  { %944 = vrot.lane.b32.xlu1 %v4626_v15, %s7377_s19 }
 0x7dd   :  { %v902_v46 = vpop.permute.xlu1 %901 }
 0x7de   :  { %v904_v53 = vpop.permute.xlu0 %903 }
 0x7df   :  { %v907_v31 = vsel %vm687_vm11, %v902_v46, %v904_v53 }
 0x7e0   :  { %911 = vst [vmem:[#allocation2 + $0x1c0] sm:$0xf] %v907_v31 }
 0x7e1   :  { %v5257_v20 = vpop.permute.xlu1 %905 }
 0x7e2   :  { %7521 = vst [vmem:[#allocation99_spill] sm:$0xff] %v5257_v20  ;;  %v908_v60 = vsel %vm687_vm11, %v904_v53, %v5257_v20  ;;  %v5261_v57 = vpop.permute.xlu0 %913 }
 0x7e3   :  { %912 = vst [vmem:[#allocation2 + $0x1c8] sm:$0xf] %v908_v60  ;;  %v921_v34 = vmul.f32 %v5261_v57, %v4612_v11 }
 0x7e5   :  { %v916_v5 = vpop.permute.xlu1 %915  ;;  %v927_v52 = vrot.slane %v921_v34, 4 }
 0x7e6   :  { %v5267_v26 = vsel %vm7224_vm8, %v5261_v57, %v916_v5  ;;  %v923_v3 = vmul.f32 0.0, %v916_v5  ;;  %v5272_v31 = vpop.permute.xlu0 %942  ;;  %vm7305_vm8 = vcmask 916480  }
 0x7e7   :  { %v922_v46 = vmul.f32 %v5267_v26, %v4605_v8  ;;  %930 = vrot.lane.b32.xlu0 %v927_v52, %s4539_s16  ;;  %v950_v34 = vmul.f32 %v5272_v31, %v4612_v11 }
 0x7e8   :  { %v929_v53 = vrot.slane %v923_v3, 4 }
 0x7e9   :  { %v945_v20 = vpop.permute.xlu1 %944  ;;  %v928_v60 = vrot.slane %v922_v46, 4 }
 0x7ea   :  { %v5276_v51 = vsel %vm7340_vm7, %v5272_v31, %v945_v20  ;;  %v952_v52 = vmul.f32 0.0, %v945_v20 }
 0x7eb   :  { %934 = vrot.lane.b32.xlu0 %v929_v53, %s4539_s16  ;;  %932 = vrot.lane.b32.xlu1 %v928_v60, %s4539_s16  ;;  %v951_v5 = vmul.f32 %v5276_v51, %v4605_v8 }
 0x7ef   :  { %956 = vrot.lane.b32.xlu1 %v950_v34, %s4537_s18  ;;  %958 = vrot.lane.b32.xlu0 %v951_v5, %s4537_s18 }
 0x7f3   :  { %960 = vrot.lane.b32.xlu1 %v952_v52, %s4537_s18  ;;  %968 = vrot.lane.b32.xlu0 %v4652_v21, %s4549_s17 }
 0x7f7   :  { %970 = vrot.lane.b32.xlu1 %v4645_v19, %s4549_s17  ;;  %972 = vrot.lane.b32.xlu0 %v4636_v17, %s4549_s17 }
 0x7fb   :  { %981 = vrot.lane.b32.xlu1 %v4660_v24, %s7369_s7  ;;  %983 = vrot.lane.b32.xlu0 %v4654_v22, %s7369_s7 }
 0x859   :  { %v931_v3 = vpop.permute.xlu0 %930 }
 0x85d   :  { %v933_v20 = vpop.permute.xlu1 %932  ;;  %v5297_v46 = vpop.permute.xlu0 %934 }
 0x85e   :  { %7522 = vst [vmem:[#allocation100_spill] sm:$0xff] %v5297_v46  ;;  %v936_v53 = vsel %vm656_vm9, %v931_v3, %v933_v20  ;;  %v937_v60 = vsel %vm656_vm9, %v933_v20, %v5297_v46 }
 0x85f   :  { %940 = vst [vmem:[#allocation2 + $0x1c0] sm:$0xf0] %v936_v53  ;;  %941 = vst [vmem:[#allocation2 + $0x1c8] sm:$0xf0] %v937_v60 }
 0x861   :  { %v957_v34 = vpop.permute.xlu1 %956  ;;  %v959_v5 = vpop.permute.xlu0 %958 }
 0x862   :  { %v962_v52 = vsel %vm628_vm6, %v957_v34, %v959_v5 }
 0x863   :  { %966 = vst [vmem:[#allocation2 + $0x1e0] sm:$0xf] %v962_v52 }
 0x865   :  { %v5303_v21 = vpop.permute.xlu1 %960  ;;  %v969_v17 = vpop.permute.xlu0 %968 }
 0x866   :  { %7523 = vst [vmem:[#allocation101_spill] sm:$0xff] %v5303_v21  ;;  %v963_v19 = vsel %vm628_vm6, %v959_v5, %v5303_v21 }
 0x867   :  { %967 = vst [vmem:[#allocation2 + $0x1e8] sm:$0xf] %v963_v19 }
 0x869   :  { %v971_v6 = vpop.permute.xlu1 %970  ;;  %v5307_v3 = vpop.permute.xlu0 %972 }
 0x86a   :  { %7524 = vst [vmem:[#allocation102_spill] sm:$0xff] %v5307_v3  ;;  %v975_v20 = vsel %vm7305_vm8, %v969_v17, %v971_v6  ;;  %v976_v53 = vsel %vm7305_vm8, %v971_v6, %v5307_v3 }
 0x86b   :  { %979 = vst [vmem:[#allocation2 + $0x1e0] sm:$0xf0] %v975_v20  ;;  %980 = vst [vmem:[#allocation2 + $0x1e8] sm:$0xf0] %v976_v53  ;;  %v2184_v20 = vld [vmem:[#allocation2 + $0x1c8] sm:$0xff]  ;;  %v2183_v53 = vld [vmem:[#allocation2 + $0x1c0] sm:$0xff] }
 0x86d   :  { %v5312_v60 = vpop.permute.xlu1 %981  ;;  %v5314_v34 = vpop.permute.xlu0 %983 }
 0x86e   :  { %7525 = vst [vmem:[#allocation103_spill] sm:$0xff] %v5312_v60  ;;  %v5319_v5 = vsel %vm7337_vm4, %v5312_v60, %v5314_v34  ;;  %v989_v19 = vmul.f32 %v5312_v60, %v4612_v11  ;;  %v2180_v60 = vld [vmem:[#allocation2 + $0x1a8] sm:$0xff] }
 0x86f   :  { %7526 = vst [vmem:[#allocation104_spill] sm:$0xff] %v5319_v5  ;;  %v990_v17 = vmul.f32 %v5319_v5, %v4605_v8  ;;  %v2179_v5 = vld [vmem:[#allocation2 + $0x1a0] sm:$0xff] }
 0x870   :  { %995 = vrot.lane.b32.xlu1 %v989_v19, %s4535_s20  ;;  %v2176_v19 = vld [vmem:[#allocation2 + $0x188] sm:$0xff] }
 0x871   :  { %997 = vrot.lane.b32.xlu0 %v990_v17, %s4535_s20  ;;  %v2175_v17 = vld [vmem:[#allocation2 + $0x180] sm:$0xff] }
 0x872   :  { %v2188_v6 = vld [vmem:[#allocation2 + $0x1e8] sm:$0xff]  ;;  %v2187_v52 = vld [vmem:[#allocation2 + $0x1e0] sm:$0xff] }
 0x873   :  { %2234 = vmatprep.subr.mxu0 %v2188_v6  ;;  %v2172_v6 = vld [vmem:[#allocation2 + $0x168] sm:$0xff] }
 0x874   :  { %1363 = vrot.lane.b32.xlu1 %v4662_v25, %s4525_s29  ;;  %2235 = vmatpush1.msra.mxu0 %v2187_v52  ;;  %v2171_v52 = vld [vmem:[#allocation2 + $0x160] sm:$0xff] }
 0x875   :  { %2236 = vmatprep.subr.mxu0 %v2184_v20  ;;  %1365 = vrot.lane.b32.xlu0 %v4668_v27, %s4525_s29  ;;  %v2164_v20 = vld [vmem:[#allocation2 + $0x128] sm:$0xff] }
 0x876   :  { %2237 = vmatpush1.msra.mxu0 %v2183_v53  ;;  %v2163_v53 = vld [vmem:[#allocation2 + $0x120] sm:$0xff] }
 0x877   :  { %2238 = vmatprep.subr.mxu0 %v2180_v60  ;;  %v2168_v60 = vld [vmem:[#allocation2 + $0x148] sm:$0xff] }
 0x878   :  { %1392 = vrot.lane.b32.xlu1 %v4676_v29, %s4519_s21  ;;  %2239 = vmatpush1.msra.mxu0 %v2179_v5  ;;  %v2167_v5 = vld [vmem:[#allocation2 + $0x140] sm:$0xff] }
 0x879   :  { %2240 = vmatprep.subr.mxu0 %v2176_v19  ;;  %1394 = vrot.lane.b32.xlu0 %v4670_v28, %s4519_s21  ;;  %v2160_v19 = vld [vmem:[#allocation2 + $0x108] sm:$0xff] }
 0x87a   :  { %2241 = vmatpush1.msra.mxu0 %v2175_v17  ;;  %v2159_v17 = vld [vmem:[#allocation2 + $0x100] sm:$0xff] }
 0x87b   :  { %2242 = vmatprep.subr.mxu0 %v2172_v6  ;;  %v2156_v6 = vld [vmem:[#allocation2 + $0xe8] sm:$0xff] }
 0x87c   :  { %1337 = vrot.lane.b32.xlu1 %v4660_v24, %s4520_s22  ;;  %2243 = vmatpush1.msra.mxu0 %v2171_v52  ;;  %v2155_v52 = vld [vmem:[#allocation2 + $0xe0] sm:$0xff] }
 0x87d   :  { %2244 = vmatprep.subr.mxu0 %v2168_v60  ;;  %1339 = vrot.lane.b32.xlu0 %v4654_v22, %s4520_s22  ;;  %v2152_v60 = vld [vmem:[#allocation2 + $0xc8] sm:$0xff] }
 0x87e   :  { %2245 = vmatpush1.msra.mxu0 %v2167_v5  ;;  %v2151_v5 = vld [vmem:[#allocation2 + $0xc0] sm:$0xff] }
 0x87f   :  { %2246 = vmatprep.subr.mxu0 %v2164_v20  ;;  %v2148_v20 = vld [vmem:[#allocation2 + $0xa8] sm:$0xff] }
 0x880   :  { %1269 = vrot.lane.b32.xlu1 %v4609_v10, %s7303_s1  ;;  %2247 = vmatpush1.msra.mxu0 %v2163_v53  ;;  %v2147_v53 = vld [vmem:[#allocation2 + $0xa0] sm:$0xff] }
 0x881   :  { %2248 = vmatprep.subr.mxu0 %v2160_v19  ;;  %1271 = vrot.lane.b32.xlu0 %v4633_v16, %s7303_s1  ;;  %v2144_v19 = vld [vmem:[#allocation2 + $0x88] sm:$0xff] }
 0x882   :  { %2249 = vmatpush1.msra.mxu0 %v2159_v17  ;;  %v2143_v17 = vld [vmem:[#allocation2 + $0x80] sm:$0xff] }
 0x883   :  { %2250 = vmatprep.subr.mxu0 %v2156_v6  ;;  %v2140_v6 = vld [vmem:[#allocation2 + $0x68] sm:$0xff] }
 0x884   :  { %1298 = vrot.lane.b32.xlu1 %v4642_v18, %s7267_s25  ;;  %2251 = vmatpush1.msra.mxu0 %v2155_v52  ;;  %v2139_v52 = vld [vmem:[#allocation2 + $0x60] sm:$0xff] }
 0x885   :  { %2252 = vmatprep.subr.mxu0 %v2152_v60  ;;  %1300 = vrot.lane.b32.xlu0 %v4626_v15, %s7267_s25  ;;  %v2136_v60 = vld [vmem:[#allocation2 + $0x48] sm:$0xff] }
 0x886   :  { %2253 = vmatpush1.msra.mxu0 %v2151_v5  ;;  %v2135_v5 = vld [vmem:[#allocation2 + $0x40] sm:$0xff] }
 0x887   :  { %2254 = vmatprep.subr.mxu0 %v2148_v20  ;;  %v2132_v20 = vld [vmem:[#allocation2 + $0x28] sm:$0xff] }
 0x888   :  { %1214 = vrot.lane.b32.xlu1 %v4676_v29, %s7306_s30  ;;  %2255 = vmatpush1.msra.mxu0 %v2147_v53  ;;  %v2131_v53 = vld [vmem:[#allocation2 + $0x20] sm:$0xff] }
 0x889   :  { %2256 = vmatprep.subr.mxu0 %v2144_v19  ;;  %1216 = vrot.lane.b32.xlu0 %v4670_v28, %s7306_s30  ;;  %v2128_v19 = vld [vmem:[#allocation2 + $0x8] sm:$0xff] }
 0x88a   :  { %2257 = vmatpush1.msra.mxu0 %v2143_v17  ;;  %v2127_v17 = vld [vmem:[#allocation2] sm:$0xff] }
 0x88b   :  { %2258 = vmatprep.subr.mxu0 %v2140_v6 }
 0x88c   :  { %1243 = vrot.lane.b32.xlu1 %v4607_v9, %s7314_s26  ;;  %2259 = vmatpush1.msra.mxu0 %v2139_v52  ;;  %v1798_v52 = vmul.f32 %v5213_v36, %v4614_v12 }
 0x88d   :  { %2260 = vmatprep.subr.mxu0 %v2136_v60  ;;  %1245 = vrot.lane.b32.xlu0 %v4624_v14, %s7314_s26  ;;  %v1769_v60 = vmul.f32 %v5175_v38, %v4618_v13 }
 0x88e   :  { %2261 = vmatpush1.msra.mxu0 %v2135_v5  ;;  %v1784_v5 = vmul.f32 %v5191_v33, %v4614_v12 }
 0x88f   :  { %2262 = vmatprep.subr.mxu0 %v2132_v20  ;;  %v1802_v20 = vrot.slane %v1798_v52, 4 }
 0x890   :  { %1159 = vrot.lane.b32.xlu1 %v4660_v24, %s7322_s5  ;;  %2263 = vmatpush1.msra.mxu0 %v2131_v53  ;;  %v1828_v24 = vmul.f32 %v5261_v57, %v4614_v12  ;;  %v1768_v53 = vmul.f32 %v5169_v56, %v4614_v12  ;;  %v7563_v56 = vld [vmem:[#allocation26_spill] sm:$0xff] }
 0x891   :  { %2264 = vmatprep.subr.mxu0 %v2128_v19  ;;  %1161 = vrot.lane.b32.xlu0 %v4654_v22, %s7322_s5  ;;  %v1773_v19 = vrot.slane %v1769_v60, 4  ;;  %v1690_v60 = vmul.f32 %v5063_v7, %v4614_v12  ;;  %v1433_v38 = vmul.f32 %v7563_v56, %v4618_v13 }
 0x892   :  { %2265 = vmatpush1.msra.mxu0 %v2127_v17  ;;  %v1772_v17 = vrot.slane %v1768_v53, 4  ;;  %v1691_v53 = vmul.f32 %v5059_v48, %v4618_v13 }
 0x894   :  { %1188 = vrot.lane.b32.xlu1 %v4662_v25, %s7324_s27 }
 0x895   :  { %1190 = vrot.lane.b32.xlu0 %v4668_v27, %s7324_s27 }
 0x898   :  { %1117 = vrot.lane.b32.xlu1 %v4642_v18, %s7331_s6  ;;  %v1815_v18 = vmul.f32 %v5241_v32, %v4618_v13 }
 0x899   :  { %1119 = vrot.lane.b32.xlu0 %v4626_v15, %s7331_s6  ;;  %v1844_v15 = vmul.f32 %v5272_v31, %v4614_v12 }
 0x89c   :  { %1062 = vrot.lane.b32.xlu1 %v4607_v9, %s7347_s0  ;;  %v5384_v9 = vrot.slane %v4618_v13, 4 }
 0x89d   :  { %1064 = vrot.lane.b32.xlu0 %v4624_v14, %s7347_s0  ;;  %v5392_v14 = vrot.slane %v4614_v12, 4 }
 0x8a0   :  { %1091 = vrot.lane.b32.xlu1 %v4609_v10, %s7231_s28  ;;  %v1845_v10 = vmul.f32 %v5276_v51, %v4618_v13 }
 0x8a1   :  { %1093 = vrot.lane.b32.xlu0 %v4633_v16, %s7231_s28  ;;  %v1829_v16 = vmul.f32 %v5267_v26, %v4618_v13 }
 0x8a3   :  { %v1833_v22 = vrot.slane %v1829_v16, 4  ;;  %v1737_v16 = vmul.f32 %v5125_v45, %v4618_v13 }
 0x8a4   :  { %1007 = vrot.lane.b32.xlu1 %v4662_v25, %s7349_s23  ;;  %v1814_v25 = vmul.f32 %v5235_v42, %v4614_v12  ;;  %v1437_v42 = vrot.slane %v1433_v38, 4 }
 0x8a5   :  { %1009 = vrot.lane.b32.xlu0 %v4668_v27, %s7349_s23  ;;  %v1799_v27 = vmul.f32 %v5219_v2, %v4618_v13 }
 0x8a7   :  { %v1803_v6 = vrot.slane %v1799_v27, 4  ;;  %v1706_v27 = vmul.f32 %v5088_v62, %v4614_v12 }
 0x8a8   :  { %1036 = vrot.lane.b32.xlu1 %v4676_v29, %s7355_s8  ;;  %v1785_v29 = vmul.f32 %v5197_v54, %v4618_v13 }
 0x8a9   :  { %1038 = vrot.lane.b32.xlu0 %v4670_v28, %s7355_s8  ;;  %v1832_v28 = vrot.slane %v1828_v24, 4 }
 0x8ac   :  { %1850 = vrot.lane.b32.xlu1 %v1845_v10, %s4537_s18  ;;  %v1750_v10 = vmul.f32 %v5151_v35, %v4614_v12 }
 0x8ad   :  { %1860 = vrot.lane.b32.xlu0 %v5384_v9, %s4549_s17 }
 0x8b0   :  { %1848 = vrot.lane.b32.xlu1 %v1844_v15, %s4537_s18  ;;  %v1736_v15 = vmul.f32 %v5132_v59, %v4614_v12 }
 0x8b1   :  { %1858 = vrot.lane.b32.xlu0 %v5392_v14, %s4549_s17 }
 0x8b4   :  { %1820 = vrot.lane.b32.xlu1 %v1815_v18, %s4541_s15  ;;  %v1751_v18 = vmul.f32 %v5147_v61, %v4618_v13  ;;  %v7290_v61 = vmov 1.0  }
 0x8b5   :  { %1836 = vrot.lane.b32.xlu0 %v1833_v22, %s4539_s16  ;;  %v1754_v22 = vrot.slane %v1750_v10, 4  ;;  %v1652_v10 = vmul.f32 %v5011_v41, %v4614_v12 }
 0x8b6   :  { %v1755_v24 = vrot.slane %v1751_v18, 4 }
 0x8b8   :  { %1818 = vrot.lane.b32.xlu1 %v1814_v25, %s4541_s15  ;;  %v1720_v25 = vmul.f32 %v5107_v30, %v4614_v12 }
 0x8b9   :  { %1834 = vrot.lane.b32.xlu0 %v1832_v28, %s4539_s16  ;;  %v1707_v28 = vmul.f32 %v5081_v1, %v4618_v13 }
 0x8bc   :  { %1790 = vrot.lane.b32.xlu1 %v1785_v29, %s4545_s3  ;;  %v1721_v29 = vmul.f32 %v5103_v40, %v4618_v13 }
 0x8bd   :  { %1806 = vrot.lane.b32.xlu0 %v1803_v6, %s4543_s13  ;;  %v1724_v6 = vrot.slane %v1720_v25, 4 }
 0x8be   :  { %v1725_v52 = vrot.slane %v1721_v29, 4  ;;  %v1623_v29 = vmul.f32 %v4961_v63, %v4618_v13 }
 0x8c0   :  { %1788 = vrot.lane.b32.xlu1 %v1784_v5, %s4545_s3  ;;  %v1676_v5 = vmul.f32 %v5044_v50, %v4614_v12  ;;  %v7550_v50 = vld [vmem:[#allocation31_spill] sm:$0xff] }
 0x8c1   :  { %1804 = vrot.lane.b32.xlu0 %v1802_v20, %s4543_s13  ;;  %v1677_v20 = vmul.f32 %v5038_v0, %v4618_v13 }
 0x8c4   :  { %1776 = vrot.lane.b32.xlu1 %v1773_v19, %s4547_s2  ;;  %v1694_v19 = vrot.slane %v1690_v60, 4 }
 0x8c5   :  { %1774 = vrot.lane.b32.xlu0 %v1772_v17, %s4547_s2  ;;  %v1695_v17 = vrot.slane %v1691_v53, 4 }
 0x8c8   :  { %1740 = vrot.lane.b32.xlu1 %v1736_v15, %s4546_s9  ;;  %v1653_v15 = vmul.f32 %v5004_v39, %v4618_v13  ;;  %v7544_v39 = vld [vmem:[#allocation34_spill] sm:$0xff] }
 0x8c9   :  { %1742 = vrot.lane.b32.xlu0 %v1737_v16, %s4546_s9 }
 0x8cc   :  { %1756 = vrot.lane.b32.xlu1 %v1754_v22, %s4548_s10 }
 0x8cd   :  { %1758 = vrot.lane.b32.xlu0 %v1755_v24, %s4548_s10  ;;  %v1636_v24 = vmul.f32 %v4986_v37, %v4614_v12 }
 0x8cf   :  { %v1640_v60 = vrot.slane %v1636_v24, 4 }
 0x8d0   :  { %1710 = vrot.lane.b32.xlu1 %v1706_v27, %s4542_s12  ;;  %v1622_v27 = vmul.f32 %v4967_v23, %v4614_v12 }
 0x8d1   :  { %1712 = vrot.lane.b32.xlu0 %v1707_v28, %s4542_s12 }
 0x8d4   :  { %1726 = vrot.lane.b32.xlu1 %v1724_v6, %s7381_s11  ;;  %v1637_v6 = vmul.f32 %v4982_v4, %v4618_v13  ;;  %v7538_v4 = vld [vmem:[#allocation37_spill] sm:$0xff] }
 0x8d5   :  { %1728 = vrot.lane.b32.xlu0 %v1725_v52, %s7381_s11  ;;  %s7686_s11 = smov 110  }
 0x8d8   :  { %1680 = vrot.lane.b32.xlu1 %v1676_v5, %s7377_s19 }
 0x8d9   :  { %1682 = vrot.lane.b32.xlu0 %v1677_v20, %s7377_s19  ;;  %v1641_v20 = vrot.slane %v1637_v6, 4  ;;  %s7675_s19 = smov 99  }
 0x8dc   :  { %1696 = vrot.lane.b32.xlu1 %v1694_v19, %s7373_s14  ;;  %v1592_v19 = vmul.f32 %v4809_v47, %v4614_v12  ;;  %v7537_v47 = vld [vmem:[#allocation35_spill] sm:$0xff] }
 0x8dd   :  { %1698 = vrot.lane.b32.xlu0 %v1695_v17, %s7373_s14  ;;  %v1606_v17 = vmul.f32 %v4869_v58, %v4614_v12  ;;  %s7670_s14 = smov 109  }
 0x8df   :  { %v1610_v24 = vrot.slane %v1606_v17, 4 }
 0x8e0   :  { %1656 = vrot.lane.b32.xlu1 %v1652_v10, %s7369_s7 }
 0x8e1   :  { %1658 = vrot.lane.b32.xlu0 %v1653_v15, %s7369_s7  ;;  %v1593_v15 = vmul.f32 %v4805_v44, %v4618_v13  ;;  %s7658_s7 = smov 97  }
 0x8e2   :  { %v996_v16 = vpop.permute.xlu1 %995 }
 0x8e3   :  { %v5471_v18 = vpop.permute.xlu0 %997 }
 0x8e4   :  { %v1001_v22 = vsel %vm7269_vm2, %v996_v16, %v5471_v18  ;;  %1666 = vrot.lane.b32.xlu1 %v5392_v14, %s7357_s24  ;;  %v1607_v16 = vmul.f32 %v4857_v49, %v4618_v13  ;;  %v7536_v49 = vld [vmem:[#allocation45_spill] sm:$0xff] }
 0x8e5   :  { %1005 = vst [vmem:[#allocation2 + $0x200] sm:$0xf] %v1001_v22  ;;  %1668 = vrot.lane.b32.xlu0 %v5384_v9, %s7357_s24  ;;  %v1550_v58 = vmul.f32 %v7536_v49, %v4614_v12  ;;  %s7641_s24 = smov 95  }
 0x8e6   :  { %v5481_v25 = vpop.permute.xlu1 %1363 }
 0x8e7   :  { %7527 = vst [vmem:[#allocation105_spill] sm:$0xff] %v5481_v25  ;;  %v5485_v28 = vpop.permute.xlu0 %1365 }
 0x8e8   :  { %1626 = vrot.lane.b32.xlu1 %v1622_v27, %s7355_s8 }
 0x8e9   :  { %1628 = vrot.lane.b32.xlu0 %v1623_v29, %s7355_s8  ;;  %v1611_v29 = vrot.slane %v1607_v16, 4  ;;  %s7365_s8 = smov 96  }
 0x8ea   :  { %v5493_v52 = vpop.permute.xlu1 %1392 }
 0x8eb   :  { %7528 = vst [vmem:[#allocation106_spill] sm:$0xff] %v5493_v52  ;;  %v5495_v5 = vpop.permute.xlu0 %1394 }
 0x8ec   :  { %1642 = vrot.lane.b32.xlu1 %v1640_v60, %s7349_s23  ;;  %v1576_v60 = vmul.f32 %v4863_v55, %v4614_v12 }
 0x8ed   :  { %1644 = vrot.lane.b32.xlu0 %v1641_v20, %s7349_s23  ;;  %s7622_s23 = smov 93  }
 0x8ee   :  { %v5499_v53 = vpop.permute.xlu1 %1337 }
 0x8ef   :  { %7529 = vst [vmem:[#allocation107_spill] sm:$0xff] %v5499_v53  ;;  %v5505_v10 = vpop.permute.xlu0 %1339 }
 0x8f0   :  { %1596 = vrot.lane.b32.xlu1 %v1592_v19, %s7231_s28  ;;  %v1577_v19 = vmul.f32 %v4803_v43, %v4618_v13  ;;  %v7535_v43 = vld [vmem:[#allocation36_spill] sm:$0xff] }
 0x8f1   :  { %1598 = vrot.lane.b32.xlu0 %v1593_v15, %s7231_s28  ;;  %s7532_s28 = smov 32   ;;  %v1580_v15 = vrot.slane %v1576_v60, 4  ;;  %v1536_v55 = vmul.f32 %v7535_v43, %v4614_v12  ;;  %v1537_v60 = vmul.f32 %v7537_v47, %v4618_v13  ;;  %v7541_v47 = vld [vmem:[#allocation33_spill] sm:$0xff] }
 0x8f2   :  { %v5513_v22 = vpop.permute.xlu1 %1269  ;;  %v1506_v23 = vmul.f32 %v7541_v47, %v4614_v12 }
 0x8f3   :  { %7530 = vst [vmem:[#allocation108_spill] sm:$0xff] %v5513_v22  ;;  %v5515_v27 = vpop.permute.xlu0 %1271 }
 0x8f4   :  { %1612 = vrot.lane.b32.xlu1 %v1610_v24, %s7347_s0  ;;  %v1581_v24 = vrot.slane %v1577_v19, 4  ;;  %v1551_v19 = vmul.f32 %v7538_v4, %v4618_v13  ;;  %v7542_v4 = vld [vmem:[#allocation44_spill] sm:$0xff] }
 0x8f5   :  { %1614 = vrot.lane.b32.xlu0 %v1611_v29, %s7347_s0  ;;  %s7618_s0 = smov 94  }
 0x8f6   :  { %v5519_v6 = vpop.permute.xlu1 %1298  ;;  %v1555_v43 = vrot.slane %v1551_v19, 4  ;;  %v1521_v19 = vmul.f32 %v7544_v39, %v4618_v13  ;;  %v7548_v39 = vld [vmem:[#allocation43_spill] sm:$0xff] }
 0x8f7   :  { %7531 = vst [vmem:[#allocation109_spill] sm:$0xff] %v5519_v6  ;;  %v5523_v20 = vpop.permute.xlu0 %1300 }
 0x8f8   :  { %1566 = vrot.lane.b32.xlu1 %v4614_v12, %s7532_s28  ;;  %v1525_v47 = vrot.slane %v1521_v19, 4  ;;  %v1491_v19 = vmul.f32 %v7550_v50, %v4618_v13 }
 0x8f9   :  { %1568 = vrot.lane.b32.xlu0 %v4618_v13, %s7532_s28 }
 0x8fa   :  { %v5531_v17 = vpop.permute.xlu1 %1214 }
 0x8fb   :  { %7533 = vst [vmem:[#allocation110_spill] sm:$0xff] %v5531_v17  ;;  %v5533_v16 = vpop.permute.xlu0 %1216 }
 0x8fc   :  { %1582 = vrot.lane.b32.xlu1 %v1580_v15, %s7331_s6 }
 0x8fd   :  { %1584 = vrot.lane.b32.xlu0 %v1581_v24, %s7331_s6  ;;  %v1554_v24 = vrot.slane %v1550_v58, 4  ;;  %s7597_s6 = smov 83  }
 0x8fe   :  { %v5537_v29 = vpop.permute.xlu1 %1243 }
 0x8ff   :  { %7534 = vst [vmem:[#allocation111_spill] sm:$0xff] %v5537_v29  ;;  %v5543_v44 = vpop.permute.xlu0 %1245 }
 0x900   :  { %1540 = vrot.lane.b32.xlu1 %v1536_v55, %s7324_s27  ;;  %v1520_v55 = vmul.f32 %v7542_v4, %v4614_v12 }
 0x901   :  { %1542 = vrot.lane.b32.xlu0 %v1537_v60, %s7324_s27  ;;  %v7543_v60 = vld [vmem:[#allocation32_spill] sm:$0xff]  ;;  %s7335_s27 = smov 80  }
 0x902   :  { %v5551_v15 = vpop.permute.xlu1 %1159  ;;  %v1507_v58 = vmul.f32 %v7543_v60, %v4618_v13  ;;  %v7547_v60 = vld [vmem:[#allocation30_spill] sm:$0xff] }
 0x903   :  { %7539 = vst [vmem:[#allocation112_spill] sm:$0xff] %v5551_v15  ;;  %v5553_v63 = vpop.permute.xlu0 %1161  ;;  %v1476_v48 = vmul.f32 %v7547_v60, %v4614_v12  ;;  %v1495_v60 = vrot.slane %v1491_v19, 4 }
 0x904   :  { %1556 = vrot.lane.b32.xlu1 %v1554_v24, %s7322_s5  ;;  %v1524_v24 = vrot.slane %v1520_v55, 4 }
 0x905   :  { %1558 = vrot.lane.b32.xlu0 %v1555_v43, %s7322_s5  ;;  %s7580_s5 = smov 81  }
 0x906   :  { %v5557_v49 = vpop.permute.xlu1 %1188 }
 0x907   :  { %7540 = vst [vmem:[#allocation113_spill] sm:$0xff] %v5557_v49  ;;  %v5563_v37 = vpop.permute.xlu0 %1190 }
 0x908   :  { %1510 = vrot.lane.b32.xlu1 %v1506_v23, %s7314_s26  ;;  %v1490_v23 = vmul.f32 %v7548_v39, %v4614_v12 }
 0x909   :  { %1512 = vrot.lane.b32.xlu0 %v1507_v58, %s7314_s26  ;;  %v7549_v58 = vld [vmem:[#allocation29_spill] sm:$0xff]  ;;  %s7573_s26 = smov 78  }
 0x90a   :  { %v5571_v43 = vpop.permute.xlu1 %1117  ;;  %v1477_v55 = vmul.f32 %v7549_v58, %v4618_v13  ;;  %v7553_v58 = vld [vmem:[#allocation28_spill] sm:$0xff] }
 0x90b   :  { %7545 = vst [vmem:[#allocation114_spill] sm:$0xff] %v5571_v43  ;;  %v5573_v41 = vpop.permute.xlu0 %1119  ;;  %v1448_v40 = vmul.f32 %v7553_v58, %v4614_v12 }
 0x90c   :  { %1526 = vrot.lane.b32.xlu1 %v1524_v24, %s7306_s30  ;;  %v1494_v24 = vrot.slane %v1490_v23, 4 }
 0x90d   :  { %1528 = vrot.lane.b32.xlu0 %v1525_v47, %s7306_s30  ;;  %s7572_s30 = smov 79  }
 0x90e   :  { %v5577_v4 = vpop.permute.xlu1 %1062 }
 0x90f   :  { %7546 = vst [vmem:[#allocation115_spill] sm:$0xff] %v5577_v4  ;;  %v5583_v0 = vpop.permute.xlu0 %1064 }
 0x910   :  { %1480 = vrot.lane.b32.xlu1 %v1476_v48, %s7267_s25  ;;  %v7554_v48 = vld [vmem:[#allocation24_spill] sm:$0xff] }
 0x911   :  { %1482 = vrot.lane.b32.xlu0 %v1477_v55, %s7267_s25  ;;  %v1449_v55 = vmul.f32 %v7554_v48, %v4618_v13  ;;  %s7556_s25 = smov 48  }
 0x912   :  { %v5591_v47 = vpop.permute.xlu1 %1091 }
 0x913   :  { %7551 = vst [vmem:[#allocation116_spill] sm:$0xff] %v5591_v47  ;;  %v5593_v7 = vpop.permute.xlu0 %1093 }
 0x914   :  { %1496 = vrot.lane.b32.xlu1 %v1494_v24, %s7303_s1 }
 0x915   :  { %1498 = vrot.lane.b32.xlu0 %v1495_v60, %s7303_s1  ;;  %v7557_v60 = vlaneseq  ;;  %s7566_s1 = smov 77  }
 0x916   :  { %v5597_v39 = vpop.permute.xlu1 %1007 }
 0x917   :  { %7552 = vst [vmem:[#allocation117_spill] sm:$0xff] %v5597_v39  ;;  %v5601_v50 = vpop.permute.xlu0 %1009  ;;  %vm5616_vm2 = vcmp.lt.s32.totalorder %v7557_v60, 512  ;;  %v7562_v60 = vld [vmem:[#allocation23_spill] sm:$0xff] }
 0x918   :  { %1452 = vrot.lane.b32.xlu1 %v1448_v40, %s4520_s22  ;;  %v7560_v40 = vld [vmem:[#allocation25_spill] sm:$0xff]  ;;  %2117 = vst.msk [vmem:[#allocation2 + $0x304] ss:$8 sm:$0xf] %vm5616_vm2, %v7290_v61  ;;  %v1419_v35 = vmul.f32 %v7562_v60, %v4618_v13 }
 0x919   :  { %1454 = vrot.lane.b32.xlu0 %v1449_v55, %s4520_s22  ;;  %v1418_v62 = vmul.f32 %v7560_v40, %v4614_v12  ;;  %v7561_v55 = vld [vmem:[#allocation42_spill] sm:$0xff] }
 0x91a   :  { %v5607_v23 = vpop.permute.xlu1 %1036  ;;  %v1432_v30 = vmul.f32 %v7561_v55, %v4614_v12 }
 0x91b   :  { %7555 = vst [vmem:[#allocation28_spill] sm:$0xff] %v5607_v23  ;;  %v5609_v19 = vpop.permute.xlu0 %1038 }
 0x91c   :  { %1466 = vrot.lane.b32.xlu1 %v5392_v14, %s7556_s25  ;;  %v1436_v36 = vrot.slane %v1432_v30, 4 }
 0x91d   :  { %1468 = vrot.lane.b32.xlu0 %v5384_v9, %s7556_s25 }
 0x91e   :  { %v1851_v1 = vpop.permute.xlu1 %1850 }
 0x91f   :  { %v1853_v45 = vsel %vm628_vm6, %v1851_v1, %v5303_v21  ;;  %v1861_v59 = vpop.permute.xlu0 %1860  ;;  %v5640_v21 = vsel %vm109_vm14, %v5493_v52, %v5495_v5 }
 0x920   :  { %1857 = vst [vmem:[#allocation2 + $0x1f8] sm:$0xf] %v1853_v45  ;;  %v1863_v33 = vsel %vm7305_vm8, %v1861_v59, %v5307_v3  ;;  %1422 = vrot.lane.b32.xlu1 %v1418_v62, %s4519_s21  ;;  %7564 = vst [vmem:[#allocation24_spill] sm:$0xff] %v5640_v21  ;;  %v1401_v30 = vmul.f32 %v5640_v21, %v4605_v8  ;;  %v2099_v38 = vmul.f32 %v5640_v21, %v4618_v13 }
 0x921   :  { %1867 = vst [vmem:[#allocation2 + $0x1f8] sm:$0xf0] %v1863_v33  ;;  %1424 = vrot.lane.b32.xlu0 %v1419_v35, %s4519_s21  ;;  %v1402_v35 = vmul.f32 0.0, %v5495_v5  ;;  %v7565_v33 = vld [vmem:[#allocation99_spill] sm:$0xff] }
 0x922   :  { %v1849_v61 = vpop.permute.xlu1 %1848 }
 0x923   :  { %v1852_v54 = vsel %vm628_vm6, %v1849_v61, %v1851_v1  ;;  %v1859_v2 = vpop.permute.xlu0 %1858 }
 0x924   :  { %1856 = vst [vmem:[#allocation2 + $0x1f0] sm:$0xf] %v1852_v54  ;;  %v1862_v45 = vsel %vm7305_vm8, %v1859_v2, %v1861_v59  ;;  %1438 = vrot.lane.b32.xlu1 %v1436_v36, %s4525_s29  ;;  %vm7568_vm8 = vcmask 400384  }
 0x925   :  { %1866 = vst [vmem:[#allocation2 + $0x1f0] sm:$0xf0] %v1862_v45  ;;  %1440 = vrot.lane.b32.xlu0 %v1437_v42, %s4525_s29  ;;  %v1400_v42 = vmul.f32 %v5493_v52, %v4612_v11  ;;  %v5668_v5 = vsel %vm7568_vm8, %v5499_v53, %v5505_v10  ;;  %vm7577_vm8 = vcmask 384000  }
 0x926   :  { %v1821_v62 = vpop.permute.xlu1 %1820  ;;  %7569 = vst [vmem:[#allocation42_spill] sm:$0xff] %v5668_v5 }
 0x927   :  { %v1823_v3 = vsel %vm687_vm11, %v1821_v62, %v7565_v33  ;;  %v1837_v1 = vpop.permute.xlu0 %1836 }
 0x928   :  { %1827 = vst [vmem:[#allocation2 + $0x1d8] sm:$0xf] %v1823_v3  ;;  %v1839_v61 = vsel %vm656_vm9, %v1837_v1, %v5297_v46  ;;  %1408 = vrot.lane.b32.xlu1 %v1401_v30, %s7566_s1  ;;  %v2190_v2 = vld [vmem:[#allocation2 + $0x1f8] sm:$0xff]  ;;  %v5663_v3 = vsel %vm150_vm10, %v5481_v25, %v5485_v28 }
 0x929   :  { %1843 = vst [vmem:[#allocation2 + $0x1d8] sm:$0xf0] %v1839_v61  ;;  %1410 = vrot.lane.b32.xlu0 %v1402_v35, %s7566_s1  ;;  %2311 = vmatprep.subr.mxu1 %v2190_v2  ;;  %7567 = vst [vmem:[#allocation25_spill] sm:$0xff] %v5663_v3  ;;  %v2098_v35 = vmul.f32 %v5493_v52, %v4614_v12  ;;  %v1372_v61 = vmul.f32 %v5663_v3, %v4605_v8  ;;  %v7570_v2 = vld [vmem:[#allocation94_spill] sm:$0xff] }
 0x92a   :  { %v1819_v59 = vpop.permute.xlu1 %1818 }
 0x92b   :  { %v1822_v54 = vsel %vm687_vm11, %v1819_v59, %v1821_v62  ;;  %v1835_v36 = vpop.permute.xlu0 %1834  ;;  %v1378_v46 = vrot.slane %v1372_v61, 4 }
 0x92c   :  { %1826 = vst [vmem:[#allocation2 + $0x1d0] sm:$0xf] %v1822_v54  ;;  %v1838_v45 = vsel %vm656_vm9, %v1835_v36, %v1837_v1  ;;  %2104 = vrot.lane.b32.xlu1 %v2099_v38, %s7566_s1  ;;  %v2189_v62 = vld [vmem:[#allocation2 + $0x1f0] sm:$0xff]  ;;  %v1346_v1 = vmul.f32 %v5668_v5, %v4605_v8  ;;  %v7571_v38 = vld [vmem:[#allocation97_spill] sm:$0xff] }
 0x92d   :  { %1842 = vst [vmem:[#allocation2 + $0x1d0] sm:$0xf0] %v1838_v45  ;;  %1406 = vrot.lane.b32.xlu0 %v1400_v42, %s7566_s1  ;;  %2312 = vmatpush1.msra.mxu1 %v2189_v62  ;;  %v1373_v45 = vmul.f32 0.0, %v5485_v28  ;;  %v1347_v62 = vmul.f32 0.0, %v5505_v10  ;;  %v2083_v28 = vmul.f32 %v5663_v3, %v4618_v13  ;;  %v7598_v3 = vld [vmem:[#allocation63_spill] sm:$0xff] }
 0x92e   :  { %v1791_v30 = vpop.permute.xlu1 %1790 }
 0x92f   :  { %v1793_v59 = vsel %vm746_vm12, %v1791_v30, %v7570_v2  ;;  %v1807_v54 = vpop.permute.xlu0 %1806 }
 0x930   :  { %1797 = vst [vmem:[#allocation2 + $0x1b8] sm:$0xf] %v1793_v59  ;;  %v1809_v36 = vsel %vm715_vm0, %v1807_v54, %v7571_v38  ;;  %2102 = vrot.lane.b32.xlu1 %v2098_v35, %s7566_s1  ;;  %v2186_v42 = vld [vmem:[#allocation2 + $0x1d8] sm:$0xff] }
 0x931   :  { %1813 = vst [vmem:[#allocation2 + $0x1b8] sm:$0xf0] %v1809_v36  ;;  %1353 = vrot.lane.b32.xlu0 %v1346_v1, %s7572_s30  ;;  %2313 = vmatprep.subr.mxu1 %v2186_v42  ;;  %v1379_v1 = vrot.slane %v1373_v45, 4  ;;  %v7574_v36 = vld [vmem:[#allocation91_spill] sm:$0xff]  ;;  %v1371_v42 = vmul.f32 %v5481_v25, %v4612_v11  ;;  %v7575_v45 = vld [vmem:[#allocation85_spill] sm:$0xff] }
 0x932   :  { %v1789_v52 = vpop.permute.xlu1 %1788 }
 0x933   :  { %v1792_v21 = vsel %vm746_vm12, %v1789_v52, %v1791_v30  ;;  %v1805_v2 = vpop.permute.xlu0 %1804 }
 0x934   :  { %1796 = vst [vmem:[#allocation2 + $0x1b0] sm:$0xf] %v1792_v21  ;;  %v1808_v59 = vsel %vm715_vm0, %v1805_v2, %v1807_v54  ;;  %1355 = vrot.lane.b32.xlu1 %v1347_v62, %s7572_s30  ;;  %v2185_v35 = vld [vmem:[#allocation2 + $0x1d0] sm:$0xff]  ;;  %v2069_v21 = vmul.f32 %v5668_v5, %v4618_v13  ;;  %v2087_v54 = vrot.slane %v2083_v28, 4 }
 0x935   :  { %1812 = vst [vmem:[#allocation2 + $0x1b0] sm:$0xf0] %v1808_v59  ;;  %1382 = vrot.lane.b32.xlu0 %v1378_v46, %s7573_s26  ;;  %2314 = vmatpush1.msra.mxu1 %v2185_v35  ;;  %v1345_v35 = vmul.f32 %v5499_v53, %v4612_v11 }
 0x936   :  { %v1777_v10 = vpop.permute.xlu1 %1776 }
 0x937   :  { %v1779_v52 = vsel %vm774_vm13, %v1777_v10, %v7574_v36  ;;  %v1775_v30 = vpop.permute.xlu0 %1774 }
 0x938   :  { %1783 = vst [vmem:[#allocation2 + $0x198] sm:$0xf0] %v1779_v52  ;;  %v1778_v61 = vsel %vm774_vm13, %v1775_v30, %v1777_v10  ;;  %1384 = vrot.lane.b32.xlu1 %v1379_v1, %s7573_s26  ;;  %v2182_v2 = vld [vmem:[#allocation2 + $0x1b8] sm:$0xff]  ;;  %v1377_v52 = vrot.slane %v1371_v42, 4  ;;  %v2082_v30 = vmul.f32 %v5481_v25, %v4614_v12 }
 0x939   :  { %1782 = vst [vmem:[#allocation2 + $0x190] sm:$0xf0] %v1778_v61  ;;  %2074 = vrot.lane.b32.xlu0 %v2069_v21, %s7572_s30  ;;  %2315 = vmatprep.subr.mxu1 %v2182_v2  ;;  %v7576_v21 = vld [vmem:[#allocation88_spill] sm:$0xff] }
 0x93a   :  { %v1741_v46 = vpop.permute.xlu1 %1740 }
 0x93b   :  { %v1744_v62 = vsel %vm763_vm5, %v7575_v45, %v1741_v46  ;;  %v1743_v59 = vpop.permute.xlu0 %1742 }
 0x93c   :  { %1748 = vst [vmem:[#allocation2 + $0x170] sm:$0xf] %v1744_v62  ;;  %v1745_v1 = vsel %vm763_vm5, %v1741_v46, %v1743_v59  ;;  %2090 = vrot.lane.b32.xlu1 %v2087_v54, %s7573_s26  ;;  %v2181_v10 = vld [vmem:[#allocation2 + $0x1b0] sm:$0xff]  ;;  %v2068_v46 = vmul.f32 %v5499_v53, %v4614_v12  ;;  %v5718_v54 = vsel %vm7577_vm8, %v5519_v6, %v5523_v20  ;;  %vm7586_vm8 = vcmask 113664  }
 0x93d   :  { %1749 = vst [vmem:[#allocation2 + $0x178] sm:$0xf] %v1745_v1  ;;  %1351 = vrot.lane.b32.xlu0 %v1345_v35, %s7572_s30  ;;  %2316 = vmatpush1.msra.mxu1 %v2181_v10  ;;  %7578 = vst [vmem:[#allocation23_spill] sm:$0xff] %v5718_v54  ;;  %v2086_v35 = vrot.slane %v2082_v30, 4  ;;  %v7579_v1 = vld [vmem:[#allocation79_spill] sm:$0xff]  ;;  %v1307_v25 = vmul.f32 %v5718_v54, %v4605_v8 }
 0x93e   :  { %v1757_v28 = vpop.permute.xlu1 %1756 }
 0x93f   :  { %v1760_v61 = vsel %vm794_vm15, %v7576_v21, %v1757_v28  ;;  %v1759_v2 = vpop.permute.xlu0 %1758  ;;  %v2178_v5 = vld [vmem:[#allocation2 + $0x198] sm:$0xff] }
 0x940   :  { %1764 = vst [vmem:[#allocation2 + $0x170] sm:$0xf0] %v1760_v61  ;;  %v1761_v62 = vsel %vm794_vm15, %v1757_v28, %v1759_v2  ;;  %1380 = vrot.lane.b32.xlu1 %v1377_v52, %s7573_s26  ;;  %2317 = vmatprep.subr.mxu1 %v2178_v5  ;;  %v2177_v42 = vld [vmem:[#allocation2 + $0x190] sm:$0xff]  ;;  %v1308_v5 = vmul.f32 0.0, %v5523_v20  ;;  %v7583_v20 = vld [vmem:[#allocation73_spill] sm:$0xff] }
 0x941   :  { %1765 = vst [vmem:[#allocation2 + $0x178] sm:$0xf0] %v1761_v62  ;;  %2072 = vrot.lane.b32.xlu0 %v2068_v46, %s7572_s30  ;;  %2318 = vmatpush1.msra.mxu1 %v2177_v42  ;;  %v7581_v61 = vld [vmem:[#allocation82_spill] sm:$0xff] }
 0x942   :  { %v1711_v59 = vpop.permute.xlu1 %1710 }
 0x943   :  { %v1714_v10 = vsel %vm7385_vm1, %v7579_v1, %v1711_v59  ;;  %v1713_v53 = vpop.permute.xlu0 %1712 }
 0x944   :  { %1718 = vst [vmem:[#allocation2 + $0x150] sm:$0xf] %v1714_v10  ;;  %v1715_v28 = vsel %vm7385_vm1, %v1711_v59, %v1713_v53  ;;  %2088 = vrot.lane.b32.xlu1 %v2086_v35, %s7573_s26  ;;  %v7582_v53 = vld [vmem:[#allocation21_spill] sm:$0xff]  ;;  %v2045_v10 = vmul.f32 %v5718_v54, %v4618_v13 }
 0x945   :  { %1719 = vst [vmem:[#allocation2 + $0x158] sm:$0xf] %v1715_v28  ;;  %1314 = vrot.lane.b32.xlu0 %v1307_v25, %s7580_s5 }
 0x946   :  { %v1727_v52 = vpop.permute.xlu1 %1726 }
 0x947   :  { %v1730_v30 = vsel %vm7326_vm3, %v7581_v61, %v1727_v52  ;;  %v1729_v2 = vpop.permute.xlu0 %1728  ;;  %v2173_v25 = vld [vmem:[#allocation2 + $0x170] sm:$0xff] }
 0x948   :  { %1734 = vst [vmem:[#allocation2 + $0x150] sm:$0xf0] %v1730_v30  ;;  %v1731_v46 = vsel %vm7326_vm3, %v1727_v52, %v1729_v2  ;;  %1316 = vrot.lane.b32.xlu1 %v1308_v5, %s7580_s5  ;;  %v2174_v62 = vld [vmem:[#allocation2 + $0x178] sm:$0xff]  ;;  %v7584_v5 = vld [vmem:[#allocation20_spill] sm:$0xff]  ;;  %vm7587_vm3 = vmmov %vm7586_vm8 }
 0x949   :  { %1735 = vst [vmem:[#allocation2 + $0x158] sm:$0xf0] %v1731_v46  ;;  %1326 = vrot.lane.b32.xlu0 %v7582_v53, %s7335_s27  ;;  %2319 = vmatprep.subr.mxu1 %v2174_v62  ;;  %v7585_v30 = vld [vmem:[#allocation76_spill] sm:$0xff]  ;;  %v1306_v62 = vmul.f32 %v5519_v6, %v4612_v11 }
 0x94a   :  { %v1681_v42 = vpop.permute.xlu1 %1680  ;;  %2320 = vmatpush1.msra.mxu1 %v2173_v25 }
 0x94b   :  { %v1684_v59 = vsel %vm7340_vm7, %v7583_v20, %v1681_v42  ;;  %v1683_v35 = vpop.permute.xlu0 %1682 }
 0x94c   :  { %1688 = vst [vmem:[#allocation2 + $0x130] sm:$0xf] %v1684_v59  ;;  %v1685_v28 = vsel %vm7340_vm7, %v1681_v42, %v1683_v35  ;;  %1328 = vrot.lane.b32.xlu1 %v7584_v5, %s7335_s27  ;;  %v7588_v35 = vld [vmem:[#allocation69_spill] sm:$0xff]  ;;  %v2044_v5 = vmul.f32 %v5519_v6, %v4614_v12 }
 0x94d   :  { %1689 = vst [vmem:[#allocation2 + $0x138] sm:$0xf] %v1685_v28  ;;  %2050 = vrot.lane.b32.xlu0 %v2045_v10, %s7580_s5 }
 0x94e   :  { %v1697_v52 = vpop.permute.xlu1 %1696 }
 0x94f   :  { %v1700_v2 = vsel %vm7586_vm8, %v7585_v30, %v1697_v52  ;;  %v1699_v46 = vpop.permute.xlu0 %1698  ;;  %v2169_v42 = vld [vmem:[#allocation2 + $0x150] sm:$0xff]  ;;  %vm7591_vm8 = vcmask 367616  }
 0x950   :  { %1704 = vst [vmem:[#allocation2 + $0x130] sm:$0xf0] %v1700_v2  ;;  %v1701_v53 = vsel %vm7587_vm3, %v1697_v52, %v1699_v46  ;;  %2060 = vrot.lane.b32.xlu1 %v5384_v9, %s7335_s27  ;;  %v2170_v25 = vld [vmem:[#allocation2 + $0x158] sm:$0xff]  ;;  %vm7589_vm3 = vcmask 375808   ;;  %v5765_v9 = vsel %vm7591_vm8, %v5537_v29, %v5543_v44  ;;  %v7593_v46 = vld [vmem:[#allocation22_spill] sm:$0xff] }
 0x951   :  { %1705 = vst [vmem:[#allocation2 + $0x138] sm:$0xf0] %v1701_v53  ;;  %1312 = vrot.lane.b32.xlu0 %v1306_v62, %s7580_s5  ;;  %2321 = vmatprep.subr.mxu1 %v2170_v25  ;;  %v5760_v52 = vsel %vm7589_vm3, %v5513_v22, %v5515_v27  ;;  %7592 = vst [vmem:[#allocation99_spill] sm:$0xff] %v5765_v9  ;;  %v7594_v25 = vld [vmem:[#allocation70_spill] sm:$0xff]  ;;  %vm7595_vm3 = vcmask 130048   ;;  %v1252_v54 = vmul.f32 %v5765_v9, %v4605_v8 }
 0x952   :  { %v1657_v59 = vpop.permute.xlu1 %1656  ;;  %2322 = vmatpush1.msra.mxu1 %v2169_v42  ;;  %7590 = vst [vmem:[#allocation26_spill] sm:$0xff] %v5760_v52  ;;  %v1278_v53 = vmul.f32 %v5760_v52, %v4605_v8  ;;  %vm7596_vm8 = vmmov %vm7595_vm3 }
 0x953   :  { %v1660_v10 = vsel %vm7337_vm4, %v7588_v35, %v1657_v59  ;;  %v1659_v28 = vpop.permute.xlu0 %1658 }
 0x954   :  { %1664 = vst [vmem:[#allocation2 + $0x110] sm:$0xf] %v1660_v10  ;;  %v1661_v2 = vsel %vm7337_vm4, %v1657_v59, %v1659_v28  ;;  %1324 = vrot.lane.b32.xlu1 %v7593_v46, %s7335_s27  ;;  %vm7603_vm4 = vcmask 146432  }
 0x955   :  { %1665 = vst [vmem:[#allocation2 + $0x118] sm:$0xf] %v1661_v2  ;;  %2048 = vrot.lane.b32.xlu0 %v2044_v5, %s7580_s5  ;;  %v1279_v5 = vmul.f32 0.0, %v5515_v27  ;;  %v1253_v2 = vmul.f32 0.0, %v5543_v44  ;;  %v2029_v27 = vmul.f32 %v5760_v52, %v4618_v13 }
 0x956   :  { %v1667_v62 = vpop.permute.xlu1 %1666 }
 0x957   :  { %v1670_v42 = vsel %vm7595_vm3, %v7594_v25, %v1667_v62  ;;  %v1669_v6 = vpop.permute.xlu0 %1668  ;;  %v2165_v28 = vld [vmem:[#allocation2 + $0x130] sm:$0xff]  ;;  %vm7599_vm3 = vcmask 154624  }
 0x958   :  { %1674 = vst [vmem:[#allocation2 + $0x110] sm:$0xf0] %v1670_v42  ;;  %v1671_v59 = vsel %vm7596_vm8, %v1667_v62, %v1669_v6  ;;  %2058 = vrot.lane.b32.xlu1 %v5392_v14, %s7335_s27  ;;  %v2166_v10 = vld [vmem:[#allocation2 + $0x138] sm:$0xff]  ;;  %v1284_v6 = vrot.slane %v1278_v53, 4  ;;  %vm7600_vm8 = vmmov %vm7599_vm3  ;;  %s7601_s27 = smov 82   ;;  %v7602_v62 = vld [vmem:[#allocation66_spill] sm:$0xff]  ;;  %v2015_v53 = vmul.f32 %v5765_v9, %v4618_v13  ;;  %v2014_v9 = vmul.f32 %v5537_v29, %v4614_v12 }
 0x959   :  { %1675 = vst [vmem:[#allocation2 + $0x118] sm:$0xf0] %v1671_v59  ;;  %1259 = vrot.lane.b32.xlu0 %v1252_v54, %s7597_s6  ;;  %2323 = vmatprep.subr.mxu1 %v2166_v10  ;;  %v1285_v54 = vrot.slane %v1279_v5, 4 }
 0x95a   :  { %v1627_v46 = vpop.permute.xlu1 %1626  ;;  %2324 = vmatpush1.msra.mxu1 %v2165_v28 }
 0x95b   :  { %v1630_v42 = vsel %vm7599_vm3, %v7598_v3, %v1627_v46  ;;  %v1629_v25 = vpop.permute.xlu0 %1628  ;;  %vm7604_vm3 = vmmov %vm7603_vm4 }
 0x95c   :  { %1634 = vst [vmem:[#allocation2 + $0xf0] sm:$0xf] %v1630_v42  ;;  %v1631_v14 = vsel %vm7600_vm8, %v1627_v46, %v1629_v25  ;;  %1261 = vrot.lane.b32.xlu1 %v1253_v2, %s7597_s6  ;;  %v2033_v46 = vrot.slane %v2029_v27, 4  ;;  %v1277_v42 = vmul.f32 %v5513_v22, %v4612_v11 }
 0x95d   :  { %1635 = vst [vmem:[#allocation2 + $0xf8] sm:$0xf] %v1631_v14  ;;  %1288 = vrot.lane.b32.xlu0 %v1284_v6, %s7601_s27  ;;  %v7605_v6 = vld [vmem:[#allocation54_spill] sm:$0xff] }
 0x95e   :  { %v1643_v44 = vpop.permute.xlu1 %1642  ;;  %v1283_v27 = vrot.slane %v1277_v42, 4 }
 0x95f   :  { %v1646_v59 = vsel %vm7603_vm4, %v7602_v62, %v1643_v44  ;;  %v1645_v10 = vpop.permute.xlu0 %1644  ;;  %v2161_v5 = vld [vmem:[#allocation2 + $0x110] sm:$0xff]  ;;  %vm7606_vm4 = vcmask 244736  }
 0x960   :  { %1650 = vst [vmem:[#allocation2 + $0xf0] sm:$0xf0] %v1646_v59  ;;  %v1647_v25 = vsel %vm7604_vm3, %v1643_v44, %v1645_v10  ;;  %1290 = vrot.lane.b32.xlu1 %v1285_v54, %s7601_s27  ;;  %v2162_v28 = vld [vmem:[#allocation2 + $0x118] sm:$0xff]  ;;  %v1251_v44 = vmul.f32 %v5537_v29, %v4612_v11  ;;  %vm7607_vm8 = vmmov %vm7606_vm4  ;;  %vm7609_vm3 = vcmask 236544  }
 0x961   :  { %1651 = vst [vmem:[#allocation2 + $0xf8] sm:$0xf0] %v1647_v25  ;;  %2020 = vrot.lane.b32.xlu0 %v2015_v53, %s7597_s6  ;;  %2325 = vmatprep.subr.mxu1 %v2162_v28  ;;  %v2028_v53 = vmul.f32 %v5513_v22, %v4614_v12  ;;  %v7608_v25 = vld [vmem:[#allocation60_spill] sm:$0xff]  ;;  %vm7614_vm7 = vmmov %vm7609_vm3  ;;  %v7615_v22 = vld [vmem:[#allocation38_spill] sm:$0xff] }
 0x962   :  { %v1597_v2 = vpop.permute.xlu1 %1596  ;;  %2326 = vmatpush1.msra.mxu1 %v2161_v5 }
 0x963   :  { %v1600_v14 = vsel %vm7606_vm4, %v7605_v6, %v1597_v2  ;;  %v1599_v59 = vpop.permute.xlu0 %1598  ;;  %vm7610_vm4 = vcmask 285696  }
 0x964   :  { %1604 = vst [vmem:[#allocation2 + $0xd0] sm:$0xf] %v1600_v14  ;;  %v1601_v54 = vsel %vm7607_vm8, %v1597_v2, %v1599_v59  ;;  %2036 = vrot.lane.b32.xlu1 %v2033_v46, %s7601_s27  ;;  %v5815_v2 = vsel %vm7610_vm4, %v5531_v17, %v5533_v16  ;;  %vm7612_vm8 = vcmask 277504   ;;  %vm7620_vm4 = vcmask 252928  }
 0x965   :  { %1605 = vst [vmem:[#allocation2 + $0xd8] sm:$0xf] %v1601_v54  ;;  %1257 = vrot.lane.b32.xlu0 %v1251_v44, %s7597_s6  ;;  %7611 = vst [vmem:[#allocation97_spill] sm:$0xff] %v5815_v2  ;;  %v5820_v46 = vsel %vm7612_vm8, %v5557_v49, %v5563_v37  ;;  %v2032_v54 = vrot.slane %v2028_v53, 4  ;;  %v1223_v29 = vmul.f32 %v5815_v2, %v4605_v8  ;;  %v1198_v53 = vmul.f32 0.0, %v5563_v37 }
 0x966   :  { %v1613_v10 = vpop.permute.xlu1 %1612  ;;  %7613 = vst [vmem:[#allocation91_spill] sm:$0xff] %v5820_v46  ;;  %vm7621_vm8 = vmmov %vm7620_vm4  ;;  %v1999_v37 = vmul.f32 %v5815_v2, %v4618_v13 }
 0x967   :  { %v1616_v28 = vsel %vm7609_vm3, %v7608_v25, %v1613_v10  ;;  %v1615_v5 = vpop.permute.xlu0 %1614  ;;  %v2157_v59 = vld [vmem:[#allocation2 + $0xf0] sm:$0xff]  ;;  %vm7616_vm3 = vcmask 261120  }
 0x968   :  { %1620 = vst [vmem:[#allocation2 + $0xd0] sm:$0xf0] %v1616_v28  ;;  %v1617_v42 = vsel %vm7614_vm7, %v1613_v10, %v1615_v5  ;;  %1286 = vrot.lane.b32.xlu1 %v1283_v27, %s7601_s27  ;;  %v2158_v14 = vld [vmem:[#allocation2 + $0xf8] sm:$0xff]  ;;  %v1197_v10 = vmul.f32 %v5820_v46, %v4605_v8  ;;  %vm7617_vm7 = vmmov %vm7616_vm3 }
 0x969   :  { %1621 = vst [vmem:[#allocation2 + $0xd8] sm:$0xf0] %v1617_v42  ;;  %2018 = vrot.lane.b32.xlu0 %v2014_v9, %s7597_s6  ;;  %2327 = vmatprep.subr.mxu1 %v2158_v14  ;;  %v1224_v9 = vmul.f32 0.0, %v5533_v16  ;;  %v7619_v42 = vld [vmem:[#allocation59_spill] sm:$0xff] }
 0x96a   :  { %v1567_v44 = vpop.permute.xlu1 %1566  ;;  %2328 = vmatpush1.msra.mxu1 %v2157_v59 }
 0x96b   :  { %v1570_v52 = vsel %vm7616_vm3, %v7615_v22, %v1567_v44  ;;  %v1569_v28 = vpop.permute.xlu0 %1568  ;;  %v1229_v22 = vrot.slane %v1223_v29, 4  ;;  %v1230_v16 = vrot.slane %v1224_v9, 4  ;;  %vm7624_vm3 = vcmask 277504  }
 0x96c   :  { %1574 = vst [vmem:[#allocation2 + $0xb0] sm:$0xf] %v1570_v52  ;;  %v1571_v27 = vsel %vm7617_vm7, %v1567_v44, %v1569_v28  ;;  %2034 = vrot.lane.b32.xlu1 %v2032_v54, %s7601_s27  ;;  %vm7625_vm7 = vmmov %vm7624_vm3  ;;  %v2003_v9 = vrot.slane %v1999_v37, 4 }
 0x96d   :  { %1575 = vst [vmem:[#allocation2 + $0xb8] sm:$0xf] %v1571_v27  ;;  %1204 = vrot.lane.b32.xlu0 %v1197_v10, %s7618_s0  ;;  %v7623_v10 = vld [vmem:[#allocation53_spill] sm:$0xff] }
 0x96e   :  { %v1583_v5 = vpop.permute.xlu1 %1582 }
 0x96f   :  { %v1586_v14 = vsel %vm7620_vm4, %v7619_v42, %v1583_v5  ;;  %v1585_v59 = vpop.permute.xlu0 %1584  ;;  %v2153_v54 = vld [vmem:[#allocation2 + $0xd0] sm:$0xff]  ;;  %vm7627_vm4 = vcmask 269312  }
 0x970   :  { %1590 = vst [vmem:[#allocation2 + $0xb0] sm:$0xf0] %v1586_v14  ;;  %v1587_v52 = vsel %vm7621_vm8, %v1583_v5, %v1585_v59  ;;  %1206 = vrot.lane.b32.xlu1 %v1198_v53, %s7618_s0  ;;  %v2154_v44 = vld [vmem:[#allocation2 + $0xd8] sm:$0xff]  ;;  %v1985_v5 = vmul.f32 %v5820_v46, %v4618_v13  ;;  %v1222_v14 = vmul.f32 %v5531_v17, %v4612_v11  ;;  %v7626_v59 = vld [vmem:[#allocation58_spill] sm:$0xff]  ;;  %vm7628_vm8 = vmmov %vm7627_vm4 }
 0x971   :  { %1591 = vst [vmem:[#allocation2 + $0xb8] sm:$0xf0] %v1587_v52  ;;  %1233 = vrot.lane.b32.xlu0 %v1229_v22, %s7622_s23  ;;  %2329 = vmatprep.subr.mxu1 %v2154_v44 }
 0x972   :  { %v1541_v28 = vpop.permute.xlu1 %1540  ;;  %2330 = vmatpush1.msra.mxu1 %v2153_v54  ;;  %v1196_v54 = vmul.f32 %v5557_v49, %v4612_v11 }
 0x973   :  { %v1544_v29 = vsel %vm7624_vm3, %v7623_v10, %v1541_v28  ;;  %v1543_v27 = vpop.permute.xlu0 %1542  ;;  %vm7630_vm3 = vcmask 367616  }
 0x974   :  { %1548 = vst [vmem:[#allocation2 + $0x90] sm:$0xf] %v1544_v29  ;;  %v1545_v53 = vsel %vm7625_vm7, %v1541_v28, %v1543_v27  ;;  %1235 = vrot.lane.b32.xlu1 %v1230_v16, %s7622_s23  ;;  %v1228_v27 = vrot.slane %v1222_v14, 4  ;;  %vm7631_vm7 = vmmov %vm7627_vm4 }
 0x975   :  { %1549 = vst [vmem:[#allocation2 + $0x98] sm:$0xf] %v1545_v53  ;;  %1990 = vrot.lane.b32.xlu0 %v1985_v5, %s7618_s0  ;;  %v1998_v5 = vmul.f32 %v5531_v17, %v4614_v12  ;;  %v7629_v53 = vld [vmem:[#allocation52_spill] sm:$0xff] }
 0x976   :  { %v1557_v22 = vpop.permute.xlu1 %1556 }
 0x977   :  { %v1560_v52 = vsel %vm7627_vm4, %v7626_v59, %v1557_v22  ;;  %v1559_v44 = vpop.permute.xlu0 %1558  ;;  %v2149_v37 = vld [vmem:[#allocation2 + $0xb0] sm:$0xff]  ;;  %vm7633_vm4 = vmmov %vm7630_vm3 }
 0x978   :  { %1564 = vst [vmem:[#allocation2 + $0x90] sm:$0xf0] %v1560_v52  ;;  %v1561_v28 = vsel %vm7628_vm8, %v1557_v22, %v1559_v44  ;;  %2006 = vrot.lane.b32.xlu1 %v2003_v9, %s7622_s23  ;;  %v2150_v16 = vld [vmem:[#allocation2 + $0xb8] sm:$0xff]  ;;  %v1984_v22 = vmul.f32 %v5557_v49, %v4614_v12  ;;  %v5868_v9 = vsel %vm7631_vm7, %v5551_v15, %v5553_v63  ;;  %vm7635_vm8 = vcmask 285696  }
 0x979   :  { %1565 = vst [vmem:[#allocation2 + $0x98] sm:$0xf0] %v1561_v28  ;;  %1202 = vrot.lane.b32.xlu0 %v1196_v54, %s7618_s0  ;;  %2331 = vmatprep.subr.mxu1 %v2150_v16  ;;  %7632 = vst [vmem:[#allocation85_spill] sm:$0xff] %v5868_v9  ;;  %v2002_v54 = vrot.slane %v1998_v5, 4  ;;  %v1168_v28 = vmul.f32 %v5868_v9, %v4605_v8  ;;  %v7634_v16 = vld [vmem:[#allocation57_spill] sm:$0xff]  ;;  %vm7638_vm7 = vcmask 384000  }
 0x97a   :  { %v1511_v29 = vpop.permute.xlu1 %1510  ;;  %2332 = vmatpush1.msra.mxu1 %v2149_v37 }
 0x97b   :  { %v1514_v46 = vsel %vm7630_vm3, %v7629_v53, %v1511_v29  ;;  %v1513_v52 = vpop.permute.xlu0 %1512  ;;  %vm7636_vm3 = vmmov %vm7635_vm8 }
 0x97c   :  { %1518 = vst [vmem:[#allocation2 + $0x70] sm:$0xf] %v1514_v46  ;;  %v1515_v44 = vsel %vm7633_vm4, %v1511_v29, %v1513_v52  ;;  %1231 = vrot.lane.b32.xlu1 %v1228_v27, %s7622_s23  ;;  %v1169_v27 = vmul.f32 0.0, %v5553_v63  ;;  %v7637_v52 = vld [vmem:[#allocation51_spill] sm:$0xff]  ;;  %vm7639_vm4 = vmmov %vm7638_vm7  ;;  %v1969_v63 = vmul.f32 %v5868_v9, %v4618_v13  ;;  %v7655_v9 = vld [vmem:[#allocation49_spill] sm:$0xff] }
 0x97d   :  { %1519 = vst [vmem:[#allocation2 + $0x78] sm:$0xf] %v1515_v44  ;;  %1988 = vrot.lane.b32.xlu0 %v1984_v22, %s7618_s0 }
 0x97e   :  { %v1527_v14 = vpop.permute.xlu1 %1526 }
 0x97f   :  { %v1530_v37 = vsel %vm7635_vm8, %v7634_v16, %v1527_v14  ;;  %v1529_v53 = vpop.permute.xlu0 %1528  ;;  %v2145_v29 = vld [vmem:[#allocation2 + $0x90] sm:$0xff]  ;;  %vm7643_vm8 = vcmask 375808  }
 0x980   :  { %1534 = vst [vmem:[#allocation2 + $0x70] sm:$0xf0] %v1530_v37  ;;  %v1531_v49 = vsel %vm7636_vm3, %v1527_v14, %v1529_v53  ;;  %2004 = vrot.lane.b32.xlu1 %v2002_v54, %s7622_s23  ;;  %v2146_v46 = vld [vmem:[#allocation2 + $0x98] sm:$0xff]  ;;  %v1174_v37 = vrot.slane %v1168_v28, 4  ;;  %v1175_v14 = vrot.slane %v1169_v27, 4  ;;  %vm7644_vm3 = vmmov %vm7643_vm8 }
 0x981   :  { %1535 = vst [vmem:[#allocation2 + $0x78] sm:$0xf0] %v1531_v49  ;;  %1148 = vrot.lane.b32.xlu0 %v4605_v8, %s7365_s8  ;;  %2333 = vmatprep.subr.mxu1 %v2146_v46  ;;  %v7640_v49 = vmov 0.0   ;;  %v7642_v46 = vld [vmem:[#allocation56_spill] sm:$0xff] }
 0x982   :  { %v1481_v5 = vpop.permute.xlu1 %1480  ;;  %2334 = vmatpush1.msra.mxu1 %v2145_v29 }
 0x983   :  { %v1484_v22 = vsel %vm7638_vm7, %v7637_v52, %v1481_v5  ;;  %v1483_v44 = vpop.permute.xlu0 %1482  ;;  %vm7646_vm7 = vcmask 400384  }
 0x984   :  { %1488 = vst [vmem:[#allocation2 + $0x50] sm:$0xf] %v1484_v22  ;;  %v1485_v53 = vsel %vm7639_vm4, %v1481_v5, %v1483_v44  ;;  %1150 = vrot.lane.b32.xlu1 %v7640_v49, %s7365_s8  ;;  %v1973_v44 = vrot.slane %v1969_v63, 4  ;;  %vm7647_vm4 = vmmov %vm7646_vm7  ;;  %v1968_v63 = vmul.f32 %v5551_v15, %v4614_v12 }
 0x985   :  { %1489 = vst [vmem:[#allocation2 + $0x58] sm:$0xf] %v1485_v53  ;;  %1178 = vrot.lane.b32.xlu0 %v1174_v37, %s7641_s24  ;;  %v1167_v37 = vmul.f32 %v5551_v15, %v4612_v11  ;;  %v7645_v53 = vld [vmem:[#allocation50_spill] sm:$0xff] }
 0x986   :  { %v1497_v54 = vpop.permute.xlu1 %1496  ;;  %v1972_v15 = vrot.slane %v1968_v63, 4  ;;  %v1127_v63 = vmul.f32 0.0, %v5573_v41 }
 0x987   :  { %v1500_v29 = vsel %vm7643_vm8, %v7642_v46, %v1497_v54  ;;  %v1499_v52 = vpop.permute.xlu0 %1498  ;;  %v2141_v27 = vld [vmem:[#allocation2 + $0x70] sm:$0xff]  ;;  %vm7649_vm8 = vcmask 392192  }
 0x988   :  { %1504 = vst [vmem:[#allocation2 + $0x50] sm:$0xf0] %v1500_v29  ;;  %v1501_v28 = vsel %vm7644_vm3, %v1497_v54, %v1499_v52  ;;  %1180 = vrot.lane.b32.xlu1 %v1175_v14, %s7641_s24  ;;  %v2142_v5 = vld [vmem:[#allocation2 + $0x78] sm:$0xff]  ;;  %v1173_v54 = vrot.slane %v1167_v37, 4  ;;  %vm7650_vm3 = vcmask 252928  }
 0x989   :  { %1505 = vst [vmem:[#allocation2 + $0x58] sm:$0xf0] %v1501_v28  ;;  %1960 = vrot.lane.b32.xlu0 %v4618_v13, %s7365_s8  ;;  %2335 = vmatprep.subr.mxu1 %v2142_v5  ;;  %v7648_v28 = vld [vmem:[#allocation27_spill] sm:$0xff] }
 0x98a   :  { %v1453_v22 = vpop.permute.xlu1 %1452  ;;  %2336 = vmatpush1.msra.mxu1 %v2141_v27 }
 0x98b   :  { %v1456_v29 = vsel %vm7646_vm7, %v7645_v53, %v1453_v22  ;;  %v1455_v46 = vpop.permute.xlu0 %1454  ;;  %vm7652_vm7 = vcmask 244736  }
 0x98c   :  { %1460 = vst [vmem:[#allocation2 + $0x30] sm:$0xf] %v1456_v29  ;;  %v1457_v52 = vsel %vm7647_vm4, %v1453_v22, %v1455_v46  ;;  %1976 = vrot.lane.b32.xlu1 %v1973_v44, %s7641_s24  ;;  %v5911_v29 = vsel %vm7650_vm3, %v5571_v43, %v5573_v41  ;;  %v5916_v46 = vsel %vm7652_vm7, %v5591_v47, %v5593_v7  ;;  %vm7654_vm4 = vmmov %vm7649_vm8  ;;  %v1133_v41 = vrot.slane %v1127_v63, 4 }
 0x98d   :  { %1461 = vst [vmem:[#allocation2 + $0x38] sm:$0xf] %v1457_v52  ;;  %1146 = vrot.lane.b32.xlu0 %v4612_v11, %s7365_s8  ;;  %7651 = vst [vmem:[#allocation88_spill] sm:$0xff] %v5911_v29  ;;  %v1126_v16 = vmul.f32 %v5911_v29, %v4605_v8  ;;  %v1125_v63 = vmul.f32 %v5571_v43, %v4612_v11 }
 0x98e   :  { %v1467_v14 = vpop.permute.xlu1 %1466  ;;  %7653 = vst [vmem:[#allocation79_spill] sm:$0xff] %v5916_v46 }
 0x98f   :  { %v1470_v5 = vsel %vm7649_vm8, %v7648_v28, %v1467_v14  ;;  %v1469_v27 = vpop.permute.xlu0 %1468  ;;  %v2137_v37 = vld [vmem:[#allocation2 + $0x50] sm:$0xff]  ;;  %v1132_v2 = vrot.slane %v1126_v16, 4  ;;  %v1929_v16 = vmul.f32 %v5916_v46, %v4618_v13  ;;  %vm7660_vm8 = vcmask 629760  }
 0x990   :  { %1474 = vst [vmem:[#allocation2 + $0x30] sm:$0xf0] %v1470_v5  ;;  %v1471_v22 = vsel %vm7654_vm4, %v1467_v14, %v1469_v27  ;;  %1176 = vrot.lane.b32.xlu1 %v1173_v54, %s7641_s24  ;;  %v2138_v44 = vld [vmem:[#allocation2 + $0x58] sm:$0xff]  ;;  %v1100_v14 = vmul.f32 %v5916_v46, %v4605_v8  ;;  %v1101_v27 = vmul.f32 0.0, %v5593_v7  ;;  %v1943_v7 = vmul.f32 %v5911_v29, %v4618_v13  ;;  %vm7661_vm3 = vmmov %vm7660_vm8 }
 0x991   :  { %1475 = vst [vmem:[#allocation2 + $0x38] sm:$0xf0] %v1471_v22  ;;  %1958 = vrot.lane.b32.xlu0 %v4614_v12, %s7365_s8  ;;  %2337 = vmatprep.subr.mxu1 %v2138_v44  ;;  %s7656_s8 = smov 98   ;;  %v7657_v44 = vld [vmem:[#allocation55_spill] sm:$0xff]  ;;  %vm7662_vm7 = vmmov %vm7661_vm3 }
 0x992   :  { %v1423_v52 = vpop.permute.xlu1 %1422  ;;  %2338 = vmatpush1.msra.mxu1 %v2137_v37  ;;  %vm7663_vm4 = vmmov %vm7661_vm3 }
 0x993   :  { %v1426_v5 = vsel %vm109_vm14, %v7655_v9, %v1423_v52  ;;  %v1425_v17 = vpop.permute.xlu0 %1424 }
 0x994   :  { %1430 = vst [vmem:[#allocation2 + $0x10] sm:$0xf] %v1426_v5  ;;  %v1427_v54 = vsel %vm109_vm14, %v1423_v52, %v1425_v17  ;;  %1974 = vrot.lane.b32.xlu1 %v1972_v15, %s7641_s24 }
 0x995   :  { %1431 = vst [vmem:[#allocation2 + $0x18] sm:$0xf] %v1427_v54  ;;  %1107 = vrot.lane.b32.xlu0 %v1100_v14, %s7656_s8  ;;  %v1947_v54 = vrot.slane %v1943_v7, 4  ;;  %v1131_v7 = vrot.slane %v1125_v63, 4 }
 0x996   :  { %v1439_v22 = vpop.permute.xlu1 %1438 }
 0x997   :  { %v1442_v37 = vsel %vm150_vm10, %v7657_v44, %v1439_v22  ;;  %v1441_v59 = vpop.permute.xlu0 %1440  ;;  %v2133_v15 = vld [vmem:[#allocation2 + $0x30] sm:$0xff] }
 0x998   :  { %1446 = vst [vmem:[#allocation2 + $0x10] sm:$0xf0] %v1442_v37  ;;  %v1443_v5 = vsel %vm150_vm10, %v1439_v22, %v1441_v59  ;;  %1109 = vrot.lane.b32.xlu1 %v1101_v27, %s7656_s8  ;;  %v2134_v17 = vld [vmem:[#allocation2 + $0x38] sm:$0xff]  ;;  %v1099_v37 = vmul.f32 %v5591_v47, %v4612_v11 }
 0x999   :  { %1447 = vst [vmem:[#allocation2 + $0x18] sm:$0xf0] %v1443_v5  ;;  %1136 = vrot.lane.b32.xlu0 %v1132_v2, %s7658_s7  ;;  %2339 = vmatprep.subr.mxu1 %v2134_v17 }
 0x99a   :  { %v1409_v52 = vpop.permute.xlu1 %1408  ;;  %2340 = vmatpush1.msra.mxu1 %v2133_v15 }
 0x99b   :  { %v5940_v14 = vpop.permute.xlu0 %1410 }
 0x99c   :  { %7659 = vst [vmem:[#allocation82_spill] sm:$0xff] %v5940_v14  ;;  %v1413_v59 = vsel %vm7660_vm8, %v1409_v52, %v5940_v14  ;;  %1138 = vrot.lane.b32.xlu1 %v1133_v41, %s7658_s7  ;;  %vm7664_vm8 = vcmask 236544  }
 0x99d   :  { %1417 = vst [vmem:[#allocation2 + $0x308] sm:$0xf] %v1413_v59  ;;  %1934 = vrot.lane.b32.xlu0 %v1929_v16, %s7656_s8  ;;  %v1942_v16 = vmul.f32 %v5571_v43, %v4614_v12 }
 0x99e   :  { %v2105_v2 = vpop.permute.xlu1 %2104 }
 0x99f   :  { %v2107_v27 = vsel %vm7661_vm3, %v2105_v2, %v5940_v14  ;;  %v1407_v22 = vpop.permute.xlu0 %1406  ;;  %v2129_v15 = vld [vmem:[#allocation2 + $0x10] sm:$0xff]  ;;  %vm7666_vm3 = vcmask 154624  }
 0x9a0   :  { %2111 = vst [vmem:[#allocation2 + $0x318] sm:$0xf] %v2107_v27  ;;  %v1412_v5 = vsel %vm7662_vm7, %v1407_v22, %v1409_v52  ;;  %1950 = vrot.lane.b32.xlu1 %v1947_v54, %s7658_s7  ;;  %v2130_v17 = vld [vmem:[#allocation2 + $0x18] sm:$0xff]  ;;  %v1928_v52 = vmul.f32 %v5591_v47, %v4614_v12  ;;  %v5965_v54 = vsel %vm7664_vm8, %v5577_v4, %v5583_v0  ;;  %v1946_v22 = vrot.slane %v1942_v16, 4 }
 0x9a1   :  { %1416 = vst [vmem:[#allocation2 + $0x300] sm:$0xf] %v1412_v5  ;;  %1105 = vrot.lane.b32.xlu0 %v1099_v37, %s7656_s8  ;;  %2341 = vmatprep.subr.mxu1 %v2130_v17  ;;  %7665 = vst [vmem:[#allocation21_spill] sm:$0xff] %v5965_v54  ;;  %v5970_v27 = vsel %vm7666_vm3, %v5607_v23, %v5609_v19  ;;  %v1071_v37 = vmul.f32 %v5965_v54, %v4605_v8  ;;  %vm7669_vm7 = vcmask 646144   ;;  %v1072_v16 = vmul.f32 0.0, %v5583_v0 }
 0x9a2   :  { %v2103_v41 = vpop.permute.xlu1 %2102  ;;  %2342 = vmatpush1.msra.mxu1 %v2129_v15  ;;  %7667 = vst [vmem:[#allocation73_spill] sm:$0xff] %v5970_v27  ;;  %vm7673_vm8 = vmmov %vm7669_vm7 }
 0x9a3   :  { %v2106_v59 = vsel %vm7663_vm4, %v2103_v41, %v2105_v2  ;;  %v1354_v14 = vpop.permute.xlu0 %1353  ;;  %v1045_v41 = vmul.f32 %v5970_v27, %v4605_v8  ;;  %vm7672_vm4 = vcmask 637952   ;;  %v1078_v0 = vrot.slane %v1072_v16, 4 }
 0x9a4   :  { %2110 = vst [vmem:[#allocation2 + $0x310] sm:$0xf] %v2106_v59  ;;  %1134 = vrot.lane.b32.xlu1 %v1131_v7, %s7658_s7  ;;  %v2224_v63 = vld [vmem:[#allocation2 + $0x308] sm:$0xff]  ;;  %v1046_v59 = vmul.f32 0.0, %v5609_v19  ;;  %v1913_v19 = vmul.f32 %v5965_v54, %v4618_v13  ;;  %vm7676_vm3 = vmmov %vm7672_vm4  ;;  %v1070_v16 = vmul.f32 %v5577_v4, %v4612_v11 }
 0x9a5   :  { %1932 = vrot.lane.b32.xlu0 %v1928_v52, %s7656_s8  ;;  %2280 = vmatprep.subr.mxu0 %v2224_v63  ;;  %3851 = vst [vmem:[#allocation2 + $0x308] sm:$0xe0] %v7640_v49 }
 0x9a6   :  { %v5975_v2 = vpop.permute.xlu1 %1355 }
 0x9a7   :  { %7668 = vst [vmem:[#allocation20_spill] sm:$0xff] %v5975_v2  ;;  %v1358_v5 = vsel %vm7669_vm7, %v1354_v14, %v5975_v2  ;;  %v1383_v17 = vpop.permute.xlu0 %1382  ;;  %v2226_v15 = vld [vmem:[#allocation2 + $0x318] sm:$0xff] }
 0x9a8   :  { %1362 = vst [vmem:[#allocation2 + $0x2e8] sm:$0xf] %v1358_v5  ;;  %1948 = vrot.lane.b32.xlu1 %v1946_v22, %s7658_s7  ;;  %2357 = vmatprep.subr.mxu1 %v2226_v15  ;;  %3853 = vst [vmem:[#allocation2 + $0x318] sm:$0xe0] %v7640_v49  ;;  %v2223_v7 = vld [vmem:[#allocation2 + $0x300] sm:$0xff]  ;;  %v1077_v15 = vrot.slane %v1071_v37, 4 }
 0x9a9   :  { %1052 = vrot.lane.b32.xlu0 %v1045_v41, %s7670_s14  ;;  %2281 = vmatpush2.msra.mxu0 %v2223_v7  ;;  %3850 = vst [vmem:[#allocation2 + $0x300] sm:$0xe0] %v7640_v49  ;;  %v7674_v41 = vmov 1.0  }
 0x9aa   :  { %v5989_v52 = vpop.permute.xlu1 %1384 }
 0x9ab   :  { %7671 = vst [vmem:[#allocation76_spill] sm:$0xff] %v5989_v52  ;;  %v1387_v63 = vsel %vm7672_vm4, %v1383_v17, %v5989_v52  ;;  %v2075_v5 = vpop.permute.xlu0 %2074  ;;  %v2225_v22 = vld [vmem:[#allocation2 + $0x310] sm:$0xff]  ;;  %vm7678_vm4 = vmmov %vm7669_vm7 }
 0x9ac   :  { %1391 = vst [vmem:[#allocation2 + $0x2e8] sm:$0xf0] %v1387_v63  ;;  %v2077_v47 = vsel %vm7673_vm8, %v2075_v5, %v5975_v2  ;;  %1054 = vrot.lane.b32.xlu1 %v1046_v59, %s7670_s14  ;;  %2358 = vmatpush2.msra.mxu1 %v2225_v22  ;;  %3848 = vst.msk [vmem:[#allocation2 + $0x304] ss:$8 sm:$0xf] %vm5616_vm2, %v7674_v41  ;;  %v1899_v59 = vmul.f32 %v5970_v27, %v4618_v13  ;;  %vm7679_vm8 = vcmask 146432  }
 0x9ad   :  { %3852 = vst [vmem:[#allocation2 + $0x310] sm:$0xe0] %v7640_v49  ;;  %2081 = vst [vmem:[#allocation2 + $0x2f8] sm:$0xf] %v2077_v47  ;;  %1081 = vrot.lane.b32.xlu0 %v1077_v15, %s7675_s19  ;;  %v1917_v49 = vrot.slane %v1913_v19, 4  ;;  %v1076_v19 = vrot.slane %v1070_v16, 4 }
 0x9ae   :  { %v2091_v37 = vpop.permute.xlu1 %2090  ;;  %vm7677_vm2 = vmmov %vm7676_vm3  ;;  %v991_v16 = vmul.f32 0.0, %v5314_v34 }
 0x9af   :  { %v2093_v7 = vsel %vm7676_vm3, %v2091_v37, %v5989_v52  ;;  %v1352_v63 = vpop.permute.xlu0 %1351  ;;  %v1044_v52 = vmul.f32 %v5607_v23, %v4612_v11  ;;  %vm7681_vm3 = vmmov %vm7677_vm2 }
 0x9b0   :  { %2097 = vst [vmem:[#allocation2 + $0x2f8] sm:$0xf0] %v2093_v7  ;;  %v1357_v24 = vsel %vm7669_vm7, %v1352_v63, %v1354_v14  ;;  %1083 = vrot.lane.b32.xlu1 %v1078_v0, %s7675_s19  ;;  %v1912_v7 = vmul.f32 %v5577_v4, %v4614_v12  ;;  %vm7683_vm7 = vcmask 662528   ;;  %v2444_v4 = vld [vmem:[#allocation3] sm:$0xf0] }
 0x9b1   :  { %1361 = vst [vmem:[#allocation2 + $0x2e0] sm:$0xf] %v1357_v24  ;;  %1904 = vrot.lane.b32.xlu0 %v1899_v59, %s7670_s14  ;;  %v1898_v24 = vmul.f32 %v5607_v23, %v4614_v12 }
 0x9b2   :  { %v1381_v47 = vpop.permute.xlu1 %1380 }
 0x9b3   :  { %v1386_v22 = vsel %vm7677_vm2, %v1381_v47, %v1383_v17  ;;  %v2073_v15 = vpop.permute.xlu0 %2072  ;;  %v2220_v41 = vld [vmem:[#allocation2 + $0x2e8] sm:$0xff]  ;;  %v6023_v17 = vsel %vm7679_vm8, %v5597_v39, %v5601_v50  ;;  %vm7384_vm2 = vcmask 654336  }
 0x9b4   :  { %1390 = vst [vmem:[#allocation2 + $0x2e0] sm:$0xf0] %v1386_v22  ;;  %v2076_v14 = vsel %vm7678_vm4, %v2073_v15, %v2075_v5  ;;  %1920 = vrot.lane.b32.xlu1 %v1917_v49, %s7675_s19  ;;  %2282 = vmatprep.subr.mxu0 %v2220_v41  ;;  %7680 = vst [vmem:[#allocation69_spill] sm:$0xff] %v6023_v17  ;;  %v1916_v49 = vrot.slane %v1912_v7, 4  ;;  %v1883_v34 = vmul.f32 %v6023_v17, %v4618_v13 }
 0x9b5   :  { %2080 = vst [vmem:[#allocation2 + $0x2f0] sm:$0xf] %v2076_v14  ;;  %1050 = vrot.lane.b32.xlu0 %v1044_v52, %s7670_s14  ;;  %v1016_v52 = vmul.f32 %v6023_v17, %v4605_v8  ;;  %vm7685_vm4 = vmmov %vm7683_vm7 }
 0x9b6   :  { %v2089_v0 = vpop.permute.xlu1 %2088  ;;  %vm7688_vm8 = vmmov %vm7685_vm4 }
 0x9b7   :  { %v2092_v63 = vsel %vm7681_vm3, %v2089_v0, %v2091_v37  ;;  %v1315_v59 = vpop.permute.xlu0 %1314  ;;  %v2222_v5 = vld [vmem:[#allocation2 + $0x2f8] sm:$0xff]  ;;  %v1017_v37 = vmul.f32 0.0, %v5601_v50  ;;  %v1022_v0 = vrot.slane %v1016_v52, 4  ;;  %v7687_v52 = vld [vmem:[#allocation104_spill] sm:$0xff]  ;;  %vm2227_vm3 = vcmask 588800  }
 0x9b8   :  { %2096 = vst [vmem:[#allocation2 + $0x2f0] sm:$0xf0] %v2092_v63  ;;  %1079 = vrot.lane.b32.xlu1 %v1076_v19, %s7675_s19  ;;  %2359 = vmatprep.subr.mxu1 %v2222_v5 }
 0x9b9   :  { %1902 = vrot.lane.b32.xlu0 %v1898_v24, %s7670_s14  ;;  %v1023_v19 = vrot.slane %v1017_v37, 4 }
 0x9ba   :  { %v6032_v47 = vpop.permute.xlu1 %1316 }
 0x9bb   :  { %7682 = vst [vmem:[#allocation22_spill] sm:$0xff] %v6032_v47  ;;  %v1319_v22 = vsel %vm7683_vm7, %v1315_v59, %v6032_v47  ;;  %v1327_v15 = vpop.permute.xlu0 %1326  ;;  %v2219_v41 = vld [vmem:[#allocation2 + $0x2e0] sm:$0xff]  ;;  %vm7690_vm7 = vmmov %vm7685_vm4 }
 0x9bc   :  { %1323 = vst [vmem:[#allocation2 + $0x2c8] sm:$0xf] %v1319_v22  ;;  %1918 = vrot.lane.b32.xlu1 %v1916_v49, %s7675_s19  ;;  %2283 = vmatpush2.msra.mxu0 %v2219_v41  ;;  %v1869_v49 = vmul.f32 %v7687_v52, %v4618_v13  ;;  %v1887_v41 = vrot.slane %v1883_v34, 4 }
 0x9bd   :  { %999 = vrot.lane.b32.xlu0 %v991_v16, %s4535_s20  ;;  %v1015_v16 = vmul.f32 %v5597_v39, %v4612_v11 }
 0x9be   :  { %v6040_v14 = vpop.permute.xlu1 %1328 }
 0x9bf   :  { %7684 = vst [vmem:[#allocation63_spill] sm:$0xff] %v6040_v14  ;;  %v1332_v50 = vsel %vm7384_vm2, %v1327_v15, %v6040_v14  ;;  %v2051_v7 = vpop.permute.xlu0 %2050  ;;  %v2221_v63 = vld [vmem:[#allocation2 + $0x2f0] sm:$0xff] }
 0x9c0   :  { %1336 = vst [vmem:[#allocation2 + $0x2c8] sm:$0xf0] %v1332_v50  ;;  %v2053_v5 = vsel %vm7685_vm4, %v2051_v7, %v6032_v47  ;;  %1026 = vrot.lane.b32.xlu1 %v1022_v0, %s7686_s11  ;;  %2360 = vmatpush2.msra.mxu1 %v2221_v63  ;;  %v2124_v0 = vld [vmem:[#allocation8 + $0x8] sm:$0xff]  ;;  %v1021_v63 = vrot.slane %v1015_v16, 4  ;;  %vm7692_vm4 = vcmask 678912  }
 0x9c1   :  { %2057 = vst [vmem:[#allocation2 + $0x2d8] sm:$0xf] %v2053_v5  ;;  %1028 = vrot.lane.b32.xlu0 %v1023_v19, %s7686_s11  ;;  %4308 = vmatprep.mubr.msk.f32.mxu0 %vm2227_vm3, %v2124_v0  ;;  %v1882_v5 = vmul.f32 %v5597_v39, %v4614_v12 }
 0x9c2   :  { %v2061_v24 = vpop.permute.xlu1 %2060  ;;  %4310 = vmatprep.mubr.msk.f32.mxu1 %vm2227_vm3, %v2124_v0 }
 0x9c3   :  { %v2063_v37 = vsel %vm7384_vm2, %v2061_v24, %v6040_v14  ;;  %v1313_v22 = vpop.permute.xlu0 %1312 }
 0x9c4   :  { %2067 = vst [vmem:[#allocation2 + $0x2d8] sm:$0xf0] %v2063_v37  ;;  %v1318_v50 = vsel %vm7688_vm8, %v1313_v22, %v1315_v59  ;;  %1874 = vrot.lane.b32.xlu1 %v1869_v49, %s4535_s20  ;;  %v7689_v49 = vld [vmem:[#allocation103_spill] sm:$0xff]  ;;  %vm7694_vm8 = vcmask 670720  }
 0x9c5   :  { %1322 = vst [vmem:[#allocation2 + $0x2c0] sm:$0xf] %v1318_v50  ;;  %1890 = vrot.lane.b32.xlu0 %v1887_v41, %s7686_s11  ;;  %v1868_v22 = vmul.f32 %v7689_v49, %v4614_v12  ;;  %v1886_v41 = vrot.slane %v1882_v5, 4 }
 0x9c6   :  { %v1325_v19 = vpop.permute.xlu1 %1324 }
 0x9c7   :  { %v1331_v34 = vsel %vm7384_vm2, %v1325_v19, %v1327_v15  ;;  %v2049_v37 = vpop.permute.xlu0 %2048  ;;  %v2216_v59 = vld [vmem:[#allocation2 + $0x2c8] sm:$0xff] }
 0x9c8   :  { %1335 = vst [vmem:[#allocation2 + $0x2c0] sm:$0xf0] %v1331_v34  ;;  %v2052_v50 = vsel %vm7690_vm7, %v2049_v37, %v2051_v7  ;;  %1024 = vrot.lane.b32.xlu1 %v1021_v63, %s7686_s11  ;;  %2284 = vmatprep.subr.mxu0 %v2216_v59  ;;  %vm7695_vm7 = vmmov %vm7692_vm4 }
 0x9c9   :  { %2056 = vst [vmem:[#allocation2 + $0x2d0] sm:$0xf] %v2052_v50  ;;  %1872 = vrot.lane.b32.xlu0 %v1868_v22, %s4535_s20 }
 0x9ca   :  { %v2059_v16 = vpop.permute.xlu1 %2058 }
 0x9cb   :  { %v2062_v0 = vsel %vm7384_vm2, %v2059_v16, %v2061_v24  ;;  %v1260_v13 = vpop.permute.xlu0 %1259  ;;  %v2218_v15 = vld [vmem:[#allocation2 + $0x2d8] sm:$0xff]  ;;  %vm7697_vm2 = vmmov %vm7695_vm7 }
 0x9cc   :  { %2066 = vst [vmem:[#allocation2 + $0x2d0] sm:$0xf0] %v2062_v0  ;;  %1888 = vrot.lane.b32.xlu1 %v1886_v41, %s7686_s11  ;;  %2361 = vmatprep.subr.mxu1 %v2218_v15 }
 0x9ce   :  { %v6071_v19 = vpop.permute.xlu1 %1261 }
 0x9cf   :  { %7691 = vst [vmem:[#allocation66_spill] sm:$0xff] %v6071_v19  ;;  %v1264_v7 = vsel %vm7692_vm4, %v1260_v13, %v6071_v19  ;;  %v1289_v63 = vpop.permute.xlu0 %1288  ;;  %v2215_v34 = vld [vmem:[#allocation2 + $0x2c0] sm:$0xff]  ;;  %vm7696_vm4 = vmmov %vm7694_vm8 }
 0x9d0   :  { %1268 = vst [vmem:[#allocation2 + $0x2a8] sm:$0xf] %v1264_v7  ;;  %2285 = vmatpush2.msra.mxu0 %v2215_v34  ;;  %vm7698_vm1 = vmmov %vm7696_vm4 }
 0x9d2   :  { %v6075_v37 = vpop.permute.xlu1 %1290 }
 0x9d3   :  { %7693 = vst [vmem:[#allocation54_spill] sm:$0xff] %v6075_v37  ;;  %v1293_v24 = vsel %vm7694_vm8, %v1289_v63, %v6075_v37  ;;  %v2021_v5 = vpop.permute.xlu0 %2020  ;;  %v2217_v59 = vld [vmem:[#allocation2 + $0x2d0] sm:$0xff]  ;;  %vm7699_vm8 = vmmov %vm7697_vm2 }
 0x9d4   :  { %1297 = vst [vmem:[#allocation2 + $0x2a8] sm:$0xf0] %v1293_v24  ;;  %v2023_v22 = vsel %vm7695_vm7, %v2021_v5, %v6071_v19  ;;  %2362 = vmatpush2.msra.mxu1 %v2217_v59  ;;  %vm7700_vm7 = vmmov %vm7698_vm1 }
 0x9d5   :  { %2027 = vst [vmem:[#allocation2 + $0x2b8] sm:$0xf] %v2023_v22 }
 0x9d6   :  { %v2037_v50 = vpop.permute.xlu1 %2036 }
 0x9d7   :  { %v2039_v16 = vsel %vm7696_vm4, %v2037_v50, %v6075_v37  ;;  %v1258_v41 = vpop.permute.xlu0 %1257 }
 0x9d8   :  { %2043 = vst [vmem:[#allocation2 + $0x2b8] sm:$0xf0] %v2039_v16  ;;  %v1263_v0 = vsel %vm7697_vm2, %v1258_v41, %v1260_v13  ;;  %vm7702_vm2 = vcmask 769024  }
 0x9d9   :  { %1267 = vst [vmem:[#allocation2 + $0x2a0] sm:$0xf] %v1263_v0  ;;  %vm7705_vm4 = vmmov %vm7702_vm2 }
 0x9da   :  { %v1287_v15 = vpop.permute.xlu1 %1286 }
 0x9db   :  { %v1292_v7 = vsel %vm7698_vm1, %v1287_v15, %v1289_v63  ;;  %v2019_v34 = vpop.permute.xlu0 %2018  ;;  %v2212_v12 = vld [vmem:[#allocation2 + $0x2a8] sm:$0xff]  ;;  %vm7704_vm1 = vcmask 760832  }
 0x9dc   :  { %1296 = vst [vmem:[#allocation2 + $0x2a0] sm:$0xf0] %v1292_v7  ;;  %v2022_v24 = vsel %vm7699_vm8, %v2019_v34, %v2021_v5  ;;  %2286 = vmatprep.subr.mxu0 %v2212_v12  ;;  %vm7706_vm8 = vmmov %vm7704_vm1 }
 0x9dd   :  { %2026 = vst [vmem:[#allocation2 + $0x2b0] sm:$0xf] %v2022_v24 }
 0x9de   :  { %v2035_v59 = vpop.permute.xlu1 %2034 }
 0x9df   :  { %v2038_v22 = vsel %vm7700_vm7, %v2035_v59, %v2037_v50  ;;  %v1205_v8 = vpop.permute.xlu0 %1204  ;;  %v2214_v11 = vld [vmem:[#allocation2 + $0x2b8] sm:$0xff]  ;;  %vm7707_vm7 = vmmov %vm7702_vm2 }
 0x9e0   :  { %2042 = vst [vmem:[#allocation2 + $0x2b0] sm:$0xf0] %v2038_v22  ;;  %2363 = vmatprep.subr.mxu1 %v2214_v11 }
 0x9e2   :  { %v6087_v16 = vpop.permute.xlu1 %1206 }
 0x9e3   :  { %7701 = vst [vmem:[#allocation60_spill] sm:$0xff] %v6087_v16  ;;  %v1209_v13 = vsel %vm7702_vm2, %v1205_v8, %v6087_v16  ;;  %v1234_v63 = vpop.permute.xlu0 %1233  ;;  %v2211_v41 = vld [vmem:[#allocation2 + $0x2a0] sm:$0xff]  ;;  %vm7708_vm2 = vmmov %vm7704_vm1 }
 0x9e4   :  { %1213 = vst [vmem:[#allocation2 + $0x288] sm:$0xf] %v1209_v13  ;;  %2287 = vmatpush2.msra.mxu0 %v2211_v41 }
 0x9e6   :  { %v6091_v0 = vpop.permute.xlu1 %1235 }
 0x9e7   :  { %7703 = vst [vmem:[#allocation59_spill] sm:$0xff] %v6091_v0  ;;  %v1238_v12 = vsel %vm7704_vm1, %v1234_v63, %v6091_v0  ;;  %v1991_v5 = vpop.permute.xlu0 %1990  ;;  %v2213_v50 = vld [vmem:[#allocation2 + $0x2b0] sm:$0xff]  ;;  %vm7709_vm1 = vmmov %vm7705_vm4 }
 0x9e8   :  { %1242 = vst [vmem:[#allocation2 + $0x288] sm:$0xf0] %v1238_v12  ;;  %v1993_v11 = vsel %vm7705_vm4, %v1991_v5, %v6087_v16  ;;  %2364 = vmatpush2.msra.mxu1 %v2213_v50  ;;  %vm7710_vm4 = vmmov %vm7708_vm2 }
 0x9e9   :  { %1997 = vst [vmem:[#allocation2 + $0x298] sm:$0xf] %v1993_v11 }
 0x9ea   :  { %v2007_v15 = vpop.permute.xlu1 %2006 }
 0x9eb   :  { %v2009_v7 = vsel %vm7706_vm8, %v2007_v15, %v6091_v0  ;;  %v1203_v34 = vpop.permute.xlu0 %1202  ;;  %vm7397_vm8 = vcmask 785408  }
 0x9ec   :  { %2013 = vst [vmem:[#allocation2 + $0x298] sm:$0xf0] %v2009_v7  ;;  %v1208_v24 = vsel %vm7707_vm7, %v1203_v34, %v1205_v8  ;;  %vm7713_vm7 = vcmask 777216  }
 0x9ed   :  { %1212 = vst [vmem:[#allocation2 + $0x280] sm:$0xf] %v1208_v24 }
 0x9ee   :  { %v1232_v59 = vpop.permute.xlu1 %1231 }
 0x9ef   :  { %v1237_v22 = vsel %vm7708_vm2, %v1232_v59, %v1234_v63  ;;  %v1989_v13 = vpop.permute.xlu0 %1988  ;;  %v2208_v41 = vld [vmem:[#allocation2 + $0x288] sm:$0xff]  ;;  %vm7714_vm2 = vmmov %vm7713_vm7 }
 0x9f0   :  { %1241 = vst [vmem:[#allocation2 + $0x280] sm:$0xf0] %v1237_v22  ;;  %v1992_v12 = vsel %vm7709_vm1, %v1989_v13, %v1991_v5  ;;  %2288 = vmatprep.subr.mxu0 %v2208_v41  ;;  %vm7715_vm1 = vmmov %vm7714_vm2 }
 0x9f1   :  { %1996 = vst [vmem:[#allocation2 + $0x290] sm:$0xf] %v1992_v12 }
 0x9f2   :  { %v2005_v50 = vpop.permute.xlu1 %2004 }
 0x9f3   :  { %v2008_v11 = vsel %vm7710_vm4, %v2005_v50, %v2007_v15  ;;  %v1149_v16 = vpop.permute.xlu0 %1148  ;;  %v2210_v0 = vld [vmem:[#allocation2 + $0x298] sm:$0xff]  ;;  %vm7716_vm4 = vmmov %vm7715_vm1 }
 0x9f4   :  { %2012 = vst [vmem:[#allocation2 + $0x290] sm:$0xf0] %v2008_v11  ;;  %2365 = vmatprep.subr.mxu1 %v2210_v0 }
 0x9f6   :  { %v6103_v8 = vpop.permute.xlu1 %1150 }
 0x9f7   :  { %7711 = vst [vmem:[#allocation53_spill] sm:$0xff] %v6103_v8  ;;  %v1154_v63 = vsel %vm7397_vm8, %v1149_v16, %v6103_v8  ;;  %v1179_v7 = vpop.permute.xlu0 %1178  ;;  %v2207_v34 = vld [vmem:[#allocation2 + $0x280] sm:$0xff] }
 0x9f8   :  { %1158 = vst [vmem:[#allocation2 + $0x268] sm:$0xf] %v1154_v63  ;;  %2289 = vmatpush2.msra.mxu0 %v2207_v34 }
 0x9fa   :  { %v6107_v5 = vpop.permute.xlu1 %1180 }
 0x9fb   :  { %7712 = vst [vmem:[#allocation50_spill] sm:$0xff] %v6107_v5  ;;  %v1183_v24 = vsel %vm7713_vm7, %v1179_v7, %v6107_v5  ;;  %v1961_v15 = vpop.permute.xlu0 %1960  ;;  %v2209_v59 = vld [vmem:[#allocation2 + $0x290] sm:$0xff]  ;;  %vm7718_vm7 = vcmask 801792  }
 0x9fc   :  { %1187 = vst [vmem:[#allocation2 + $0x268] sm:$0xf0] %v1183_v24  ;;  %v1963_v0 = vsel %vm7397_vm8, %v1961_v15, %v6103_v8  ;;  %2366 = vmatpush2.msra.mxu1 %v2209_v59 }
 0x9fd   :  { %1967 = vst [vmem:[#allocation2 + $0x278] sm:$0xf] %v1963_v0 }
 0x9fe   :  { %v1977_v22 = vpop.permute.xlu1 %1976 }
 0x9ff   :  { %v1979_v13 = vsel %vm7714_vm2, %v1977_v22, %v6107_v5  ;;  %v1147_v41 = vpop.permute.xlu0 %1146  ;;  %vm7720_vm2 = vcmask 793600  }
 0xa00   :  { %1983 = vst [vmem:[#allocation2 + $0x278] sm:$0xf0] %v1979_v13  ;;  %v1153_v12 = vsel %vm7397_vm8, %v1147_v41, %v1149_v16 }
 0xa01   :  { %1157 = vst [vmem:[#allocation2 + $0x260] sm:$0xf] %v1153_v12 }
 0xa02   :  { %v1177_v50 = vpop.permute.xlu1 %1176 }
 0xa03   :  { %v1182_v11 = vsel %vm7715_vm1, %v1177_v50, %v1179_v7  ;;  %v1959_v63 = vpop.permute.xlu0 %1958  ;;  %v2204_v34 = vld [vmem:[#allocation2 + $0x268] sm:$0xff]  ;;  %vm7721_vm1 = vmmov %vm7718_vm7 }
 0xa04   :  { %1186 = vst [vmem:[#allocation2 + $0x260] sm:$0xf0] %v1182_v11  ;;  %v1962_v24 = vsel %vm7397_vm8, %v1959_v63, %v1961_v15  ;;  %2290 = vmatprep.subr.mxu0 %v2204_v34  ;;  %vm7724_vm8 = vmmov %vm7720_vm2 }
 0xa05   :  { %1966 = vst [vmem:[#allocation2 + $0x270] sm:$0xf] %v1962_v24 }
 0xa06   :  { %v1975_v59 = vpop.permute.xlu1 %1974 }
 0xa07   :  { %v1978_v0 = vsel %vm7716_vm4, %v1975_v59, %v1977_v22  ;;  %v1108_v8 = vpop.permute.xlu0 %1107  ;;  %v2206_v5 = vld [vmem:[#allocation2 + $0x278] sm:$0xff]  ;;  %vm7722_vm4 = vmmov %vm7720_vm2 }
 0xa08   :  { %1982 = vst [vmem:[#allocation2 + $0x270] sm:$0xf0] %v1978_v0  ;;  %2367 = vmatprep.subr.mxu1 %v2206_v5 }
 0xa0a   :  { %v6119_v13 = vpop.permute.xlu1 %1109 }
 0xa0b   :  { %7717 = vst [vmem:[#allocation27_spill] sm:$0xff] %v6119_v13  ;;  %v1112_v16 = vsel %vm7718_vm7, %v1108_v8, %v6119_v13  ;;  %v1137_v7 = vpop.permute.xlu0 %1136  ;;  %v2203_v41 = vld [vmem:[#allocation2 + $0x260] sm:$0xff]  ;;  %vm7723_vm7 = vmmov %vm7721_vm1 }
 0xa0c   :  { %1116 = vst [vmem:[#allocation2 + $0x248] sm:$0xf] %v1112_v16  ;;  %2291 = vmatpush2.msra.mxu0 %v2203_v41 }
 0xa0e   :  { %v6123_v12 = vpop.permute.xlu1 %1138 }
 0xa0f   :  { %7719 = vst [vmem:[#allocation49_spill] sm:$0xff] %v6123_v12  ;;  %v1141_v15 = vsel %vm7720_vm2, %v1137_v7, %v6123_v12  ;;  %v1935_v50 = vpop.permute.xlu0 %1934  ;;  %v2205_v22 = vld [vmem:[#allocation2 + $0x270] sm:$0xff]  ;;  %vm7725_vm2 = vmmov %vm7721_vm1 }
 0xa10   :  { %1145 = vst [vmem:[#allocation2 + $0x248] sm:$0xf0] %v1141_v15  ;;  %v1937_v5 = vsel %vm7721_vm1, %v1935_v50, %v6119_v13  ;;  %2368 = vmatpush2.msra.mxu1 %v2205_v22  ;;  %vm7726_vm1 = vmmov %vm7722_vm4 }
 0xa11   :  { %1941 = vst [vmem:[#allocation2 + $0x258] sm:$0xf] %v1937_v5 }
 0xa12   :  { %v1951_v11 = vpop.permute.xlu1 %1950 }
 0xa13   :  { %v1953_v63 = vsel %vm7722_vm4, %v1951_v11, %v6123_v12  ;;  %v1106_v34 = vpop.permute.xlu0 %1105  ;;  %vm7728_vm4 = vcmask 891904  }
 0xa14   :  { %1957 = vst [vmem:[#allocation2 + $0x258] sm:$0xf0] %v1953_v63  ;;  %v1111_v24 = vsel %vm7723_vm7, %v1106_v34, %v1108_v8  ;;  %vm7731_vm7 = vmmov %vm7728_vm4 }
 0xa15   :  { %1115 = vst [vmem:[#allocation2 + $0x240] sm:$0xf] %v1111_v24 }
 0xa16   :  { %v1135_v59 = vpop.permute.xlu1 %1134 }
 0xa17   :  { %v1140_v0 = vsel %vm7724_vm8, %v1135_v59, %v1137_v7  ;;  %v1933_v16 = vpop.permute.xlu0 %1932  ;;  %v2200_v41 = vld [vmem:[#allocation2 + $0x248] sm:$0xff]  ;;  %vm7730_vm8 = vcmask 809984  }
 0xa18   :  { %1144 = vst [vmem:[#allocation2 + $0x240] sm:$0xf0] %v1140_v0  ;;  %v1936_v15 = vsel %vm7725_vm2, %v1933_v16, %v1935_v50  ;;  %2292 = vmatprep.subr.mxu0 %v2200_v41  ;;  %vm7732_vm2 = vmmov %vm7730_vm8 }
 0xa19   :  { %1940 = vst [vmem:[#allocation2 + $0x250] sm:$0xf] %v1936_v15 }
 0xa1a   :  { %v1949_v22 = vpop.permute.xlu1 %1948 }
 0xa1b   :  { %v1952_v5 = vsel %vm7726_vm1, %v1949_v22, %v1951_v11  ;;  %v1053_v13 = vpop.permute.xlu0 %1052  ;;  %v2202_v12 = vld [vmem:[#allocation2 + $0x258] sm:$0xff]  ;;  %vm7733_vm1 = vmmov %vm7728_vm4 }
 0xa1c   :  { %1956 = vst [vmem:[#allocation2 + $0x250] sm:$0xf0] %v1952_v5  ;;  %2369 = vmatprep.subr.mxu1 %v2202_v12 }
 0xa1e   :  { %v6135_v63 = vpop.permute.xlu1 %1054 }
 0xa1f   :  { %7727 = vst [vmem:[#allocation55_spill] sm:$0xff] %v6135_v63  ;;  %v1057_v8 = vsel %vm7728_vm4, %v1053_v13, %v6135_v63  ;;  %v1082_v7 = vpop.permute.xlu0 %1081  ;;  %v2199_v34 = vld [vmem:[#allocation2 + $0x240] sm:$0xff]  ;;  %vm7734_vm4 = vmmov %vm7732_vm2 }
 0xa20   :  { %1061 = vst [vmem:[#allocation2 + $0x228] sm:$0xf] %v1057_v8  ;;  %2293 = vmatpush2.msra.mxu0 %v2199_v34 }
 0xa22   :  { %v6139_v24 = vpop.permute.xlu1 %1083 }
 0xa23   :  { %7729 = vst [vmem:[#allocation118_spill] sm:$0xff] %v6139_v24  ;;  %v1086_v50 = vsel %vm7730_vm8, %v1082_v7, %v6139_v24  ;;  %v1905_v59 = vpop.permute.xlu0 %1904  ;;  %v2201_v11 = vld [vmem:[#allocation2 + $0x250] sm:$0xff]  ;;  %vm7735_vm8 = vmmov %vm7733_vm1 }
 0xa24   :  { %1090 = vst [vmem:[#allocation2 + $0x228] sm:$0xf0] %v1086_v50  ;;  %v1907_v12 = vsel %vm7731_vm7, %v1905_v59, %v6135_v63  ;;  %2370 = vmatpush2.msra.mxu1 %v2201_v11  ;;  %vm7736_vm7 = vmmov %vm7732_vm2 }
 0xa25   :  { %1911 = vst [vmem:[#allocation2 + $0x238] sm:$0xf] %v1907_v12 }
 0xa26   :  { %v1921_v0 = vpop.permute.xlu1 %1920 }
 0xa27   :  { %v1923_v16 = vsel %vm7732_vm2, %v1921_v0, %v6139_v24  ;;  %v1051_v41 = vpop.permute.xlu0 %1050  ;;  %vm7738_vm2 = vcmask 908288  }
 0xa28   :  { %1927 = vst [vmem:[#allocation2 + $0x238] sm:$0xf0] %v1923_v16  ;;  %v1056_v15 = vsel %vm7733_vm1, %v1051_v41, %v1053_v13  ;;  %vm7740_vm1 = vcmask 900096  }
 0xa29   :  { %1060 = vst [vmem:[#allocation2 + $0x220] sm:$0xf] %v1056_v15 }
 0xa2a   :  { %v1080_v22 = vpop.permute.xlu1 %1079 }
 0xa2b   :  { %v1085_v5 = vsel %vm7734_vm4, %v1080_v22, %v1082_v7  ;;  %v1903_v8 = vpop.permute.xlu0 %1902  ;;  %v2196_v34 = vld [vmem:[#allocation2 + $0x228] sm:$0xff]  ;;  %vm7741_vm4 = vmmov %vm7738_vm2 }
 0xa2c   :  { %1089 = vst [vmem:[#allocation2 + $0x220] sm:$0xf0] %v1085_v5  ;;  %v1906_v50 = vsel %vm7735_vm8, %v1903_v8, %v1905_v59  ;;  %2294 = vmatprep.subr.mxu0 %v2196_v34  ;;  %vm7742_vm8 = vmmov %vm7740_vm1 }
 0xa2d   :  { %1910 = vst [vmem:[#allocation2 + $0x230] sm:$0xf] %v1906_v50 }
 0xa2e   :  { %v1919_v11 = vpop.permute.xlu1 %1918 }
 0xa2f   :  { %v1922_v12 = vsel %vm7736_vm7, %v1919_v11, %v1921_v0  ;;  %v6151_v63 = vpop.permute.xlu0 %999  ;;  %v2198_v24 = vld [vmem:[#allocation2 + $0x238] sm:$0xff]  ;;  %vm7743_vm7 = vmmov %vm7740_vm1 }
 0xa30   :  { %7737 = vst [vmem:[#allocation119_spill] sm:$0xff] %v6151_v63  ;;  %1926 = vst [vmem:[#allocation2 + $0x230] sm:$0xf0] %v1922_v12  ;;  %v1002_v13 = vsel %vm7738_vm2, %v5471_v18, %v6151_v63  ;;  %2371 = vmatprep.subr.mxu1 %v2198_v24 }
 0xa31   :  { %1006 = vst [vmem:[#allocation2 + $0x208] sm:$0xf] %v1002_v13 }
 0xa32   :  { %v1027_v7 = vpop.permute.xlu1 %1026 }
 0xa33   :  { %v6156_v16 = vpop.permute.xlu0 %1028  ;;  %v2195_v41 = vld [vmem:[#allocation2 + $0x220] sm:$0xff] }
 0xa34   :  { %7739 = vst [vmem:[#allocation120_spill] sm:$0xff] %v6156_v16  ;;  %v1031_v59 = vsel %vm7740_vm1, %v1027_v7, %v6156_v16  ;;  %2295 = vmatpush2.msra.mxu0 %v2195_v41 }
 0xa35   :  { %1035 = vst [vmem:[#allocation2 + $0x208] sm:$0xf0] %v1031_v59  ;;  %v2123_v59 = vld [vmem:[#allocation8] sm:$0xff] }
 0xa36   :  { %v1875_v0 = vpop.permute.xlu1 %1874 }
 0xa37   :  { %v1877_v15 = vsel %vm7741_vm4, %v1875_v0, %v6151_v63  ;;  %v1891_v22 = vpop.permute.xlu0 %1890  ;;  %v2197_v5 = vld [vmem:[#allocation2 + $0x230] sm:$0xff]  ;;  %vm7769_vm4 = vcmask 400384  }
 0xa38   :  { %1881 = vst [vmem:[#allocation2 + $0x218] sm:$0xf] %v1877_v15  ;;  %v1893_v18 = vsel %vm7742_vm8, %v1891_v22, %v6156_v16  ;;  %2372 = vmatpush2.msra.mxu1 %v2197_v5  ;;  %v2126_v5 = vld [vmem:[#allocation8 + $0x18] sm:$0xf]  ;;  %vm7771_vm8 = vmmov %vm7769_vm4 }
 0xa39   :  { %1897 = vst [vmem:[#allocation2 + $0x218] sm:$0xf0] %v1893_v18 }
 0xa3a   :  { %v1025_v24 = vpop.permute.xlu1 %1024 }
 0xa3b   :  { %v1030_v8 = vsel %vm7743_vm7, %v1025_v24, %v1027_v7  ;;  %v1873_v34 = vpop.permute.xlu0 %1872  ;;  %v2125_v7 = vld [vmem:[#allocation8 + $0x10] sm:$0xf]  ;;  %vm7772_vm7 = vcmask 392192  }
 0xa3c   :  { %1034 = vst [vmem:[#allocation2 + $0x200] sm:$0xf0] %v1030_v8  ;;  %v1876_v50 = vsel %vm7738_vm2, %v1873_v34, %v1875_v0  ;;  %v2192_v11 = vld [vmem:[#allocation2 + $0x208] sm:$0xff]  ;;  %vm7775_vm2 = vcmask 916480  }
 0xa3d   :  { %1880 = vst [vmem:[#allocation2 + $0x210] sm:$0xf] %v1876_v50  ;;  %2296 = vmatprep.subr.mxu0 %v2192_v11 }
 0xa3e   :  { %v1889_v12 = vpop.permute.xlu1 %1888 }
 0xa3f   :  { %v1892_v13 = vsel %vm7740_vm1, %v1889_v12, %v1891_v22  ;;  %vm7780_vm1 = vmmov %vm7775_vm2 }
 0xa40   :  { %1896 = vst [vmem:[#allocation2 + $0x210] sm:$0xf0] %v1892_v13  ;;  %v2194_v41 = vld [vmem:[#allocation2 + $0x218] sm:$0xff] }
 0xa41   :  { %2373 = vmatprep.subr.mxu1 %v2194_v41 }
 0xa43   :  { %v2191_v15 = vld [vmem:[#allocation2 + $0x200] sm:$0xff] }
 0xa44   :  { %2297 = vmatpush2.msra.mxu0 %v2191_v15 }
 0xa45   :  { %2299 = vmatmul.mubr.f32.vlgmr.msra.gmra.mxu0 %v2123_v59 }
 0xa46   :  { %4309 = vmatprep.mubr.msk.f32.mxu0 %vm2227_vm3, %v2126_v5 }
 0xa47   :  { %v2193_v18 = vld [vmem:[#allocation2 + $0x210] sm:$0xff] }
 0xa48   :  { %2374 = vmatpush2.msra.mxu1 %v2193_v18 }
 0xa49   :  { %2305 = vmatmul.mubr.f32.gmra.mxu0 %v2125_v7  ;;  %2376 = vmatmul.mubr.f32.vlgmr.msra.gmra.mxu1 %v2123_v59 }
 0xa4a   :  { %4311 = vmatprep.mubr.msk.f32.mxu1 %vm2227_vm3, %v2126_v5 }
 0xa4d   :  { %2382 = vmatmul.mubr.f32.gmra.mxu1 %v2125_v7 }
 0xb05   :  { %v2300_v0 = vpop.f32.mrf.mxu0 }
 0xb06   :  { %v2388_v22 = vmul.f32 0.2, %v2300_v0 }
 0xb07   :  { %v2302_v24 = vpop.f32.mrf.mxu0 }
 0xb08   :  { %v2392_v8 = vmax.f32 %v2300_v0, %v2388_v22  ;;  %v2389_v34 = vmul.f32 0.2, %v2302_v24 }
 0xb09   :  { %v2306_v50 = vpop.f32.mrf.mxu0  ;;  %v2377_v11 = vpop.f32.mrf.mxu1 }
 0xb0a   :  { %v2400_v12 = vrot.slane %v2392_v8, 4  ;;  %v2393_v13 = vmax.f32 %v2302_v24, %v2389_v34  ;;  %v2416_v41 = vmul.f32 0.2, %v2306_v50  ;;  %v2390_v15 = vmul.f32 0.2, %v2377_v11 }
 0xb0b   :  { %v2308_v16 = vpop.f32.mrf.mxu0  ;;  %v2379_v63 = vpop.f32.mrf.mxu1 }
 0xb0c   :  { %v2408_v37 = vmul.f32 %v2400_v12, %v2392_v8  ;;  %v2401_v18 = vrot.slane %v2393_v13, 4  ;;  %v2420_v19 = vmax.f32 %v2306_v50, %v2416_v41  ;;  %v2394_v59 = vmax.f32 %v2377_v11, %v2390_v15 }
 0xb0d   :  { %v2417_v14 = vmul.f32 0.2, %v2308_v16  ;;  %v2391_v5 = vmul.f32 0.2, %v2379_v63  ;;  %v2383_v7 = vpop.f32.mrf.mxu1 }
 0xb0e   :  { %v2409_v47 = vmul.f32 %v2401_v18, %v2393_v13  ;;  %v2428_v49 = vrot.slane %v2420_v19, 4  ;;  %v2402_v39 = vrot.slane %v2394_v59, 4  ;;  %v2418_v2 = vmul.f32 0.2, %v2383_v7 }
 0xb0f   :  { %v2421_v0 = vmax.f32 %v2308_v16, %v2417_v14  ;;  %v2395_v22 = vmax.f32 %v2379_v63, %v2391_v5  ;;  %v2385_v52 = vpop.f32.mrf.mxu1  ;;  %v2412_v17 = vadd.f32 %v2408_v37, %v2392_v8  ;;  %v2445_v14 = vld [vmem:[#allocation3 + $0x8] sm:$0xf0] }
 0xb10   :  { %v2436_v24 = vmul.f32 %v2428_v49, %v2392_v8  ;;  %v2410_v34 = vmul.f32 %v2402_v39, %v2394_v59  ;;  %v2419_v23 = vmul.f32 0.2, %v2385_v52  ;;  %v2422_v54 = vmax.f32 %v2383_v7, %v2418_v2  ;;  %v2448_v39 = vld [vmem:[#allocation3 + $0x10] sm:$0xf0] }
 0xb11   :  { %v2429_v27 = vrot.slane %v2421_v0, 4  ;;  %v2403_v12 = vrot.slane %v2395_v22, 4  ;;  %v2413_v11 = vadd.f32 %v2409_v47, %v2393_v13 }
 0xb12   :  { %v2440_v50 = vadd.f32 %v2436_v24, %v2412_v17  ;;  %v2423_v41 = vmax.f32 %v2385_v52, %v2419_v23  ;;  %v2414_v18 = vadd.f32 %v2410_v34, %v2394_v59  ;;  %v2430_v19 = vrot.slane %v2422_v54, 4  ;;  %v2449_v54 = vld [vmem:[#allocation3 + $0x18] sm:$0xf0] }
 0xb13   :  { %v2437_v15 = vmul.f32 %v2429_v27, %v2393_v13  ;;  %v2411_v43 = vmul.f32 %v2403_v12, %v2395_v22 }
 0xb14   :  { %v2446_v46 = vadd.f32 %v2444_v4, %v2440_v50  ;;  %v2431_v63 = vrot.slane %v2423_v41, 4  ;;  %v2438_v5 = vmul.f32 %v2430_v19, %v2394_v59 }
 0xb15   :  { %v2441_v16 = vadd.f32 %v2437_v15, %v2413_v11  ;;  %v2415_v37 = vadd.f32 %v2411_v43, %v2395_v22 }
 0xb16   :  { %v6169_v49 = vrot.slane %v2446_v46, 4  ;;  %v2439_v8 = vmul.f32 %v2431_v63, %v2395_v22  ;;  %v2442_v29 = vadd.f32 %v2438_v5, %v2414_v18 }
 0xb17   :  { %v2447_v0 = vadd.f32 %v2445_v14, %v2441_v16 }
 0xb18   :  { %2804 = vst [vmem:[#allocation2 + $0x180] sm:$0xf] %v6169_v49  ;;  %v2450_v23 = vadd.f32 %v2448_v39, %v2442_v29  ;;  %v2443_v27 = vadd.f32 %v2439_v8, %v2415_v37  ;;  %v2458_v4 = vmul.f32 %v6169_v49, %v7560_v40  ;;  %v2472_v17 = vmul.f32 %v6169_v49, %v7561_v55 }
 0xb19   :  { %v6172_v2 = vrot.slane %v2447_v0, 4  ;;  %v2488_v7 = vmul.f32 %v6169_v49, %v7553_v58  ;;  %v6199_v24 = vrot.slane %v6169_v49, 4  ;;  %v2882_v41 = vmul.f32 %v6169_v49, %v5272_v31 }
 0xb1a   :  { %2462 = vrot.lane.b32.xlu0 %v2458_v4, %s4519_s21  ;;  %v6180_v43 = vrot.slane %v2450_v23, 4  ;;  %v2451_v46 = vadd.f32 %v2449_v54, %v2443_v27  ;;  %v2476_v52 = vrot.slane %v2472_v17, 4  ;;  %v2866_v5 = vmul.f32 %v6169_v49, %v5261_v57  ;;  %v7746_v54 = vld [vmem:[#allocation93_spill] sm:$0xff] }
 0xb1b   :  { %2805 = vst [vmem:[#allocation2 + $0x188] sm:$0xf] %v6172_v2  ;;  %v2459_v47 = vmul.f32 %v6172_v2, %v7562_v60  ;;  %v2473_v29 = vmul.f32 %v6172_v2, %v7563_v56  ;;  %v2489_v22 = vmul.f32 %v6172_v2, %v7554_v48  ;;  %v2883_v34 = vmul.f32 %v6172_v2, %v5276_v51 }
 0xb1c   :  { %3502 = vst [vmem:[#allocation2 + $0x190] sm:$0xf] %v6180_v43  ;;  %v6187_v13 = vrot.slane %v2451_v46, 4  ;;  %v6207_v12 = vrot.slane %v6172_v2, 4  ;;  %v2867_v15 = vmul.f32 %v6172_v2, %v5267_v26  ;;  %v6230_v18 = vrot.slane %v6180_v43, 4 }
 0xb1d   :  { %2464 = vrot.lane.b32.xlu1 %v2459_v47, %s4519_s21  ;;  %v2477_v59 = vrot.slane %v2473_v29, 4  ;;  %v2853_v14 = vmul.f32 %v6172_v2, %v5241_v32  ;;  %v2870_v39 = vrot.slane %v2866_v5, 4  ;;  %v3564_v8 = vmul.f32 %v6180_v43, %v5261_v57 }
 0xb1e   :  { %2478 = vrot.lane.b32.xlu0 %v2476_v52, %s4525_s29  ;;  %3503 = vst [vmem:[#allocation2 + $0x198] sm:$0xf] %v6187_v13  ;;  %v3581_v50 = vmul.f32 %v6187_v13, %v5276_v51  ;;  %v6215_v11 = vrot.slane %v6187_v13, 4  ;;  %v3580_v51 = vmul.f32 %v6180_v43, %v5272_v31  ;;  %v3565_v19 = vmul.f32 %v6187_v13, %v5267_v26  ;;  %v7744_v26 = vld [vmem:[#allocation98_spill] sm:$0xff]  ;;  %v7747_v52 = vld [vmem:[#allocation95_spill] sm:$0xff] }
 0xb1f   :  { %v2871_v63 = vrot.slane %v2867_v15, 4  ;;  %v3551_v31 = vmul.f32 %v6187_v13, %v5241_v32  ;;  %v2852_v37 = vmul.f32 %v6169_v49, %v7744_v26  ;;  %v7745_v32 = vld [vmem:[#allocation96_spill] sm:$0xff]  ;;  %v3550_v23 = vmul.f32 %v6180_v43, %v7744_v26 }
 0xb20   :  { %v3569_v16 = vrot.slane %v3565_v19, 4  ;;  %v2837_v0 = vmul.f32 %v6172_v2, %v7745_v32  ;;  %v3568_v27 = vrot.slane %v3564_v8, 4  ;;  %v3535_v4 = vmul.f32 %v6187_v13, %v7745_v32  ;;  %v7752_v32 = vld [vmem:[#allocation84_spill] sm:$0xff] }
 0xb21   :  { %2480 = vrot.lane.b32.xlu1 %v2477_v59, %s4525_s29  ;;  %v2823_v57 = vmul.f32 %v6172_v2, %v7746_v54  ;;  %v3521_v46 = vmul.f32 %v6187_v13, %v7746_v54  ;;  %v2836_v29 = vmul.f32 %v6169_v49, %v7747_v52  ;;  %v7748_v59 = vld [vmem:[#allocation92_spill] sm:$0xff] }
 0xb22   :  { %2492 = vrot.lane.b32.xlu0 %v2488_v7, %s4520_s22  ;;  %v2841_v17 = vrot.slane %v2837_v0, 4  ;;  %v3539_v47 = vrot.slane %v3535_v4, 4  ;;  %v2822_v7 = vmul.f32 %v6169_v49, %v7748_v59  ;;  %v2774_v0 = vmul.f32 %v6169_v49, %v7752_v32  ;;  %v7754_v4 = vld [vmem:[#allocation86_spill] sm:$0xff] }
 0xb23   :  { %v2789_v54 = vmul.f32 %v6172_v2, %v7754_v4 }
 0xb25   :  { %2494 = vrot.lane.b32.xlu1 %v2489_v22, %s4520_s22  ;;  %v2840_v22 = vrot.slane %v2836_v29, 4  ;;  %v3487_v29 = vmul.f32 %v6187_v13, %v7754_v4  ;;  %v7762_v4 = vld [vmem:[#allocation71_spill] sm:$0xff] }
 0xb26   :  { %2504 = vrot.lane.b32.xlu0 %v6199_v24, %s7556_s25 }
 0xb29   :  { %2888 = vrot.lane.b32.xlu1 %v2883_v34, %s4537_s18  ;;  %v3534_v34 = vmul.f32 %v6180_v43, %v7747_v52 }
 0xb2a   :  { %2898 = vrot.lane.b32.xlu0 %v6207_v12, %s4549_s17 }
 0xb2b   :  { %v3538_v19 = vrot.slane %v3534_v34, 4 }
 0xb2d   :  { %3586 = vrot.lane.b32.xlu1 %v3581_v50, %s4537_s18  ;;  %v7749_v50 = vld [vmem:[#allocation90_spill] sm:$0xff] }
 0xb2e   :  { %3596 = vrot.lane.b32.xlu0 %v6215_v11, %s4549_s17  ;;  %v3505_v15 = vmul.f32 %v6187_v13, %v7749_v50 }
 0xb31   :  { %2886 = vrot.lane.b32.xlu1 %v2882_v41, %s4537_s18  ;;  %v2807_v41 = vmul.f32 %v6172_v2, %v7749_v50  ;;  %v7756_v50 = vld [vmem:[#allocation78_spill] sm:$0xff] }
 0xb32   :  { %2896 = vrot.lane.b32.xlu0 %v6199_v24, %s4549_s17 }
 0xb35   :  { %3584 = vrot.lane.b32.xlu1 %v3580_v51, %s4537_s18  ;;  %v3520_v51 = vmul.f32 %v6180_v43, %v7748_v59  ;;  %s7795_s18 = smov 31  }
 0xb36   :  { %3594 = vrot.lane.b32.xlu0 %v6230_v18, %s4549_s17  ;;  %s7791_s17 = smov 29  }
 0xb39   :  { %2858 = vrot.lane.b32.xlu1 %v2853_v14, %s4541_s15  ;;  %v2811_v14 = vrot.slane %v2807_v41, 4  ;;  %v2744_v41 = vmul.f32 %v6169_v49, %v7756_v50 }
 0xb3a   :  { %2874 = vrot.lane.b32.xlu0 %v2871_v63, %s4539_s16  ;;  %v3509_v63 = vrot.slane %v3505_v15, 4  ;;  %v7757_v15 = vld [vmem:[#allocation77_spill] sm:$0xff] }
 0xb3d   :  { %3556 = vrot.lane.b32.xlu1 %v3551_v31, %s4541_s15  ;;  %v7750_v31 = vld [vmem:[#allocation89_spill] sm:$0xff] }
 0xb3e   :  { %3572 = vrot.lane.b32.xlu0 %v3569_v16, %s4539_s16  ;;  %v2806_v16 = vmul.f32 %v6169_v49, %v7750_v31  ;;  %v3504_v5 = vmul.f32 %v6180_v43, %v7750_v31 }
 0xb40   :  { %v2810_v26 = vrot.slane %v2806_v16, 4 }
 0xb41   :  { %2856 = vrot.lane.b32.xlu1 %v2852_v37, %s4541_s15  ;;  %v3508_v37 = vrot.slane %v3504_v5, 4  ;;  %v3442_v5 = vmul.f32 %v6180_v43, %v7756_v50 }
 0xb42   :  { %2872 = vrot.lane.b32.xlu0 %v2870_v39, %s4539_s16  ;;  %v7751_v39 = vld [vmem:[#allocation87_spill] sm:$0xff] }
 0xb43   :  { %v2788_v8 = vmul.f32 %v6169_v49, %v7751_v39 }
 0xb45   :  { %3554 = vrot.lane.b32.xlu1 %v3550_v23, %s4541_s15  ;;  %v7753_v23 = vld [vmem:[#allocation83_spill] sm:$0xff]  ;;  %s7783_s15 = smov 18  }
 0xb46   :  { %3570 = vrot.lane.b32.xlu0 %v3568_v27, %s4539_s16  ;;  %v2775_v27 = vmul.f32 %v6172_v2, %v7753_v23  ;;  %v3473_v52 = vmul.f32 %v6187_v13, %v7753_v23  ;;  %v7761_v23 = vld [vmem:[#allocation72_spill] sm:$0xff]  ;;  %s7790_s16 = smov 30  }
 0xb49   :  { %2828 = vrot.lane.b32.xlu1 %v2823_v57, %s4545_s3  ;;  %v2792_v57 = vrot.slane %v2788_v8, 4 }
 0xb4a   :  { %2844 = vrot.lane.b32.xlu0 %v2841_v17, %s4543_s13  ;;  %v2793_v17 = vrot.slane %v2789_v54, 4  ;;  %v2715_v54 = vmul.f32 %v6172_v2, %v7762_v4 }
 0xb4d   :  { %3526 = vrot.lane.b32.xlu1 %v3521_v46, %s4545_s3  ;;  %v3486_v46 = vmul.f32 %v6180_v43, %v7751_v39 }
 0xb4e   :  { %3542 = vrot.lane.b32.xlu0 %v3539_v47, %s4543_s13  ;;  %v3472_v47 = vmul.f32 %v6180_v43, %v7752_v32  ;;  %v7760_v32 = vld [vmem:[#allocation75_spill] sm:$0xff] }
 0xb4f   :  { %v3490_v59 = vrot.slane %v3486_v46, 4 }
 0xb51   :  { %2826 = vrot.lane.b32.xlu1 %v2822_v7, %s4545_s3  ;;  %v3491_v7 = vrot.slane %v3487_v29, 4  ;;  %v3412_v29 = vmul.f32 %v6180_v43, %v7761_v23 }
 0xb52   :  { %2842 = vrot.lane.b32.xlu0 %v2840_v22, %s4543_s13  ;;  %v7755_v22 = vld [vmem:[#allocation81_spill] sm:$0xff] }
 0xb53   :  { %v2758_v34 = vmul.f32 %v6169_v49, %v7755_v22  ;;  %v3456_v16 = vmul.f32 %v6180_v43, %v7755_v22 }
 0xb55   :  { %3524 = vrot.lane.b32.xlu1 %v3520_v51, %s4545_s3  ;;  %v2745_v51 = vmul.f32 %v6172_v2, %v7757_v15  ;;  %v3460_v39 = vrot.slane %v3456_v16, 4  ;;  %s7764_s3 = smov 15  }
 0xb56   :  { %3540 = vrot.lane.b32.xlu0 %v3538_v19, %s4543_s13  ;;  %v7758_v19 = vld [vmem:[#allocation80_spill] sm:$0xff]  ;;  %s7781_s13 = smov 19  }
 0xb59   :  { %2814 = vrot.lane.b32.xlu1 %v2811_v14, %s4547_s2  ;;  %v2759_v14 = vmul.f32 %v6172_v2, %v7758_v19 }
 0xb5a   :  { %3512 = vrot.lane.b32.xlu0 %v3509_v63, %s4547_s2  ;;  %v2762_v63 = vrot.slane %v2758_v34, 4 }
 0xb5b   :  { %v2763_v31 = vrot.slane %v2759_v14, 4 }
 0xb5d   :  { %2812 = vrot.lane.b32.xlu1 %v2810_v26, %s4547_s2  ;;  %v3443_v26 = vmul.f32 %v6187_v13, %v7757_v15 }
 0xb5e   :  { %3510 = vrot.lane.b32.xlu0 %v3508_v37, %s4547_s2  ;;  %s7759_s2 = smov 3   ;;  %v3457_v37 = vmul.f32 %v6187_v13, %v7758_v19 }
 0xb60   :  { %v3461_v8 = vrot.slane %v3457_v37, 4 }
 0xb61   :  { %2778 = vrot.lane.b32.xlu1 %v2774_v0, %s4546_s9  ;;  %v2728_v0 = vmul.f32 %v6169_v49, %v7760_v32 }
 0xb62   :  { %2780 = vrot.lane.b32.xlu0 %v2775_v27, %s4546_s9  ;;  %v2714_v27 = vmul.f32 %v6169_v49, %v7761_v23 }
 0xb63   :  { %v2732_v46 = vrot.slane %v2728_v0, 4 }
 0xb65   :  { %2794 = vrot.lane.b32.xlu1 %v2792_v57, %s4548_s10  ;;  %v7763_v57 = vld [vmem:[#allocation74_spill] sm:$0xff] }
 0xb66   :  { %2796 = vrot.lane.b32.xlu0 %v2793_v17, %s4548_s10  ;;  %v2729_v17 = vmul.f32 %v6172_v2, %v7763_v57 }
 0xb69   :  { %3476 = vrot.lane.b32.xlu1 %v3472_v47, %s4546_s9  ;;  %v2733_v47 = vrot.slane %v2729_v17, 4 }
 0xb6a   :  { %3478 = vrot.lane.b32.xlu0 %v3473_v52, %s4546_s9  ;;  %s7765_s9 = smov 14   ;;  %v3426_v52 = vmul.f32 %v6180_v43, %v7760_v32 }
 0xb6c   :  { %v3430_v34 = vrot.slane %v3426_v52, 4  ;;  %v7774_v52 = vld [vmem:[#allocation102_spill] sm:$0xff] }
 0xb6d   :  { %3492 = vrot.lane.b32.xlu1 %v3490_v59, %s4548_s10  ;;  %v3413_v59 = vmul.f32 %v6187_v13, %v7762_v4 }
 0xb6e   :  { %3494 = vrot.lane.b32.xlu0 %v3491_v7, %s4548_s10  ;;  %v3427_v7 = vmul.f32 %v6187_v13, %v7763_v57  ;;  %s7768_s10 = smov 17  }
 0xb71   :  { %2748 = vrot.lane.b32.xlu1 %v2744_v41, %s4542_s12  ;;  %v3431_v41 = vrot.slane %v3427_v7, 4 }
 0xb72   :  { %2750 = vrot.lane.b32.xlu0 %v2745_v51, %s4542_s12  ;;  %v7766_v51 = vld [vmem:[#allocation68_spill] sm:$0xff] }
 0xb73   :  { %v2690_v19 = vmul.f32 %v6169_v49, %v7766_v51  ;;  %v3388_v0 = vmul.f32 %v6180_v43, %v7766_v51 }
 0xb75   :  { %2764 = vrot.lane.b32.xlu1 %v2762_v63, %s7759_s2  ;;  %v7767_v63 = vld [vmem:[#allocation67_spill] sm:$0xff] }
 0xb76   :  { %2766 = vrot.lane.b32.xlu0 %v2763_v31, %s7759_s2  ;;  %v2691_v31 = vmul.f32 %v6172_v2, %v7767_v63 }
 0xb79   :  { %3446 = vrot.lane.b32.xlu1 %v3442_v5, %s4542_s12 }
 0xb7a   :  { %3448 = vrot.lane.b32.xlu0 %v3443_v26, %s4542_s12  ;;  %s7770_s12 = smov 16  }
 0xb7d   :  { %3462 = vrot.lane.b32.xlu1 %v3460_v39, %s7759_s2 }
 0xb7e   :  { %3464 = vrot.lane.b32.xlu0 %v3461_v8, %s7759_s2  ;;  %s7801_s2 = smov 33  }
 0xb81   :  { %2718 = vrot.lane.b32.xlu1 %v2714_v27, %s7764_s3  ;;  %v3389_v27 = vmul.f32 %v6187_v13, %v7767_v63 }
 0xb82   :  { %2720 = vrot.lane.b32.xlu0 %v2715_v54, %s7764_s3 }
 0xb85   :  { %2734 = vrot.lane.b32.xlu1 %v2732_v46, %s7765_s9  ;;  %v7773_v46 = vld [vmem:[#allocation101_spill] sm:$0xff] }
 0xb86   :  { %2736 = vrot.lane.b32.xlu0 %v2733_v47, %s7765_s9 }
 0xb89   :  { %3416 = vrot.lane.b32.xlu1 %v3412_v29, %s7764_s3 }
 0xb8a   :  { %3418 = vrot.lane.b32.xlu0 %v3413_v59, %s7764_s3  ;;  %v7776_v59 = vld [vmem:[#allocation65_spill] sm:$0xff]  ;;  %s7806_s3 = smov 45  }
 0xb8b   :  { %v2674_v7 = vmul.f32 %v6169_v49, %v7776_v59 }
 0xb8c   :  { %v2463_v22 = vpop.permute.xlu0 %2462 }
 0xb8d   :  { %v2466_v50 = vsel %vm109_vm14, %v7655_v9, %v2463_v22  ;;  %3432 = vrot.lane.b32.xlu1 %v3430_v34, %s7765_s9  ;;  %v7777_v34 = vld [vmem:[#allocation62_spill] sm:$0xff] }
 0xb8e   :  { %2470 = vst [vmem:[#allocation2] sm:$0xf] %v2466_v50  ;;  %3434 = vrot.lane.b32.xlu0 %v3431_v41, %s7765_s9  ;;  %v2660_v50 = vmul.f32 %v6169_v49, %v7777_v34  ;;  %s7809_s9 = smov 35  }
 0xb8f   :  { %v2465_v15 = vpop.permute.xlu1 %2464 }
 0xb90   :  { %v2479_v14 = vpop.permute.xlu0 %2478  ;;  %v2467_v16 = vsel %vm109_vm14, %v2463_v22, %v2465_v15  ;;  %v7778_v15 = vld [vmem:[#allocation61_spill] sm:$0xff] }
 0xb91   :  { %v2482_v5 = vsel %vm150_vm10, %v7657_v44, %v2479_v14  ;;  %2471 = vst [vmem:[#allocation2 + $0x8] sm:$0xf] %v2467_v16  ;;  %2694 = vrot.lane.b32.xlu1 %v2690_v19, %s7768_s10  ;;  %v2661_v51 = vmul.f32 %v6172_v2, %v7778_v15  ;;  %v7779_v19 = vld [vmem:[#allocation64_spill] sm:$0xff] }
 0xb92   :  { %2486 = vst [vmem:[#allocation2] sm:$0xf0] %v2482_v5  ;;  %2696 = vrot.lane.b32.xlu0 %v2691_v31, %s7768_s10  ;;  %v2678_v5 = vrot.slane %v2674_v7, 4 }
 0xb93   :  { %v2481_v26 = vpop.permute.xlu1 %2480 }
 0xb94   :  { %v2493_v37 = vpop.permute.xlu0 %2492  ;;  %v2483_v39 = vsel %vm150_vm10, %v2479_v14, %v2481_v26  ;;  %v2675_v14 = vmul.f32 %v6172_v2, %v7779_v19 }
 0xb95   :  { %v2496_v8 = vsel %vm7769_vm4, %v7645_v53, %v2493_v37  ;;  %2487 = vst [vmem:[#allocation2 + $0x8] sm:$0xf0] %v2483_v39  ;;  %2704 = vrot.lane.b32.xlu1 %v6199_v24, %s7770_s12  ;;  %vm7782_vm4 = vmmov %vm7780_vm1 }
 0xb96   :  { %2500 = vst [vmem:[#allocation2 + $0x20] sm:$0xf] %v2496_v8  ;;  %2706 = vrot.lane.b32.xlu0 %v6207_v12, %s7770_s12 }
 0xb97   :  { %v2495_v32 = vpop.permute.xlu1 %2494 }
 0xb98   :  { %v6385_v23 = vpop.permute.xlu0 %2504  ;;  %v2497_v4 = vsel %vm7771_vm8, %v2493_v37, %v2495_v32  ;;  %v2679_v37 = vrot.slane %v2675_v14, 4  ;;  %vm7784_vm8 = vmmov %vm7780_vm1 }
 0xb99   :  { %v2508_v54 = vsel %vm7772_vm7, %v7648_v28, %v6385_v23  ;;  %2501 = vst [vmem:[#allocation2 + $0x28] sm:$0xf] %v2497_v4  ;;  %3392 = vrot.lane.b32.xlu1 %v3388_v0, %s7768_s10  ;;  %v3372_v0 = vmul.f32 %v6180_v43, %v7776_v59  ;;  %v3358_v4 = vmul.f32 %v6180_v43, %v7777_v34  ;;  %vm7821_vm7 = vcmask 121856  }
 0xb9a   :  { %2512 = vst [vmem:[#allocation2 + $0x20] sm:$0xf0] %v2508_v54  ;;  %3394 = vrot.lane.b32.xlu0 %v3389_v27, %s7768_s10  ;;  %s7820_s10 = smov 47  }
 0xb9b   :  { %v2889_v57 = vpop.permute.xlu1 %2888  ;;  %v3376_v59 = vrot.slane %v3372_v0, 4 }
 0xb9c   :  { %v2899_v17 = vpop.permute.xlu0 %2898  ;;  %v2891_v47 = vsel %vm628_vm6, %v2889_v57, %v7773_v46 }
 0xb9d   :  { %v2901_v29 = vsel %vm7775_vm2, %v2899_v17, %v7774_v52  ;;  %2895 = vst [vmem:[#allocation2 + $0x1e8] sm:$0xf] %v2891_v47  ;;  %3402 = vrot.lane.b32.xlu1 %v6230_v18, %s7770_s12  ;;  %vm7822_vm2 = vmmov %vm7821_vm7 }
 0xb9e   :  { %2905 = vst [vmem:[#allocation2 + $0x1e8] sm:$0xf0] %v2901_v29  ;;  %3404 = vrot.lane.b32.xlu0 %v6215_v11, %s7770_s12 }
 0xb9f   :  { %v3587_v22 = vpop.permute.xlu1 %3586 }
 0xba0   :  { %v3597_v41 = vpop.permute.xlu0 %3596  ;;  %v3589_v63 = vsel %vm628_vm6, %v3587_v22, %v7773_v46 }
 0xba1   :  { %v3599_v31 = vsel %vm7780_vm1, %v3597_v41, %v7774_v52  ;;  %3593 = vst [vmem:[#allocation2 + $0x1f8] sm:$0xf] %v3589_v63  ;;  %2664 = vrot.lane.b32.xlu1 %v2660_v50, %s7781_s13  ;;  %vm7824_vm1 = vcmask 113664  }
 0xba2   :  { %3603 = vst [vmem:[#allocation2 + $0x1f8] sm:$0xf0] %v3599_v31  ;;  %2666 = vrot.lane.b32.xlu0 %v2661_v51, %s7781_s13  ;;  %v7787_v31 = vld [vmem:[#allocation40_spill] sm:$0xff] }
 0xba3   :  { %v2887_v16 = vpop.permute.xlu1 %2886 }
 0xba4   :  { %v2897_v26 = vpop.permute.xlu0 %2896  ;;  %v2890_v39 = vsel %vm628_vm6, %v2887_v16, %v2889_v57  ;;  %v3359_v57 = vmul.f32 %v6187_v13, %v7778_v15  ;;  %v7785_v15 = vld [vmem:[#allocation100_spill] sm:$0xff]  ;;  %v2631_v16 = vmul.f32 %v6172_v2, %v7787_v31 }
 0xba5   :  { %v2900_v8 = vsel %vm7782_vm4, %v2897_v26, %v2899_v17  ;;  %v3921_v32 = vld [vmem:[#allocation2 + $0x1e8] sm:$0xff]  ;;  %2894 = vst [vmem:[#allocation2 + $0x1e0] sm:$0xf] %v2890_v39  ;;  %2680 = vrot.lane.b32.xlu1 %v2678_v5, %s7783_s15  ;;  %v3373_v17 = vmul.f32 %v6187_v13, %v7779_v19  ;;  %v7788_v5 = vld [vmem:[#allocation48_spill] sm:$0xff]  ;;  %vm7825_vm4 = vmmov %vm7824_vm1 }
 0xba6   :  { %2904 = vst [vmem:[#allocation2 + $0x1e0] sm:$0xf0] %v2900_v8  ;;  %2682 = vrot.lane.b32.xlu0 %v2679_v37, %s7783_s15  ;;  %3969 = vmatprep.subr.mxu0 %v3921_v32  ;;  %v7786_v19 = vld [vmem:[#allocation41_spill] sm:$0xff]  ;;  %v2644_v26 = vmul.f32 %v6169_v49, %v7788_v5  ;;  %v7789_v37 = vld [vmem:[#allocation46_spill] sm:$0xff] }
 0xba7   :  { %v3585_v27 = vpop.permute.xlu1 %3584  ;;  %v3377_v34 = vrot.slane %v3373_v17, 4  ;;  %v2630_v14 = vmul.f32 %v6169_v49, %v7786_v19  ;;  %v2645_v39 = vmul.f32 %v6172_v2, %v7789_v37 }
 0xba8   :  { %v3595_v54 = vpop.permute.xlu0 %3594  ;;  %v3588_v46 = vsel %vm628_vm6, %v3585_v27, %v3587_v22  ;;  %vm7810_vm6 = vcmask 23552  }
 0xba9   :  { %v3598_v47 = vsel %vm7784_vm8, %v3595_v54, %v3597_v41  ;;  %v3923_v52 = vld [vmem:[#allocation2 + $0x1f8] sm:$0xff]  ;;  %3592 = vst [vmem:[#allocation2 + $0x1f0] sm:$0xf] %v3588_v46  ;;  %3362 = vrot.lane.b32.xlu1 %v3358_v4, %s7781_s13  ;;  %v2648_v4 = vrot.slane %v2644_v26, 4  ;;  %vm7826_vm8 = vmmov %vm7822_vm2 }
 0xbaa   :  { %3602 = vst [vmem:[#allocation2 + $0x1f0] sm:$0xf0] %v3598_v47  ;;  %3364 = vrot.lane.b32.xlu0 %v3359_v57, %s7781_s13  ;;  %4052 = vmatprep.subr.mxu1 %v3923_v52  ;;  %v2649_v57 = vrot.slane %v2645_v39, 4  ;;  %v3328_v52 = vmul.f32 %v6180_v43, %v7786_v19  ;;  %v7793_v39 = vld [vmem:[#allocation47_spill] sm:$0xff]  ;;  %s7823_s13 = smov 46  }
 0xbab   :  { %v2859_v29 = vpop.permute.xlu1 %2858 }
 0xbac   :  { %v2875_v7 = vpop.permute.xlu0 %2874  ;;  %v2861_v50 = vsel %vm687_vm11, %v2859_v29, %v7565_v33 }
 0xbad   :  { %v2877_v22 = vsel %vm656_vm9, %v2875_v7, %v7785_v15  ;;  %v3920_v51 = vld [vmem:[#allocation2 + $0x1e0] sm:$0xff]  ;;  %2865 = vst [vmem:[#allocation2 + $0x1c8] sm:$0xf] %v2861_v50  ;;  %3378 = vrot.lane.b32.xlu1 %v3376_v59, %s7783_s15 }
 0xbae   :  { %2881 = vst [vmem:[#allocation2 + $0x1c8] sm:$0xf0] %v2877_v22  ;;  %3380 = vrot.lane.b32.xlu0 %v3377_v34, %s7783_s15  ;;  %3970 = vmatpush1.msra.mxu0 %v3920_v51  ;;  %v3329_v34 = vmul.f32 %v6187_v13, %v7787_v31 }
 0xbaf   :  { %v3557_v41 = vpop.permute.xlu1 %3556 }
 0xbb0   :  { %v3573_v63 = vpop.permute.xlu0 %3572  ;;  %v3559_v8 = vsel %vm687_vm11, %v3557_v41, %v7565_v33 }
 0xbb1   :  { %v3575_v32 = vsel %vm656_vm9, %v3573_v63, %v7785_v15  ;;  %v3922_v0 = vld [vmem:[#allocation2 + $0x1f0] sm:$0xff]  ;;  %3563 = vst [vmem:[#allocation2 + $0x1d8] sm:$0xf] %v3559_v8  ;;  %2634 = vrot.lane.b32.xlu1 %v2630_v14, %s7790_s16  ;;  %v2614_v8 = vmul.f32 %v6169_v49, %v7793_v39 }
 0xbb2   :  { %3579 = vst [vmem:[#allocation2 + $0x1d8] sm:$0xf0] %v3575_v32  ;;  %2636 = vrot.lane.b32.xlu0 %v2631_v16, %s7790_s16  ;;  %4053 = vmatpush1.msra.mxu1 %v3922_v0  ;;  %v7792_v16 = vld [vmem:[#allocation94_spill] sm:$0xff]  ;;  %v7794_v32 = vld [vmem:[#allocation39_spill] sm:$0xff] }
 0xbb3   :  { %v2857_v27 = vpop.permute.xlu1 %2856  ;;  %v2615_v0 = vmul.f32 %v6172_v2, %v7794_v32 }
 0xbb4   :  { %v2873_v54 = vpop.permute.xlu0 %2872  ;;  %v2860_v17 = vsel %vm687_vm11, %v2857_v27, %v2859_v29  ;;  %v3342_v29 = vmul.f32 %v6180_v43, %v7788_v5 }
 0xbb5   :  { %v2876_v46 = vsel %vm656_vm9, %v2873_v54, %v2875_v7  ;;  %v3917_v33 = vld [vmem:[#allocation2 + $0x1c8] sm:$0xff]  ;;  %2864 = vst [vmem:[#allocation2 + $0x1c0] sm:$0xf] %v2860_v17  ;;  %2650 = vrot.lane.b32.xlu1 %v2648_v4, %s7791_s17  ;;  %v3343_v7 = vmul.f32 %v6187_v13, %v7789_v37  ;;  %v2618_v17 = vrot.slane %v2614_v8, 4  ;;  %v7797_v8 = vld [vmem:[#allocation35_spill] sm:$0xff] }
 0xbb6   :  { %2880 = vst [vmem:[#allocation2 + $0x1c0] sm:$0xf0] %v2876_v46  ;;  %2652 = vrot.lane.b32.xlu0 %v2649_v57, %s7791_s17  ;;  %3971 = vmatprep.subr.mxu0 %v3917_v33  ;;  %v3346_v19 = vrot.slane %v3342_v29, 4  ;;  %v2619_v33 = vrot.slane %v2615_v0, 4  ;;  %v3312_v29 = vmul.f32 %v6180_v43, %v7793_v39  ;;  %v7798_v0 = vld [vmem:[#allocation45_spill] sm:$0xff] }
 0xbb7   :  { %v3555_v47 = vpop.permute.xlu1 %3554  ;;  %v3347_v31 = vrot.slane %v3343_v7, 4  ;;  %v3313_v7 = vmul.f32 %v6187_v13, %v7794_v32  ;;  %v2575_v32 = vmul.f32 %v6172_v2, %v7797_v8 }
 0xbb8   :  { %v3571_v59 = vpop.permute.xlu0 %3570  ;;  %v3558_v50 = vsel %vm687_vm11, %v3555_v47, %v3557_v41 }
 0xbb9   :  { %v3574_v15 = vsel %vm656_vm9, %v3571_v59, %v3573_v63  ;;  %v3919_v22 = vld [vmem:[#allocation2 + $0x1d8] sm:$0xff]  ;;  %3562 = vst [vmem:[#allocation2 + $0x1d0] sm:$0xf] %v3558_v50  ;;  %3332 = vrot.lane.b32.xlu1 %v3328_v52, %s7790_s16  ;;  %vm7811_vm9 = vmmov %vm7810_vm6 }
 0xbba   :  { %3578 = vst [vmem:[#allocation2 + $0x1d0] sm:$0xf0] %v3574_v15  ;;  %3334 = vrot.lane.b32.xlu0 %v3329_v34, %s7790_s16  ;;  %4054 = vmatprep.subr.mxu1 %v3919_v22 }
 0xbbb   :  { %v2829_v51 = vpop.permute.xlu1 %2828 }
 0xbbc   :  { %v2845_v14 = vpop.permute.xlu0 %2844  ;;  %v2831_v5 = vsel %vm746_vm12, %v2829_v51, %v7792_v16 }
 0xbbd   :  { %v2847_v41 = vsel %vm715_vm0, %v2845_v14, %v7571_v38  ;;  %v3916_v26 = vld [vmem:[#allocation2 + $0x1c0] sm:$0xff]  ;;  %2835 = vst [vmem:[#allocation2 + $0x1a8] sm:$0xf] %v2831_v5  ;;  %3348 = vrot.lane.b32.xlu1 %v3346_v19, %s7791_s17  ;;  %v3316_v19 = vrot.slane %v3312_v29, 4 }
 0xbbe   :  { %2851 = vst [vmem:[#allocation2 + $0x1a8] sm:$0xf0] %v2847_v41  ;;  %3350 = vrot.lane.b32.xlu0 %v3347_v31, %s7791_s17  ;;  %3972 = vmatpush1.msra.mxu0 %v3916_v26  ;;  %v3317_v31 = vrot.slane %v3313_v7, 4 }
 0xbbf   :  { %v3527_v63 = vpop.permute.xlu1 %3526 }
 0xbc0   :  { %v3543_v37 = vpop.permute.xlu0 %3542  ;;  %v3529_v27 = vsel %vm746_vm12, %v3527_v63, %v7792_v16 }
 0xbc1   :  { %v3545_v4 = vsel %vm715_vm0, %v3543_v37, %v7571_v38  ;;  %v3918_v54 = vld [vmem:[#allocation2 + $0x1d0] sm:$0xff]  ;;  %3533 = vst [vmem:[#allocation2 + $0x1b8] sm:$0xf] %v3529_v27  ;;  %2604 = vrot.lane.b32.xlu1 %v6169_v49, %s7532_s28  ;;  %v2588_v27 = vmul.f32 %v6169_v49, %v7798_v0 }
 0xbc2   :  { %3549 = vst [vmem:[#allocation2 + $0x1b8] sm:$0xf0] %v3545_v4  ;;  %2606 = vrot.lane.b32.xlu0 %v6172_v2, %s7532_s28  ;;  %4055 = vmatpush1.msra.mxu1 %v3918_v54 }
 0xbc3   :  { %v2827_v57 = vpop.permute.xlu1 %2826 }
 0xbc4   :  { %v2843_v46 = vpop.permute.xlu0 %2842  ;;  %v2830_v47 = vsel %vm746_vm12, %v2827_v57, %v2829_v51  ;;  %v7799_v57 = vld [vmem:[#allocation37_spill] sm:$0xff] }
 0xbc5   :  { %v2846_v52 = vsel %vm715_vm0, %v2843_v46, %v2845_v14  ;;  %v3913_v59 = vld [vmem:[#allocation2 + $0x1a8] sm:$0xff]  ;;  %2834 = vst [vmem:[#allocation2 + $0x1a0] sm:$0xf] %v2830_v47  ;;  %2620 = vrot.lane.b32.xlu1 %v2618_v17, %s7795_s18  ;;  %v2589_v17 = vmul.f32 %v6172_v2, %v7799_v57 }
 0xbc6   :  { %2850 = vst [vmem:[#allocation2 + $0x1a0] sm:$0xf0] %v2846_v52  ;;  %2622 = vrot.lane.b32.xlu0 %v2619_v33, %s7795_s18  ;;  %3973 = vmatprep.subr.mxu0 %v3913_v59  ;;  %v2592_v33 = vrot.slane %v2588_v27, 4 }
 0xbc7   :  { %v3525_v38 = vpop.permute.xlu1 %3524 }
 0xbc8   :  { %v3541_v34 = vpop.permute.xlu0 %3540  ;;  %v3528_v50 = vsel %vm746_vm12, %v3525_v38, %v3527_v63  ;;  %v7796_v63 = vld [vmem:[#allocation36_spill] sm:$0xff] }
 0xbc9   :  { %v3544_v15 = vsel %vm715_vm0, %v3541_v34, %v3543_v37  ;;  %v3915_v22 = vld [vmem:[#allocation2 + $0x1b8] sm:$0xff]  ;;  %3532 = vst [vmem:[#allocation2 + $0x1b0] sm:$0xf] %v3528_v50  ;;  %3302 = vrot.lane.b32.xlu1 %v6180_v43, %s7532_s28  ;;  %v2574_v37 = vmul.f32 %v6169_v49, %v7796_v63  ;;  %v2593_v34 = vrot.slane %v2589_v17, 4  ;;  %v3272_v50 = vmul.f32 %v6180_v43, %v7796_v63  ;;  %v7804_v17 = vld [vmem:[#allocation32_spill] sm:$0xff] }
 0xbca   :  { %3548 = vst [vmem:[#allocation2 + $0x1b0] sm:$0xf0] %v3544_v15  ;;  %3304 = vrot.lane.b32.xlu0 %v6187_v13, %s7532_s28  ;;  %4056 = vmatprep.subr.mxu1 %v3915_v22  ;;  %s7800_s28 = smov 34   ;;  %v3286_v22 = vmul.f32 %v6180_v43, %v7798_v0  ;;  %v7802_v0 = vld [vmem:[#allocation33_spill] sm:$0xff]  ;;  %vm7807_vm0 = vcmask 105472  }
 0xbcb   :  { %v2815_v51 = vpop.permute.xlu1 %2814  ;;  %v2544_v27 = vmul.f32 %v6169_v49, %v7802_v0  ;;  %vm7812_vm11 = vmmov %vm7807_vm0 }
 0xbcc   :  { %v3513_v14 = vpop.permute.xlu0 %3512  ;;  %v2817_v16 = vsel %vm774_vm13, %v2815_v51, %v7574_v36  ;;  %vm7813_vm12 = vmmov %vm7807_vm0 }
 0xbcd   :  { %v3515_v5 = vsel %vm774_vm13, %v3513_v14, %v7574_v36  ;;  %v3912_v41 = vld [vmem:[#allocation2 + $0x1a0] sm:$0xff]  ;;  %2821 = vst [vmem:[#allocation2 + $0x188] sm:$0xf0] %v2817_v16  ;;  %3318 = vrot.lane.b32.xlu1 %v3316_v19, %s7795_s18 }
 0xbce   :  { %3519 = vst [vmem:[#allocation2 + $0x198] sm:$0xf0] %v3515_v5  ;;  %3320 = vrot.lane.b32.xlu0 %v3317_v31, %s7795_s18  ;;  %3974 = vmatpush1.msra.mxu0 %v3912_v41  ;;  %v3273_v31 = vmul.f32 %v6187_v13, %v7797_v8  ;;  %v3287_v5 = vmul.f32 %v6187_v13, %v7799_v57 }
 0xbcf   :  { %v2813_v26 = vpop.permute.xlu1 %2812 }
 0xbd0   :  { %v3511_v39 = vpop.permute.xlu0 %3510  ;;  %v2816_v36 = vsel %vm774_vm13, %v2813_v26, %v2815_v51  ;;  %v3290_v26 = vrot.slane %v3286_v22, 4  ;;  %v3291_v8 = vrot.slane %v3287_v5, 4  ;;  %v3242_v22 = vmul.f32 %v6180_v43, %v7802_v0 }
 0xbd1   :  { %v3514_v4 = vsel %vm774_vm13, %v3511_v39, %v3513_v14  ;;  %v3914_v54 = vld [vmem:[#allocation2 + $0x1b0] sm:$0xff]  ;;  %2820 = vst [vmem:[#allocation2 + $0x180] sm:$0xf0] %v2816_v36  ;;  %2578 = vrot.lane.b32.xlu1 %v2574_v37, %s7800_s28  ;;  %vm7816_vm13 = vmmov %vm7810_vm6 }
 0xbd2   :  { %3518 = vst [vmem:[#allocation2 + $0x190] sm:$0xf0] %v3514_v4  ;;  %2580 = vrot.lane.b32.xlu0 %v2575_v32, %s7800_s28  ;;  %4057 = vmatpush1.msra.mxu1 %v3914_v54  ;;  %v7803_v4 = vld [vmem:[#allocation44_spill] sm:$0xff] }
 0xbd3   :  { %v2779_v46 = vpop.permute.xlu1 %2778  ;;  %v2558_v54 = vmul.f32 %v6169_v49, %v7803_v4 }
 0xbd4   :  { %v2781_v47 = vpop.permute.xlu0 %2780  ;;  %v2782_v52 = vsel %vm763_vm5, %v7575_v45, %v2779_v46  ;;  %v3909_v59 = vld [vmem:[#allocation2 + $0x188] sm:$0xff] }
 0xbd5   :  { %v2783_v38 = vsel %vm763_vm5, %v2779_v46, %v2781_v47  ;;  %v3911_v29 = vld [vmem:[#allocation2 + $0x198] sm:$0xff]  ;;  %2786 = vst [vmem:[#allocation2 + $0x160] sm:$0xf] %v2782_v52  ;;  %2594 = vrot.lane.b32.xlu1 %v2592_v33, %s7801_s2  ;;  %3975 = vmatprep.subr.mxu0 %v3909_v59  ;;  %v2545_v46 = vmul.f32 %v6172_v2, %v7804_v17  ;;  %v7805_v47 = vld [vmem:[#allocation34_spill] sm:$0xff] }
 0xbd6   :  { %2787 = vst [vmem:[#allocation2 + $0x168] sm:$0xf] %v2783_v38  ;;  %2596 = vrot.lane.b32.xlu0 %v2593_v34, %s7801_s2  ;;  %4058 = vmatprep.subr.mxu1 %v3911_v29  ;;  %v2559_v52 = vmul.f32 %v6172_v2, %v7805_v47 }
 0xbd7   :  { %v2795_v7 = vpop.permute.xlu1 %2794 }
 0xbd8   :  { %v2797_v15 = vpop.permute.xlu0 %2796  ;;  %v2798_v51 = vsel %vm794_vm15, %v7576_v21, %v2795_v7  ;;  %v3908_v19 = vld [vmem:[#allocation2 + $0x180] sm:$0xff] }
 0xbd9   :  { %v2799_v14 = vsel %vm794_vm15, %v2795_v7, %v2797_v15  ;;  %v3910_v16 = vld [vmem:[#allocation2 + $0x190] sm:$0xff]  ;;  %2802 = vst [vmem:[#allocation2 + $0x160] sm:$0xf0] %v2798_v51  ;;  %3276 = vrot.lane.b32.xlu1 %v3272_v50, %s7800_s28  ;;  %3976 = vmatpush1.msra.mxu0 %v3908_v19  ;;  %v2563_v50 = vrot.slane %v2559_v52, 4  ;;  %v3256_v19 = vmul.f32 %v6180_v43, %v7803_v4  ;;  %v7819_v52 = vld [vmem:[#allocation31_spill] sm:$0xff] }
 0xbda   :  { %2803 = vst [vmem:[#allocation2 + $0x168] sm:$0xf0] %v2799_v14  ;;  %3278 = vrot.lane.b32.xlu0 %v3273_v31, %s7800_s28  ;;  %4059 = vmatpush1.msra.mxu1 %v3910_v16  ;;  %v3243_v16 = vmul.f32 %v6187_v13, %v7804_v17 }
 0xbdb   :  { %v3477_v41 = vpop.permute.xlu1 %3476 }
 0xbdc   :  { %v3479_v63 = vpop.permute.xlu0 %3478  ;;  %v3480_v37 = vsel %vm763_vm5, %v7575_v45, %v3477_v41 }
 0xbdd   :  { %v3481_v39 = vsel %vm763_vm5, %v3477_v41, %v3479_v63  ;;  %3484 = vst [vmem:[#allocation2 + $0x170] sm:$0xf] %v3480_v37  ;;  %3292 = vrot.lane.b32.xlu1 %v3290_v26, %s7801_s2  ;;  %vm7808_vm5 = vmmov %vm7807_vm0  ;;  %v3257_v41 = vmul.f32 %v6187_v13, %v7805_v47  ;;  %v3260_v37 = vrot.slane %v3256_v19, 4 }
 0xbde   :  { %3485 = vst [vmem:[#allocation2 + $0x178] sm:$0xf] %v3481_v39  ;;  %3294 = vrot.lane.b32.xlu0 %v3291_v8, %s7801_s2 }
 0xbdf   :  { %v3493_v32 = vpop.permute.xlu1 %3492  ;;  %v3261_v0 = vrot.slane %v3257_v41, 4  ;;  %v3227_v41 = vmul.f32 %v6187_v13, %v7819_v52 }
 0xbe0   :  { %v3495_v36 = vpop.permute.xlu0 %3494  ;;  %v3496_v45 = vsel %vm794_vm15, %v7576_v21, %v3493_v32  ;;  %v3904_v59 = vld [vmem:[#allocation2 + $0x160] sm:$0xff]  ;;  %v2562_v21 = vrot.slane %v2558_v54, 4 }
 0xbe1   :  { %v3497_v57 = vsel %vm794_vm15, %v3493_v32, %v3495_v36  ;;  %v3905_v33 = vld [vmem:[#allocation2 + $0x168] sm:$0xff]  ;;  %3500 = vst [vmem:[#allocation2 + $0x170] sm:$0xf0] %v3496_v45  ;;  %2548 = vrot.lane.b32.xlu1 %v2544_v27, %s7806_s3  ;;  %v7814_v36 = vld [vmem:[#allocation30_spill] sm:$0xff]  ;;  %v7815_v45 = vld [vmem:[#allocation43_spill] sm:$0xff] }
 0xbe2   :  { %3501 = vst [vmem:[#allocation2 + $0x178] sm:$0xf0] %v3497_v57  ;;  %3977 = vmatprep.subr.mxu0 %v3905_v33  ;;  %2550 = vrot.lane.b32.xlu0 %v2545_v46, %s7806_s3  ;;  %v2514_v4 = vmul.f32 %v6169_v49, %v7814_v36  ;;  %v2528_v57 = vmul.f32 %v6169_v49, %v7815_v45  ;;  %vm7817_vm15 = vmmov %vm7810_vm6  ;;  %v7818_v46 = vld [vmem:[#allocation29_spill] sm:$0xff] }
 0xbe3   :  { %3978 = vmatpush1.msra.mxu0 %v3904_v59  ;;  %v2749_v38 = vpop.permute.xlu1 %2748  ;;  %v2515_v33 = vmul.f32 %v6172_v2, %v7818_v46  ;;  %v2529_v59 = vmul.f32 %v6172_v2, %v7819_v52  ;;  %v3226_v19 = vmul.f32 %v6180_v43, %v7815_v45  ;;  %v3186_v45 = vmul.f32 %v6180_v43, %v7553_v58  ;;  %v7832_v52 = vld [vmem:[#allocation70_spill] sm:$0xff] }
 0xbe4   :  { %v2751_v34 = vpop.permute.xlu0 %2750  ;;  %v2752_v29 = vsel %vm7807_vm0, %v7579_v1, %v2749_v38  ;;  %vm7827_vm0 = vmmov %vm7822_vm2 }
 0xbe5   :  { %v2753_v7 = vsel %vm7808_vm5, %v2749_v38, %v2751_v34  ;;  %2756 = vst [vmem:[#allocation2 + $0x140] sm:$0xf] %v2752_v29  ;;  %2564 = vrot.lane.b32.xlu1 %v2562_v21, %s7809_s9  ;;  %vm7828_vm5 = vmmov %vm7824_vm1 }
 0xbe6   :  { %2757 = vst [vmem:[#allocation2 + $0x148] sm:$0xf] %v2753_v7  ;;  %2566 = vrot.lane.b32.xlu0 %v2563_v50, %s7809_s9  ;;  %v2533_v50 = vrot.slane %v2529_v59, 4 }
 0xbe7   :  { %v2765_v15 = vpop.permute.xlu1 %2764 }
 0xbe8   :  { %v2767_v51 = vpop.permute.xlu0 %2766  ;;  %v2768_v14 = vsel %vm7810_vm6, %v7581_v61, %v2765_v15  ;;  %v3906_v26 = vld [vmem:[#allocation2 + $0x170] sm:$0xff]  ;;  %vm7829_vm6 = vmmov %vm7824_vm1 }
 0xbe9   :  { %v2769_v31 = vsel %vm7811_vm9, %v2765_v15, %v2767_v51  ;;  %v3907_v5 = vld [vmem:[#allocation2 + $0x178] sm:$0xff]  ;;  %2772 = vst [vmem:[#allocation2 + $0x140] sm:$0xf0] %v2768_v14  ;;  %3246 = vrot.lane.b32.xlu1 %v3242_v22, %s7806_s3  ;;  %v3212_v22 = vmul.f32 %v6180_v43, %v7814_v36  ;;  %vm7830_vm9 = vcmask 138240  }
 0xbea   :  { %2773 = vst [vmem:[#allocation2 + $0x148] sm:$0xf0] %v2769_v31  ;;  %4060 = vmatprep.subr.mxu1 %v3907_v5  ;;  %3248 = vrot.lane.b32.xlu0 %v3243_v16, %s7806_s3  ;;  %v3213_v16 = vmul.f32 %v6187_v13, %v7818_v46 }
 0xbeb   :  { %4061 = vmatpush1.msra.mxu1 %v3906_v26  ;;  %v3447_v63 = vpop.permute.xlu1 %3446 }
 0xbec   :  { %v3449_v39 = vpop.permute.xlu0 %3448  ;;  %v3450_v8 = vsel %vm7812_vm11, %v7579_v1, %v3447_v63  ;;  %vm7831_vm11 = vmmov %vm7830_vm9 }
 0xbed   :  { %v3451_v32 = vsel %vm7813_vm12, %v3447_v63, %v3449_v39  ;;  %3454 = vst [vmem:[#allocation2 + $0x150] sm:$0xf] %v3450_v8  ;;  %3262 = vrot.lane.b32.xlu1 %v3260_v37, %s7809_s9  ;;  %v3230_v37 = vrot.slane %v3226_v19, 4  ;;  %vm7833_vm12 = vcmask 130048  }
 0xbee   :  { %3455 = vst [vmem:[#allocation2 + $0x158] sm:$0xf] %v3451_v32  ;;  %3264 = vrot.lane.b32.xlu0 %v3261_v0, %s7809_s9  ;;  %v3231_v0 = vrot.slane %v3227_v41, 4 }
 0xbef   :  { %v3463_v27 = vpop.permute.xlu1 %3462 }
 0xbf0   :  { %v3465_v54 = vpop.permute.xlu0 %3464  ;;  %v3466_v1 = vsel %vm7816_vm13, %v7581_v61, %v3463_v27  ;;  %v3900_v38 = vld [vmem:[#allocation2 + $0x140] sm:$0xff]  ;;  %v2532_v61 = vrot.slane %v2528_v57, 4  ;;  %vm7834_vm13 = vmmov %vm7833_vm12 }
 0xbf1   :  { %v3467_v17 = vsel %vm7817_vm15, %v3463_v27, %v3465_v54  ;;  %v3901_v47 = vld [vmem:[#allocation2 + $0x148] sm:$0xff]  ;;  %3470 = vst [vmem:[#allocation2 + $0x150] sm:$0xf0] %v3466_v1  ;;  %2518 = vrot.lane.b32.xlu1 %v2514_v4, %s7820_s10  ;;  %vm7835_vm15 = vmmov %vm7830_vm9 }
 0xbf2   :  { %3471 = vst [vmem:[#allocation2 + $0x158] sm:$0xf0] %v3467_v17  ;;  %3979 = vmatprep.subr.mxu0 %v3901_v47  ;;  %2520 = vrot.lane.b32.xlu0 %v2515_v33, %s7820_s10 }
 0xbf3   :  { %3980 = vmatpush1.msra.mxu0 %v3900_v38  ;;  %v2719_v21 = vpop.permute.xlu1 %2718  ;;  %v3156_v38 = vmul.f32 %v6180_v43, %v7560_v40  ;;  %v3171_v40 = vmul.f32 %v6187_v13, %v7563_v56 }
 0xbf4   :  { %v2721_v34 = vpop.permute.xlu0 %2720  ;;  %v2722_v29 = vsel %vm7821_vm7, %v7583_v20, %v2719_v21  ;;  %vm7836_vm7 = vmmov %vm7830_vm9 }
 0xbf5   :  { %v2723_v7 = vsel %vm7822_vm2, %v2719_v21, %v2721_v34  ;;  %2726 = vst [vmem:[#allocation2 + $0x120] sm:$0xf] %v2722_v29  ;;  %2534 = vrot.lane.b32.xlu1 %v2532_v61, %s7823_s13  ;;  %v3170_v61 = vmul.f32 %v6180_v43, %v7561_v55  ;;  %v3175_v19 = vrot.slane %v3171_v40, 4  ;;  %vm7837_vm2 = vmmov %vm7833_vm12 }
 0xbf6   :  { %2727 = vst [vmem:[#allocation2 + $0x128] sm:$0xf] %v2723_v7  ;;  %2536 = vrot.lane.b32.xlu0 %v2533_v50, %s7823_s13  ;;  %v3157_v7 = vmul.f32 %v6187_v13, %v7562_v60 }
 0xbf7   :  { %v2735_v15 = vpop.permute.xlu1 %2734 }
 0xbf8   :  { %v2737_v51 = vpop.permute.xlu0 %2736  ;;  %v2738_v14 = vsel %vm7824_vm1, %v7585_v30, %v2735_v15  ;;  %v3902_v26 = vld [vmem:[#allocation2 + $0x150] sm:$0xff]  ;;  %vm7838_vm1 = vmmov %vm7837_vm2 }
 0xbf9   :  { %v2739_v31 = vsel %vm7825_vm4, %v2735_v15, %v2737_v51  ;;  %v3903_v5 = vld [vmem:[#allocation2 + $0x158] sm:$0xff]  ;;  %2742 = vst [vmem:[#allocation2 + $0x120] sm:$0xf0] %v2738_v14  ;;  %3216 = vrot.lane.b32.xlu1 %v3212_v22, %s7820_s10  ;;  %v3174_v22 = vrot.slane %v3170_v61, 4  ;;  %vm7840_vm4 = vcmask 154624  }
 0xbfa   :  { %2743 = vst [vmem:[#allocation2 + $0x128] sm:$0xf0] %v2739_v31  ;;  %4062 = vmatprep.subr.mxu1 %v3903_v5  ;;  %3218 = vrot.lane.b32.xlu0 %v3213_v16, %s7820_s10  ;;  %v7839_v31 = vld [vmem:[#allocation24_spill] sm:$0xff] }
 0xbfb   :  { %4063 = vmatpush1.msra.mxu1 %v3902_v26  ;;  %v3417_v63 = vpop.permute.xlu1 %3416  ;;  %v3835_v26 = vmul.f32 %v6187_v13, %v7839_v31 }
 0xbfc   :  { %v3419_v39 = vpop.permute.xlu0 %3418  ;;  %v3420_v8 = vsel %vm7826_vm8, %v7583_v20, %v3417_v63  ;;  %vm7841_vm8 = vmmov %vm7840_vm4 }
 0xbfd   :  { %v3421_v32 = vsel %vm7827_vm0, %v3417_v63, %v3419_v39  ;;  %3424 = vst [vmem:[#allocation2 + $0x130] sm:$0xf] %v3420_v8  ;;  %3232 = vrot.lane.b32.xlu1 %v3230_v37, %s7823_s13  ;;  %v7842_v8 = vld [vmem:[#allocation106_spill] sm:$0xff]  ;;  %vm7844_vm0 = vcmask 146432  }
 0xbfe   :  { %3425 = vst [vmem:[#allocation2 + $0x138] sm:$0xf] %v3421_v32  ;;  %3234 = vrot.lane.b32.xlu0 %v3231_v0, %s7823_s13  ;;  %v3136_v32 = vmul.f32 %v6169_v49, %v7842_v8  ;;  %v7843_v0 = vld [vmem:[#allocation25_spill] sm:$0xff] }
 0xbff   :  { %v3433_v27 = vpop.permute.xlu1 %3432 }
 0xc00   :  { %v3435_v36 = vpop.permute.xlu0 %3434  ;;  %v3436_v4 = vsel %vm7828_vm5, %v7585_v30, %v3433_v27  ;;  %v3896_v57 = vld [vmem:[#allocation2 + $0x120] sm:$0xff]  ;;  %v3187_v30 = vmul.f32 %v6187_v13, %v7554_v48  ;;  %vm7845_vm5 = vmmov %vm7844_vm0 }
 0xc01   :  { %v3437_v54 = vsel %vm7829_vm6, %v3433_v27, %v3435_v36  ;;  %v3897_v20 = vld [vmem:[#allocation2 + $0x128] sm:$0xff]  ;;  %3440 = vst [vmem:[#allocation2 + $0x130] sm:$0xf0] %v3436_v4  ;;  %2506 = vrot.lane.b32.xlu1 %v6207_v12, %s7556_s25  ;;  %v3121_v27 = vmul.f32 %v6172_v2, %v7843_v0  ;;  %v3834_v4 = vmul.f32 %v6180_v43, %v7842_v8  ;;  %vm7847_vm6 = vmmov %vm7840_vm4 }
 0xc02   :  { %3441 = vst [vmem:[#allocation2 + $0x138] sm:$0xf0] %v3437_v54  ;;  %3981 = vmatprep.subr.mxu0 %v3897_v20  ;;  %3190 = vrot.lane.b32.xlu0 %v3186_v45, %s4520_s22 }
 0xc03   :  { %3982 = vmatpush1.msra.mxu0 %v3896_v57  ;;  %v2695_v1 = vpop.permute.xlu1 %2694  ;;  %v7846_v57 = vld [vmem:[#allocation42_spill] sm:$0xff] }
 0xc04   :  { %v2697_v17 = vpop.permute.xlu0 %2696  ;;  %v2698_v46 = vsel %vm7830_vm9, %v7588_v35, %v2695_v1  ;;  %vm7848_vm9 = vmmov %vm7840_vm4 }
 0xc05   :  { %v2699_v58 = vsel %vm7831_vm11, %v2695_v1, %v2697_v17  ;;  %2702 = vst [vmem:[#allocation2 + $0x100] sm:$0xf] %v2698_v46  ;;  %3192 = vrot.lane.b32.xlu1 %v3187_v30, %s4520_s22  ;;  %v3107_v1 = vmul.f32 %v6172_v2, %v7846_v57  ;;  %v3819_v46 = vmul.f32 %v6187_v13, %v7843_v0  ;;  %vm7850_vm11 = vmmov %vm7844_vm0  ;;  %s7897_s22 = smov 96  }
 0xc06   :  { %2703 = vst [vmem:[#allocation2 + $0x108] sm:$0xf] %v2699_v58  ;;  %3202 = vrot.lane.b32.xlu0 %v6230_v18, %s7556_s25 }
 0xc07   :  { %v2705_v33 = vpop.permute.xlu1 %2704 }
 0xc08   :  { %v2707_v47 = vpop.permute.xlu0 %2706  ;;  %v2708_v59 = vsel %vm7833_vm12, %v7832_v52, %v2705_v33  ;;  %v3898_v34 = vld [vmem:[#allocation2 + $0x130] sm:$0xff]  ;;  %vm7851_vm12 = vmmov %vm7844_vm0 }
 0xc09   :  { %v2709_v48 = vsel %vm7834_vm13, %v2705_v33, %v2707_v47  ;;  %v3899_v21 = vld [vmem:[#allocation2 + $0x138] sm:$0xff]  ;;  %2712 = vst [vmem:[#allocation2 + $0x100] sm:$0xf0] %v2708_v59  ;;  %3204 = vrot.lane.b32.xlu1 %v6215_v11, %s7556_s25  ;;  %v3125_v33 = vrot.slane %v3121_v27, 4  ;;  %vm7853_vm13 = vcmask 244736  }
 0xc0a   :  { %2713 = vst [vmem:[#allocation2 + $0x108] sm:$0xf0] %v2709_v48  ;;  %4064 = vmatprep.subr.mxu1 %v3899_v21  ;;  %3160 = vrot.lane.b32.xlu0 %v3156_v38, %s4519_s21  ;;  %v3805_v48 = vmul.f32 %v6187_v13, %v7846_v57  ;;  %v3823_v21 = vrot.slane %v3819_v46, 4  ;;  %v7864_v46 = vld [vmem:[#allocation38_spill] sm:$0xff] }
 0xc0b   :  { %4065 = vmatpush1.msra.mxu1 %v3898_v34  ;;  %v3393_v29 = vpop.permute.xlu1 %3392  ;;  %v7849_v34 = vld [vmem:[#allocation105_spill] sm:$0xff] }
 0xc0c   :  { %v3395_v50 = vpop.permute.xlu0 %3394  ;;  %v3396_v55 = vsel %vm7835_vm15, %v7588_v35, %v3393_v29  ;;  %v3137_v35 = vmul.f32 %v6172_v2, %v7839_v31  ;;  %vm7854_vm15 = vmmov %vm7853_vm13 }
 0xc0d   :  { %v3397_v15 = vsel %vm7836_vm7, %v3393_v29, %v3395_v50  ;;  %3400 = vst [vmem:[#allocation2 + $0x110] sm:$0xf] %v3396_v55  ;;  %3162 = vrot.lane.b32.xlu1 %v3157_v7, %s4519_s21  ;;  %v3120_v29 = vmul.f32 %v6169_v49, %v7849_v34  ;;  %v7852_v50 = vld [vmem:[#allocation107_spill] sm:$0xff]  ;;  %vm7855_vm7 = vcmask 236544   ;;  %s7860_s21 = smov 80  }
 0xc0e   :  { %3401 = vst [vmem:[#allocation2 + $0x118] sm:$0xf] %v3397_v15  ;;  %3176 = vrot.lane.b32.xlu0 %v3174_v22, %s4525_s29  ;;  %v3106_v40 = vmul.f32 %v6169_v49, %v7852_v50 }
 0xc0f   :  { %v3403_v51 = vpop.permute.xlu1 %3402 }
 0xc10   :  { %v3405_v14 = vpop.permute.xlu0 %3404  ;;  %v3406_v60 = vsel %vm7837_vm2, %v7832_v52, %v3403_v51  ;;  %v3892_v5 = vld [vmem:[#allocation2 + $0x100] sm:$0xff]  ;;  %vm7856_vm2 = vmmov %vm7855_vm7 }
 0xc11   :  { %v3407_v56 = vsel %vm7838_vm1, %v3403_v51, %v3405_v14  ;;  %v3893_v16 = vld [vmem:[#allocation2 + $0x108] sm:$0xff]  ;;  %3410 = vst [vmem:[#allocation2 + $0x110] sm:$0xf0] %v3406_v60  ;;  %3178 = vrot.lane.b32.xlu1 %v3175_v19, %s4525_s29  ;;  %v3124_v51 = vrot.slane %v3120_v29, 4  ;;  %vm7858_vm1 = vmmov %vm7853_vm13 }
 0xc12   :  { %3411 = vst [vmem:[#allocation2 + $0x118] sm:$0xf0] %v3407_v56  ;;  %3983 = vmatprep.subr.mxu0 %v3893_v16  ;;  %3142 = vrot.lane.b32.xlu0 %v3137_v35, %s7566_s1  ;;  %v3804_v56 = vmul.f32 %v6180_v43, %v7852_v50 }
 0xc13   :  { %3984 = vmatpush1.msra.mxu0 %v3892_v5  ;;  %v2665_v41 = vpop.permute.xlu1 %2664 }
 0xc14   :  { %v2667_v63 = vpop.permute.xlu0 %2666  ;;  %v2668_v37 = vsel %vm7840_vm4, %v7598_v3, %v2665_v41  ;;  %vm7859_vm4 = vmmov %vm7858_vm1 }
 0xc15   :  { %v2669_v39 = vsel %vm7841_vm8, %v2665_v41, %v2667_v63  ;;  %2672 = vst [vmem:[#allocation2 + $0xe0] sm:$0xf] %v2668_v37  ;;  %3840 = vrot.lane.b32.xlu1 %v3835_v26, %s7566_s1  ;;  %v7857_v26 = vld [vmem:[#allocation23_spill] sm:$0xff]  ;;  %vm7861_vm8 = vmmov %vm7856_vm2 }
 0xc16   :  { %2673 = vst [vmem:[#allocation2 + $0xe8] sm:$0xf] %v2669_v39  ;;  %3140 = vrot.lane.b32.xlu0 %v3136_v32, %s7566_s1  ;;  %v3083_v63 = vmul.f32 %v6172_v2, %v7857_v26 }
 0xc17   :  { %v2681_v36 = vpop.permute.xlu1 %2680 }
 0xc18   :  { %v2683_v54 = vpop.permute.xlu0 %2682  ;;  %v2684_v45 = vsel %vm7844_vm0, %v7602_v62, %v2681_v36  ;;  %v3894_v17 = vld [vmem:[#allocation2 + $0x110] sm:$0xff]  ;;  %vm7862_vm0 = vmmov %vm7856_vm2 }
 0xc19   :  { %v2685_v20 = vsel %vm7845_vm5, %v2681_v36, %v2683_v54  ;;  %v3895_v30 = vld [vmem:[#allocation2 + $0x118] sm:$0xff]  ;;  %2688 = vst [vmem:[#allocation2 + $0xe0] sm:$0xf0] %v2684_v45  ;;  %3838 = vrot.lane.b32.xlu1 %v3834_v4, %s7566_s1  ;;  %v3781_v36 = vmul.f32 %v6187_v13, %v7857_v26  ;;  %vm7865_vm5 = vcmask 261120  }
 0xc1a   :  { %2689 = vst [vmem:[#allocation2 + $0xe8] sm:$0xf0] %v2685_v20  ;;  %4066 = vmatprep.subr.mxu1 %v3895_v30  ;;  %3112 = vrot.lane.b32.xlu0 %v3107_v1, %s7572_s30 }
 0xc1b   :  { %4067 = vmatpush1.msra.mxu1 %v3894_v17  ;;  %v3363_v58 = vpop.permute.xlu1 %3362 }
 0xc1c   :  { %v3365_v47 = vpop.permute.xlu0 %3364  ;;  %v3366_v52 = vsel %vm7847_vm6, %v7598_v3, %v3363_v58  ;;  %vm7866_vm6 = vmmov %vm7865_vm5 }
 0xc1d   :  { %v3367_v59 = vsel %vm7848_vm9, %v3363_v58, %v3365_v47  ;;  %3370 = vst [vmem:[#allocation2 + $0xf0] sm:$0xf] %v3366_v52  ;;  %3128 = vrot.lane.b32.xlu1 %v3125_v33, %s7573_s26  ;;  %vm7868_vm9 = vcmask 252928  }
 0xc1e   :  { %3371 = vst [vmem:[#allocation2 + $0xf8] sm:$0xf] %v3367_v59  ;;  %3810 = vrot.lane.b32.xlu0 %v3805_v48, %s7572_s30 }
 0xc1f   :  { %v3379_v38 = vpop.permute.xlu1 %3378 }
 0xc20   :  { %v3381_v61 = vpop.permute.xlu0 %3380  ;;  %v3382_v3 = vsel %vm7850_vm11, %v7602_v62, %v3379_v38  ;;  %v3888_v15 = vld [vmem:[#allocation2 + $0xe0] sm:$0xff]  ;;  %v3818_v62 = vmul.f32 %v6180_v43, %v7849_v34  ;;  %vm7869_vm11 = vmmov %vm7868_vm9 }
 0xc21   :  { %v3383_v7 = vsel %vm7851_vm12, %v3379_v38, %v3381_v61  ;;  %v3889_v55 = vld [vmem:[#allocation2 + $0xe8] sm:$0xff]  ;;  %3386 = vst [vmem:[#allocation2 + $0xf0] sm:$0xf0] %v3382_v3  ;;  %3826 = vrot.lane.b32.xlu1 %v3823_v21, %s7573_s26  ;;  %v7870_v21 = vld [vmem:[#allocation99_spill] sm:$0xff]  ;;  %vm7871_vm12 = vmmov %vm7865_vm5 }
 0xc22   :  { %3387 = vst [vmem:[#allocation2 + $0xf8] sm:$0xf0] %v3383_v7  ;;  %3985 = vmatprep.subr.mxu0 %v3889_v55  ;;  %3110 = vrot.lane.b32.xlu0 %v3106_v40, %s7572_s30  ;;  %v3822_v35 = vrot.slane %v3818_v62, 4  ;;  %v3053_v61 = vmul.f32 %v6172_v2, %v7870_v21 }
 0xc23   :  { %3986 = vmatpush1.msra.mxu0 %v3888_v15  ;;  %v2635_v22 = vpop.permute.xlu1 %2634 }
 0xc24   :  { %v2637_v19 = vpop.permute.xlu0 %2636  ;;  %v2638_v14 = vsel %vm7853_vm13, %v7605_v6, %v2635_v22  ;;  %vm7872_vm13 = vmmov %vm7865_vm5 }
 0xc25   :  { %v2639_v60 = vsel %vm7854_vm15, %v2635_v22, %v2637_v19  ;;  %2642 = vst [vmem:[#allocation2 + $0xc0] sm:$0xf] %v2638_v14  ;;  %3126 = vrot.lane.b32.xlu1 %v3124_v51, %s7573_s26  ;;  %v7873_v19 = vld [vmem:[#allocation108_spill] sm:$0xff]  ;;  %vm7874_vm15 = vmmov %vm7868_vm9 }
 0xc26   :  { %2643 = vst [vmem:[#allocation2 + $0xc8] sm:$0xf] %v2639_v60  ;;  %3808 = vrot.lane.b32.xlu0 %v3804_v56, %s7572_s30  ;;  %v3066_v62 = vmul.f32 %v6169_v49, %v7873_v19  ;;  %v7876_v56 = vld [vmem:[#allocation111_spill] sm:$0xff] }
 0xc27   :  { %v2651_v31 = vpop.permute.xlu1 %2650 }
 0xc28   :  { %v2653_v16 = vpop.permute.xlu0 %2652  ;;  %v2654_v5 = vsel %vm7855_vm7, %v7608_v25, %v2651_v31  ;;  %v3890_v39 = vld [vmem:[#allocation2 + $0xf0] sm:$0xff]  ;;  %vm7875_vm7 = vmmov %vm7868_vm9 }
 0xc29   :  { %v2655_v41 = vsel %vm7856_vm2, %v2651_v31, %v2653_v16  ;;  %v3891_v37 = vld [vmem:[#allocation2 + $0xf8] sm:$0xff]  ;;  %2658 = vst [vmem:[#allocation2 + $0xc0] sm:$0xf0] %v2654_v5  ;;  %3824 = vrot.lane.b32.xlu1 %v3822_v35, %s7573_s26  ;;  %v3052_v31 = vmul.f32 %v6169_v49, %v7876_v56  ;;  %vm7877_vm2 = vcmask 277504  }
 0xc2a   :  { %2659 = vst [vmem:[#allocation2 + $0xc8] sm:$0xf0] %v2655_v41  ;;  %4068 = vmatprep.subr.mxu1 %v3891_v37  ;;  %3088 = vrot.lane.b32.xlu0 %v3083_v63, %s7580_s5  ;;  %v3070_v41 = vrot.slane %v3066_v62, 4 }
 0xc2b   :  { %4069 = vmatpush1.msra.mxu1 %v3890_v39  ;;  %v3333_v8 = vpop.permute.xlu1 %3332  ;;  %v3750_v39 = vmul.f32 %v6180_v43, %v7876_v56 }
 0xc2c   :  { %v3335_v32 = vpop.permute.xlu0 %3334  ;;  %v3336_v0 = vsel %vm7858_vm1, %v7605_v6, %v3333_v8  ;;  %v7863_v6 = vld [vmem:[#allocation109_spill] sm:$0xff]  ;;  %vm7878_vm1 = vmmov %vm7877_vm2 }
 0xc2d   :  { %v3337_v27 = vsel %vm7859_vm4, %v3333_v8, %v3335_v32  ;;  %3340 = vst [vmem:[#allocation2 + $0xd0] sm:$0xf] %v3336_v0  ;;  %3098 = vrot.lane.b32.xlu1 %v6207_v12, %s7860_s21  ;;  %v3082_v57 = vmul.f32 %v6169_v49, %v7863_v6  ;;  %v3780_v33 = vmul.f32 %v6180_v43, %v7863_v6  ;;  %v7879_v8 = vld [vmem:[#allocation97_spill] sm:$0xff]  ;;  %vm7881_vm4 = vcmask 269312  }
 0xc2e   :  { %3341 = vst [vmem:[#allocation2 + $0xd8] sm:$0xf] %v3337_v27  ;;  %3786 = vrot.lane.b32.xlu0 %v3781_v36, %s7580_s5  ;;  %v3037_v32 = vmul.f32 %v6172_v2, %v7879_v8  ;;  %v7880_v36 = vld [vmem:[#allocation58_spill] sm:$0xff] }
 0xc2f   :  { %v3349_v4 = vpop.permute.xlu1 %3348 }
 0xc30   :  { %v3351_v54 = vpop.permute.xlu0 %3350  ;;  %v3352_v45 = vsel %vm7861_vm8, %v7608_v25, %v3349_v4  ;;  %v3884_v12 = vld [vmem:[#allocation2 + $0xc0] sm:$0xff]  ;;  %vm7883_vm8 = vmmov %vm7881_vm4 }
 0xc31   :  { %v3353_v20 = vsel %vm7862_vm0, %v3349_v4, %v3351_v54  ;;  %v3885_v1 = vld [vmem:[#allocation2 + $0xc8] sm:$0xff]  ;;  %3356 = vst [vmem:[#allocation2 + $0xd0] sm:$0xf0] %v3352_v45  ;;  %3796 = vrot.lane.b32.xlu1 %v6215_v11, %s7860_s21  ;;  %v7867_v11 = vld [vmem:[#allocation26_spill] sm:$0xff]  ;;  %v7882_v45 = vld [vmem:[#allocation91_spill] sm:$0xff] }
 0xc32   :  { %3357 = vst [vmem:[#allocation2 + $0xd8] sm:$0xf0] %v3353_v20  ;;  %3987 = vmatprep.subr.mxu0 %v3885_v1  ;;  %3086 = vrot.lane.b32.xlu0 %v3082_v57, %s7580_s5  ;;  %v3067_v47 = vmul.f32 %v6172_v2, %v7867_v11  ;;  %v3765_v29 = vmul.f32 %v6187_v13, %v7867_v11  ;;  %vm7884_vm0 = vmmov %vm7878_vm1 }
 0xc33   :  { %3988 = vmatpush1.msra.mxu0 %v3884_v12  ;;  %v2605_v30 = vpop.permute.xlu1 %2604  ;;  %v3023_v20 = vmul.f32 %v6172_v2, %v7882_v45  ;;  %v3735_v12 = vmul.f32 %v6187_v13, %v7879_v8 }
 0xc34   :  { %v2607_v17 = vpop.permute.xlu0 %2606  ;;  %v2608_v25 = vsel %vm7865_vm5, %v7864_v46, %v2605_v30  ;;  %v3071_v7 = vrot.slane %v3067_v47, 4  ;;  %v3769_v22 = vrot.slane %v3765_v29, 4  ;;  %vm7885_vm5 = vmmov %vm7884_vm0 }
 0xc35   :  { %v2609_v58 = vsel %vm7866_vm6, %v2605_v30, %v2607_v17  ;;  %2612 = vst [vmem:[#allocation2 + $0xa0] sm:$0xf] %v2608_v25  ;;  %3096 = vrot.lane.b32.xlu1 %v6199_v24, %s7860_s21  ;;  %v3041_v17 = vrot.slane %v3037_v32, 4  ;;  %v3739_v47 = vrot.slane %v3735_v12, 4  ;;  %vm7887_vm6 = vmmov %vm7881_vm4  ;;  %v7900_v32 = vld [vmem:[#allocation112_spill] sm:$0xff] }
 0xc36   :  { %2613 = vst [vmem:[#allocation2 + $0xa8] sm:$0xf] %v2609_v58  ;;  %3784 = vrot.lane.b32.xlu0 %v3780_v33, %s7580_s5  ;;  %v3721_v58 = vmul.f32 %v6187_v13, %v7882_v45 }
 0xc37   :  { %v2621_v52 = vpop.permute.xlu1 %2620 }
 0xc38   :  { %v2623_v59 = vpop.permute.xlu0 %2622  ;;  %v2624_v48 = vsel %vm7868_vm9, %v7619_v42, %v2621_v52  ;;  %v3886_v24 = vld [vmem:[#allocation2 + $0xd0] sm:$0xff]  ;;  %vm7889_vm9 = vmmov %vm7881_vm4 }
 0xc39   :  { %v2625_v38 = vsel %vm7869_vm11, %v2621_v52, %v2623_v59  ;;  %v3887_v34 = vld [vmem:[#allocation2 + $0xd8] sm:$0xff]  ;;  %2628 = vst [vmem:[#allocation2 + $0xa0] sm:$0xf0] %v2624_v48  ;;  %3794 = vrot.lane.b32.xlu1 %v6230_v18, %s7860_s21  ;;  %v3751_v18 = vmul.f32 %v6187_v13, %v7870_v21  ;;  %v7886_v52 = vld [vmem:[#allocation110_spill] sm:$0xff]  ;;  %vm7891_vm11 = vcmask 367616  }
 0xc3a   :  { %2629 = vst [vmem:[#allocation2 + $0xa8] sm:$0xf0] %v2625_v38  ;;  %4070 = vmatprep.subr.mxu1 %v3887_v34  ;;  %3058 = vrot.lane.b32.xlu0 %v3053_v61, %s7597_s6  ;;  %v3036_v59 = vmul.f32 %v6169_v49, %v7886_v52  ;;  %v7888_v38 = vld [vmem:[#allocation113_spill] sm:$0xff] }
 0xc3b   :  { %4071 = vmatpush1.msra.mxu1 %v3886_v24  ;;  %v3303_v3 = vpop.permute.xlu1 %3302  ;;  %v3022_v21 = vmul.f32 %v6169_v49, %v7888_v38 }
 0xc3c   :  { %v3305_v50 = vpop.permute.xlu0 %3304  ;;  %v3306_v40 = vsel %vm7871_vm12, %v7864_v46, %v3303_v3  ;;  %vm7892_vm12 = vmmov %vm7891_vm11 }
 0xc3d   :  { %v3307_v55 = vsel %vm7872_vm13, %v3303_v3, %v3305_v50  ;;  %3310 = vst [vmem:[#allocation2 + $0xb0] sm:$0xf] %v3306_v40  ;;  %3074 = vrot.lane.b32.xlu1 %v3071_v7, %s7601_s27  ;;  %v3040_v3 = vrot.slane %v3036_v59, 4  ;;  %v3734_v7 = vmul.f32 %v6180_v43, %v7886_v52  ;;  %v7890_v50 = vld [vmem:[#allocation52_spill] sm:$0xff]  ;;  %vm7895_vm13 = vcmask 285696   ;;  %v7909_v59 = vld [vmem:[#allocation79_spill] sm:$0xff] }
 0xc3e   :  { %3311 = vst [vmem:[#allocation2 + $0xb8] sm:$0xf] %v3307_v55  ;;  %3756 = vrot.lane.b32.xlu0 %v3751_v18, %s7597_s6  ;;  %v3720_v18 = vmul.f32 %v6180_v43, %v7888_v38 }
 0xc3f   :  { %v3319_v15 = vpop.permute.xlu1 %3318  ;;  %v3738_v62 = vrot.slane %v3734_v7, 4  ;;  %v3665_v7 = vmul.f32 %v6187_v13, %v7909_v59 }
 0xc40   :  { %v3321_v51 = vpop.permute.xlu0 %3320  ;;  %v3322_v14 = vsel %vm7874_vm15, %v7619_v42, %v3319_v15  ;;  %v3880_v16 = vld [vmem:[#allocation2 + $0xa0] sm:$0xff]  ;;  %v3764_v42 = vmul.f32 %v6180_v43, %v7873_v19  ;;  %vm7896_vm15 = vmmov %vm7895_vm13 }
 0xc41   :  { %v3323_v60 = vsel %vm7875_vm7, %v3319_v15, %v3321_v51  ;;  %v3881_v35 = vld [vmem:[#allocation2 + $0xa8] sm:$0xff]  ;;  %3326 = vst [vmem:[#allocation2 + $0xb0] sm:$0xf0] %v3322_v14  ;;  %3772 = vrot.lane.b32.xlu1 %v3769_v22, %s7601_s27  ;;  %vm7898_vm7 = vmmov %vm7891_vm11 }
 0xc42   :  { %3327 = vst [vmem:[#allocation2 + $0xb8] sm:$0xf0] %v3323_v60  ;;  %3989 = vmatprep.subr.mxu0 %v3881_v35  ;;  %3056 = vrot.lane.b32.xlu0 %v3052_v31, %s7597_s6  ;;  %v3768_v27 = vrot.slane %v3764_v42, 4  ;;  %v7893_v22 = vld [vmem:[#allocation85_spill] sm:$0xff] }
 0xc43   :  { %3990 = vmatpush1.msra.mxu0 %v3880_v16  ;;  %v2579_v5 = vpop.permute.xlu1 %2578  ;;  %v3007_v51 = vmul.f32 %v6172_v2, %v7893_v22  ;;  %v7894_v14 = vld [vmem:[#allocation57_spill] sm:$0xff] }
 0xc44   :  { %v2581_v26 = vpop.permute.xlu0 %2580  ;;  %v2582_v63 = vsel %vm7877_vm2, %v7623_v10, %v2579_v5  ;;  %vm7899_vm2 = vmmov %vm7898_vm7 }
 0xc45   :  { %v2583_v37 = vsel %vm7878_vm1, %v2579_v5, %v2581_v26  ;;  %2586 = vst [vmem:[#allocation2 + $0x80] sm:$0xf] %v2582_v63  ;;  %3072 = vrot.lane.b32.xlu1 %v3070_v41, %s7601_s27  ;;  %v3705_v5 = vmul.f32 %v6187_v13, %v7893_v22  ;;  %v3011_v26 = vrot.slane %v3007_v51, 4  ;;  %vm7901_vm1 = vmmov %vm7895_vm13 }
 0xc46   :  { %2587 = vst [vmem:[#allocation2 + $0x88] sm:$0xf] %v2583_v37  ;;  %3754 = vrot.lane.b32.xlu0 %v3750_v39, %s7597_s6 }
 0xc47   :  { %v2595_v0 = vpop.permute.xlu1 %2594  ;;  %v3709_v8 = vrot.slane %v3705_v5, 4 }
 0xc48   :  { %v2598_v4 = vsel %vm7881_vm4, %v7880_v36, %v2595_v0  ;;  %v2597_v54 = vpop.permute.xlu0 %2596  ;;  %v3882_v1 = vld [vmem:[#allocation2 + $0xb0] sm:$0xff]  ;;  %vm7902_vm4 = vmmov %vm7901_vm1 }
 0xc49   :  { %v3883_v6 = vld [vmem:[#allocation2 + $0xb8] sm:$0xff]  ;;  %2602 = vst [vmem:[#allocation2 + $0x80] sm:$0xf0] %v2598_v4  ;;  %3770 = vrot.lane.b32.xlu1 %v3768_v27, %s7601_s27  ;;  %v2599_v57 = vsel %vm7883_vm8, %v2595_v0, %v2597_v54  ;;  %v3006_v0 = vmul.f32 %v6169_v49, %v7900_v32  ;;  %vm7904_vm8 = vcmask 384000  }
 0xc4a   :  { %4072 = vmatprep.subr.mxu1 %v3883_v6  ;;  %2603 = vst [vmem:[#allocation2 + $0x88] sm:$0xf0] %v2599_v57  ;;  %3028 = vrot.lane.b32.xlu0 %v3023_v20, %s7618_s0  ;;  %v3704_v57 = vmul.f32 %v6180_v43, %v7900_v32 }
 0xc4b   :  { %4073 = vmatpush1.msra.mxu1 %v3882_v1  ;;  %v3277_v30 = vpop.permute.xlu1 %3276  ;;  %v3010_v6 = vrot.slane %v3006_v0, 4  ;;  %v7903_v1 = vld [vmem:[#allocation51_spill] sm:$0xff]  ;;  %v7921_v0 = vld [vmem:[#allocation73_spill] sm:$0xff] }
 0xc4c   :  { %v3280_v46 = vsel %vm7884_vm0, %v7623_v10, %v3277_v30  ;;  %v3279_v25 = vpop.permute.xlu0 %3278  ;;  %vm7905_vm0 = vmmov %vm7904_vm8 }
 0xc4d   :  { %3284 = vst [vmem:[#allocation2 + $0x90] sm:$0xf] %v3280_v46  ;;  %3044 = vrot.lane.b32.xlu1 %v3041_v17, %s7622_s23  ;;  %v3281_v33 = vsel %vm7885_vm5, %v3277_v30, %v3279_v25  ;;  %v7906_v46 = vld [vmem:[#allocation88_spill] sm:$0xff]  ;;  %vm7908_vm5 = vcmask 375808  }
 0xc4e   :  { %3285 = vst [vmem:[#allocation2 + $0x98] sm:$0xf] %v3281_v33  ;;  %3726 = vrot.lane.b32.xlu0 %v3721_v58, %s7618_s0  ;;  %v2981_v25 = vmul.f32 %v6172_v2, %v7906_v46  ;;  %v3708_v33 = vrot.slane %v3704_v57, 4 }
 0xc4f   :  { %v3293_v11 = vpop.permute.xlu1 %3292 }
 0xc50   :  { %v3296_v10 = vsel %vm7887_vm6, %v7880_v36, %v3293_v11  ;;  %v3295_v48 = vpop.permute.xlu0 %3294  ;;  %v3876_v24 = vld [vmem:[#allocation2 + $0x80] sm:$0xff]  ;;  %vm7910_vm6 = vmmov %vm7908_vm5 }
 0xc51   :  { %3300 = vst [vmem:[#allocation2 + $0x90] sm:$0xf0] %v3296_v10  ;;  %3742 = vrot.lane.b32.xlu1 %v3739_v47, %s7622_s23  ;;  %v3297_v61 = vsel %vm7889_vm9, %v3293_v11, %v3295_v48  ;;  %v3877_v34 = vld [vmem:[#allocation2 + $0x88] sm:$0xff]  ;;  %v7907_v11 = vld [vmem:[#allocation56_spill] sm:$0xff]  ;;  %v2967_v10 = vmul.f32 %v6172_v2, %v7909_v59  ;;  %vm7911_vm9 = vmmov %vm7905_vm0 }
 0xc52   :  { %3301 = vst [vmem:[#allocation2 + $0x98] sm:$0xf0] %v3297_v61  ;;  %3026 = vrot.lane.b32.xlu0 %v3022_v21, %s7618_s0  ;;  %3991 = vmatprep.subr.mxu0 %v3877_v34  ;;  %v3679_v61 = vmul.f32 %v6187_v13, %v7906_v46  ;;  %v7925_v59 = vld [vmem:[#allocation28_spill] sm:$0xff] }
 0xc53   :  { %v2549_v29 = vpop.permute.xlu1 %2548  ;;  %3992 = vmatpush1.msra.mxu0 %v3876_v24  ;;  %v2985_v24 = vrot.slane %v2981_v25, 4  ;;  %v3860_v25 = vld [vmem:[#allocation2] sm:$0xff] }
 0xc54   :  { %v2552_v40 = vsel %vm7891_vm11, %v7890_v50, %v2549_v29  ;;  %v2551_v55 = vpop.permute.xlu0 %2550  ;;  %vm7912_vm11 = vmmov %vm7905_vm0 }
 0xc55   :  { %2556 = vst [vmem:[#allocation2 + $0x60] sm:$0xf] %v2552_v40  ;;  %3042 = vrot.lane.b32.xlu1 %v3040_v3, %s7622_s23  ;;  %v2553_v15 = vsel %vm7892_vm12, %v2549_v29, %v2551_v55  ;;  %v3683_v55 = vrot.slane %v3679_v61, 4  ;;  %vm7914_vm12 = vmmov %vm7908_vm5 }
 0xc56   :  { %2557 = vst [vmem:[#allocation2 + $0x68] sm:$0xf] %v2553_v15  ;;  %3724 = vrot.lane.b32.xlu0 %v3720_v18, %s7618_s0  ;;  %v7913_v18 = vld [vmem:[#allocation114_spill] sm:$0xff] }
 0xc57   :  { %v2565_v19 = vpop.permute.xlu1 %2564  ;;  %v2980_v15 = vmul.f32 %v6169_v49, %v7913_v18 }
 0xc58   :  { %v2568_v60 = vsel %vm7895_vm13, %v7894_v14, %v2565_v19  ;;  %v2567_v56 = vpop.permute.xlu0 %2566  ;;  %v3878_v16 = vld [vmem:[#allocation2 + $0x90] sm:$0xff]  ;;  %vm7916_vm13 = vmmov %vm7908_vm5 }
 0xc59   :  { %2572 = vst [vmem:[#allocation2 + $0x60] sm:$0xf0] %v2568_v60  ;;  %3740 = vrot.lane.b32.xlu1 %v3738_v62, %s7622_s23  ;;  %v2569_v31 = vsel %vm7896_vm15, %v2565_v19, %v2567_v56  ;;  %v3879_v35 = vld [vmem:[#allocation2 + $0x98] sm:$0xff]  ;;  %v7915_v19 = vld [vmem:[#allocation116_spill] sm:$0xff]  ;;  %vm7917_vm15 = vcmask 392192   ;;  %s4553_s23 = smov [#allocation11]  }
 0xc5a   :  { %2573 = vst [vmem:[#allocation2 + $0x68] sm:$0xf0] %v2569_v31  ;;  %2998 = vrot.lane.b32.xlu0 %v6172_v2, %s7897_s22  ;;  %4074 = vmatprep.subr.mxu1 %v3879_v35  ;;  %v2966_v62 = vmul.f32 %v6169_v49, %v7915_v19  ;;  %v2984_v35 = vrot.slane %v2980_v15, 4 }
 0xc5b   :  { %v3247_v41 = vpop.permute.xlu1 %3246  ;;  %4075 = vmatpush1.msra.mxu1 %v3878_v16  ;;  %v3678_v16 = vmul.f32 %v6180_v43, %v7913_v18 }
 0xc5c   :  { %v3250_v42 = vsel %vm7898_vm7, %v7890_v50, %v3247_v41  ;;  %v3249_v63 = vpop.permute.xlu0 %3248  ;;  %vm7918_vm7 = vcmask 400384  }
 0xc5d   :  { %3254 = vst [vmem:[#allocation2 + $0x70] sm:$0xf] %v3250_v42  ;;  %3014 = vrot.lane.b32.xlu1 %v3011_v26, %s7641_s24  ;;  %v3251_v37 = vsel %vm7899_vm2, %v3247_v41, %v3249_v63  ;;  %v3664_v26 = vmul.f32 %v6180_v43, %v7915_v19  ;;  %v7919_v63 = vld [vmem:[#allocation21_spill] sm:$0xff]  ;;  %vm7920_vm2 = vmmov %vm7918_vm7 }
 0xc5e   :  { %3255 = vst [vmem:[#allocation2 + $0x78] sm:$0xf] %v3251_v37  ;;  %3696 = vrot.lane.b32.xlu0 %v6187_v13, %s7897_s22  ;;  %v2951_v37 = vmul.f32 %v6172_v2, %v7919_v63 }
 0xc5f   :  { %v3263_v39 = vpop.permute.xlu1 %3262 }
 0xc60   :  { %v3266_v27 = vsel %vm7901_vm1, %v7894_v14, %v3263_v39  ;;  %v3265_v36 = vpop.permute.xlu0 %3264  ;;  %v3872_v45 = vld [vmem:[#allocation2 + $0x60] sm:$0xff]  ;;  %vm7922_vm1 = vmmov %vm7917_vm15 }
 0xc61   :  { %3270 = vst [vmem:[#allocation2 + $0x70] sm:$0xf0] %v3266_v27  ;;  %3712 = vrot.lane.b32.xlu1 %v3709_v8, %s7641_s24  ;;  %v3267_v4 = vsel %vm7902_vm4, %v3263_v39, %v3265_v36  ;;  %v3873_v54 = vld [vmem:[#allocation2 + $0x68] sm:$0xff]  ;;  %v3682_v8 = vrot.slane %v3678_v16, 4  ;;  %v2937_v27 = vmul.f32 %v6172_v2, %v7921_v0  ;;  %vm7923_vm4 = vmmov %vm7922_vm1 }
 0xc62   :  { %3271 = vst [vmem:[#allocation2 + $0x78] sm:$0xf0] %v3267_v4  ;;  %2996 = vrot.lane.b32.xlu0 %v6169_v49, %s7897_s22  ;;  %3993 = vmatprep.subr.mxu0 %v3873_v54  ;;  %v3649_v54 = vmul.f32 %v6187_v13, %v7919_v63 }
 0xc63   :  { %v2519_v20 = vpop.permute.xlu1 %2518  ;;  %3994 = vmatpush1.msra.mxu0 %v3872_v45 }
 0xc64   :  { %v2522_v12 = vsel %vm7904_vm8, %v7903_v1, %v2519_v20  ;;  %v2521_v30 = vpop.permute.xlu0 %2520 }
 0xc65   :  { %2526 = vst [vmem:[#allocation2 + $0x40] sm:$0xf] %v2522_v12  ;;  %3012 = vrot.lane.b32.xlu1 %v3010_v6, %s7641_s24  ;;  %v2523_v17 = vsel %vm7905_vm0, %v2519_v20, %v2521_v30  ;;  %v2955_v20 = vrot.slane %v2951_v37, 4  ;;  %v3635_v12 = vmul.f32 %v6187_v13, %v7921_v0  ;;  %v3864_v30 = vld [vmem:[#allocation2 + $0x20] sm:$0xff] }
 0xc66   :  { %2527 = vst [vmem:[#allocation2 + $0x48] sm:$0xf] %v2523_v17  ;;  %3694 = vrot.lane.b32.xlu0 %v6180_v43, %s7897_s22  ;;  %v3861_v17 = vld [vmem:[#allocation2 + $0x8] sm:$0xff] }
 0xc67   :  { %v2535_v58 = vpop.permute.xlu1 %2534 }
 0xc68   :  { %v2538_v47 = vsel %vm7908_vm5, %v7907_v11, %v2535_v58  ;;  %v2537_v52 = vpop.permute.xlu0 %2536  ;;  %v3874_v21 = vld [vmem:[#allocation2 + $0x70] sm:$0xff]  ;;  %vm7934_vm5 = vcmask 646144  }
 0xc69   :  { %2542 = vst [vmem:[#allocation2 + $0x40] sm:$0xf0] %v2538_v47  ;;  %3710 = vrot.lane.b32.xlu1 %v3708_v33, %s7641_s24  ;;  %v2539_v48 = vsel %vm7910_vm6, %v2535_v58, %v2537_v52  ;;  %v3875_v38 = vld [vmem:[#allocation2 + $0x78] sm:$0xff]  ;;  %v3653_v58 = vrot.slane %v3649_v54, 4  ;;  %vm7937_vm6 = vcmask 637952   ;;  %s4294_s24 = sshll.u32 %s4553_s23, 4  ;;  %s4295_s24 = int_to_ptr.vmem [resolvable:$true] %s4294_s24 }
 0xc6a   :  { %2543 = vst [vmem:[#allocation2 + $0x48] sm:$0xf0] %v2539_v48  ;;  %2972 = vrot.lane.b32.xlu0 %v2967_v10, %s7656_s8  ;;  %4076 = vmatprep.subr.mxu1 %v3875_v38  ;;  %v7924_v33 = vld [vmem:[#allocation115_spill] sm:$0xff]  ;;  %p4475_p7 = scmp.lt.s32.totalorder %s4295_s24, %s4295_s24 }
 0xc6b   :  { %v3217_v34 = vpop.permute.xlu1 %3216  ;;  %4077 = vmatpush1.msra.mxu1 %v3874_v21  ;;  %v3648_v21 = vmul.f32 %v6180_v43, %v7924_v33 }
 0xc6c   :  { %v3220_v29 = vsel %vm7911_vm9, %v7903_v1, %v3217_v34  ;;  %v3219_v3 = vpop.permute.xlu0 %3218  ;;  %vm7939_vm9 = vmmov %vm7934_vm5 }
 0xc6d   :  { %3224 = vst [vmem:[#allocation2 + $0x50] sm:$0xf] %v3220_v29  ;;  %2988 = vrot.lane.b32.xlu1 %v2985_v24, %s7658_s7  ;;  %v3221_v50 = vsel %vm7912_vm11, %v3217_v34, %v3219_v3  ;;  %v3634_v29 = vmul.f32 %v6180_v43, %v7925_v59  ;;  %v3652_v18 = vrot.slane %v3648_v21, 4  ;;  %vm7940_vm11 = vmmov %vm7937_vm6 }
 0xc6e   :  { %3225 = vst [vmem:[#allocation2 + $0x58] sm:$0xf] %v3221_v50  ;;  %3670 = vrot.lane.b32.xlu0 %v3665_v7, %s7656_s8  ;;  %v7928_v50 = vld [vmem:[#allocation69_spill] sm:$0xff] }
 0xc6f   :  { %v3233_v40 = vpop.permute.xlu1 %3232 }
 0xc70   :  { %v3236_v22 = vsel %vm7914_vm12, %v7907_v11, %v3233_v40  ;;  %v3235_v51 = vpop.permute.xlu0 %3234  ;;  %v3868_v56 = vld [vmem:[#allocation2 + $0x40] sm:$0xff]  ;;  %v2950_v11 = vmul.f32 %v6169_v49, %v7924_v33  ;;  %vm7941_vm12 = vmmov %vm7934_vm5 }
 0xc71   :  { %3240 = vst [vmem:[#allocation2 + $0x50] sm:$0xf0] %v3236_v22  ;;  %3686 = vrot.lane.b32.xlu1 %v3683_v55, %s7658_s7  ;;  %v3237_v14 = vsel %vm7916_vm13, %v3233_v40, %v3235_v51  ;;  %v3869_v60 = vld [vmem:[#allocation2 + $0x48] sm:$0xff]  ;;  %v2921_v40 = vmul.f32 %v6172_v2, %v7928_v50  ;;  %v7930_v51 = vld [vmem:[#allocation104_spill] sm:$0xff]  ;;  %vm7942_vm13 = vmmov %vm7937_vm6 }
 0xc72   :  { %3241 = vst [vmem:[#allocation2 + $0x58] sm:$0xf0] %v3237_v14  ;;  %2970 = vrot.lane.b32.xlu0 %v2966_v62, %s7656_s8  ;;  %3995 = vmatprep.subr.mxu0 %v3869_v60  ;;  %v2954_v38 = vrot.slane %v2950_v11, 4  ;;  %v2907_v19 = vmul.f32 %v6172_v2, %v7930_v51  ;;  %v3619_v14 = vmul.f32 %v6187_v13, %v7928_v50 }
 0xc73   :  { %v2507_v31 = vpop.permute.xlu1 %2506  ;;  %3996 = vmatpush1.msra.mxu0 %v3868_v56  ;;  %v2925_v56 = vrot.slane %v2921_v40, 4 }
 0xc74   :  { %v2509_v5 = vsel %vm7917_vm15, %v6385_v23, %v2507_v31  ;;  %v3191_v41 = vpop.permute.xlu0 %3190  ;;  %vm7943_vm15 = vmmov %vm7934_vm5 }
 0xc75   :  { %2513 = vst [vmem:[#allocation2 + $0x28] sm:$0xf0] %v2509_v5  ;;  %2986 = vrot.lane.b32.xlu1 %v2984_v35, %s7658_s7  ;;  %v3194_v42 = vsel %vm7918_vm7, %v7645_v53, %v3191_v41  ;;  %v3605_v5 = vmul.f32 %v6187_v13, %v7930_v51  ;;  %vm7944_vm7 = vmmov %vm7937_vm6 }
 0xc76   :  { %3198 = vst [vmem:[#allocation2 + $0x30] sm:$0xf] %v3194_v42  ;;  %3668 = vrot.lane.b32.xlu0 %v3664_v26, %s7656_s8 }
 0xc77   :  { %v3193_v39 = vpop.permute.xlu1 %3192 }
 0xc78   :  { %v3195_v23 = vsel %vm7920_vm2, %v3191_v41, %v3193_v39  ;;  %v3203_v32 = vpop.permute.xlu0 %3202  ;;  %v3870_v4 = vld [vmem:[#allocation2 + $0x50] sm:$0xff]  ;;  %v7933_v41 = vld [vmem:[#allocation20_spill] sm:$0xff]  ;;  %v3623_v39 = vrot.slane %v3619_v14, 4  ;;  %vm7946_vm2 = vcmask 662528  }
 0xc79   :  { %3199 = vst [vmem:[#allocation2 + $0x38] sm:$0xf] %v3195_v23  ;;  %3684 = vrot.lane.b32.xlu1 %v3682_v8, %s7658_s7  ;;  %v3206_v53 = vsel %vm7922_vm1, %v7648_v28, %v3203_v32  ;;  %v3871_v36 = vld [vmem:[#allocation2 + $0x58] sm:$0xff]  ;;  %v7935_v8 = vld [vmem:[#allocation117_spill] sm:$0xff]  ;;  %vm7948_vm1 = vcmask 654336  }
 0xc7a   :  { %3210 = vst [vmem:[#allocation2 + $0x30] sm:$0xf0] %v3206_v53  ;;  %2942 = vrot.lane.b32.xlu0 %v2937_v27, %s7670_s14  ;;  %4078 = vmatprep.subr.mxu1 %v3871_v36  ;;  %v2920_v23 = vmul.f32 %v6169_v49, %v7935_v8  ;;  %v7938_v36 = vld [vmem:[#allocation103_spill] sm:$0xff] }
 0xc7b   :  { %v3205_v45 = vpop.permute.xlu1 %3204  ;;  %4079 = vmatpush1.msra.mxu1 %v3870_v4  ;;  %v2906_v4 = vmul.f32 %v6169_v49, %v7938_v36 }
 0xc7c   :  { %v3207_v6 = vsel %vm7923_vm4, %v3203_v32, %v3205_v45  ;;  %v3865_v57 = vld [vmem:[#allocation2 + $0x28] sm:$0xff]  ;;  %v3161_v1 = vpop.permute.xlu0 %3160  ;;  %v7936_v32 = vld [vmem:[#allocation76_spill] sm:$0xff]  ;;  %vm7949_vm4 = vmmov %vm7946_vm2 }
 0xc7d   :  { %3211 = vst [vmem:[#allocation2 + $0x38] sm:$0xf0] %v3207_v6  ;;  %2958 = vrot.lane.b32.xlu1 %v2955_v20, %s7675_s19  ;;  %3997 = vmatprep.subr.mxu0 %v3865_v57  ;;  %v3164_v28 = vsel %vm109_vm14, %v7655_v9, %v3161_v1  ;;  %v2936_v9 = vmul.f32 %v6169_v49, %v7925_v59  ;;  %v3855_v20 = vld [vmem:[#allocation9 + $0x8] sm:$0xff]  ;;  %v2924_v57 = vrot.slane %v2920_v23, 4 }
 0xc7e   :  { %3168 = vst [vmem:[#allocation2 + $0x10] sm:$0xf] %v3164_v28  ;;  %3998 = vmatpush1.msra.mxu0 %v3864_v30  ;;  %3640 = vrot.lane.b32.xlu0 %v3635_v12, %s7670_s14 }
 0xc7f   :  { %v3163_v46 = vpop.permute.xlu1 %3162  ;;  %3999 = vmatprep.subr.mxu0 %v3861_v17  ;;  %4312 = vmatprep.mubr.msk.f32.mxu0 %vm2227_vm3, %v3855_v20  ;;  %v3604_v17 = vmul.f32 %v6180_v43, %v7938_v36 }
 0xc80   :  { %v3165_v47 = vsel %vm109_vm14, %v3161_v1, %v3163_v46  ;;  %4000 = vmatpush1.msra.mxu0 %v3860_v25  ;;  %v3177_v52 = vpop.permute.xlu0 %3176  ;;  %vm7927_vm14 = vcmask 629760   ;;  %v3618_v1 = vmul.f32 %v6180_v43, %v7935_v8  ;;  %4315 = vmatprep.mubr.msk.f32.mxu1 %vm2227_vm3, %v3855_v20 }
 0xc81   :  { %3169 = vst [vmem:[#allocation2 + $0x18] sm:$0xf] %v3165_v47  ;;  %3656 = vrot.lane.b32.xlu1 %v3653_v58, %s7675_s19  ;;  %v3180_v10 = vsel %vm150_vm10, %v7657_v44, %v3177_v52  ;;  %v7926_v44 = vld [vmem:[#allocation82_spill] sm:$0xff] }
 0xc82   :  { %3184 = vst [vmem:[#allocation2 + $0x10] sm:$0xf0] %v3180_v10  ;;  %2940 = vrot.lane.b32.xlu0 %v2936_v9, %s7670_s14  ;;  %v3866_v7 = vld [vmem:[#allocation2 + $0x30] sm:$0xff]  ;;  %v3622_v58 = vrot.slane %v3618_v1, 4  ;;  %v7965_v1 = vld [vmem:[#allocation60_spill] sm:$0xff] }
 0xc83   :  { %v3179_v48 = vpop.permute.xlu1 %3178 }
 0xc84   :  { %v3181_v61 = vsel %vm150_vm10, %v3177_v52, %v3179_v48  ;;  %v3867_v34 = vld [vmem:[#allocation2 + $0x38] sm:$0xff]  ;;  %v3143_v24 = vpop.permute.xlu0 %3142  ;;  %vm7929_vm10 = vmmov %vm7927_vm14 }
 0xc85   :  { %3185 = vst [vmem:[#allocation2 + $0x18] sm:$0xf0] %v3181_v61  ;;  %2956 = vrot.lane.b32.xlu1 %v2954_v38, %s7675_s19  ;;  %4080 = vmatprep.subr.mxu1 %v3867_v34  ;;  %v3145_v3 = vsel %vm7927_vm14, %v3143_v24, %v7926_v44  ;;  %vm7931_vm8 = vmmov %vm7929_vm10  ;;  %v7945_v38 = vld [vmem:[#allocation22_spill] sm:$0xff]  ;;  %v7947_v34 = vld [vmem:[#allocation63_spill] sm:$0xff] }
 0xc86   :  { %3149 = vst [vmem:[#allocation2 + $0x308] sm:$0xf] %v3145_v3  ;;  %4081 = vmatpush1.msra.mxu1 %v3866_v7  ;;  %3638 = vrot.lane.b32.xlu0 %v3634_v29, %s7670_s14  ;;  %vm7932_vm0 = vmmov %vm7931_vm8 }
 0xc87   :  { %v3841_v55 = vpop.permute.xlu1 %3840  ;;  %vm7950_vm14 = vmmov %vm7948_vm1 }
 0xc88   :  { %v3843_v15 = vsel %vm7929_vm10, %v3841_v55, %v7926_v44  ;;  %v3141_v22 = vpop.permute.xlu0 %3140  ;;  %vm7951_vm10 = vmmov %vm7946_vm2 }
 0xc89   :  { %3847 = vst [vmem:[#allocation2 + $0x318] sm:$0xf] %v3843_v15  ;;  %3654 = vrot.lane.b32.xlu1 %v3652_v18, %s7675_s19  ;;  %v3144_v62 = vsel %vm7931_vm8, %v3141_v22, %v3143_v24  ;;  %v3862_v42 = vld [vmem:[#allocation2 + $0x10] sm:$0xff]  ;;  %vm7952_vm8 = vmmov %vm7948_vm1 }
 0xc8a   :  { %3148 = vst [vmem:[#allocation2 + $0x300] sm:$0xf] %v3144_v62  ;;  %2912 = vrot.lane.b32.xlu0 %v2907_v19, %s4535_s20 }
 0xc8b   :  { %v3839_v60 = vpop.permute.xlu1 %3838 }
 0xc8c   :  { %v3842_v31 = vsel %vm7932_vm0, %v3839_v60, %v3841_v55  ;;  %v3863_v35 = vld [vmem:[#allocation2 + $0x18] sm:$0xff]  ;;  %v3113_v16 = vpop.permute.xlu0 %3112  ;;  %vm7953_vm0 = vmmov %vm7946_vm2 }
 0xc8d   :  { %3846 = vst [vmem:[#allocation2 + $0x310] sm:$0xf] %v3842_v31  ;;  %2928 = vrot.lane.b32.xlu1 %v2925_v56, %s7686_s11  ;;  %4082 = vmatprep.subr.mxu1 %v3863_v35  ;;  %v3115_v26 = vsel %vm7934_vm5, %v3113_v16, %v7933_v41  ;;  %v3957_v63 = vld [vmem:[#allocation2 + $0x308] sm:$0xff]  ;;  %vm7954_vm5 = vmmov %vm7948_vm1  ;;  %v7955_v35 = vld [vmem:[#allocation66_spill] sm:$0xff] }
 0xc8e   :  { %3119 = vst [vmem:[#allocation2 + $0x2e8] sm:$0xf] %v3115_v26  ;;  %4083 = vmatpush1.msra.mxu1 %v3862_v42  ;;  %3610 = vrot.lane.b32.xlu0 %v3605_v5, %s4535_s20 }
 0xc8f   :  { %v3129_v37 = vpop.permute.xlu1 %3128  ;;  %4015 = vmatprep.subr.mxu0 %v3957_v63 }
 0xc90   :  { %v3131_v0 = vsel %vm7937_vm6, %v3129_v37, %v7936_v32  ;;  %v3959_v27 = vld [vmem:[#allocation2 + $0x318] sm:$0xff]  ;;  %v3811_v53 = vpop.permute.xlu0 %3810  ;;  %vm7956_vm6 = vcmask 678912  }
 0xc91   :  { %3135 = vst [vmem:[#allocation2 + $0x2e8] sm:$0xf0] %v3131_v0  ;;  %3626 = vrot.lane.b32.xlu1 %v3623_v39, %s7686_s11  ;;  %4098 = vmatprep.subr.mxu1 %v3959_v27  ;;  %v3813_v54 = vsel %vm7939_vm9, %v3811_v53, %v7933_v41  ;;  %v3956_v45 = vld [vmem:[#allocation2 + $0x300] sm:$0xff]  ;;  %v7957_v41 = vld [vmem:[#allocation54_spill] sm:$0xff]  ;;  %vm7958_vm9 = vcmask 670720  }
 0xc92   :  { %3817 = vst [vmem:[#allocation2 + $0x2f8] sm:$0xf] %v3813_v54  ;;  %2910 = vrot.lane.b32.xlu0 %v2906_v4, %s4535_s20  ;;  %4016 = vmatpush2.msra.mxu0 %v3956_v45 }
 0xc93   :  { %v3827_v6 = vpop.permute.xlu1 %3826 }
 0xc94   :  { %v3829_v12 = vsel %vm7940_vm11, %v3827_v6, %v7936_v32  ;;  %v3958_v28 = vld [vmem:[#allocation2 + $0x310] sm:$0xff]  ;;  %v3111_v30 = vpop.permute.xlu0 %3110  ;;  %vm7959_vm11 = vmmov %vm7956_vm6 }
 0xc95   :  { %3833 = vst [vmem:[#allocation2 + $0x2f8] sm:$0xf0] %v3829_v12  ;;  %2926 = vrot.lane.b32.xlu1 %v2924_v57, %s7686_s11  ;;  %4099 = vmatpush2.msra.mxu1 %v3958_v28  ;;  %v3114_v46 = vsel %vm7941_vm12, %v3111_v30, %v3113_v16  ;;  %vm7960_vm12 = vmmov %vm7958_vm9  ;;  %v7967_v30 = vld [vmem:[#allocation59_spill] sm:$0xff] }
 0xc96   :  { %3118 = vst [vmem:[#allocation2 + $0x2e0] sm:$0xf] %v3114_v46  ;;  %3608 = vrot.lane.b32.xlu0 %v3604_v17, %s4535_s20 }
 0xc97   :  { %v3127_v25 = vpop.permute.xlu1 %3126 }
 0xc98   :  { %v3130_v33 = vsel %vm7942_vm13, %v3127_v25, %v3129_v37  ;;  %v3953_v11 = vld [vmem:[#allocation2 + $0x2e8] sm:$0xff]  ;;  %v3809_v47 = vpop.permute.xlu0 %3808  ;;  %vm7961_vm13 = vmmov %vm7956_vm6 }
 0xc99   :  { %3134 = vst [vmem:[#allocation2 + $0x2e0] sm:$0xf0] %v3130_v33  ;;  %3624 = vrot.lane.b32.xlu1 %v3622_v58, %s7686_s11  ;;  %4017 = vmatprep.subr.mxu0 %v3953_v11  ;;  %v3812_v52 = vsel %vm7943_vm15, %v3809_v47, %v3811_v53  ;;  %vm7962_vm15 = vmmov %vm7958_vm9  ;;  %s4470_s11 = scalar_lea.vmem %s4295_s24, 512 }
 0xc9a   :  { %3816 = vst [vmem:[#allocation2 + $0x2f0] sm:$0xf] %v3812_v52  ;;  %p4471_p6 = scmp.ne.s32.totalorder %s4295_s24, %s4470_s11  ;;  %p4476_p8 = scmp.lt.s32.totalorder %s4470_s11, %s4470_s11 }
 0xc9b   :  { %v3825_v59 = vpop.permute.xlu1 %3824 }
 0xc9c   :  { %v3828_v9 = vsel %vm7944_vm7, %v3825_v59, %v3827_v6  ;;  %v3955_v10 = vld [vmem:[#allocation2 + $0x2f8] sm:$0xff]  ;;  %v3089_v48 = vpop.permute.xlu0 %3088  ;;  %vm7963_vm7 = vmmov %vm7956_vm6  ;;  %p4477_p9 = por %p4476_p8, %p4475_p7 }
 0xc9d   :  { %3832 = vst [vmem:[#allocation2 + $0x2f0] sm:$0xf0] %v3828_v9  ;;  %4100 = vmatprep.subr.mxu1 %v3955_v10  ;;  %v3091_v21 = vsel %vm7946_vm2, %v3089_v48, %v7945_v38  ;;  %vm7964_vm2 = vmmov %vm7958_vm9 }
 0xc9e   :  { %3095 = vst [vmem:[#allocation2 + $0x2c8] sm:$0xf] %v3091_v21  ;;  %p4478_p10 = pnand %p4477_p9, %p4471_p6 }
 0xc9f   :  { %v3099_v61 = vpop.permute.xlu1 %3098 }
 0xca0   :  { %v3101_v24 = vsel %vm7948_vm1, %v3099_v61, %v7947_v34  ;;  %v3952_v29 = vld [vmem:[#allocation2 + $0x2e0] sm:$0xff]  ;;  %v3787_v44 = vpop.permute.xlu0 %3786  ;;  %vm7966_vm1 = vcmask 769024  }
 0xca1   :  { %3105 = vst [vmem:[#allocation2 + $0x2c8] sm:$0xf0] %v3101_v24  ;;  %4018 = vmatpush2.msra.mxu0 %v3952_v29  ;;  %v3789_v3 = vsel %vm7949_vm4, %v3787_v44, %v7945_v38  ;;  %vm7968_vm4 = vcmask 760832  }
 0xca2   :  { %3793 = vst [vmem:[#allocation2 + $0x2d8] sm:$0xf] %v3789_v3 }
 0xca3   :  { %v3797_v7 = vpop.permute.xlu1 %3796 }
 0xca4   :  { %v3799_v50 = vsel %vm7950_vm14, %v3797_v7, %v7947_v34  ;;  %v3954_v40 = vld [vmem:[#allocation2 + $0x2f0] sm:$0xff]  ;;  %v3087_v55 = vpop.permute.xlu0 %3086  ;;  %vm7969_vm14 = vmmov %vm7966_vm1 }
 0xca5   :  { %3803 = vst [vmem:[#allocation2 + $0x2d8] sm:$0xf0] %v3799_v50  ;;  %4101 = vmatpush2.msra.mxu1 %v3954_v40  ;;  %v3090_v18 = vsel %vm7951_vm10, %v3087_v55, %v3089_v48  ;;  %vm7970_vm10 = vmmov %vm7968_vm4  ;;  %v7977_v50 = vld [vmem:[#allocation50_spill] sm:$0xff] }
 0xca6   :  { %3094 = vst [vmem:[#allocation2 + $0x2c0] sm:$0xf] %v3090_v18 }
 0xca7   :  { %v3097_v15 = vpop.permute.xlu1 %3096 }
 0xca8   :  { %v3100_v22 = vsel %vm7952_vm8, %v3097_v15, %v3099_v61  ;;  %v3949_v51 = vld [vmem:[#allocation2 + $0x2c8] sm:$0xff]  ;;  %v3785_v19 = vpop.permute.xlu0 %3784  ;;  %vm7971_vm8 = vmmov %vm7966_vm1 }
 0xca9   :  { %3104 = vst [vmem:[#allocation2 + $0x2c0] sm:$0xf0] %v3100_v22  ;;  %4019 = vmatprep.subr.mxu0 %v3949_v51  ;;  %v3788_v62 = vsel %vm7953_vm0, %v3785_v19, %v3787_v44  ;;  %vm7972_vm0 = vmmov %vm7968_vm4  ;;  %v7975_v44 = vld [vmem:[#allocation53_spill] sm:$0xff] }
 0xcaa   :  { %3792 = vst [vmem:[#allocation2 + $0x2d0] sm:$0xf] %v3788_v62 }
 0xcab   :  { %v3795_v14 = vpop.permute.xlu1 %3794 }
 0xcac   :  { %v3798_v60 = vsel %vm7954_vm5, %v3795_v14, %v3797_v7  ;;  %v3951_v56 = vld [vmem:[#allocation2 + $0x2d8] sm:$0xff]  ;;  %v3059_v31 = vpop.permute.xlu0 %3058  ;;  %vm7973_vm5 = vmmov %vm7966_vm1 }
 0xcad   :  { %3802 = vst [vmem:[#allocation2 + $0x2d0] sm:$0xf0] %v3798_v60  ;;  %4102 = vmatprep.subr.mxu1 %v3951_v56  ;;  %v3061_v16 = vsel %vm7956_vm6, %v3059_v31, %v7955_v35  ;;  %vm7974_vm6 = vmmov %vm7972_vm0 }
 0xcae   :  { %3065 = vst [vmem:[#allocation2 + $0x2a8] sm:$0xf] %v3061_v16 }
 0xcaf   :  { %v3075_v5 = vpop.permute.xlu1 %3074 }
 0xcb0   :  { %v3077_v26 = vsel %vm7958_vm9, %v3075_v5, %v7957_v41  ;;  %v3948_v42 = vld [vmem:[#allocation2 + $0x2c0] sm:$0xff]  ;;  %v3757_v63 = vpop.permute.xlu0 %3756  ;;  %vm7976_vm9 = vcmask 785408  }
 0xcb1   :  { %3081 = vst [vmem:[#allocation2 + $0x2a8] sm:$0xf0] %v3077_v26  ;;  %4020 = vmatpush2.msra.mxu0 %v3948_v42  ;;  %v3759_v37 = vsel %vm7959_vm11, %v3757_v63, %v7955_v35  ;;  %vm7978_vm11 = vcmask 777216  }
 0xcb2   :  { %3763 = vst [vmem:[#allocation2 + $0x2b8] sm:$0xf] %v3759_v37 }
 0xcb3   :  { %v3773_v39 = vpop.permute.xlu1 %3772 }
 0xcb4   :  { %v3775_v8 = vsel %vm7960_vm12, %v3773_v39, %v7957_v41  ;;  %v3950_v23 = vld [vmem:[#allocation2 + $0x2d0] sm:$0xff]  ;;  %v3057_v32 = vpop.permute.xlu0 %3056  ;;  %vm7979_vm12 = vmmov %vm7976_vm9 }
 0xcb5   :  { %3779 = vst [vmem:[#allocation2 + $0x2b8] sm:$0xf0] %v3775_v8  ;;  %4103 = vmatpush2.msra.mxu1 %v3950_v23  ;;  %v3060_v0 = vsel %vm7961_vm13, %v3057_v32, %v3059_v31  ;;  %vm7980_vm13 = vmmov %vm7978_vm11  ;;  %v7987_v8 = vld [vmem:[#allocation49_spill] sm:$0xff] }
 0xcb6   :  { %3064 = vst [vmem:[#allocation2 + $0x2a0] sm:$0xf] %v3060_v0 }
 0xcb7   :  { %v3073_v27 = vpop.permute.xlu1 %3072 }
 0xcb8   :  { %v3076_v53 = vsel %vm7962_vm15, %v3073_v27, %v3075_v5  ;;  %v3945_v36 = vld [vmem:[#allocation2 + $0x2a8] sm:$0xff]  ;;  %v3755_v4 = vpop.permute.xlu0 %3754  ;;  %vm7981_vm15 = vmmov %vm7976_vm9 }
 0xcb9   :  { %3080 = vst [vmem:[#allocation2 + $0x2a0] sm:$0xf0] %v3076_v53  ;;  %4021 = vmatprep.subr.mxu0 %v3945_v36  ;;  %v3758_v54 = vsel %vm7963_vm7, %v3755_v4, %v3757_v63  ;;  %vm7982_vm7 = vmmov %vm7978_vm11  ;;  %v7985_v63 = vld [vmem:[#allocation27_spill] sm:$0xff] }
 0xcba   :  { %3762 = vst [vmem:[#allocation2 + $0x2b0] sm:$0xf] %v3758_v54 }
 0xcbb   :  { %v3771_v45 = vpop.permute.xlu1 %3770 }
 0xcbc   :  { %v3774_v20 = vsel %vm7964_vm2, %v3771_v45, %v3773_v39  ;;  %v3947_v6 = vld [vmem:[#allocation2 + $0x2b8] sm:$0xff]  ;;  %v3029_v57 = vpop.permute.xlu0 %3028  ;;  %vm7983_vm2 = vmmov %vm7976_vm9 }
 0xcbd   :  { %3778 = vst [vmem:[#allocation2 + $0x2b0] sm:$0xf0] %v3774_v20  ;;  %4104 = vmatprep.subr.mxu1 %v3947_v6  ;;  %v3031_v12 = vsel %vm7966_vm1, %v3029_v57, %v7965_v1  ;;  %vm7984_vm1 = vmmov %vm7982_vm7 }
 0xcbe   :  { %3035 = vst [vmem:[#allocation2 + $0x288] sm:$0xf] %v3031_v12 }
 0xcbf   :  { %v3045_v28 = vpop.permute.xlu1 %3044 }
 0xcc0   :  { %v3047_v17 = vsel %vm7968_vm4, %v3045_v28, %v7967_v30  ;;  %v3944_v46 = vld [vmem:[#allocation2 + $0x2a0] sm:$0xff]  ;;  %v3727_v25 = vpop.permute.xlu0 %3726  ;;  %vm7986_vm4 = vcmask 801792  }
 0xcc1   :  { %3051 = vst [vmem:[#allocation2 + $0x288] sm:$0xf0] %v3047_v17  ;;  %4022 = vmatpush2.msra.mxu0 %v3944_v46  ;;  %v3729_v58 = vsel %vm7969_vm14, %v3727_v25, %v7965_v1  ;;  %vm7988_vm14 = vcmask 793600  }
 0xcc2   :  { %3733 = vst [vmem:[#allocation2 + $0x298] sm:$0xf] %v3729_v58 }
 0xcc3   :  { %v3743_v33 = vpop.permute.xlu1 %3742 }
 0xcc4   :  { %v3745_v11 = vsel %vm7970_vm10, %v3743_v33, %v7967_v30  ;;  %v3946_v47 = vld [vmem:[#allocation2 + $0x2b0] sm:$0xff]  ;;  %v3027_v52 = vpop.permute.xlu0 %3026  ;;  %vm7989_vm10 = vmmov %vm7986_vm4 }
 0xcc5   :  { %3749 = vst [vmem:[#allocation2 + $0x298] sm:$0xf0] %v3745_v11  ;;  %4105 = vmatpush2.msra.mxu1 %v3946_v47  ;;  %v3030_v59 = vsel %vm7971_vm8, %v3027_v52, %v3029_v57  ;;  %vm7990_vm8 = vmmov %vm7988_vm14  ;;  %v7997_v11 = vld [vmem:[#allocation118_spill] sm:$0xff] }
 0xcc6   :  { %3034 = vst [vmem:[#allocation2 + $0x280] sm:$0xf] %v3030_v59 }
 0xcc7   :  { %v3043_v9 = vpop.permute.xlu1 %3042 }
 0xcc8   :  { %v3046_v10 = vsel %vm7972_vm0, %v3043_v9, %v3045_v28  ;;  %v3941_v48 = vld [vmem:[#allocation2 + $0x288] sm:$0xff]  ;;  %v3725_v38 = vpop.permute.xlu0 %3724  ;;  %vm7991_vm0 = vmmov %vm7986_vm4 }
 0xcc9   :  { %3050 = vst [vmem:[#allocation2 + $0x280] sm:$0xf0] %v3046_v10  ;;  %4023 = vmatprep.subr.mxu0 %v3941_v48  ;;  %v3728_v21 = vsel %vm7973_vm5, %v3725_v38, %v3727_v25  ;;  %vm7992_vm5 = vmmov %vm7990_vm8  ;;  %v7995_v25 = vld [vmem:[#allocation55_spill] sm:$0xff] }
 0xcca   :  { %3732 = vst [vmem:[#allocation2 + $0x290] sm:$0xf] %v3728_v21 }
 0xccb   :  { %v3741_v61 = vpop.permute.xlu1 %3740 }
 0xccc   :  { %v3744_v34 = vsel %vm7974_vm6, %v3741_v61, %v3743_v33  ;;  %v3943_v24 = vld [vmem:[#allocation2 + $0x298] sm:$0xff]  ;;  %v2999_v29 = vpop.permute.xlu0 %2998  ;;  %vm7993_vm6 = vmmov %vm7991_vm0 }
 0xccd   :  { %3748 = vst [vmem:[#allocation2 + $0x290] sm:$0xf0] %v3744_v34  ;;  %4106 = vmatprep.subr.mxu1 %v3943_v24  ;;  %v3001_v3 = vsel %vm7976_vm9, %v2999_v29, %v7975_v44  ;;  %vm7994_vm9 = vmmov %vm7992_vm5 }
 0xcce   :  { %3005 = vst [vmem:[#allocation2 + $0x268] sm:$0xf] %v3001_v3 }
 0xccf   :  { %v3015_v7 = vpop.permute.xlu1 %3014 }
 0xcd0   :  { %v3017_v40 = vsel %vm7978_vm11, %v3015_v7, %v7977_v50  ;;  %v3940_v55 = vld [vmem:[#allocation2 + $0x280] sm:$0xff]  ;;  %v3697_v18 = vpop.permute.xlu0 %3696  ;;  %vm7996_vm11 = vcmask 891904  }
 0xcd1   :  { %3021 = vst [vmem:[#allocation2 + $0x268] sm:$0xf0] %v3017_v40  ;;  %4024 = vmatpush2.msra.mxu0 %v3940_v55  ;;  %v3699_v15 = vsel %vm7979_vm12, %v3697_v18, %v7975_v44  ;;  %vm7998_vm12 = vcmask 809984  }
 0xcd2   :  { %3703 = vst [vmem:[#allocation2 + $0x278] sm:$0xf] %v3699_v15 }
 0xcd3   :  { %v3713_v22 = vpop.permute.xlu1 %3712 }
 0xcd4   :  { %v3715_v51 = vsel %vm7980_vm13, %v3713_v22, %v7977_v50  ;;  %v3942_v19 = vld [vmem:[#allocation2 + $0x290] sm:$0xff]  ;;  %v2997_v62 = vpop.permute.xlu0 %2996  ;;  %vm7999_vm13 = vmmov %vm7996_vm11 }
 0xcd5   :  { %3719 = vst [vmem:[#allocation2 + $0x278] sm:$0xf0] %v3715_v51  ;;  %4107 = vmatpush2.msra.mxu1 %v3942_v19  ;;  %v3000_v14 = vsel %vm7981_vm15, %v2997_v62, %v2999_v29  ;;  %vm8000_vm15 = vmmov %vm7998_vm12  ;;  %v8007_v51 = vld [vmem:[#allocation120_spill] sm:$0xff] }
 0xcd6   :  { %3004 = vst [vmem:[#allocation2 + $0x260] sm:$0xf] %v3000_v14 }
 0xcd7   :  { %v3013_v60 = vpop.permute.xlu1 %3012 }
 0xcd8   :  { %v3016_v56 = vsel %vm7982_vm7, %v3013_v60, %v3015_v7  ;;  %v3937_v31 = vld [vmem:[#allocation2 + $0x268] sm:$0xff]  ;;  %v3695_v35 = vpop.permute.xlu0 %3694  ;;  %vm8001_vm7 = vmmov %vm7996_vm11 }
 0xcd9   :  { %3020 = vst [vmem:[#allocation2 + $0x260] sm:$0xf0] %v3016_v56  ;;  %4025 = vmatprep.subr.mxu0 %v3937_v31  ;;  %v3698_v16 = vsel %vm7983_vm2, %v3695_v35, %v3697_v18  ;;  %vm8002_vm2 = vmmov %vm7998_vm12  ;;  %v8005_v18 = vld [vmem:[#allocation119_spill] sm:$0xff] }
 0xcda   :  { %3702 = vst [vmem:[#allocation2 + $0x270] sm:$0xf] %v3698_v16 }
 0xcdb   :  { %v3711_v5 = vpop.permute.xlu1 %3710 }
 0xcdc   :  { %v3714_v41 = vsel %vm7984_vm1, %v3711_v5, %v3713_v22  ;;  %v3939_v26 = vld [vmem:[#allocation2 + $0x278] sm:$0xff]  ;;  %v2973_v42 = vpop.permute.xlu0 %2972  ;;  %vm8003_vm1 = vmmov %vm8001_vm7 }
 0xcdd   :  { %3718 = vst [vmem:[#allocation2 + $0x270] sm:$0xf0] %v3714_v41  ;;  %4108 = vmatprep.subr.mxu1 %v3939_v26  ;;  %v2975_v37 = vsel %vm7986_vm4, %v2973_v42, %v7985_v63  ;;  %vm8004_vm4 = vmmov %vm8002_vm2 }
 0xcde   :  { %2979 = vst [vmem:[#allocation2 + $0x248] sm:$0xf] %v2975_v37 }
 0xcdf   :  { %v2989_v39 = vpop.permute.xlu1 %2988 }
 0xce0   :  { %v2991_v23 = vsel %vm7988_vm14, %v2989_v39, %v7987_v8  ;;  %v3936_v32 = vld [vmem:[#allocation2 + $0x260] sm:$0xff]  ;;  %v3671_v0 = vpop.permute.xlu0 %3670  ;;  %vm8006_vm14 = vcmask 908288  }
 0xce1   :  { %2995 = vst [vmem:[#allocation2 + $0x248] sm:$0xf0] %v2991_v23  ;;  %4026 = vmatpush2.msra.mxu0 %v3936_v32  ;;  %v3673_v27 = vsel %vm7989_vm10, %v3671_v0, %v7985_v63  ;;  %vm8008_vm10 = vcmask 900096   ;;  %v3854_v32 = vld [vmem:[#allocation9] sm:$0xff] }
 0xce2   :  { %3677 = vst [vmem:[#allocation2 + $0x258] sm:$0xf] %v3673_v27  ;;  %v3857_v27 = vld [vmem:[#allocation9 + $0x18] sm:$0xff] }
 0xce3   :  { %v3687_v53 = vpop.permute.xlu1 %3686 }
 0xce4   :  { %v3689_v36 = vsel %vm7990_vm8, %v3687_v53, %v7987_v8  ;;  %v3938_v4 = vld [vmem:[#allocation2 + $0x270] sm:$0xff]  ;;  %v2971_v54 = vpop.permute.xlu0 %2970  ;;  %vm8009_vm8 = vmmov %vm8006_vm14 }
 0xce5   :  { %3693 = vst [vmem:[#allocation2 + $0x258] sm:$0xf0] %v3689_v36  ;;  %4109 = vmatpush2.msra.mxu1 %v3938_v4  ;;  %v2974_v45 = vsel %vm7991_vm0, %v2971_v54, %v2973_v42  ;;  %vm8010_vm0 = vmmov %vm8008_vm10  ;;  %v3859_v4 = vld [vmem:[#allocation9 + $0x28] sm:$0xff]  ;;  %v3858_v54 = vld [vmem:[#allocation9 + $0x20] sm:$0xff] }
 0xce6   :  { %2978 = vst [vmem:[#allocation2 + $0x240] sm:$0xf] %v2974_v45 }
 0xce7   :  { %v2987_v20 = vpop.permute.xlu1 %2986 }
 0xce8   :  { %v2990_v6 = vsel %vm7992_vm5, %v2987_v20, %v2989_v39  ;;  %v3933_v57 = vld [vmem:[#allocation2 + $0x248] sm:$0xff]  ;;  %v3669_v1 = vpop.permute.xlu0 %3668  ;;  %vm8011_vm5 = vmmov %vm8009_vm8 }
 0xce9   :  { %2994 = vst [vmem:[#allocation2 + $0x240] sm:$0xf0] %v2990_v6  ;;  %4027 = vmatprep.subr.mxu0 %v3933_v57  ;;  %v3672_v12 = vsel %vm7993_vm6, %v3669_v1, %v3671_v0  ;;  %vm8012_vm6 = vmmov %vm8010_vm0 }
 0xcea   :  { %3676 = vst [vmem:[#allocation2 + $0x250] sm:$0xf] %v3672_v12 }
 0xceb   :  { %v3685_v28 = vpop.permute.xlu1 %3684 }
 0xcec   :  { %v3688_v30 = vsel %vm7994_vm9, %v3685_v28, %v3687_v53  ;;  %v3935_v17 = vld [vmem:[#allocation2 + $0x258] sm:$0xff]  ;;  %v2943_v46 = vpop.permute.xlu0 %2942  ;;  %vm8013_vm9 = vmmov %vm8011_vm5  ;;  %v3856_v53 = vld [vmem:[#allocation9 + $0x10] sm:$0xff] }
 0xced   :  { %3692 = vst [vmem:[#allocation2 + $0x250] sm:$0xf0] %v3688_v30  ;;  %4110 = vmatprep.subr.mxu1 %v3935_v17  ;;  %v2945_v58 = vsel %vm7996_vm11, %v2943_v46, %v7995_v25  ;;  %vm8014_vm11 = vmmov %vm8010_vm0 }
 0xcee   :  { %2949 = vst [vmem:[#allocation2 + $0x228] sm:$0xf] %v2945_v58 }
 0xcef   :  { %v2959_v33 = vpop.permute.xlu1 %2958 }
 0xcf0   :  { %v2961_v47 = vsel %vm7998_vm12, %v2959_v33, %v7997_v11  ;;  %v3932_v52 = vld [vmem:[#allocation2 + $0x240] sm:$0xff]  ;;  %v3641_v59 = vpop.permute.xlu0 %3640 }
 0xcf1   :  { %2965 = vst [vmem:[#allocation2 + $0x228] sm:$0xf0] %v2961_v47  ;;  %4028 = vmatpush2.msra.mxu0 %v3932_v52  ;;  %v3643_v9 = vsel %vm7999_vm13, %v3641_v59, %v7995_v25 }
 0xcf2   :  { %3647 = vst [vmem:[#allocation2 + $0x238] sm:$0xf] %v3643_v9 }
 0xcf3   :  { %v3657_v10 = vpop.permute.xlu1 %3656 }
 0xcf4   :  { %v3659_v48 = vsel %vm8000_vm15, %v3657_v10, %v7997_v11  ;;  %v3934_v38 = vld [vmem:[#allocation2 + $0x250] sm:$0xff]  ;;  %v2941_v21 = vpop.permute.xlu0 %2940 }
 0xcf5   :  { %3663 = vst [vmem:[#allocation2 + $0x238] sm:$0xf0] %v3659_v48  ;;  %4111 = vmatpush2.msra.mxu1 %v3934_v38  ;;  %v2944_v61 = vsel %vm8001_vm7, %v2941_v21, %v2943_v46 }
 0xcf6   :  { %2948 = vst [vmem:[#allocation2 + $0x220] sm:$0xf] %v2944_v61 }
 0xcf7   :  { %v2957_v34 = vpop.permute.xlu1 %2956 }
 0xcf8   :  { %v2960_v24 = vsel %vm8002_vm2, %v2957_v34, %v2959_v33  ;;  %v3929_v29 = vld [vmem:[#allocation2 + $0x228] sm:$0xff]  ;;  %v3639_v44 = vpop.permute.xlu0 %3638 }
 0xcf9   :  { %2964 = vst [vmem:[#allocation2 + $0x220] sm:$0xf0] %v2960_v24  ;;  %4029 = vmatprep.subr.mxu0 %v3929_v29  ;;  %v3642_v3 = vsel %vm8003_vm1, %v3639_v44, %v3641_v59 }
 0xcfa   :  { %3646 = vst [vmem:[#allocation2 + $0x230] sm:$0xf] %v3642_v3 }
 0xcfb   :  { %v3655_v7 = vpop.permute.xlu1 %3654 }
 0xcfc   :  { %v3658_v50 = vsel %vm8004_vm4, %v3655_v7, %v3657_v10  ;;  %v3931_v40 = vld [vmem:[#allocation2 + $0x238] sm:$0xff]  ;;  %v2913_v55 = vpop.permute.xlu0 %2912 }
 0xcfd   :  { %3662 = vst [vmem:[#allocation2 + $0x230] sm:$0xf0] %v3658_v50  ;;  %4112 = vmatprep.subr.mxu1 %v3931_v40  ;;  %v2915_v15 = vsel %vm8006_vm14, %v2913_v55, %v8005_v18 }
 0xcfe   :  { %2919 = vst [vmem:[#allocation2 + $0x208] sm:$0xf] %v2915_v15 }
 0xcff   :  { %v2929_v22 = vpop.permute.xlu1 %2928 }
 0xd00   :  { %v2931_v19 = vsel %vm8008_vm10, %v2929_v22, %v8007_v51  ;;  %v3928_v62 = vld [vmem:[#allocation2 + $0x220] sm:$0xff]  ;;  %v3611_v14 = vpop.permute.xlu0 %3610 }
 0xd01   :  { %2935 = vst [vmem:[#allocation2 + $0x208] sm:$0xf0] %v2931_v19  ;;  %4030 = vmatpush2.msra.mxu0 %v3928_v62  ;;  %v3613_v60 = vsel %vm8009_vm8, %v3611_v14, %v8005_v18 }
 0xd02   :  { %3617 = vst [vmem:[#allocation2 + $0x218] sm:$0xf] %v3613_v60 }
 0xd03   :  { %v3627_v56 = vpop.permute.xlu1 %3626 }
 0xd04   :  { %v3629_v31 = vsel %vm8010_vm0, %v3627_v56, %v8007_v51  ;;  %v3930_v35 = vld [vmem:[#allocation2 + $0x230] sm:$0xff]  ;;  %v2911_v16 = vpop.permute.xlu0 %2910 }
 0xd05   :  { %3633 = vst [vmem:[#allocation2 + $0x218] sm:$0xf0] %v3629_v31  ;;  %4113 = vmatpush2.msra.mxu1 %v3930_v35  ;;  %v2914_v5 = vsel %vm8011_vm5, %v2911_v16, %v2913_v55 }
 0xd06   :  { %2918 = vst [vmem:[#allocation2 + $0x200] sm:$0xf] %v2914_v5 }
 0xd07   :  { %v2927_v41 = vpop.permute.xlu1 %2926 }
 0xd08   :  { %v2930_v26 = vsel %vm8012_vm6, %v2927_v41, %v2929_v22  ;;  %v3925_v42 = vld [vmem:[#allocation2 + $0x208] sm:$0xff]  ;;  %v3609_v63 = vpop.permute.xlu0 %3608 }
 0xd09   :  { %2934 = vst [vmem:[#allocation2 + $0x200] sm:$0xf0] %v2930_v26  ;;  %4031 = vmatprep.subr.mxu0 %v3925_v42  ;;  %v3612_v37 = vsel %vm8013_vm9, %v3609_v63, %v3611_v14 }
 0xd0a   :  { %3616 = vst [vmem:[#allocation2 + $0x210] sm:$0xf] %v3612_v37 }
 0xd0b   :  { %v3625_v39 = vpop.permute.xlu1 %3624 }
 0xd0c   :  { %v3628_v8 = vsel %vm8014_vm11, %v3625_v39, %v3627_v56  ;;  %v3927_v23 = vld [vmem:[#allocation2 + $0x218] sm:$0xff] }
 0xd0d   :  { %3632 = vst [vmem:[#allocation2 + $0x210] sm:$0xf0] %v3628_v8  ;;  %4114 = vmatprep.subr.mxu1 %v3927_v23 }
 0xd10   :  { %v3924_v0 = vld [vmem:[#allocation2 + $0x200] sm:$0xff] }
 0xd11   :  { %4032 = vmatpush2.msra.mxu0 %v3924_v0 }
 0xd12   :  { %4034 = vmatmul.mubr.f32.vlgmr.msra.gmra.mxu0 %v3854_v32 }
 0xd13   :  { %4313 = vmatprep.mubr.msk.f32.mxu0 %vm2227_vm3, %v3857_v27 }
 0xd14   :  { %v3926_v36 = vld [vmem:[#allocation2 + $0x210] sm:$0xff] }
 0xd15   :  { %4115 = vmatpush2.msra.mxu1 %v3926_v36 }
 0xd16   :  { %4040 = vmatmul.mubr.f32.gmra.mxu0 %v3856_v53  ;;  %4117 = vmatmul.mubr.f32.vlgmr.msra.gmra.mxu1 %v3854_v32 }
 0xd17   :  { %4314 = vmatprep.mubr.msk.f32.mxu0 %vm2227_vm3, %v3859_v4  ;;  %4316 = vmatprep.mubr.msk.f32.mxu1 %vm2227_vm3, %v3857_v27 }
 0xd1a   :  { %4046 = vmatmul.mubr.f32.gmra.mxu0 %v3858_v54  ;;  %4123 = vmatmul.mubr.f32.gmra.mxu1 %v3856_v53 }
 0xd1b   :  { %4317 = vmatprep.mubr.msk.f32.mxu1 %vm2227_vm3, %v3859_v4  ;;  %vm4263_vm3 = vcmask 1043456  }
 0xd1e   :  { %4129 = vmatmul.mubr.f32.gmra.mxu1 %v3858_v54 }
 0xdd2   :  { %v4035_v45 = vpop.f32.mrf.mxu0 }
 0xdd3   :  { %v4135_v20 = vmul.f32 0.2, %v4035_v45 }
 0xdd4   :  { %v4037_v6 = vpop.f32.mrf.mxu0 }
 0xdd5   :  { %v4139_v57 = vmax.f32 %v4035_v45, %v4135_v20  ;;  %v4136_v1 = vmul.f32 0.2, %v4037_v6 }
 0xdd6   :  { %v4041_v12 = vpop.f32.mrf.mxu0  ;;  %v4118_v28 = vpop.f32.mrf.mxu1 }
 0xdd7   :  { %v4147_v30 = vrot.slane %v4139_v57, 4  ;;  %v4140_v17 = vmax.f32 %v4037_v6, %v4136_v1  ;;  %v4163_v46 = vmul.f32 0.2, %v4041_v12  ;;  %v4137_v25 = vmul.f32 0.2, %v4118_v28 }
 0xdd8   :  { %v4043_v58 = vpop.f32.mrf.mxu0  ;;  %v4120_v33 = vpop.f32.mrf.mxu1 }
 0xdd9   :  { %v4155_v11 = vmul.f32 %v4147_v30, %v4139_v57  ;;  %v4148_v47 = vrot.slane %v4140_v17, 4  ;;  %v4167_v52 = vmax.f32 %v4041_v12, %v4163_v46  ;;  %v4141_v59 = vmax.f32 %v4118_v28, %v4137_v25 }
 0xdda   :  { %v4164_v9 = vmul.f32 0.2, %v4043_v58  ;;  %v4138_v10 = vmul.f32 0.2, %v4120_v33  ;;  %v4124_v48 = vpop.f32.mrf.mxu1  ;;  %v4047_v0 = vpop.f32.mrf.mxu0 }
 0xddb   :  { %v4175_v38 = vrot.slane %v4167_v52, 4  ;;  %v4149_v21 = vrot.slane %v4141_v59, 4  ;;  %v4156_v61 = vmul.f32 %v4148_v47, %v4140_v17  ;;  %v4165_v29 = vmul.f32 0.2, %v4124_v48 }
 0xddc   :  { %v4168_v34 = vmax.f32 %v4043_v58, %v4164_v9  ;;  %v4142_v24 = vmax.f32 %v4120_v33, %v4138_v10  ;;  %v4159_v44 = vadd.f32 %v4155_v11, %v4139_v57  ;;  %v4126_v7 = vpop.f32.mrf.mxu1  ;;  %v4191_v4 = vmul.f32 0.2, %v4047_v0  ;;  %v4049_v54 = vpop.f32.mrf.mxu0 }
 0xddd   :  { %v4183_v3 = vmul.f32 %v4175_v38, %v4139_v57  ;;  %v4169_v40 = vmax.f32 %v4124_v48, %v4165_v29  ;;  %v4157_v18 = vmul.f32 %v4149_v21, %v4141_v59  ;;  %v4160_v15 = vadd.f32 %v4156_v61, %v4140_v17 }
 0xdde   :  { %v4176_v50 = vrot.slane %v4168_v34, 4  ;;  %v4150_v51 = vrot.slane %v4142_v24, 4  ;;  %v4166_v19 = vmul.f32 0.2, %v4126_v7  ;;  %v4192_v57 = vmul.f32 0.2, %v4049_v54  ;;  %v4130_v1 = vpop.f32.mrf.mxu1 }
 0xddf   :  { %v4187_v55 = vadd.f32 %v4183_v3, %v4159_v44  ;;  %v4177_v14 = vrot.slane %v4169_v40, 4  ;;  %v4161_v56 = vadd.f32 %v4157_v18, %v4141_v59  ;;  %v4195_v12 = vmax.f32 %v4047_v0, %v4191_v4  ;;  %v8018_v4 = vld [vmem:[#allocation19_spill] sm:$0xff] }
 0xde0   :  { %v4184_v22 = vmul.f32 %v4176_v50, %v4140_v17  ;;  %v4158_v16 = vmul.f32 %v4150_v51, %v4142_v24  ;;  %v4170_v5 = vmax.f32 %v4126_v7, %v4166_v19  ;;  %v4193_v17 = vmul.f32 0.2, %v4130_v1  ;;  %v4132_v11 = vpop.f32.mrf.mxu1 }
 0xde1   :  { %v4227_v62 = vmul.f32 0.5, %v4187_v55  ;;  %v4185_v31 = vmul.f32 %v4177_v14, %v4141_v59  ;;  %v4196_v46 = vmax.f32 %v4049_v54, %v4192_v57  ;;  %v4199_v58 = vmul.f32 %v4195_v12, %v4175_v38  ;;  %v8015_v38 = vld [vmem:[#allocation17_spill] sm:$0xff] }
 0xde2   :  { %v4188_v60 = vadd.f32 %v4184_v22, %v4160_v15  ;;  %v4178_v26 = vrot.slane %v4170_v5, 4  ;;  %v4162_v63 = vadd.f32 %v4158_v16, %v4142_v24  ;;  %v4211_v33 = vrot.slane %v4195_v12, 4 }
 0xde3   :  { %4374 = vtanh.f32 %v4227_v62  ;;  %v4189_v41 = vadd.f32 %v4185_v31, %v4161_v56  ;;  %v4197_v52 = vmax.f32 %v4130_v1, %v4193_v17  ;;  %v4200_v59 = vmul.f32 %v4196_v46, %v4176_v50 }
 0xde4   :  { %v4228_v35 = vmul.f32 0.5, %v4188_v60  ;;  %v4186_v37 = vmul.f32 %v4178_v26, %v4142_v24  ;;  %v4212_v9 = vrot.slane %v4196_v46, 4  ;;  %v4194_v10 = vmul.f32 0.2, %v4132_v11  ;;  %v8016_v60 = vld [vmem:[#allocation16_spill] sm:$0xff] }
 0xde5   :  { %v4229_v42 = vmul.f32 0.5, %v4189_v41  ;;  %v4203_v48 = vadd.f32 %v4199_v58, %v4195_v12  ;;  %v4219_v21 = vmul.f32 %v4211_v33, %v4195_v12  ;;  %v4201_v24 = vmul.f32 %v4197_v52, %v4177_v14 }
 0xde6   :  { %4376 = vtanh.f32 %v4228_v35  ;;  %v4190_v39 = vadd.f32 %v4186_v37, %v4162_v63  ;;  %v4213_v29 = vrot.slane %v4197_v52, 4  ;;  %v4204_v44 = vadd.f32 %v4200_v59, %v4196_v46 }
 0xde7   :  { %4378 = vtanh.f32 %v4229_v42  ;;  %v4220_v3 = vmul.f32 %v4212_v9, %v4196_v46  ;;  %v4198_v7 = vmax.f32 %v4132_v11, %v4194_v10  ;;  %v4223_v55 = vadd.f32 %v4219_v21, %v4203_v48  ;;  %v8017_v42 = vld [vmem:[#allocation18_spill] sm:$0xff] }
 0xde8   :  { %v4230_v8 = vmul.f32 0.5, %v4190_v39  ;;  %v4205_v51 = vadd.f32 %v4201_v24, %v4197_v52  ;;  %v4221_v50 = vmul.f32 %v4213_v29, %v4197_v52 }
 0xde9   :  { %v4224_v62 = vadd.f32 %v4220_v3, %v4204_v44  ;;  %v4202_v31 = vmul.f32 %v4198_v7, %v4178_v26  ;;  %v4214_v35 = vrot.slane %v4198_v7, 4 }
 0xdea   :  { %4380 = vtanh.f32 %v4230_v8  ;;  %v4225_v41 = vadd.f32 %v4221_v50, %v4205_v51 }
 0xdeb   :  { %v4206_v8 = vadd.f32 %v4202_v31, %v4198_v7 }
 0xdf0   :  { %v4375_v23 = vpop.eup %4374 }
 0xdf1   :  { %v4235_v32 = vmul.f32 0.8, %v4375_v23  ;;  %v4222_v23 = vmul.f32 %v4214_v35, %v4198_v7 }
 0xdf3   :  { %v4377_v27 = vpop.eup %4376  ;;  %v4239_v53 = vmul.f32 1.442695, %v4235_v32 }
 0xdf4   :  { %v4236_v36 = vmul.f32 0.8, %v4377_v27  ;;  %v4379_v45 = vpop.eup %4378 }
 0xdf5   :  { %4382 = vpow2.f32 %v4239_v53  ;;  %v4237_v6 = vmul.f32 0.8, %v4379_v45 }
 0xdf6   :  { %v4241_v20 = vmul.f32 1.442695, %v4236_v36  ;;  %v4226_v36 = vadd.f32 %v4222_v23, %v4206_v8 }
 0xdf7   :  { %v4243_v28 = vmul.f32 1.442695, %v4237_v6  ;;  %v4381_v30 = vpop.eup %4380 }
 0xdf8   :  { %4384 = vpow2.f32 %v4241_v20  ;;  %v4238_v25 = vmul.f32 0.8, %v4381_v30 }
 0xdf9   :  { %4386 = vpow2.f32 %v4243_v28 }
 0xdfa   :  { %v4245_v47 = vmul.f32 1.442695, %v4238_v25 }
 0xdfc   :  { %4388 = vpow2.f32 %v4245_v47 }
 0xe02   :  { %v4383_v61 = vpop.eup %4382 }
 0xe03   :  { %v4249_v34 = vrot.slane %v4383_v61, 4 }
 0xe05   :  { %v4385_v40 = vpop.eup %4384  ;;  %v4253_v18 = vmul.f32 %v4249_v34, %v8015_v38 }
 0xe06   :  { %v4250_v15 = vrot.slane %v4385_v40, 4  ;;  %v4387_v19 = vpop.eup %4386 }
 0xe07   :  { %v4255_v22 = vadd.f32 %v4253_v18, %v4223_v55  ;;  %v4270_v14 = vrot.slane %v4387_v19, 4 }
 0xe08   :  { %v4254_v56 = vmul.f32 %v4250_v15, %v8016_v60 }
 0xe09   :  { %v4259_v16 = vrot.slane %v4255_v22, 4  ;;  %v4274_v63 = vmul.f32 %v4270_v14, %v8017_v42  ;;  %v4389_v32 = vpop.eup %4388 }
 0xe0a   :  { %v4256_v5 = vadd.f32 %v4254_v56, %v4224_v62  ;;  %v4271_v27 = vrot.slane %v4389_v32, 4 }
 0xe0b   :  { %v4264_v37 = vsel %vm4263_vm3, %v6169_v49, %v4259_v16  ;;  %v4276_v0 = vadd.f32 %v4274_v63, %v4225_v41 }
 0xe0c   :  { %v4260_v39 = vrot.slane %v4256_v5, 4  ;;  %4266 = vst [vmem:[#allocation11] sm:$0xff] %v4264_v37  ;;  %v4275_v54 = vmul.f32 %v4271_v27, %v8018_v4 }
 0xe0d   :  { %v4280_v53 = vrot.slane %v4276_v0, 4 }
 0xe0e   :  { %v4265_v26 = vsel %vm4263_vm3, %v6172_v2, %v4260_v39  ;;  %v4277_v20 = vadd.f32 %v4275_v54, %v4226_v36 }
 0xe0f   :  { %4267 = vst [vmem:[#allocation11 + $0x8] sm:$0xff] %v4265_v26  ;;  %v4284_v45 = vsel %vm4263_vm3, %v6180_v43, %v4280_v53 }
 0xe10   :  { %4287 = vst [vmem:[#allocation11 + $0x10] sm:$0xff] %v4284_v45  ;;  %v4281_v49 = vrot.slane %v4277_v20, 4 }
 0xe12   :  { %v4285_v6 = vsel %vm4263_vm3, %v6187_v13, %v4281_v49 }
 0xe13   :  { %4288 = vst [vmem:[#allocation11 + $0x18] sm:$0xff] %v4285_v6 }
 0xe14   :  { %4481 = shalt.err (!%p4478_p10)
}
 0xe15   :  { %s8019_s14 = smov 256  }
 0xe16   :  { %4300 = dma.vmem_to_hbm [thread:$0]  %s4295_s24, 512, %s7065_s4, [#allocation5], %s8019_s14, %s8019_s14, %s7770_s12  }
 0xe17   :  { %4496 = dma.done.wait [#allocation5], 512  }
 0xe18   :  { %4497 = vsyncadd [#allocation5], 4294966784 }
 0xe19   :  { %4304 = vsyncpa [#allocation4], 1 }
 0xe1a   :  { %4305 = vsyncpa [#allocation7], 1 }
 0xe1b   :  { %4306 = vsyncpa [#allocation10], 1 }
 0xe1c   :  { %4307 = vsyncpa [#allocation5], 1 }

</bundles_post_ra>
